<compile_context>
chip_gen: v5e
topology: v5e:2x2
jax: 0.10.0
libtpu: 0.0.40
codegen_flags: <defaults>
</compile_context>

<pallas_src>
import math

import jax
import jax.numpy as jnp
from jax.experimental import pallas as pl
from jax.experimental.pallas import tpu as pltpu


# ----------------------------------------------------------------------------
# Tiling helpers
# ----------------------------------------------------------------------------
def _choose_tile(dim, cap, align):
    """Largest tile <= cap that divides dim and is a multiple of align
    (falls back to the whole dim, which is always a legal full-extent block)."""
    if dim <= cap:
        return dim
    t = (cap // align) * align
    while t >= align:
        if dim % t == 0:
            return t
        t -= align
    return dim


# ----------------------------------------------------------------------------
# Tiled linear:  y = act(LN?(x) @ w + b) [+ residual]
# ----------------------------------------------------------------------------
def pallas_linear(x, w, b, *, activation=None, ln_gamma=None, ln_beta=None,
                  eps=1e-6, residual=None, out_dtype=jnp.bfloat16):
    """x:(M,K) bf16/f32, w:(K,N) bf16, b:(N,) f32, residual:(M,N) optional.

    Tiled over (M//tm, N//tn, K//tk); K is the innermost ("arbitrary")
    reduction axis.  Optional pre-LayerNorm over K is fused into the x tile
    (forces tk=K).  Optional residual is added in the k==nk-1 finalize.
    Accumulation is f32 (VMEM scratch when out_dtype != f32)."""
    M, K = x.shape
    N = w.shape[1]
    fuse_ln = ln_gamma is not None
    fuse_res = residual is not None
    use_scratch = jnp.dtype(out_dtype) != jnp.dtype(jnp.float32)

    if fuse_ln:
        # whole-K input tile; bound the double-buffered footprint (v7x guard)
        x_bytes = max(jnp.dtype(x.dtype).itemsize, 2)
        tm_cap = max(8, min(256, ((24 * 1024 * 1024) // (2 * K * x_bytes) // 8) * 8))
        tn_cap = 512
        tk = K
    else:
        tm_cap, tn_cap = 512, 1024
        tk = _choose_tile(K, 512, 128)
    tm = _choose_tile(M, tm_cap, 8)
    tn = _choose_tile(N, tn_cap, 128)
    nk = K // tk
    grid = (M // tm, N // tn, nk)

    def kernel(*refs):
        idx = 0
        x_ref = refs[idx]; idx += 1
        w_ref = refs[idx]; idx += 1
        b_ref = refs[idx]; idx += 1
        if fuse_ln:
            g_ref = refs[idx]; idx += 1
            bt_ref = refs[idx]; idx += 1
        if fuse_res:
            r_ref = refs[idx]; idx += 1
        o_ref = refs[idx]; idx += 1
        acc_ref = refs[idx] if use_scratch else o_ref

        @pl.when(pl.program_id(2) == 0)
        def _():
            acc_ref[...] = jnp.zeros_like(acc_ref)

        xv = x_ref[...]
        if fuse_ln:
            xv = xv.astype(jnp.float32)
            mu = jnp.mean(xv, axis=-1, keepdims=True)
            var = jnp.mean(jnp.square(xv - mu), axis=-1, keepdims=True)
            xv = (xv - mu) * jax.lax.rsqrt(var + eps) * g_ref[...] + bt_ref[...]

        acc_ref[...] += jnp.dot(xv.astype(jnp.bfloat16), w_ref[...],
                                preferred_element_type=jnp.float32)

        @pl.when(pl.program_id(2) == nk - 1)
        def _():
            y = acc_ref[...] + b_ref[...]
            if activation == "gelu":
                y = jax.nn.gelu(y)
            if fuse_res:
                y = y + r_ref[...].astype(jnp.float32)
            o_ref[...] = y.astype(out_dtype)

    in_specs = [
        pl.BlockSpec((tm, tk), lambda i, j, k: (i, k)),
        pl.BlockSpec((tk, tn), lambda i, j, k: (k, j)),
        pl.BlockSpec((1, tn), lambda i, j, k: (0, j)),
    ]
    operands = [x, w, b.reshape(1, N)]
    if fuse_ln:
        in_specs += [pl.BlockSpec((1, tk), lambda i, j, k: (0, k)),
                     pl.BlockSpec((1, tk), lambda i, j, k: (0, k))]
        operands += [ln_gamma.reshape(1, K), ln_beta.reshape(1, K)]
    if fuse_res:
        in_specs += [pl.BlockSpec((tm, tn), lambda i, j, k: (i, j))]
        operands += [residual]

    scratch = [pltpu.VMEM((tm, tn), jnp.float32)] if use_scratch else []

    return pl.pallas_call(
        kernel,
        out_shape=jax.ShapeDtypeStruct((M, N), out_dtype),
        grid_spec=pltpu.PrefetchScalarGridSpec(
            num_scalar_prefetch=0,
            grid=grid,
            in_specs=in_specs,
            out_specs=pl.BlockSpec((tm, tn), lambda i, j, k: (i, j)),
            scratch_shapes=scratch),
        compiler_params=pltpu.CompilerParams(
            dimension_semantics=("parallel", "parallel", "arbitrary"),
            vmem_limit_bytes=48 * 1024 * 1024),
    )(*operands)


# ----------------------------------------------------------------------------
# Stand-alone LayerNorm (only where the normalized value is reused / the
# consumer is a big-N matmul where fused LN would be recomputed N/tn times).
# ----------------------------------------------------------------------------
def pallas_layernorm(x, gamma, beta, eps, out_dtype=jnp.bfloat16):
    M, D = x.shape
    tm = _choose_tile(M, 512, 8)

    def kernel(x_ref, g_ref, b_ref, o_ref):
        xv = x_ref[...].astype(jnp.float32)
        mu = jnp.mean(xv, axis=-1, keepdims=True)
        var = jnp.mean(jnp.square(xv - mu), axis=-1, keepdims=True)
        y = (xv - mu) * jax.lax.rsqrt(var + eps) * g_ref[...] + b_ref[...]
        o_ref[...] = y.astype(out_dtype)

    return pl.pallas_call(
        kernel,
        out_shape=jax.ShapeDtypeStruct((M, D), out_dtype),
        grid=(M // tm,),
        in_specs=[pl.BlockSpec((tm, D), lambda i: (i, 0)),
                  pl.BlockSpec((1, D), lambda i: (0, 0)),
                  pl.BlockSpec((1, D), lambda i: (0, 0))],
        out_specs=pl.BlockSpec((tm, D), lambda i: (i, 0)),
        compiler_params=pltpu.CompilerParams(
            dimension_semantics=("parallel",)),
    )(x, gamma.reshape(1, D), beta.reshape(1, D))


# ----------------------------------------------------------------------------
# Attention (packed heads, per-batch grid, in-kernel mask from SMEM lengths)
# ----------------------------------------------------------------------------
def _mha_heads(qs, ks, vs, kl, num_heads, dh, causal, scale):
    """qs:(Sq,H*dh) ks/vs:(Sk,H*dh) bf16; kl scalar int32; returns (Sq,H*dh) f32."""
    Sq = qs.shape[0]
    Sk = ks.shape[0]
    kpos = jax.lax.broadcasted_iota(jnp.int32, (Sq, Sk), 1)
    mask = kpos < kl
    if causal:
        qpos = jax.lax.broadcasted_iota(jnp.int32, (Sq, Sk), 0)
        mask = jnp.logical_and(mask, qpos >= kpos)

    outs = []
    for h in range(num_heads):
        sl = slice(h * dh, (h + 1) * dh)
        # fold 1/sqrt(dh) into q (Sq,dh) rather than the (Sq,Sk) scores
        qh = (qs[:, sl].astype(jnp.float32) * scale).astype(jnp.bfloat16)
        s = jax.lax.dot_general(qh, ks[:, sl], (((1,), (1,)), ((), ())),
                                preferred_element_type=jnp.float32)   # (Sq,Sk)
        s = jnp.where(mask, s, -1e9)
        s = s - jnp.max(s, axis=-1, keepdims=True)
        p = jnp.exp(s)
        inv = pl.reciprocal(jnp.sum(p, axis=-1, keepdims=True), approx=True)
        outs.append(jnp.dot((p * inv).astype(jnp.bfloat16), vs[:, sl],
                            preferred_element_type=jnp.float32))      # (Sq,dh)
    return jnp.concatenate(outs, axis=-1)                             # (Sq,H*dh)


def pallas_self_attention(qkv, key_lens, num_heads, causal):
    """qkv:(B,S,3*H*dh) bf16 packed [Q|K|V] (head-major inside each chunk).
    Returns merged-head (B,S,H*dh) bf16."""
    B, S, C = qkv.shape
    Hdh = C // 3
    dh = Hdh // num_heads
    scale = float(1.0 / math.sqrt(dh))

    def kernel(lens_ref, qkv_ref, o_ref):
        kl = lens_ref[pl.program_id(0)]
        slab = qkv_ref[0]                                  # (S, 3*H*dh)
        out = _mha_heads(slab[:, 0:Hdh], slab[:, Hdh:2 * Hdh],
                         slab[:, 2 * Hdh:3 * Hdh],
                         kl, num_heads, dh, causal, scale)
        o_ref[0] = out.astype(o_ref.dtype)

    return pl.pallas_call(
        kernel,
        out_shape=jax.ShapeDtypeStruct((B, S, Hdh), jnp.bfloat16),
        grid_spec=pltpu.PrefetchScalarGridSpec(
            num_scalar_prefetch=1,
            grid=(B,),
            in_specs=[pl.BlockSpec((1, S, C), lambda b, lens: (b, 0, 0))],
            out_specs=pl.BlockSpec((1, S, Hdh), lambda b, lens: (b, 0, 0))),
        compiler_params=pltpu.CompilerParams(
            dimension_semantics=("parallel",)),
    )(key_lens, qkv)


def pallas_cross_attention(q, kv, key_lens, num_heads):
    """q:(B,Sq,H*dh) bf16, kv:(B,Sk,2*H*dh) bf16 packed [K|V]."""
    B, Sq, Hdh = q.shape
    Sk = kv.shape[1]
    dh = Hdh // num_heads
    scale = float(1.0 / math.sqrt(dh))

    def kernel(lens_ref, q_ref, kv_ref, o_ref):
        kl = lens_ref[pl.program_id(0)]
        qslab = q_ref[0]                                   # (Sq, H*dh)
        kvslab = kv_ref[0]                                 # (Sk, 2*H*dh)
        out = _mha_heads(qslab, kvslab[:, 0:Hdh], kvslab[:, Hdh:2 * Hdh],
                         kl, num_heads, dh, False, scale)
        o_ref[0] = out.astype(o_ref.dtype)

    return pl.pallas_call(
        kernel,
        out_shape=jax.ShapeDtypeStruct((B, Sq, Hdh), jnp.bfloat16),
        grid_spec=pltpu.PrefetchScalarGridSpec(
            num_scalar_prefetch=1,
            grid=(B,),
            in_specs=[pl.BlockSpec((1, Sq, Hdh), lambda b, lens: (b, 0, 0)),
                      pl.BlockSpec((1, Sk, 2 * Hdh), lambda b, lens: (b, 0, 0))],
            out_specs=pl.BlockSpec((1, Sq, Hdh), lambda b, lens: (b, 0, 0))),
        compiler_params=pltpu.CompilerParams(
            dimension_semantics=("parallel",)),
    )(key_lens, q, kv)


# ----------------------------------------------------------------------------
# Model glue (reshapes only; all compute in Pallas, residuals fused in-kernel)
# ----------------------------------------------------------------------------
def self_attention_sublayer(p, ln, h, key_lens, num_heads, eps, causal):
    B, S, D = h.shape
    hf = h.reshape(B * S, D)
    qkv = pallas_linear(hf, p["wqkv"], p["bqkv"],
                        ln_gamma=ln["g"], ln_beta=ln["b"], eps=eps)
    o = pallas_self_attention(qkv.reshape(B, S, -1), key_lens, num_heads, causal)
    out = pallas_linear(o.reshape(B * S, -1), p["wo"], p["bo"], residual=hf)
    return out.reshape(B, S, D)


def cross_attention_sublayer(p, ln, h, enc, enc_lens, num_heads, eps):
    B, Sd, D = h.shape
    Se = enc.shape[1]
    hf = h.reshape(B * Sd, D)
    q = pallas_linear(hf, p["wq"], p["bq"],
                      ln_gamma=ln["g"], ln_beta=ln["b"], eps=eps)
    kv = pallas_linear(enc.reshape(B * Se, D), p["wkv"], p["bkv"])
    o = pallas_cross_attention(q.reshape(B, Sd, -1), kv.reshape(B, Se, -1),
                               enc_lens, num_heads)
    out = pallas_linear(o.reshape(B * Sd, -1), p["wo"], p["bo"], residual=hf)
    return out.reshape(B, Sd, D)


def ffn_sublayer(p, ln, h, eps):
    B, S, D = h.shape
    hf = h.reshape(B * S, D)
    y = pallas_linear(hf, p["w1"], p["b1"], activation="gelu",
                      ln_gamma=ln["g"], ln_beta=ln["b"], eps=eps)
    out = pallas_linear(y, p["w2"], p["b2"], residual=hf)
    return out.reshape(B, S, D)


def encoder_forward(params, cfg, ids, enc_lens):
    # embedding gather left to XLA; hidden stream is bf16
    h = params["emb"][ids].astype(jnp.bfloat16)            # (B, Se, D)
    for blk in params["enc_blocks"]:
        h = self_attention_sublayer(blk["self"], blk["ln1"], h, enc_lens,
                                    cfg["num_heads"], cfg["eps"], causal=False)
        h = ffn_sublayer(blk["ffn"], blk["ln2"], h, cfg["eps"])
    B, S, D = h.shape
    hn = pallas_layernorm(h.reshape(B * S, D), params["enc_ln_f"]["g"],
                          params["enc_ln_f"]["b"], cfg["eps"],
                          out_dtype=jnp.bfloat16)
    return hn.reshape(B, S, D)


def decoder_forward(params, cfg, ids, encoded, dec_lens, enc_lens):
    B, Sd = ids.shape
    D, V = cfg["hidden_dim"], cfg["vocab"]
    h = params["emb"][ids].astype(jnp.bfloat16)             # (B, Sd, D)
    for blk in params["dec_blocks"]:
        h = self_attention_sublayer(blk["self"], blk["ln1"], h, dec_lens,
                                    cfg["num_heads"], cfg["eps"], causal=True)
        h = cross_attention_sublayer(blk["cross"], blk["ln2"], h, encoded,
                                     enc_lens, cfg["num_heads"], cfg["eps"])
        h = ffn_sublayer(blk["ffn"], blk["ln3"], h, cfg["eps"])
    # standalone final LN (bf16) + K-tiled tied-embedding logits (emb.T
    # precomputed once at init); avoids per-N-tile LN recompute at large vocab.
    hn = pallas_layernorm(h.reshape(B * Sd, D), params["dec_ln_f"]["g"],
                          params["dec_ln_f"]["b"], cfg["eps"],
                          out_dtype=jnp.bfloat16)
    logits = pallas_linear(hn, params["emb_out"],
                           jnp.zeros((V,), jnp.float32),
                           out_dtype=jnp.float32)
    return logits.reshape(B, Sd, V)


def combined_forward(params, cfg, enc_ids, dec_ids, enc_mask, dec_mask):
    # masks (1 = token, 0 = pad) reduced to per-sequence key lengths consumed
    # in-kernel via SMEM scalar prefetch; no dense (B,Sq,Sk) bias is built.
    enc_lens = jnp.sum(enc_mask > 0, axis=-1).astype(jnp.int32)
    dec_lens = jnp.sum(dec_mask > 0, axis=-1).astype(jnp.int32)
    encoded = encoder_forward(params, cfg, enc_ids, enc_lens)
    return decoder_forward(params, cfg, dec_ids, encoded, dec_lens, enc_lens)


# ----------------------------------------------------------------------------
# Deterministic parameter construction (weights bf16, LN/bias f32)
# ----------------------------------------------------------------------------
def _dense(key, shape, scale=0.02, dtype=jnp.bfloat16):
    return (scale * jax.random.normal(key, shape)).astype(dtype)


def _self_attn_params(key, D, qkv):
    k1, k2 = jax.random.split(key)
    return {"wqkv": _dense(k1, (D, 3 * qkv)), "bqkv": jnp.zeros((3 * qkv,), jnp.float32),
            "wo": _dense(k2, (qkv, D)), "bo": jnp.zeros((D,), jnp.float32)}


def _cross_attn_params(key, D, qkv):
    k1, k2, k3 = jax.random.split(key, 3)
    return {"wq": _dense(k1, (D, qkv)), "bq": jnp.zeros((qkv,), jnp.float32),
            "wkv": _dense(k2, (D, 2 * qkv)), "bkv": jnp.zeros((2 * qkv,), jnp.float32),
            "wo": _dense(k3, (qkv, D)), "bo": jnp.zeros((D,), jnp.float32)}


def _ffn_params(key, D, F):
    k1, k2 = jax.random.split(key)
    return {"w1": _dense(k1, (D, F)), "b1": jnp.zeros((F,), jnp.float32),
            "w2": _dense(k2, (F, D)), "b2": jnp.zeros((D,), jnp.float32)}


def _ln_params(D):
    return {"g": jnp.ones((D,), jnp.float32), "b": jnp.zeros((D,), jnp.float32)}


def init_params(key, cfg, padding_idx=0):
    D, qkv, F, V = cfg["hidden_dim"], cfg["qkv_dim"], cfg["ffn_dim"], cfg["vocab"]
    keys = jax.random.split(key, 1 + 5 * cfg["num_layers"])
    it = iter(keys)
    emb = _dense(next(it), (V, D), dtype=jnp.float32).at[padding_idx].set(0.0)
    enc_blocks = []
    for _ in range(cfg["num_layers"]):
        enc_blocks.append({"self": _self_attn_params(next(it), D, qkv),
                           "ffn": _ffn_params(next(it), D, F),
                           "ln1": _ln_params(D), "ln2": _ln_params(D)})
    dec_blocks = []
    for _ in range(cfg["num_layers"]):
        dec_blocks.append({"self": _self_attn_params(next(it), D, qkv),
                           "cross": _cross_attn_params(next(it), D, qkv),
                           "ffn": _ffn_params(next(it), D, F),
                           "ln1": _ln_params(D), "ln2": _ln_params(D),
                           "ln3": _ln_params(D)})
    return {"emb": emb,
            "emb_out": emb.T.astype(jnp.bfloat16),   # tied output weight, precomputed once
            "enc_blocks": enc_blocks, "dec_blocks": dec_blocks,
            "enc_ln_f": _ln_params(D), "dec_ln_f": _ln_params(D)}


# ----------------------------------------------------------------------------
if __name__ == "__main__":
    # lane-dense small config: hidden/qkv/ffn/vocab are multiples of 128
    cfg = dict(hidden_dim=128, qkv_dim=128, num_heads=4, ffn_dim=256,
               vocab=256, num_layers=2, eps=1e-6)
    B, S_ENC, S_DEC = 2, 16, 8

    root = jax.random.PRNGKey(0)
    k_in1, k_in2, k_par = jax.random.split(root, 3)

    enc_ids = jax.random.randint(k_in1, (B, S_ENC), 1, cfg["vocab"])
    dec_ids = jax.random.randint(k_in2, (B, S_DEC), 1, cfg["vocab"])
    # padding masks (1 = valid token, 0 = pad); second example is shorter
    enc_mask = (jnp.arange(S_ENC)[None, :] < jnp.array([S_ENC, 12])[:, None]).astype(jnp.float32)
    dec_mask = (jnp.arange(S_DEC)[None, :] < jnp.array([S_DEC, 6])[:, None]).astype(jnp.float32)
    enc_ids = enc_ids * enc_mask.astype(enc_ids.dtype)   # pad positions -> padding_idx 0
    dec_ids = dec_ids * dec_mask.astype(dec_ids.dtype)

    params = init_params(k_par, cfg)

    fwd = jax.jit(lambda p, ei, di, em, dm: combined_forward(p, cfg, ei, di, em, dm))
    logits = fwd(params, enc_ids, dec_ids, enc_mask, dec_mask)
    logits = jax.block_until_ready(logits)

    assert logits.shape == (B, S_DEC, cfg["vocab"])
    assert bool(jnp.all(jnp.isfinite(logits)))
    print("KERNEL_OK")
</pallas_src>

<mosaic_0001>
module attributes {stable_mosaic.version = 11 : i64} {
  func.func @kernel(%arg0: i32, %arg1: i32, %arg2: i32, %arg3: memref<32x128xbf16, #tpu.memory_space<vmem>>, %arg4: memref<128x384xbf16, #tpu.memory_space<vmem>>, %arg5: memref<1x384xf32, #tpu.memory_space<vmem>>, %arg6: memref<1x128xf32, #tpu.memory_space<vmem>>, %arg7: memref<1x128xf32, #tpu.memory_space<vmem>>, %arg8: memref<32x384xbf16, #tpu.memory_space<vmem>>, %arg9: memref<32x384xf32, #tpu.memory_space<vmem>>) attributes {dimension_semantics = [#tpu.dimension_semantics<parallel>, #tpu.dimension_semantics<parallel>, #tpu.dimension_semantics<arbitrary>], iteration_bounds = array<i64: 1, 1, 1>, scalar_prefetch = 0 : i64, scratch_operands = 1 : i64, tpu.core_type = #tpu.core_type<tc>, window_params = [{transform_indices = @transform_0, window_bounds = array<i64: 32, 128>}, {transform_indices = @transform_1, window_bounds = array<i64: 128, 384>}, {transform_indices = @transform_2, window_bounds = array<i64: 1, 384>}, {transform_indices = @transform_3, window_bounds = array<i64: 1, 128>}, {transform_indices = @transform_4, window_bounds = array<i64: 1, 128>}, {transform_indices = @transform_5, window_bounds = array<i64: 32, 384>}]} {
    %c0_i32 = arith.constant 0 : i32
    %0 = arith.cmpi eq, %arg2, %c0_i32 : i32
    %1 = arith.extui %0 : i1 to i32
    %c0_i32_0 = arith.constant 0 : i32
    %2 = arith.cmpi ne, %1, %c0_i32_0 : i32
    scf.if %2 {
      %cst_19 = arith.constant 0.000000e+00 : f32
      %38 = vector.broadcast %cst_19 : f32 to vector<32x384xf32>
      %c0_20 = arith.constant 0 : index
      %c0_21 = arith.constant 0 : index
      %39 = vector.load %arg9[%c0_20, %c0_21] : memref<32x384xf32, #tpu.memory_space<vmem>>, vector<32x384xf32>
      tpu.vector_store %arg9[%c0_20, %c0_21], %38 {strides = array<i32>} : memref<32x384xf32, #tpu.memory_space<vmem>>, vector<32x384xf32>,
    } else {
    }
    %c0 = arith.constant 0 : index
    %c0_1 = arith.constant 0 : index
    %3 = vector.load %arg3[%c0, %c0_1] : memref<32x128xbf16, #tpu.memory_space<vmem>>, vector<32x128xbf16>
    %4 = arith.extf %3 : vector<32x128xbf16> to vector<32x128xf32>
    %cst = arith.constant dense<0.000000e+00> : vector<32xf32>
    %5 = vector.multi_reduction <add>, %4, %cst [1] : vector<32x128xf32> to vector<32xf32>
    %6 = vector.shape_cast %5 : vector<32xf32> to vector<32x1xf32>
    %cst_2 = arith.constant 1.280000e+02 : f32
    %7 = vector.broadcast %cst_2 : f32 to vector<32x1xf32>
    %8 = arith.divf %6, %7 : vector<32x1xf32>
    %9 = vector.broadcast %8 : vector<32x1xf32> to vector<32x128xf32>
    %10 = arith.subf %4, %9 : vector<32x128xf32>
    %11 = arith.mulf %10, %10 : vector<32x128xf32>
    %cst_3 = arith.constant dense<0.000000e+00> : vector<32xf32>
    %12 = vector.multi_reduction <add>, %11, %cst_3 [1] : vector<32x128xf32> to vector<32xf32>
    %13 = vector.shape_cast %12 : vector<32xf32> to vector<32x1xf32>
    %cst_4 = arith.constant 1.280000e+02 : f32
    %14 = vector.broadcast %cst_4 : f32 to vector<32x1xf32>
    %15 = arith.divf %13, %14 : vector<32x1xf32>
    %16 = vector.broadcast %8 : vector<32x1xf32> to vector<32x128xf32>
    %17 = arith.subf %4, %16 : vector<32x128xf32>
    %cst_5 = arith.constant 9.99999997E-7 : f32
    %18 = vector.broadcast %cst_5 : f32 to vector<32x1xf32>
    %19 = arith.addf %15, %18 : vector<32x1xf32>
    %20 = math.rsqrt %19 : vector<32x1xf32>
    %21 = vector.broadcast %20 : vector<32x1xf32> to vector<32x128xf32>
    %22 = arith.mulf %17, %21 : vector<32x128xf32>
    %c0_6 = arith.constant 0 : index
    %c0_7 = arith.constant 0 : index
    %23 = vector.load %arg6[%c0_6, %c0_7] : memref<1x128xf32, #tpu.memory_space<vmem>>, vector<1x128xf32>
    %24 = vector.broadcast %23 : vector<1x128xf32> to vector<32x128xf32>
    %25 = arith.mulf %22, %24 : vector<32x128xf32>
    %c0_8 = arith.constant 0 : index
    %c0_9 = arith.constant 0 : index
    %26 = vector.load %arg7[%c0_8, %c0_9] : memref<1x128xf32, #tpu.memory_space<vmem>>, vector<1x128xf32>
    %27 = vector.broadcast %26 : vector<1x128xf32> to vector<32x128xf32>
    %28 = arith.addf %25, %27 : vector<32x128xf32>
    %c0_10 = arith.constant 0 : index
    %c0_11 = arith.constant 0 : index
    %29 = vector.load %arg9[%c0_10, %c0_11] : memref<32x384xf32, #tpu.memory_space<vmem>>, vector<32x384xf32>
    %30 = arith.truncf %28 : vector<32x128xf32> to vector<32x128xbf16>
    %c0_12 = arith.constant 0 : index
    %c0_13 = arith.constant 0 : index
    %31 = vector.load %arg4[%c0_12, %c0_13] : memref<128x384xbf16, #tpu.memory_space<vmem>>, vector<128x384xbf16>
    %cst_14 = arith.constant dense<0.000000e+00> : vector<32x384xf32>
    %32 = tpu.matmul %30, %31, %cst_14 {dimension_numbers = #tpu.dot_dimension_numbers<[1], [0], [0], [1], [0, 0, 1, 1], [], []>} : vector<32x128xbf16>, vector<128x384xbf16>, vector<32x384xf32> -> vector<32x384xf32>
    %33 = arith.addf %29, %32 : vector<32x384xf32>
    %c0_15 = arith.constant 0 : index
    %c0_16 = arith.constant 0 : index
    %34 = vector.load %arg9[%c0_15, %c0_16] : memref<32x384xf32, #tpu.memory_space<vmem>>, vector<32x384xf32>
    tpu.vector_store %arg9[%c0_15, %c0_16], %33 {strides = array<i32>} : memref<32x384xf32, #tpu.memory_space<vmem>>, vector<32x384xf32>,
    %c0_i32_17 = arith.constant 0 : i32
    %35 = arith.cmpi eq, %arg2, %c0_i32_17 : i32
    %36 = arith.extui %35 : i1 to i32
    %c0_i32_18 = arith.constant 0 : i32
    %37 = arith.cmpi ne, %36, %c0_i32_18 : i32
    scf.if %37 {
      %c0_19 = arith.constant 0 : index
      %c0_20 = arith.constant 0 : index
      %38 = vector.load %arg9[%c0_19, %c0_20] : memref<32x384xf32, #tpu.memory_space<vmem>>, vector<32x384xf32>
      %c0_21 = arith.constant 0 : index
      %c0_22 = arith.constant 0 : index
      %39 = vector.load %arg5[%c0_21, %c0_22] : memref<1x384xf32, #tpu.memory_space<vmem>>, vector<1x384xf32>
      %40 = vector.broadcast %39 : vector<1x384xf32> to vector<32x384xf32>
      %41 = arith.addf %38, %40 : vector<32x384xf32>
      %42 = arith.truncf %41 : vector<32x384xf32> to vector<32x384xbf16>
      %c0_23 = arith.constant 0 : index
      %c0_24 = arith.constant 0 : index
      %43 = vector.load %arg8[%c0_23, %c0_24] : memref<32x384xbf16, #tpu.memory_space<vmem>>, vector<32x384xbf16>
      tpu.vector_store %arg8[%c0_23, %c0_24], %42 {strides = array<i32>} : memref<32x384xbf16, #tpu.memory_space<vmem>>, vector<32x384xbf16>,
    } else {
    }
    return
  }
  func.func @transform_0(%arg0: i32, %arg1: i32, %arg2: i32) -> (i32, i32) {
    %c0_i32 = arith.constant 0 : i32
    return %arg0, %arg2 : i32, i32
  }
  func.func @transform_1(%arg0: i32, %arg1: i32, %arg2: i32) -> (i32, i32) {
    %c0_i32 = arith.constant 0 : i32
    return %arg2, %arg1 : i32, i32
  }
  func.func @transform_2(%arg0: i32, %arg1: i32, %arg2: i32) -> (i32, i32) {
    %c0_i32 = arith.constant 0 : i32
    %c0_i32_0 = arith.constant 0 : i32
    return %c0_i32, %arg1 : i32, i32
  }
  func.func @transform_3(%arg0: i32, %arg1: i32, %arg2: i32) -> (i32, i32) {
    %c0_i32 = arith.constant 0 : i32
    %c0_i32_0 = arith.constant 0 : i32
    return %c0_i32, %arg2 : i32, i32
  }
  func.func @transform_4(%arg0: i32, %arg1: i32, %arg2: i32) -> (i32, i32) {
    %c0_i32 = arith.constant 0 : i32
    %c0_i32_0 = arith.constant 0 : i32
    return %c0_i32, %arg2 : i32, i32
  }
  func.func @transform_5(%arg0: i32, %arg1: i32, %arg2: i32) -> (i32, i32) {
    %c0_i32 = arith.constant 0 : i32
    return %arg0, %arg1 : i32, i32
  }
}

module attributes {stable_mosaic.version = 11 : i64} {
  func.func @kernel(%arg0: i32, %arg1: memref<2xi32, #tpu.memory_space<smem>>, %arg2: memref<1x16x384xbf16, #tpu.memory_space<vmem>>, %arg3: memref<1x16x128xbf16, #tpu.memory_space<vmem>>) attributes {dimension_semantics = [#tpu.dimension_semantics<parallel>], iteration_bounds = array<i64: 2>, scalar_prefetch = 1 : i64, scratch_operands = 0 : i64, tpu.core_type = #tpu.core_type<tc>, window_params = [{transform_indices = @transform_0, window_bounds = array<i64: 1, 16, 384>}, {transform_indices = @transform_1, window_bounds = array<i64: 1, 16, 128>}]} {
    %0 = arith.index_cast %arg0 : i32 to index
    %1 = memref.load %arg1[%0] : memref<2xi32, #tpu.memory_space<smem>>
    %c0 = arith.constant 0 : index
    %c0_0 = arith.constant 0 : index
    %c0_1 = arith.constant 0 : index
    %2 = vector.load %arg2[%c0, %c0_0, %c0_1] : memref<1x16x384xbf16, #tpu.memory_space<vmem>>, vector<1x16x384xbf16>
    %3 = vector.shape_cast %2 : vector<1x16x384xbf16> to vector<16x384xbf16>
    %4 = vector.extract_strided_slice %3 {offsets = [0, 0], sizes = [16, 128], strides = [1, 1]} : vector<16x384xbf16> to vector<16x128xbf16>
    %5 = vector.extract_strided_slice %3 {offsets = [0, 128], sizes = [16, 128], strides = [1, 1]} : vector<16x384xbf16> to vector<16x128xbf16>
    %6 = vector.extract_strided_slice %3 {offsets = [0, 256], sizes = [16, 128], strides = [1, 1]} : vector<16x384xbf16> to vector<16x128xbf16>
    %7 = tpu.iota {dimensions = array<i32: 1>} : vector<16x16xi32>
    %8 = vector.broadcast %1 : i32 to vector<16x16xi32>
    %9 = arith.cmpi slt, %7, %8 : vector<16x16xi32>
    %10 = vector.extract_strided_slice %4 {offsets = [0, 0], sizes = [16, 32], strides = [1, 1]} : vector<16x128xbf16> to vector<16x32xbf16>
    %11 = arith.extf %10 : vector<16x32xbf16> to vector<16x32xf32>
    %cst = arith.constant 0.176776692 : f32
    %12 = vector.broadcast %cst : f32 to vector<16x32xf32>
    %13 = arith.mulf %11, %12 : vector<16x32xf32>
    %14 = arith.truncf %13 : vector<16x32xf32> to vector<16x32xbf16>
    %15 = vector.extract_strided_slice %5 {offsets = [0, 0], sizes = [16, 32], strides = [1, 1]} : vector<16x128xbf16> to vector<16x32xbf16>
    %cst_2 = arith.constant dense<0.000000e+00> : vector<16x16xf32>
    %16 = tpu.matmul %14, %15, %cst_2 {dimension_numbers = #tpu.dot_dimension_numbers<[1], [1], [0], [0], [0, 0, 1, 0], [], []>} : vector<16x32xbf16>, vector<16x32xbf16>, vector<16x16xf32> -> vector<16x16xf32>
    %cst_3 = arith.constant -1.000000e+09 : f32
    %17 = vector.broadcast %cst_3 : f32 to vector<16x16xf32>
    %18 = arith.select %9, %16, %17 : vector<16x16xi1>, vector<16x16xf32>
    %cst_4 = arith.constant dense<0xFF800000> : vector<16xf32>
    %19 = vector.multi_reduction <maximumf>, %18, %cst_4 [1] : vector<16x16xf32> to vector<16xf32>
    %20 = vector.shape_cast %19 : vector<16xf32> to vector<16x1xf32>
    %21 = vector.broadcast %20 : vector<16x1xf32> to vector<16x16xf32>
    %22 = arith.subf %18, %21 : vector<16x16xf32>
    %23 = math.exp %22 : vector<16x16xf32>
    %cst_5 = arith.constant dense<0.000000e+00> : vector<16xf32>
    %24 = vector.multi_reduction <add>, %23, %cst_5 [1] : vector<16x16xf32> to vector<16xf32>
    %25 = vector.shape_cast %24 : vector<16xf32> to vector<16x1xf32>
    %26 = tpu.reciprocal %25 {approx = true} : vector<16x1xf32> -> vector<16x1xf32>
    %27 = vector.broadcast %26 : vector<16x1xf32> to vector<16x16xf32>
    %28 = arith.mulf %23, %27 : vector<16x16xf32>
    %29 = arith.truncf %28 : vector<16x16xf32> to vector<16x16xbf16>
    %30 = vector.extract_strided_slice %6 {offsets = [0, 0], sizes = [16, 32], strides = [1, 1]} : vector<16x128xbf16> to vector<16x32xbf16>
    %cst_6 = arith.constant dense<0.000000e+00> : vector<16x32xf32>
    %31 = tpu.matmul %29, %30, %cst_6 {dimension_numbers = #tpu.dot_dimension_numbers<[1], [0], [0], [1], [0, 0, 1, 1], [], []>} : vector<16x16xbf16>, vector<16x32xbf16>, vector<16x32xf32> -> vector<16x32xf32>
    %32 = vector.extract_strided_slice %4 {offsets = [0, 32], sizes = [16, 32], strides = [1, 1]} : vector<16x128xbf16> to vector<16x32xbf16>
    %33 = arith.extf %32 : vector<16x32xbf16> to vector<16x32xf32>
    %cst_7 = arith.constant 0.176776692 : f32
    %34 = vector.broadcast %cst_7 : f32 to vector<16x32xf32>
    %35 = arith.mulf %33, %34 : vector<16x32xf32>
    %36 = arith.truncf %35 : vector<16x32xf32> to vector<16x32xbf16>
    %37 = vector.extract_strided_slice %5 {offsets = [0, 32], sizes = [16, 32], strides = [1, 1]} : vector<16x128xbf16> to vector<16x32xbf16>
    %cst_8 = arith.constant dense<0.000000e+00> : vector<16x16xf32>
    %38 = tpu.matmul %36, %37, %cst_8 {dimension_numbers = #tpu.dot_dimension_numbers<[1], [1], [0], [0], [0, 0, 1, 0], [], []>} : vector<16x32xbf16>, vector<16x32xbf16>, vector<16x16xf32> -> vector<16x16xf32>
    %cst_9 = arith.constant -1.000000e+09 : f32
    %39 = vector.broadcast %cst_9 : f32 to vector<16x16xf32>
    %40 = arith.select %9, %38, %39 : vector<16x16xi1>, vector<16x16xf32>
    %cst_10 = arith.constant dense<0xFF800000> : vector<16xf32>
    %41 = vector.multi_reduction <maximumf>, %40, %cst_10 [1] : vector<16x16xf32> to vector<16xf32>
    %42 = vector.shape_cast %41 : vector<16xf32> to vector<16x1xf32>
    %43 = vector.broadcast %42 : vector<16x1xf32> to vector<16x16xf32>
    %44 = arith.subf %40, %43 : vector<16x16xf32>
    %45 = math.exp %44 : vector<16x16xf32>
    %cst_11 = arith.constant dense<0.000000e+00> : vector<16xf32>
    %46 = vector.multi_reduction <add>, %45, %cst_11 [1] : vector<16x16xf32> to vector<16xf32>
    %47 = vector.shape_cast %46 : vector<16xf32> to vector<16x1xf32>
    %48 = tpu.reciprocal %47 {approx = true} : vector<16x1xf32> -> vector<16x1xf32>
    %49 = vector.broadcast %48 : vector<16x1xf32> to vector<16x16xf32>
    %50 = arith.mulf %45, %49 : vector<16x16xf32>
    %51 = arith.truncf %50 : vector<16x16xf32> to vector<16x16xbf16>
    %52 = vector.extract_strided_slice %6 {offsets = [0, 32], sizes = [16, 32], strides = [1, 1]} : vector<16x128xbf16> to vector<16x32xbf16>
    %cst_12 = arith.constant dense<0.000000e+00> : vector<16x32xf32>
    %53 = tpu.matmul %51, %52, %cst_12 {dimension_numbers = #tpu.dot_dimension_numbers<[1], [0], [0], [1], [0, 0, 1, 1], [], []>} : vector<16x16xbf16>, vector<16x32xbf16>, vector<16x32xf32> -> vector<16x32xf32>
    %54 = vector.extract_strided_slice %4 {offsets = [0, 64], sizes = [16, 32], strides = [1, 1]} : vector<16x128xbf16> to vector<16x32xbf16>
    %55 = arith.extf %54 : vector<16x32xbf16> to vector<16x32xf32>
    %cst_13 = arith.constant 0.176776692 : f32
    %56 = vector.broadcast %cst_13 : f32 to vector<16x32xf32>
    %57 = arith.mulf %55, %56 : vector<16x32xf32>
    %58 = arith.truncf %57 : vector<16x32xf32> to vector<16x32xbf16>
    %59 = vector.extract_strided_slice %5 {offsets = [0, 64], sizes = [16, 32], strides = [1, 1]} : vector<16x128xbf16> to vector<16x32xbf16>
    %cst_14 = arith.constant dense<0.000000e+00> : vector<16x16xf32>
    %60 = tpu.matmul %58, %59, %cst_14 {dimension_numbers = #tpu.dot_dimension_numbers<[1], [1], [0], [0], [0, 0, 1, 0], [], []>} : vector<16x32xbf16>, vector<16x32xbf16>, vector<16x16xf32> -> vector<16x16xf32>
    %cst_15 = arith.constant -1.000000e+09 : f32
    %61 = vector.broadcast %cst_15 : f32 to vector<16x16xf32>
    %62 = arith.select %9, %60, %61 : vector<16x16xi1>, vector<16x16xf32>
    %cst_16 = arith.constant dense<0xFF800000> : vector<16xf32>
    %63 = vector.multi_reduction <maximumf>, %62, %cst_16 [1] : vector<16x16xf32> to vector<16xf32>
    %64 = vector.shape_cast %63 : vector<16xf32> to vector<16x1xf32>
    %65 = vector.broadcast %64 : vector<16x1xf32> to vector<16x16xf32>
    %66 = arith.subf %62, %65 : vector<16x16xf32>
    %67 = math.exp %66 : vector<16x16xf32>
    %cst_17 = arith.constant dense<0.000000e+00> : vector<16xf32>
    %68 = vector.multi_reduction <add>, %67, %cst_17 [1] : vector<16x16xf32> to vector<16xf32>
    %69 = vector.shape_cast %68 : vector<16xf32> to vector<16x1xf32>
    %70 = tpu.reciprocal %69 {approx = true} : vector<16x1xf32> -> vector<16x1xf32>
    %71 = vector.broadcast %70 : vector<16x1xf32> to vector<16x16xf32>
    %72 = arith.mulf %67, %71 : vector<16x16xf32>
    %73 = arith.truncf %72 : vector<16x16xf32> to vector<16x16xbf16>
    %74 = vector.extract_strided_slice %6 {offsets = [0, 64], sizes = [16, 32], strides = [1, 1]} : vector<16x128xbf16> to vector<16x32xbf16>
    %cst_18 = arith.constant dense<0.000000e+00> : vector<16x32xf32>
    %75 = tpu.matmul %73, %74, %cst_18 {dimension_numbers = #tpu.dot_dimension_numbers<[1], [0], [0], [1], [0, 0, 1, 1], [], []>} : vector<16x16xbf16>, vector<16x32xbf16>, vector<16x32xf32> -> vector<16x32xf32>
    %76 = vector.extract_strided_slice %4 {offsets = [0, 96], sizes = [16, 32], strides = [1, 1]} : vector<16x128xbf16> to vector<16x32xbf16>
    %77 = arith.extf %76 : vector<16x32xbf16> to vector<16x32xf32>
    %cst_19 = arith.constant 0.176776692 : f32
    %78 = vector.broadcast %cst_19 : f32 to vector<16x32xf32>
    %79 = arith.mulf %77, %78 : vector<16x32xf32>
    %80 = arith.truncf %79 : vector<16x32xf32> to vector<16x32xbf16>
    %81 = vector.extract_strided_slice %5 {offsets = [0, 96], sizes = [16, 32], strides = [1, 1]} : vector<16x128xbf16> to vector<16x32xbf16>
    %cst_20 = arith.constant dense<0.000000e+00> : vector<16x16xf32>
    %82 = tpu.matmul %80, %81, %cst_20 {dimension_numbers = #tpu.dot_dimension_numbers<[1], [1], [0], [0], [0, 0, 1, 0], [], []>} : vector<16x32xbf16>, vector<16x32xbf16>, vector<16x16xf32> -> vector<16x16xf32>
    %cst_21 = arith.constant -1.000000e+09 : f32
    %83 = vector.broadcast %cst_21 : f32 to vector<16x16xf32>
    %84 = arith.select %9, %82, %83 : vector<16x16xi1>, vector<16x16xf32>
    %cst_22 = arith.constant dense<0xFF800000> : vector<16xf32>
    %85 = vector.multi_reduction <maximumf>, %84, %cst_22 [1] : vector<16x16xf32> to vector<16xf32>
    %86 = vector.shape_cast %85 : vector<16xf32> to vector<16x1xf32>
    %87 = vector.broadcast %86 : vector<16x1xf32> to vector<16x16xf32>
    %88 = arith.subf %84, %87 : vector<16x16xf32>
    %89 = math.exp %88 : vector<16x16xf32>
    %cst_23 = arith.constant dense<0.000000e+00> : vector<16xf32>
    %90 = vector.multi_reduction <add>, %89, %cst_23 [1] : vector<16x16xf32> to vector<16xf32>
    %91 = vector.shape_cast %90 : vector<16xf32> to vector<16x1xf32>
    %92 = tpu.reciprocal %91 {approx = true} : vector<16x1xf32> -> vector<16x1xf32>
    %93 = vector.broadcast %92 : vector<16x1xf32> to vector<16x16xf32>
    %94 = arith.mulf %89, %93 : vector<16x16xf32>
    %95 = arith.truncf %94 : vector<16x16xf32> to vector<16x16xbf16>
    %96 = vector.extract_strided_slice %6 {offsets = [0, 96], sizes = [16, 32], strides = [1, 1]} : vector<16x128xbf16> to vector<16x32xbf16>
    %cst_24 = arith.constant dense<0.000000e+00> : vector<16x32xf32>
    %97 = tpu.matmul %95, %96, %cst_24 {dimension_numbers = #tpu.dot_dimension_numbers<[1], [0], [0], [1], [0, 0, 1, 1], [], []>} : vector<16x16xbf16>, vector<16x32xbf16>, vector<16x32xf32> -> vector<16x32xf32>
    %98 = tpu.concatenate %31, %53, %75, %97 in 1 : vector<16x32xf32>, vector<16x32xf32>, vector<16x32xf32>, vector<16x32xf32> -> vector<16x128xf32>
    %99 = arith.truncf %98 : vector<16x128xf32> to vector<16x128xbf16>
    %c0_25 = arith.constant 0 : index
    %c0_26 = arith.constant 0 : index
    %c0_27 = arith.constant 0 : index
    %100 = vector.load %arg3[%c0_25, %c0_26, %c0_27] : memref<1x16x128xbf16, #tpu.memory_space<vmem>>, vector<1x16x128xbf16>
    %101 = vector.shape_cast %100 : vector<1x16x128xbf16> to vector<16x128xbf16>
    %102 = vector.shape_cast %99 : vector<16x128xbf16> to vector<1x16x128xbf16>
    tpu.vector_store %arg3[%c0_25, %c0_26, %c0_27], %102 {strides = array<i32>} : memref<1x16x128xbf16, #tpu.memory_space<vmem>>, vector<1x16x128xbf16>,
    return
  }
  func.func @transform_0(%arg0: i32, %arg1: memref<2xi32, #tpu.memory_space<smem>>) -> (i32, i32, i32) {
    %c0_i32 = arith.constant 0 : i32
    %c0_i32_0 = arith.constant 0 : i32
    %c0_i32_1 = arith.constant 0 : i32
    return %arg0, %c0_i32, %c0_i32_0 : i32, i32, i32
  }
  func.func @transform_1(%arg0: i32, %arg1: memref<2xi32, #tpu.memory_space<smem>>) -> (i32, i32, i32) {
    %c0_i32 = arith.constant 0 : i32
    %c0_i32_0 = arith.constant 0 : i32
    %c0_i32_1 = arith.constant 0 : i32
    return %arg0, %c0_i32, %c0_i32_0 : i32, i32, i32
  }
}

module attributes {stable_mosaic.version = 11 : i64} {
  func.func @kernel(%arg0: i32, %arg1: i32, %arg2: i32, %arg3: memref<32x128xbf16, #tpu.memory_space<vmem>>, %arg4: memref<128x128xbf16, #tpu.memory_space<vmem>>, %arg5: memref<1x128xf32, #tpu.memory_space<vmem>>, %arg6: memref<32x128xbf16, #tpu.memory_space<vmem>>, %arg7: memref<32x128xbf16, #tpu.memory_space<vmem>>, %arg8: memref<32x128xf32, #tpu.memory_space<vmem>>) attributes {dimension_semantics = [#tpu.dimension_semantics<parallel>, #tpu.dimension_semantics<parallel>, #tpu.dimension_semantics<arbitrary>], iteration_bounds = array<i64: 1, 1, 1>, scalar_prefetch = 0 : i64, scratch_operands = 1 : i64, tpu.core_type = #tpu.core_type<tc>, window_params = [{transform_indices = @transform_0, window_bounds = array<i64: 32, 128>}, {transform_indices = @transform_1, window_bounds = array<i64: 128, 128>}, {transform_indices = @transform_2, window_bounds = array<i64: 1, 128>}, {transform_indices = @transform_3, window_bounds = array<i64: 32, 128>}, {transform_indices = @transform_4, window_bounds = array<i64: 32, 128>}]} {
    %c0_i32 = arith.constant 0 : i32
    %0 = arith.cmpi eq, %arg2, %c0_i32 : i32
    %1 = arith.extui %0 : i1 to i32
    %c0_i32_0 = arith.constant 0 : i32
    %2 = arith.cmpi ne, %1, %c0_i32_0 : i32
    scf.if %2 {
      %cst_10 = arith.constant 0.000000e+00 : f32
      %12 = vector.broadcast %cst_10 : f32 to vector<32x128xf32>
      %c0_11 = arith.constant 0 : index
      %c0_12 = arith.constant 0 : index
      %13 = vector.load %arg8[%c0_11, %c0_12] : memref<32x128xf32, #tpu.memory_space<vmem>>, vector<32x128xf32>
      tpu.vector_store %arg8[%c0_11, %c0_12], %12 {strides = array<i32>} : memref<32x128xf32, #tpu.memory_space<vmem>>, vector<32x128xf32>,
    } else {
    }
    %c0 = arith.constant 0 : index
    %c0_1 = arith.constant 0 : index
    %3 = vector.load %arg3[%c0, %c0_1] : memref<32x128xbf16, #tpu.memory_space<vmem>>, vector<32x128xbf16>
    %c0_2 = arith.constant 0 : index
    %c0_3 = arith.constant 0 : index
    %4 = vector.load %arg8[%c0_2, %c0_3] : memref<32x128xf32, #tpu.memory_space<vmem>>, vector<32x128xf32>
    %c0_4 = arith.constant 0 : index
    %c0_5 = arith.constant 0 : index
    %5 = vector.load %arg4[%c0_4, %c0_5] : memref<128x128xbf16, #tpu.memory_space<vmem>>, vector<128x128xbf16>
    %cst = arith.constant dense<0.000000e+00> : vector<32x128xf32>
    %6 = tpu.matmul %3, %5, %cst {dimension_numbers = #tpu.dot_dimension_numbers<[1], [0], [0], [1], [0, 0, 1, 1], [], []>} : vector<32x128xbf16>, vector<128x128xbf16>, vector<32x128xf32> -> vector<32x128xf32>
    %7 = arith.addf %4, %6 : vector<32x128xf32>
    %c0_6 = arith.constant 0 : index
    %c0_7 = arith.constant 0 : index
    %8 = vector.load %arg8[%c0_6, %c0_7] : memref<32x128xf32, #tpu.memory_space<vmem>>, vector<32x128xf32>
    tpu.vector_store %arg8[%c0_6, %c0_7], %7 {strides = array<i32>} : memref<32x128xf32, #tpu.memory_space<vmem>>, vector<32x128xf32>,
    %c0_i32_8 = arith.constant 0 : i32
    %9 = arith.cmpi eq, %arg2, %c0_i32_8 : i32
    %10 = arith.extui %9 : i1 to i32
    %c0_i32_9 = arith.constant 0 : i32
    %11 = arith.cmpi ne, %10, %c0_i32_9 : i32
    scf.if %11 {
      %c0_10 = arith.constant 0 : index
      %c0_11 = arith.constant 0 : index
      %12 = vector.load %arg8[%c0_10, %c0_11] : memref<32x128xf32, #tpu.memory_space<vmem>>, vector<32x128xf32>
      %c0_12 = arith.constant 0 : index
      %c0_13 = arith.constant 0 : index
      %13 = vector.load %arg5[%c0_12, %c0_13] : memref<1x128xf32, #tpu.memory_space<vmem>>, vector<1x128xf32>
      %14 = vector.broadcast %13 : vector<1x128xf32> to vector<32x128xf32>
      %15 = arith.addf %12, %14 : vector<32x128xf32>
      %c0_14 = arith.constant 0 : index
      %c0_15 = arith.constant 0 : index
      %16 = vector.load %arg6[%c0_14, %c0_15] : memref<32x128xbf16, #tpu.memory_space<vmem>>, vector<32x128xbf16>
      %17 = arith.extf %16 : vector<32x128xbf16> to vector<32x128xf32>
      %18 = arith.addf %15, %17 : vector<32x128xf32>
      %19 = arith.truncf %18 : vector<32x128xf32> to vector<32x128xbf16>
      %c0_16 = arith.constant 0 : index
      %c0_17 = arith.constant 0 : index
      %20 = vector.load %arg7[%c0_16, %c0_17] : memref<32x128xbf16, #tpu.memory_space<vmem>>, vector<32x128xbf16>
      tpu.vector_store %arg7[%c0_16, %c0_17], %19 {strides = array<i32>} : memref<32x128xbf16, #tpu.memory_space<vmem>>, vector<32x128xbf16>,
    } else {
    }
    return
  }
  func.func @transform_0(%arg0: i32, %arg1: i32, %arg2: i32) -> (i32, i32) {
    %c0_i32 = arith.constant 0 : i32
    return %arg0, %arg2 : i32, i32
  }
  func.func @transform_1(%arg0: i32, %arg1: i32, %arg2: i32) -> (i32, i32) {
    %c0_i32 = arith.constant 0 : i32
    return %arg2, %arg1 : i32, i32
  }
  func.func @transform_2(%arg0: i32, %arg1: i32, %arg2: i32) -> (i32, i32) {
    %c0_i32 = arith.constant 0 : i32
    %c0_i32_0 = arith.constant 0 : i32
    return %c0_i32, %arg1 : i32, i32
  }
  func.func @transform_3(%arg0: i32, %arg1: i32, %arg2: i32) -> (i32, i32) {
    %c0_i32 = arith.constant 0 : i32
    return %arg0, %arg1 : i32, i32
  }
  func.func @transform_4(%arg0: i32, %arg1: i32, %arg2: i32) -> (i32, i32) {
    %c0_i32 = arith.constant 0 : i32
    return %arg0, %arg1 : i32, i32
  }
}

module attributes {stable_mosaic.version = 11 : i64} {
  func.func @kernel(%arg0: i32, %arg1: i32, %arg2: i32, %arg3: memref<32x128xbf16, #tpu.memory_space<vmem>>, %arg4: memref<128x256xbf16, #tpu.memory_space<vmem>>, %arg5: memref<1x256xf32, #tpu.memory_space<vmem>>, %arg6: memref<1x128xf32, #tpu.memory_space<vmem>>, %arg7: memref<1x128xf32, #tpu.memory_space<vmem>>, %arg8: memref<32x256xbf16, #tpu.memory_space<vmem>>, %arg9: memref<32x256xf32, #tpu.memory_space<vmem>>) attributes {dimension_semantics = [#tpu.dimension_semantics<parallel>, #tpu.dimension_semantics<parallel>, #tpu.dimension_semantics<arbitrary>], iteration_bounds = array<i64: 1, 1, 1>, scalar_prefetch = 0 : i64, scratch_operands = 1 : i64, tpu.core_type = #tpu.core_type<tc>, window_params = [{transform_indices = @transform_0, window_bounds = array<i64: 32, 128>}, {transform_indices = @transform_1, window_bounds = array<i64: 128, 256>}, {transform_indices = @transform_2, window_bounds = array<i64: 1, 256>}, {transform_indices = @transform_3, window_bounds = array<i64: 1, 128>}, {transform_indices = @transform_4, window_bounds = array<i64: 1, 128>}, {transform_indices = @transform_5, window_bounds = array<i64: 32, 256>}]} {
    %c0_i32 = arith.constant 0 : i32
    %0 = arith.cmpi eq, %arg2, %c0_i32 : i32
    %1 = arith.extui %0 : i1 to i32
    %c0_i32_0 = arith.constant 0 : i32
    %2 = arith.cmpi ne, %1, %c0_i32_0 : i32
    scf.if %2 {
      %cst_19 = arith.constant 0.000000e+00 : f32
      %38 = vector.broadcast %cst_19 : f32 to vector<32x256xf32>
      %c0_20 = arith.constant 0 : index
      %c0_21 = arith.constant 0 : index
      %39 = vector.load %arg9[%c0_20, %c0_21] : memref<32x256xf32, #tpu.memory_space<vmem>>, vector<32x256xf32>
      tpu.vector_store %arg9[%c0_20, %c0_21], %38 {strides = array<i32>} : memref<32x256xf32, #tpu.memory_space<vmem>>, vector<32x256xf32>,
    } else {
    }
    %c0 = arith.constant 0 : index
    %c0_1 = arith.constant 0 : index
    %3 = vector.load %arg3[%c0, %c0_1] : memref<32x128xbf16, #tpu.memory_space<vmem>>, vector<32x128xbf16>
    %4 = arith.extf %3 : vector<32x128xbf16> to vector<32x128xf32>
    %cst = arith.constant dense<0.000000e+00> : vector<32xf32>
    %5 = vector.multi_reduction <add>, %4, %cst [1] : vector<32x128xf32> to vector<32xf32>
    %6 = vector.shape_cast %5 : vector<32xf32> to vector<32x1xf32>
    %cst_2 = arith.constant 1.280000e+02 : f32
    %7 = vector.broadcast %cst_2 : f32 to vector<32x1xf32>
    %8 = arith.divf %6, %7 : vector<32x1xf32>
    %9 = vector.broadcast %8 : vector<32x1xf32> to vector<32x128xf32>
    %10 = arith.subf %4, %9 : vector<32x128xf32>
    %11 = arith.mulf %10, %10 : vector<32x128xf32>
    %cst_3 = arith.constant dense<0.000000e+00> : vector<32xf32>
    %12 = vector.multi_reduction <add>, %11, %cst_3 [1] : vector<32x128xf32> to vector<32xf32>
    %13 = vector.shape_cast %12 : vector<32xf32> to vector<32x1xf32>
    %cst_4 = arith.constant 1.280000e+02 : f32
    %14 = vector.broadcast %cst_4 : f32 to vector<32x1xf32>
    %15 = arith.divf %13, %14 : vector<32x1xf32>
    %16 = vector.broadcast %8 : vector<32x1xf32> to vector<32x128xf32>
    %17 = arith.subf %4, %16 : vector<32x128xf32>
    %cst_5 = arith.constant 9.99999997E-7 : f32
    %18 = vector.broadcast %cst_5 : f32 to vector<32x1xf32>
    %19 = arith.addf %15, %18 : vector<32x1xf32>
    %20 = math.rsqrt %19 : vector<32x1xf32>
    %21 = vector.broadcast %20 : vector<32x1xf32> to vector<32x128xf32>
    %22 = arith.mulf %17, %21 : vector<32x128xf32>
    %c0_6 = arith.constant 0 : index
    %c0_7 = arith.constant 0 : index
    %23 = vector.load %arg6[%c0_6, %c0_7] : memref<1x128xf32, #tpu.memory_space<vmem>>, vector<1x128xf32>
    %24 = vector.broadcast %23 : vector<1x128xf32> to vector<32x128xf32>
    %25 = arith.mulf %22, %24 : vector<32x128xf32>
    %c0_8 = arith.constant 0 : index
    %c0_9 = arith.constant 0 : index
    %26 = vector.load %arg7[%c0_8, %c0_9] : memref<1x128xf32, #tpu.memory_space<vmem>>, vector<1x128xf32>
    %27 = vector.broadcast %26 : vector<1x128xf32> to vector<32x128xf32>
    %28 = arith.addf %25, %27 : vector<32x128xf32>
    %c0_10 = arith.constant 0 : index
    %c0_11 = arith.constant 0 : index
    %29 = vector.load %arg9[%c0_10, %c0_11] : memref<32x256xf32, #tpu.memory_space<vmem>>, vector<32x256xf32>
    %30 = arith.truncf %28 : vector<32x128xf32> to vector<32x128xbf16>
    %c0_12 = arith.constant 0 : index
    %c0_13 = arith.constant 0 : index
    %31 = vector.load %arg4[%c0_12, %c0_13] : memref<128x256xbf16, #tpu.memory_space<vmem>>, vector<128x256xbf16>
    %cst_14 = arith.constant dense<0.000000e+00> : vector<32x256xf32>
    %32 = tpu.matmul %30, %31, %cst_14 {dimension_numbers = #tpu.dot_dimension_numbers<[1], [0], [0], [1], [0, 0, 1, 1], [], []>} : vector<32x128xbf16>, vector<128x256xbf16>, vector<32x256xf32> -> vector<32x256xf32>
    %33 = arith.addf %29, %32 : vector<32x256xf32>
    %c0_15 = arith.constant 0 : index
    %c0_16 = arith.constant 0 : index
    %34 = vector.load %arg9[%c0_15, %c0_16] : memref<32x256xf32, #tpu.memory_space<vmem>>, vector<32x256xf32>
    tpu.vector_store %arg9[%c0_15, %c0_16], %33 {strides = array<i32>} : memref<32x256xf32, #tpu.memory_space<vmem>>, vector<32x256xf32>,
    %c0_i32_17 = arith.constant 0 : i32
    %35 = arith.cmpi eq, %arg2, %c0_i32_17 : i32
    %36 = arith.extui %35 : i1 to i32
    %c0_i32_18 = arith.constant 0 : i32
    %37 = arith.cmpi ne, %36, %c0_i32_18 : i32
    scf.if %37 {
      %c0_19 = arith.constant 0 : index
      %c0_20 = arith.constant 0 : index
      %38 = vector.load %arg9[%c0_19, %c0_20] : memref<32x256xf32, #tpu.memory_space<vmem>>, vector<32x256xf32>
      %c0_21 = arith.constant 0 : index
      %c0_22 = arith.constant 0 : index
      %39 = vector.load %arg5[%c0_21, %c0_22] : memref<1x256xf32, #tpu.memory_space<vmem>>, vector<1x256xf32>
      %40 = vector.broadcast %39 : vector<1x256xf32> to vector<32x256xf32>
      %41 = arith.addf %38, %40 : vector<32x256xf32>
      %42 = arith.mulf %41, %41 : vector<32x256xf32>
      %43 = arith.mulf %41, %42 : vector<32x256xf32>
      %cst_23 = arith.constant 4.471500e-02 : f32
      %44 = vector.broadcast %cst_23 : f32 to vector<32x256xf32>
      %45 = arith.mulf %44, %43 : vector<32x256xf32>
      %46 = arith.addf %41, %45 : vector<32x256xf32>
      %cst_24 = arith.constant 0.797884583 : f32
      %47 = vector.broadcast %cst_24 : f32 to vector<32x256xf32>
      %48 = arith.mulf %47, %46 : vector<32x256xf32>
      %49 = math.tanh %48 : vector<32x256xf32>
      %cst_25 = arith.constant 1.000000e+00 : f32
      %50 = vector.broadcast %cst_25 : f32 to vector<32x256xf32>
      %51 = arith.addf %50, %49 : vector<32x256xf32>
      %cst_26 = arith.constant 5.000000e-01 : f32
      %52 = vector.broadcast %cst_26 : f32 to vector<32x256xf32>
      %53 = arith.mulf %52, %51 : vector<32x256xf32>
      %54 = arith.mulf %41, %53 : vector<32x256xf32>
      %55 = arith.truncf %54 : vector<32x256xf32> to vector<32x256xbf16>
      %c0_27 = arith.constant 0 : index
      %c0_28 = arith.constant 0 : index
      %56 = vector.load %arg8[%c0_27, %c0_28] : memref<32x256xbf16, #tpu.memory_space<vmem>>, vector<32x256xbf16>
      tpu.vector_store %arg8[%c0_27, %c0_28], %55 {strides = array<i32>} : memref<32x256xbf16, #tpu.memory_space<vmem>>, vector<32x256xbf16>,
    } else {
    }
    return
  }
  func.func @transform_0(%arg0: i32, %arg1: i32, %arg2: i32) -> (i32, i32) {
    %c0_i32 = arith.constant 0 : i32
    return %arg0, %arg2 : i32, i32
  }
  func.func @transform_1(%arg0: i32, %arg1: i32, %arg2: i32) -> (i32, i32) {
    %c0_i32 = arith.constant 0 : i32
    return %arg2, %arg1 : i32, i32
  }
  func.func @transform_2(%arg0: i32, %arg1: i32, %arg2: i32) -> (i32, i32) {
    %c0_i32 = arith.constant 0 : i32
    %c0_i32_0 = arith.constant 0 : i32
    return %c0_i32, %arg1 : i32, i32
  }
  func.func @transform_3(%arg0: i32, %arg1: i32, %arg2: i32) -> (i32, i32) {
    %c0_i32 = arith.constant 0 : i32
    %c0_i32_0 = arith.constant 0 : i32
    return %c0_i32, %arg2 : i32, i32
  }
  func.func @transform_4(%arg0: i32, %arg1: i32, %arg2: i32) -> (i32, i32) {
    %c0_i32 = arith.constant 0 : i32
    %c0_i32_0 = arith.constant 0 : i32
    return %c0_i32, %arg2 : i32, i32
  }
  func.func @transform_5(%arg0: i32, %arg1: i32, %arg2: i32) -> (i32, i32) {
    %c0_i32 = arith.constant 0 : i32
    return %arg0, %arg1 : i32, i32
  }
}

module attributes {stable_mosaic.version = 11 : i64} {
  func.func @kernel(%arg0: i32, %arg1: i32, %arg2: i32, %arg3: memref<32x256xbf16, #tpu.memory_space<vmem>>, %arg4: memref<256x128xbf16, #tpu.memory_space<vmem>>, %arg5: memref<1x128xf32, #tpu.memory_space<vmem>>, %arg6: memref<32x128xbf16, #tpu.memory_space<vmem>>, %arg7: memref<32x128xbf16, #tpu.memory_space<vmem>>, %arg8: memref<32x128xf32, #tpu.memory_space<vmem>>) attributes {dimension_semantics = [#tpu.dimension_semantics<parallel>, #tpu.dimension_semantics<parallel>, #tpu.dimension_semantics<arbitrary>], iteration_bounds = array<i64: 1, 1, 1>, scalar_prefetch = 0 : i64, scratch_operands = 1 : i64, tpu.core_type = #tpu.core_type<tc>, window_params = [{transform_indices = @transform_0, window_bounds = array<i64: 32, 256>}, {transform_indices = @transform_1, window_bounds = array<i64: 256, 128>}, {transform_indices = @transform_2, window_bounds = array<i64: 1, 128>}, {transform_indices = @transform_3, window_bounds = array<i64: 32, 128>}, {transform_indices = @transform_4, window_bounds = array<i64: 32, 128>}]} {
    %c0_i32 = arith.constant 0 : i32
    %0 = arith.cmpi eq, %arg2, %c0_i32 : i32
    %1 = arith.extui %0 : i1 to i32
    %c0_i32_0 = arith.constant 0 : i32
    %2 = arith.cmpi ne, %1, %c0_i32_0 : i32
    scf.if %2 {
      %cst_10 = arith.constant 0.000000e+00 : f32
      %12 = vector.broadcast %cst_10 : f32 to vector<32x128xf32>
      %c0_11 = arith.constant 0 : index
      %c0_12 = arith.constant 0 : index
      %13 = vector.load %arg8[%c0_11, %c0_12] : memref<32x128xf32, #tpu.memory_space<vmem>>, vector<32x128xf32>
      tpu.vector_store %arg8[%c0_11, %c0_12], %12 {strides = array<i32>} : memref<32x128xf32, #tpu.memory_space<vmem>>, vector<32x128xf32>,
    } else {
    }
    %c0 = arith.constant 0 : index
    %c0_1 = arith.constant 0 : index
    %3 = vector.load %arg3[%c0, %c0_1] : memref<32x256xbf16, #tpu.memory_space<vmem>>, vector<32x256xbf16>
    %c0_2 = arith.constant 0 : index
    %c0_3 = arith.constant 0 : index
    %4 = vector.load %arg8[%c0_2, %c0_3] : memref<32x128xf32, #tpu.memory_space<vmem>>, vector<32x128xf32>
    %c0_4 = arith.constant 0 : index
    %c0_5 = arith.constant 0 : index
    %5 = vector.load %arg4[%c0_4, %c0_5] : memref<256x128xbf16, #tpu.memory_space<vmem>>, vector<256x128xbf16>
    %cst = arith.constant dense<0.000000e+00> : vector<32x128xf32>
    %6 = tpu.matmul %3, %5, %cst {dimension_numbers = #tpu.dot_dimension_numbers<[1], [0], [0], [1], [0, 0, 1, 1], [], []>} : vector<32x256xbf16>, vector<256x128xbf16>, vector<32x128xf32> -> vector<32x128xf32>
    %7 = arith.addf %4, %6 : vector<32x128xf32>
    %c0_6 = arith.constant 0 : index
    %c0_7 = arith.constant 0 : index
    %8 = vector.load %arg8[%c0_6, %c0_7] : memref<32x128xf32, #tpu.memory_space<vmem>>, vector<32x128xf32>
    tpu.vector_store %arg8[%c0_6, %c0_7], %7 {strides = array<i32>} : memref<32x128xf32, #tpu.memory_space<vmem>>, vector<32x128xf32>,
    %c0_i32_8 = arith.constant 0 : i32
    %9 = arith.cmpi eq, %arg2, %c0_i32_8 : i32
    %10 = arith.extui %9 : i1 to i32
    %c0_i32_9 = arith.constant 0 : i32
    %11 = arith.cmpi ne, %10, %c0_i32_9 : i32
    scf.if %11 {
      %c0_10 = arith.constant 0 : index
      %c0_11 = arith.constant 0 : index
      %12 = vector.load %arg8[%c0_10, %c0_11] : memref<32x128xf32, #tpu.memory_space<vmem>>, vector<32x128xf32>
      %c0_12 = arith.constant 0 : index
      %c0_13 = arith.constant 0 : index
      %13 = vector.load %arg5[%c0_12, %c0_13] : memref<1x128xf32, #tpu.memory_space<vmem>>, vector<1x128xf32>
      %14 = vector.broadcast %13 : vector<1x128xf32> to vector<32x128xf32>
      %15 = arith.addf %12, %14 : vector<32x128xf32>
      %c0_14 = arith.constant 0 : index
      %c0_15 = arith.constant 0 : index
      %16 = vector.load %arg6[%c0_14, %c0_15] : memref<32x128xbf16, #tpu.memory_space<vmem>>, vector<32x128xbf16>
      %17 = arith.extf %16 : vector<32x128xbf16> to vector<32x128xf32>
      %18 = arith.addf %15, %17 : vector<32x128xf32>
      %19 = arith.truncf %18 : vector<32x128xf32> to vector<32x128xbf16>
      %c0_16 = arith.constant 0 : index
      %c0_17 = arith.constant 0 : index
      %20 = vector.load %arg7[%c0_16, %c0_17] : memref<32x128xbf16, #tpu.memory_space<vmem>>, vector<32x128xbf16>
      tpu.vector_store %arg7[%c0_16, %c0_17], %19 {strides = array<i32>} : memref<32x128xbf16, #tpu.memory_space<vmem>>, vector<32x128xbf16>,
    } else {
    }
    return
  }
  func.func @transform_0(%arg0: i32, %arg1: i32, %arg2: i32) -> (i32, i32) {
    %c0_i32 = arith.constant 0 : i32
    return %arg0, %arg2 : i32, i32
  }
  func.func @transform_1(%arg0: i32, %arg1: i32, %arg2: i32) -> (i32, i32) {
    %c0_i32 = arith.constant 0 : i32
    return %arg2, %arg1 : i32, i32
  }
  func.func @transform_2(%arg0: i32, %arg1: i32, %arg2: i32) -> (i32, i32) {
    %c0_i32 = arith.constant 0 : i32
    %c0_i32_0 = arith.constant 0 : i32
    return %c0_i32, %arg1 : i32, i32
  }
  func.func @transform_3(%arg0: i32, %arg1: i32, %arg2: i32) -> (i32, i32) {
    %c0_i32 = arith.constant 0 : i32
    return %arg0, %arg1 : i32, i32
  }
  func.func @transform_4(%arg0: i32, %arg1: i32, %arg2: i32) -> (i32, i32) {
    %c0_i32 = arith.constant 0 : i32
    return %arg0, %arg1 : i32, i32
  }
}

module attributes {stable_mosaic.version = 11 : i64} {
  func.func @kernel(%arg0: i32, %arg1: i32, %arg2: i32, %arg3: memref<32x128xbf16, #tpu.memory_space<vmem>>, %arg4: memref<128x256xbf16, #tpu.memory_space<vmem>>, %arg5: memref<1x256xf32, #tpu.memory_space<vmem>>, %arg6: memref<32x256xbf16, #tpu.memory_space<vmem>>, %arg7: memref<32x256xf32, #tpu.memory_space<vmem>>) attributes {dimension_semantics = [#tpu.dimension_semantics<parallel>, #tpu.dimension_semantics<parallel>, #tpu.dimension_semantics<arbitrary>], iteration_bounds = array<i64: 1, 1, 1>, scalar_prefetch = 0 : i64, scratch_operands = 1 : i64, tpu.core_type = #tpu.core_type<tc>, window_params = [{transform_indices = @transform_0, window_bounds = array<i64: 32, 128>}, {transform_indices = @transform_1, window_bounds = array<i64: 128, 256>}, {transform_indices = @transform_2, window_bounds = array<i64: 1, 256>}, {transform_indices = @transform_3, window_bounds = array<i64: 32, 256>}]} {
    %c0_i32 = arith.constant 0 : i32
    %0 = arith.cmpi eq, %arg2, %c0_i32 : i32
    %1 = arith.extui %0 : i1 to i32
    %c0_i32_0 = arith.constant 0 : i32
    %2 = arith.cmpi ne, %1, %c0_i32_0 : i32
    scf.if %2 {
      %cst_10 = arith.constant 0.000000e+00 : f32
      %12 = vector.broadcast %cst_10 : f32 to vector<32x256xf32>
      %c0_11 = arith.constant 0 : index
      %c0_12 = arith.constant 0 : index
      %13 = vector.load %arg7[%c0_11, %c0_12] : memref<32x256xf32, #tpu.memory_space<vmem>>, vector<32x256xf32>
      tpu.vector_store %arg7[%c0_11, %c0_12], %12 {strides = array<i32>} : memref<32x256xf32, #tpu.memory_space<vmem>>, vector<32x256xf32>,
    } else {
    }
    %c0 = arith.constant 0 : index
    %c0_1 = arith.constant 0 : index
    %3 = vector.load %arg3[%c0, %c0_1] : memref<32x128xbf16, #tpu.memory_space<vmem>>, vector<32x128xbf16>
    %c0_2 = arith.constant 0 : index
    %c0_3 = arith.constant 0 : index
    %4 = vector.load %arg7[%c0_2, %c0_3] : memref<32x256xf32, #tpu.memory_space<vmem>>, vector<32x256xf32>
    %c0_4 = arith.constant 0 : index
    %c0_5 = arith.constant 0 : index
    %5 = vector.load %arg4[%c0_4, %c0_5] : memref<128x256xbf16, #tpu.memory_space<vmem>>, vector<128x256xbf16>
    %cst = arith.constant dense<0.000000e+00> : vector<32x256xf32>
    %6 = tpu.matmul %3, %5, %cst {dimension_numbers = #tpu.dot_dimension_numbers<[1], [0], [0], [1], [0, 0, 1, 1], [], []>} : vector<32x128xbf16>, vector<128x256xbf16>, vector<32x256xf32> -> vector<32x256xf32>
    %7 = arith.addf %4, %6 : vector<32x256xf32>
    %c0_6 = arith.constant 0 : index
    %c0_7 = arith.constant 0 : index
    %8 = vector.load %arg7[%c0_6, %c0_7] : memref<32x256xf32, #tpu.memory_space<vmem>>, vector<32x256xf32>
    tpu.vector_store %arg7[%c0_6, %c0_7], %7 {strides = array<i32>} : memref<32x256xf32, #tpu.memory_space<vmem>>, vector<32x256xf32>,
    %c0_i32_8 = arith.constant 0 : i32
    %9 = arith.cmpi eq, %arg2, %c0_i32_8 : i32
    %10 = arith.extui %9 : i1 to i32
    %c0_i32_9 = arith.constant 0 : i32
    %11 = arith.cmpi ne, %10, %c0_i32_9 : i32
    scf.if %11 {
      %c0_10 = arith.constant 0 : index
      %c0_11 = arith.constant 0 : index
      %12 = vector.load %arg7[%c0_10, %c0_11] : memref<32x256xf32, #tpu.memory_space<vmem>>, vector<32x256xf32>
      %c0_12 = arith.constant 0 : index
      %c0_13 = arith.constant 0 : index
      %13 = vector.load %arg5[%c0_12, %c0_13] : memref<1x256xf32, #tpu.memory_space<vmem>>, vector<1x256xf32>
      %14 = vector.broadcast %13 : vector<1x256xf32> to vector<32x256xf32>
      %15 = arith.addf %12, %14 : vector<32x256xf32>
      %16 = arith.truncf %15 : vector<32x256xf32> to vector<32x256xbf16>
      %c0_14 = arith.constant 0 : index
      %c0_15 = arith.constant 0 : index
      %17 = vector.load %arg6[%c0_14, %c0_15] : memref<32x256xbf16, #tpu.memory_space<vmem>>, vector<32x256xbf16>
      tpu.vector_store %arg6[%c0_14, %c0_15], %16 {strides = array<i32>} : memref<32x256xbf16, #tpu.memory_space<vmem>>, vector<32x256xbf16>,
    } else {
    }
    return
  }
  func.func @transform_0(%arg0: i32, %arg1: i32, %arg2: i32) -> (i32, i32) {
    %c0_i32 = arith.constant 0 : i32
    return %arg0, %arg2 : i32, i32
  }
  func.func @transform_1(%arg0: i32, %arg1: i32, %arg2: i32) -> (i32, i32) {
    %c0_i32 = arith.constant 0 : i32
    return %arg2, %arg1 : i32, i32
  }
  func.func @transform_2(%arg0: i32, %arg1: i32, %arg2: i32) -> (i32, i32) {
    %c0_i32 = arith.constant 0 : i32
    %c0_i32_0 = arith.constant 0 : i32
    return %c0_i32, %arg1 : i32, i32
  }
  func.func @transform_3(%arg0: i32, %arg1: i32, %arg2: i32) -> (i32, i32) {
    %c0_i32 = arith.constant 0 : i32
    return %arg0, %arg1 : i32, i32
  }
}

module attributes {stable_mosaic.version = 11 : i64} {
  func.func @kernel(%arg0: i32, %arg1: i32, %arg2: i32, %arg3: memref<32x128xbf16, #tpu.memory_space<vmem>>, %arg4: memref<128x256xbf16, #tpu.memory_space<vmem>>, %arg5: memref<1x256xf32, #tpu.memory_space<vmem>>, %arg6: memref<1x128xf32, #tpu.memory_space<vmem>>, %arg7: memref<1x128xf32, #tpu.memory_space<vmem>>, %arg8: memref<32x256xbf16, #tpu.memory_space<vmem>>, %arg9: memref<32x256xf32, #tpu.memory_space<vmem>>) attributes {dimension_semantics = [#tpu.dimension_semantics<parallel>, #tpu.dimension_semantics<parallel>, #tpu.dimension_semantics<arbitrary>], iteration_bounds = array<i64: 1, 1, 1>, scalar_prefetch = 0 : i64, scratch_operands = 1 : i64, tpu.core_type = #tpu.core_type<tc>, window_params = [{transform_indices = @transform_0, window_bounds = array<i64: 32, 128>}, {transform_indices = @transform_1, window_bounds = array<i64: 128, 256>}, {transform_indices = @transform_2, window_bounds = array<i64: 1, 256>}, {transform_indices = @transform_3, window_bounds = array<i64: 1, 128>}, {transform_indices = @transform_4, window_bounds = array<i64: 1, 128>}, {transform_indices = @transform_5, window_bounds = array<i64: 32, 256>}]} {
    %c0_i32 = arith.constant 0 : i32
    %0 = arith.cmpi eq, %arg2, %c0_i32 : i32
    %1 = arith.extui %0 : i1 to i32
    %c0_i32_0 = arith.constant 0 : i32
    %2 = arith.cmpi ne, %1, %c0_i32_0 : i32
    scf.if %2 {
      %cst_19 = arith.constant 0.000000e+00 : f32
      %38 = vector.broadcast %cst_19 : f32 to vector<32x256xf32>
      %c0_20 = arith.constant 0 : index
      %c0_21 = arith.constant 0 : index
      %39 = vector.load %arg9[%c0_20, %c0_21] : memref<32x256xf32, #tpu.memory_space<vmem>>, vector<32x256xf32>
      tpu.vector_store %arg9[%c0_20, %c0_21], %38 {strides = array<i32>} : memref<32x256xf32, #tpu.memory_space<vmem>>, vector<32x256xf32>,
    } else {
    }
    %c0 = arith.constant 0 : index
    %c0_1 = arith.constant 0 : index
    %3 = vector.load %arg3[%c0, %c0_1] : memref<32x128xbf16, #tpu.memory_space<vmem>>, vector<32x128xbf16>
    %4 = arith.extf %3 : vector<32x128xbf16> to vector<32x128xf32>
    %cst = arith.constant dense<0.000000e+00> : vector<32xf32>
    %5 = vector.multi_reduction <add>, %4, %cst [1] : vector<32x128xf32> to vector<32xf32>
    %6 = vector.shape_cast %5 : vector<32xf32> to vector<32x1xf32>
    %cst_2 = arith.constant 1.280000e+02 : f32
    %7 = vector.broadcast %cst_2 : f32 to vector<32x1xf32>
    %8 = arith.divf %6, %7 : vector<32x1xf32>
    %9 = vector.broadcast %8 : vector<32x1xf32> to vector<32x128xf32>
    %10 = arith.subf %4, %9 : vector<32x128xf32>
    %11 = arith.mulf %10, %10 : vector<32x128xf32>
    %cst_3 = arith.constant dense<0.000000e+00> : vector<32xf32>
    %12 = vector.multi_reduction <add>, %11, %cst_3 [1] : vector<32x128xf32> to vector<32xf32>
    %13 = vector.shape_cast %12 : vector<32xf32> to vector<32x1xf32>
    %cst_4 = arith.constant 1.280000e+02 : f32
    %14 = vector.broadcast %cst_4 : f32 to vector<32x1xf32>
    %15 = arith.divf %13, %14 : vector<32x1xf32>
    %16 = vector.broadcast %8 : vector<32x1xf32> to vector<32x128xf32>
    %17 = arith.subf %4, %16 : vector<32x128xf32>
    %cst_5 = arith.constant 9.99999997E-7 : f32
    %18 = vector.broadcast %cst_5 : f32 to vector<32x1xf32>
    %19 = arith.addf %15, %18 : vector<32x1xf32>
    %20 = math.rsqrt %19 : vector<32x1xf32>
    %21 = vector.broadcast %20 : vector<32x1xf32> to vector<32x128xf32>
    %22 = arith.mulf %17, %21 : vector<32x128xf32>
    %c0_6 = arith.constant 0 : index
    %c0_7 = arith.constant 0 : index
    %23 = vector.load %arg6[%c0_6, %c0_7] : memref<1x128xf32, #tpu.memory_space<vmem>>, vector<1x128xf32>
    %24 = vector.broadcast %23 : vector<1x128xf32> to vector<32x128xf32>
    %25 = arith.mulf %22, %24 : vector<32x128xf32>
    %c0_8 = arith.constant 0 : index
    %c0_9 = arith.constant 0 : index
    %26 = vector.load %arg7[%c0_8, %c0_9] : memref<1x128xf32, #tpu.memory_space<vmem>>, vector<1x128xf32>
    %27 = vector.broadcast %26 : vector<1x128xf32> to vector<32x128xf32>
    %28 = arith.addf %25, %27 : vector<32x128xf32>
    %c0_10 = arith.constant 0 : index
    %c0_11 = arith.constant 0 : index
    %29 = vector.load %arg9[%c0_10, %c0_11] : memref<32x256xf32, #tpu.memory_space<vmem>>, vector<32x256xf32>
    %30 = arith.truncf %28 : vector<32x128xf32> to vector<32x128xbf16>
    %c0_12 = arith.constant 0 : index
    %c0_13 = arith.constant 0 : index
    %31 = vector.load %arg4[%c0_12, %c0_13] : memref<128x256xbf16, #tpu.memory_space<vmem>>, vector<128x256xbf16>
    %cst_14 = arith.constant dense<0.000000e+00> : vector<32x256xf32>
    %32 = tpu.matmul %30, %31, %cst_14 {dimension_numbers = #tpu.dot_dimension_numbers<[1], [0], [0], [1], [0, 0, 1, 1], [], []>} : vector<32x128xbf16>, vector<128x256xbf16>, vector<32x256xf32> -> vector<32x256xf32>
    %33 = arith.addf %29, %32 : vector<32x256xf32>
    %c0_15 = arith.constant 0 : index
    %c0_16 = arith.constant 0 : index
    %34 = vector.load %arg9[%c0_15, %c0_16] : memref<32x256xf32, #tpu.memory_space<vmem>>, vector<32x256xf32>
    tpu.vector_store %arg9[%c0_15, %c0_16], %33 {strides = array<i32>} : memref<32x256xf32, #tpu.memory_space<vmem>>, vector<32x256xf32>,
    %c0_i32_17 = arith.constant 0 : i32
    %35 = arith.cmpi eq, %arg2, %c0_i32_17 : i32
    %36 = arith.extui %35 : i1 to i32
    %c0_i32_18 = arith.constant 0 : i32
    %37 = arith.cmpi ne, %36, %c0_i32_18 : i32
    scf.if %37 {
      %c0_19 = arith.constant 0 : index
      %c0_20 = arith.constant 0 : index
      %38 = vector.load %arg9[%c0_19, %c0_20] : memref<32x256xf32, #tpu.memory_space<vmem>>, vector<32x256xf32>
      %c0_21 = arith.constant 0 : index
      %c0_22 = arith.constant 0 : index
      %39 = vector.load %arg5[%c0_21, %c0_22] : memref<1x256xf32, #tpu.memory_space<vmem>>, vector<1x256xf32>
      %40 = vector.broadcast %39 : vector<1x256xf32> to vector<32x256xf32>
      %41 = arith.addf %38, %40 : vector<32x256xf32>
      %42 = arith.mulf %41, %41 : vector<32x256xf32>
      %43 = arith.mulf %41, %42 : vector<32x256xf32>
      %cst_23 = arith.constant 4.471500e-02 : f32
      %44 = vector.broadcast %cst_23 : f32 to vector<32x256xf32>
      %45 = arith.mulf %44, %43 : vector<32x256xf32>
      %46 = arith.addf %41, %45 : vector<32x256xf32>
      %cst_24 = arith.constant 0.797884583 : f32
      %47 = vector.broadcast %cst_24 : f32 to vector<32x256xf32>
      %48 = arith.mulf %47, %46 : vector<32x256xf32>
      %49 = math.tanh %48 : vector<32x256xf32>
      %cst_25 = arith.constant 1.000000e+00 : f32
      %50 = vector.broadcast %cst_25 : f32 to vector<32x256xf32>
      %51 = arith.addf %50, %49 : vector<32x256xf32>
      %cst_26 = arith.constant 5.000000e-01 : f32
      %52 = vector.broadcast %cst_26 : f32 to vector<32x256xf32>
      %53 = arith.mulf %52, %51 : vector<32x256xf32>
      %54 = arith.mulf %41, %53 : vector<32x256xf32>
      %55 = arith.truncf %54 : vector<32x256xf32> to vector<32x256xbf16>
      %c0_27 = arith.constant 0 : index
      %c0_28 = arith.constant 0 : index
      %56 = vector.load %arg8[%c0_27, %c0_28] : memref<32x256xbf16, #tpu.memory_space<vmem>>, vector<32x256xbf16>
      tpu.vector_store %arg8[%c0_27, %c0_28], %55 {strides = array<i32>} : memref<32x256xbf16, #tpu.memory_space<vmem>>, vector<32x256xbf16>,
    } else {
    }
    return
  }
  func.func @transform_0(%arg0: i32, %arg1: i32, %arg2: i32) -> (i32, i32) {
    %c0_i32 = arith.constant 0 : i32
    return %arg0, %arg2 : i32, i32
  }
  func.func @transform_1(%arg0: i32, %arg1: i32, %arg2: i32) -> (i32, i32) {
    %c0_i32 = arith.constant 0 : i32
    return %arg2, %arg1 : i32, i32
  }
  func.func @transform_2(%arg0: i32, %arg1: i32, %arg2: i32) -> (i32, i32) {
    %c0_i32 = arith.constant 0 : i32
    %c0_i32_0 = arith.constant 0 : i32
    return %c0_i32, %arg1 : i32, i32
  }
  func.func @transform_3(%arg0: i32, %arg1: i32, %arg2: i32) -> (i32, i32) {
    %c0_i32 = arith.constant 0 : i32
    %c0_i32_0 = arith.constant 0 : i32
    return %c0_i32, %arg2 : i32, i32
  }
  func.func @transform_4(%arg0: i32, %arg1: i32, %arg2: i32) -> (i32, i32) {
    %c0_i32 = arith.constant 0 : i32
    %c0_i32_0 = arith.constant 0 : i32
    return %c0_i32, %arg2 : i32, i32
  }
  func.func @transform_5(%arg0: i32, %arg1: i32, %arg2: i32) -> (i32, i32) {
    %c0_i32 = arith.constant 0 : i32
    return %arg0, %arg1 : i32, i32
  }
}

module attributes {stable_mosaic.version = 11 : i64} {
  func.func @kernel(%arg0: i32, %arg1: memref<32x128xbf16, #tpu.memory_space<vmem>>, %arg2: memref<1x128xf32, #tpu.memory_space<vmem>>, %arg3: memref<1x128xf32, #tpu.memory_space<vmem>>, %arg4: memref<32x128xbf16, #tpu.memory_space<vmem>>) attributes {dimension_semantics = [#tpu.dimension_semantics<parallel>], iteration_bounds = array<i64: 1>, scalar_prefetch = 0 : i64, scratch_operands = 0 : i64, tpu.core_type = #tpu.core_type<tc>, window_params = [{transform_indices = @transform_0, window_bounds = array<i64: 32, 128>}, {pipeline_mode = #tpu.pipeline_mode<synchronous>, transform_indices = @transform_1, window_bounds = array<i64: 1, 128>}, {pipeline_mode = #tpu.pipeline_mode<synchronous>, transform_indices = @transform_2, window_bounds = array<i64: 1, 128>}, {transform_indices = @transform_3, window_bounds = array<i64: 32, 128>}]} {
    %c0 = arith.constant 0 : index
    %c0_0 = arith.constant 0 : index
    %0 = vector.load %arg1[%c0, %c0_0] : memref<32x128xbf16, #tpu.memory_space<vmem>>, vector<32x128xbf16>
    %1 = arith.extf %0 : vector<32x128xbf16> to vector<32x128xf32>
    %cst = arith.constant dense<0.000000e+00> : vector<32xf32>
    %2 = vector.multi_reduction <add>, %1, %cst [1] : vector<32x128xf32> to vector<32xf32>
    %3 = vector.shape_cast %2 : vector<32xf32> to vector<32x1xf32>
    %cst_1 = arith.constant 1.280000e+02 : f32
    %4 = vector.broadcast %cst_1 : f32 to vector<32x1xf32>
    %5 = arith.divf %3, %4 : vector<32x1xf32>
    %6 = vector.broadcast %5 : vector<32x1xf32> to vector<32x128xf32>
    %7 = arith.subf %1, %6 : vector<32x128xf32>
    %8 = arith.mulf %7, %7 : vector<32x128xf32>
    %cst_2 = arith.constant dense<0.000000e+00> : vector<32xf32>
    %9 = vector.multi_reduction <add>, %8, %cst_2 [1] : vector<32x128xf32> to vector<32xf32>
    %10 = vector.shape_cast %9 : vector<32xf32> to vector<32x1xf32>
    %cst_3 = arith.constant 1.280000e+02 : f32
    %11 = vector.broadcast %cst_3 : f32 to vector<32x1xf32>
    %12 = arith.divf %10, %11 : vector<32x1xf32>
    %13 = vector.broadcast %5 : vector<32x1xf32> to vector<32x128xf32>
    %14 = arith.subf %1, %13 : vector<32x128xf32>
    %cst_4 = arith.constant 9.99999997E-7 : f32
    %15 = vector.broadcast %cst_4 : f32 to vector<32x1xf32>
    %16 = arith.addf %12, %15 : vector<32x1xf32>
    %17 = math.rsqrt %16 : vector<32x1xf32>
    %18 = vector.broadcast %17 : vector<32x1xf32> to vector<32x128xf32>
    %19 = arith.mulf %14, %18 : vector<32x128xf32>
    %c0_5 = arith.constant 0 : index
    %c0_6 = arith.constant 0 : index
    %20 = vector.load %arg2[%c0_5, %c0_6] : memref<1x128xf32, #tpu.memory_space<vmem>>, vector<1x128xf32>
    %21 = vector.broadcast %20 : vector<1x128xf32> to vector<32x128xf32>
    %22 = arith.mulf %19, %21 : vector<32x128xf32>
    %c0_7 = arith.constant 0 : index
    %c0_8 = arith.constant 0 : index
    %23 = vector.load %arg3[%c0_7, %c0_8] : memref<1x128xf32, #tpu.memory_space<vmem>>, vector<1x128xf32>
    %24 = vector.broadcast %23 : vector<1x128xf32> to vector<32x128xf32>
    %25 = arith.addf %22, %24 : vector<32x128xf32>
    %26 = arith.truncf %25 : vector<32x128xf32> to vector<32x128xbf16>
    %c0_9 = arith.constant 0 : index
    %c0_10 = arith.constant 0 : index
    %27 = vector.load %arg4[%c0_9, %c0_10] : memref<32x128xbf16, #tpu.memory_space<vmem>>, vector<32x128xbf16>
    tpu.vector_store %arg4[%c0_9, %c0_10], %26 {strides = array<i32>} : memref<32x128xbf16, #tpu.memory_space<vmem>>, vector<32x128xbf16>,
    return
  }
  func.func @transform_0(%arg0: i32) -> (i32, i32) {
    %c0_i32 = arith.constant 0 : i32
    %c0_i32_0 = arith.constant 0 : i32
    return %arg0, %c0_i32 : i32, i32
  }
  func.func @transform_1(%arg0: i32) -> (i32, i32) {
    %c0_i32 = arith.constant 0 : i32
    %c0_i32_0 = arith.constant 0 : i32
    %c0_i32_1 = arith.constant 0 : i32
    return %c0_i32, %c0_i32_0 : i32, i32
  }
  func.func @transform_2(%arg0: i32) -> (i32, i32) {
    %c0_i32 = arith.constant 0 : i32
    %c0_i32_0 = arith.constant 0 : i32
    %c0_i32_1 = arith.constant 0 : i32
    return %c0_i32, %c0_i32_0 : i32, i32
  }
  func.func @transform_3(%arg0: i32) -> (i32, i32) {
    %c0_i32 = arith.constant 0 : i32
    %c0_i32_0 = arith.constant 0 : i32
    return %arg0, %c0_i32 : i32, i32
  }
}

module attributes {stable_mosaic.version = 11 : i64} {
  func.func @kernel(%arg0: i32, %arg1: i32, %arg2: i32, %arg3: memref<16x128xbf16, #tpu.memory_space<vmem>>, %arg4: memref<128x384xbf16, #tpu.memory_space<vmem>>, %arg5: memref<1x384xf32, #tpu.memory_space<vmem>>, %arg6: memref<1x128xf32, #tpu.memory_space<vmem>>, %arg7: memref<1x128xf32, #tpu.memory_space<vmem>>, %arg8: memref<16x384xbf16, #tpu.memory_space<vmem>>, %arg9: memref<16x384xf32, #tpu.memory_space<vmem>>) attributes {dimension_semantics = [#tpu.dimension_semantics<parallel>, #tpu.dimension_semantics<parallel>, #tpu.dimension_semantics<arbitrary>], iteration_bounds = array<i64: 1, 1, 1>, scalar_prefetch = 0 : i64, scratch_operands = 1 : i64, tpu.core_type = #tpu.core_type<tc>, window_params = [{transform_indices = @transform_0, window_bounds = array<i64: 16, 128>}, {transform_indices = @transform_1, window_bounds = array<i64: 128, 384>}, {transform_indices = @transform_2, window_bounds = array<i64: 1, 384>}, {transform_indices = @transform_3, window_bounds = array<i64: 1, 128>}, {transform_indices = @transform_4, window_bounds = array<i64: 1, 128>}, {transform_indices = @transform_5, window_bounds = array<i64: 16, 384>}]} {
    %c0_i32 = arith.constant 0 : i32
    %0 = arith.cmpi eq, %arg2, %c0_i32 : i32
    %1 = arith.extui %0 : i1 to i32
    %c0_i32_0 = arith.constant 0 : i32
    %2 = arith.cmpi ne, %1, %c0_i32_0 : i32
    scf.if %2 {
      %cst_19 = arith.constant 0.000000e+00 : f32
      %38 = vector.broadcast %cst_19 : f32 to vector<16x384xf32>
      %c0_20 = arith.constant 0 : index
      %c0_21 = arith.constant 0 : index
      %39 = vector.load %arg9[%c0_20, %c0_21] : memref<16x384xf32, #tpu.memory_space<vmem>>, vector<16x384xf32>
      tpu.vector_store %arg9[%c0_20, %c0_21], %38 {strides = array<i32>} : memref<16x384xf32, #tpu.memory_space<vmem>>, vector<16x384xf32>,
    } else {
    }
    %c0 = arith.constant 0 : index
    %c0_1 = arith.constant 0 : index
    %3 = vector.load %arg3[%c0, %c0_1] : memref<16x128xbf16, #tpu.memory_space<vmem>>, vector<16x128xbf16>
    %4 = arith.extf %3 : vector<16x128xbf16> to vector<16x128xf32>
    %cst = arith.constant dense<0.000000e+00> : vector<16xf32>
    %5 = vector.multi_reduction <add>, %4, %cst [1] : vector<16x128xf32> to vector<16xf32>
    %6 = vector.shape_cast %5 : vector<16xf32> to vector<16x1xf32>
    %cst_2 = arith.constant 1.280000e+02 : f32
    %7 = vector.broadcast %cst_2 : f32 to vector<16x1xf32>
    %8 = arith.divf %6, %7 : vector<16x1xf32>
    %9 = vector.broadcast %8 : vector<16x1xf32> to vector<16x128xf32>
    %10 = arith.subf %4, %9 : vector<16x128xf32>
    %11 = arith.mulf %10, %10 : vector<16x128xf32>
    %cst_3 = arith.constant dense<0.000000e+00> : vector<16xf32>
    %12 = vector.multi_reduction <add>, %11, %cst_3 [1] : vector<16x128xf32> to vector<16xf32>
    %13 = vector.shape_cast %12 : vector<16xf32> to vector<16x1xf32>
    %cst_4 = arith.constant 1.280000e+02 : f32
    %14 = vector.broadcast %cst_4 : f32 to vector<16x1xf32>
    %15 = arith.divf %13, %14 : vector<16x1xf32>
    %16 = vector.broadcast %8 : vector<16x1xf32> to vector<16x128xf32>
    %17 = arith.subf %4, %16 : vector<16x128xf32>
    %cst_5 = arith.constant 9.99999997E-7 : f32
    %18 = vector.broadcast %cst_5 : f32 to vector<16x1xf32>
    %19 = arith.addf %15, %18 : vector<16x1xf32>
    %20 = math.rsqrt %19 : vector<16x1xf32>
    %21 = vector.broadcast %20 : vector<16x1xf32> to vector<16x128xf32>
    %22 = arith.mulf %17, %21 : vector<16x128xf32>
    %c0_6 = arith.constant 0 : index
    %c0_7 = arith.constant 0 : index
    %23 = vector.load %arg6[%c0_6, %c0_7] : memref<1x128xf32, #tpu.memory_space<vmem>>, vector<1x128xf32>
    %24 = vector.broadcast %23 : vector<1x128xf32> to vector<16x128xf32>
    %25 = arith.mulf %22, %24 : vector<16x128xf32>
    %c0_8 = arith.constant 0 : index
    %c0_9 = arith.constant 0 : index
    %26 = vector.load %arg7[%c0_8, %c0_9] : memref<1x128xf32, #tpu.memory_space<vmem>>, vector<1x128xf32>
    %27 = vector.broadcast %26 : vector<1x128xf32> to vector<16x128xf32>
    %28 = arith.addf %25, %27 : vector<16x128xf32>
    %c0_10 = arith.constant 0 : index
    %c0_11 = arith.constant 0 : index
    %29 = vector.load %arg9[%c0_10, %c0_11] : memref<16x384xf32, #tpu.memory_space<vmem>>, vector<16x384xf32>
    %30 = arith.truncf %28 : vector<16x128xf32> to vector<16x128xbf16>
    %c0_12 = arith.constant 0 : index
    %c0_13 = arith.constant 0 : index
    %31 = vector.load %arg4[%c0_12, %c0_13] : memref<128x384xbf16, #tpu.memory_space<vmem>>, vector<128x384xbf16>
    %cst_14 = arith.constant dense<0.000000e+00> : vector<16x384xf32>
    %32 = tpu.matmul %30, %31, %cst_14 {dimension_numbers = #tpu.dot_dimension_numbers<[1], [0], [0], [1], [0, 0, 1, 1], [], []>} : vector<16x128xbf16>, vector<128x384xbf16>, vector<16x384xf32> -> vector<16x384xf32>
    %33 = arith.addf %29, %32 : vector<16x384xf32>
    %c0_15 = arith.constant 0 : index
    %c0_16 = arith.constant 0 : index
    %34 = vector.load %arg9[%c0_15, %c0_16] : memref<16x384xf32, #tpu.memory_space<vmem>>, vector<16x384xf32>
    tpu.vector_store %arg9[%c0_15, %c0_16], %33 {strides = array<i32>} : memref<16x384xf32, #tpu.memory_space<vmem>>, vector<16x384xf32>,
    %c0_i32_17 = arith.constant 0 : i32
    %35 = arith.cmpi eq, %arg2, %c0_i32_17 : i32
    %36 = arith.extui %35 : i1 to i32
    %c0_i32_18 = arith.constant 0 : i32
    %37 = arith.cmpi ne, %36, %c0_i32_18 : i32
    scf.if %37 {
      %c0_19 = arith.constant 0 : index
      %c0_20 = arith.constant 0 : index
      %38 = vector.load %arg9[%c0_19, %c0_20] : memref<16x384xf32, #tpu.memory_space<vmem>>, vector<16x384xf32>
      %c0_21 = arith.constant 0 : index
      %c0_22 = arith.constant 0 : index
      %39 = vector.load %arg5[%c0_21, %c0_22] : memref<1x384xf32, #tpu.memory_space<vmem>>, vector<1x384xf32>
      %40 = vector.broadcast %39 : vector<1x384xf32> to vector<16x384xf32>
      %41 = arith.addf %38, %40 : vector<16x384xf32>
      %42 = arith.truncf %41 : vector<16x384xf32> to vector<16x384xbf16>
      %c0_23 = arith.constant 0 : index
      %c0_24 = arith.constant 0 : index
      %43 = vector.load %arg8[%c0_23, %c0_24] : memref<16x384xbf16, #tpu.memory_space<vmem>>, vector<16x384xbf16>
      tpu.vector_store %arg8[%c0_23, %c0_24], %42 {strides = array<i32>} : memref<16x384xbf16, #tpu.memory_space<vmem>>, vector<16x384xbf16>,
    } else {
    }
    return
  }
  func.func @transform_0(%arg0: i32, %arg1: i32, %arg2: i32) -> (i32, i32) {
    %c0_i32 = arith.constant 0 : i32
    return %arg0, %arg2 : i32, i32
  }
  func.func @transform_1(%arg0: i32, %arg1: i32, %arg2: i32) -> (i32, i32) {
    %c0_i32 = arith.constant 0 : i32
    return %arg2, %arg1 : i32, i32
  }
  func.func @transform_2(%arg0: i32, %arg1: i32, %arg2: i32) -> (i32, i32) {
    %c0_i32 = arith.constant 0 : i32
    %c0_i32_0 = arith.constant 0 : i32
    return %c0_i32, %arg1 : i32, i32
  }
  func.func @transform_3(%arg0: i32, %arg1: i32, %arg2: i32) -> (i32, i32) {
    %c0_i32 = arith.constant 0 : i32
    %c0_i32_0 = arith.constant 0 : i32
    return %c0_i32, %arg2 : i32, i32
  }
  func.func @transform_4(%arg0: i32, %arg1: i32, %arg2: i32) -> (i32, i32) {
    %c0_i32 = arith.constant 0 : i32
    %c0_i32_0 = arith.constant 0 : i32
    return %c0_i32, %arg2 : i32, i32
  }
  func.func @transform_5(%arg0: i32, %arg1: i32, %arg2: i32) -> (i32, i32) {
    %c0_i32 = arith.constant 0 : i32
    return %arg0, %arg1 : i32, i32
  }
}

module attributes {stable_mosaic.version = 11 : i64} {
  func.func @kernel(%arg0: i32, %arg1: i32, %arg2: i32, %arg3: memref<16x128xbf16, #tpu.memory_space<vmem>>, %arg4: memref<128x128xbf16, #tpu.memory_space<vmem>>, %arg5: memref<1x128xf32, #tpu.memory_space<vmem>>, %arg6: memref<16x128xbf16, #tpu.memory_space<vmem>>, %arg7: memref<16x128xbf16, #tpu.memory_space<vmem>>, %arg8: memref<16x128xf32, #tpu.memory_space<vmem>>) attributes {dimension_semantics = [#tpu.dimension_semantics<parallel>, #tpu.dimension_semantics<parallel>, #tpu.dimension_semantics<arbitrary>], iteration_bounds = array<i64: 1, 1, 1>, scalar_prefetch = 0 : i64, scratch_operands = 1 : i64, tpu.core_type = #tpu.core_type<tc>, window_params = [{transform_indices = @transform_0, window_bounds = array<i64: 16, 128>}, {transform_indices = @transform_1, window_bounds = array<i64: 128, 128>}, {transform_indices = @transform_2, window_bounds = array<i64: 1, 128>}, {transform_indices = @transform_3, window_bounds = array<i64: 16, 128>}, {transform_indices = @transform_4, window_bounds = array<i64: 16, 128>}]} {
    %c0_i32 = arith.constant 0 : i32
    %0 = arith.cmpi eq, %arg2, %c0_i32 : i32
    %1 = arith.extui %0 : i1 to i32
    %c0_i32_0 = arith.constant 0 : i32
    %2 = arith.cmpi ne, %1, %c0_i32_0 : i32
    scf.if %2 {
      %cst_10 = arith.constant 0.000000e+00 : f32
      %12 = vector.broadcast %cst_10 : f32 to vector<16x128xf32>
      %c0_11 = arith.constant 0 : index
      %c0_12 = arith.constant 0 : index
      %13 = vector.load %arg8[%c0_11, %c0_12] : memref<16x128xf32, #tpu.memory_space<vmem>>, vector<16x128xf32>
      tpu.vector_store %arg8[%c0_11, %c0_12], %12 {strides = array<i32>} : memref<16x128xf32, #tpu.memory_space<vmem>>, vector<16x128xf32>,
    } else {
    }
    %c0 = arith.constant 0 : index
    %c0_1 = arith.constant 0 : index
    %3 = vector.load %arg3[%c0, %c0_1] : memref<16x128xbf16, #tpu.memory_space<vmem>>, vector<16x128xbf16>
    %c0_2 = arith.constant 0 : index
    %c0_3 = arith.constant 0 : index
    %4 = vector.load %arg8[%c0_2, %c0_3] : memref<16x128xf32, #tpu.memory_space<vmem>>, vector<16x128xf32>
    %c0_4 = arith.constant 0 : index
    %c0_5 = arith.constant 0 : index
    %5 = vector.load %arg4[%c0_4, %c0_5] : memref<128x128xbf16, #tpu.memory_space<vmem>>, vector<128x128xbf16>
    %cst = arith.constant dense<0.000000e+00> : vector<16x128xf32>
    %6 = tpu.matmul %3, %5, %cst {dimension_numbers = #tpu.dot_dimension_numbers<[1], [0], [0], [1], [0, 0, 1, 1], [], []>} : vector<16x128xbf16>, vector<128x128xbf16>, vector<16x128xf32> -> vector<16x128xf32>
    %7 = arith.addf %4, %6 : vector<16x128xf32>
    %c0_6 = arith.constant 0 : index
    %c0_7 = arith.constant 0 : index
    %8 = vector.load %arg8[%c0_6, %c0_7] : memref<16x128xf32, #tpu.memory_space<vmem>>, vector<16x128xf32>
    tpu.vector_store %arg8[%c0_6, %c0_7], %7 {strides = array<i32>} : memref<16x128xf32, #tpu.memory_space<vmem>>, vector<16x128xf32>,
    %c0_i32_8 = arith.constant 0 : i32
    %9 = arith.cmpi eq, %arg2, %c0_i32_8 : i32
    %10 = arith.extui %9 : i1 to i32
    %c0_i32_9 = arith.constant 0 : i32
    %11 = arith.cmpi ne, %10, %c0_i32_9 : i32
    scf.if %11 {
      %c0_10 = arith.constant 0 : index
      %c0_11 = arith.constant 0 : index
      %12 = vector.load %arg8[%c0_10, %c0_11] : memref<16x128xf32, #tpu.memory_space<vmem>>, vector<16x128xf32>
      %c0_12 = arith.constant 0 : index
      %c0_13 = arith.constant 0 : index
      %13 = vector.load %arg5[%c0_12, %c0_13] : memref<1x128xf32, #tpu.memory_space<vmem>>, vector<1x128xf32>
      %14 = vector.broadcast %13 : vector<1x128xf32> to vector<16x128xf32>
      %15 = arith.addf %12, %14 : vector<16x128xf32>
      %c0_14 = arith.constant 0 : index
      %c0_15 = arith.constant 0 : index
      %16 = vector.load %arg6[%c0_14, %c0_15] : memref<16x128xbf16, #tpu.memory_space<vmem>>, vector<16x128xbf16>
      %17 = arith.extf %16 : vector<16x128xbf16> to vector<16x128xf32>
      %18 = arith.addf %15, %17 : vector<16x128xf32>
      %19 = arith.truncf %18 : vector<16x128xf32> to vector<16x128xbf16>
      %c0_16 = arith.constant 0 : index
      %c0_17 = arith.constant 0 : index
      %20 = vector.load %arg7[%c0_16, %c0_17] : memref<16x128xbf16, #tpu.memory_space<vmem>>, vector<16x128xbf16>
      tpu.vector_store %arg7[%c0_16, %c0_17], %19 {strides = array<i32>} : memref<16x128xbf16, #tpu.memory_space<vmem>>, vector<16x128xbf16>,
    } else {
    }
    return
  }
  func.func @transform_0(%arg0: i32, %arg1: i32, %arg2: i32) -> (i32, i32) {
    %c0_i32 = arith.constant 0 : i32
    return %arg0, %arg2 : i32, i32
  }
  func.func @transform_1(%arg0: i32, %arg1: i32, %arg2: i32) -> (i32, i32) {
    %c0_i32 = arith.constant 0 : i32
    return %arg2, %arg1 : i32, i32
  }
  func.func @transform_2(%arg0: i32, %arg1: i32, %arg2: i32) -> (i32, i32) {
    %c0_i32 = arith.constant 0 : i32
    %c0_i32_0 = arith.constant 0 : i32
    return %c0_i32, %arg1 : i32, i32
  }
  func.func @transform_3(%arg0: i32, %arg1: i32, %arg2: i32) -> (i32, i32) {
    %c0_i32 = arith.constant 0 : i32
    return %arg0, %arg1 : i32, i32
  }
  func.func @transform_4(%arg0: i32, %arg1: i32, %arg2: i32) -> (i32, i32) {
    %c0_i32 = arith.constant 0 : i32
    return %arg0, %arg1 : i32, i32
  }
}

module attributes {stable_mosaic.version = 11 : i64} {
  func.func @kernel(%arg0: i32, %arg1: memref<2xi32, #tpu.memory_space<smem>>, %arg2: memref<1x8x384xbf16, #tpu.memory_space<vmem>>, %arg3: memref<1x8x128xbf16, #tpu.memory_space<vmem>>) attributes {dimension_semantics = [#tpu.dimension_semantics<parallel>], iteration_bounds = array<i64: 2>, scalar_prefetch = 1 : i64, scratch_operands = 0 : i64, tpu.core_type = #tpu.core_type<tc>, window_params = [{transform_indices = @transform_0, window_bounds = array<i64: 1, 8, 384>}, {transform_indices = @transform_1, window_bounds = array<i64: 1, 8, 128>}]} {
    %0 = arith.index_cast %arg0 : i32 to index
    %1 = memref.load %arg1[%0] : memref<2xi32, #tpu.memory_space<smem>>
    %c0 = arith.constant 0 : index
    %c0_0 = arith.constant 0 : index
    %c0_1 = arith.constant 0 : index
    %2 = vector.load %arg2[%c0, %c0_0, %c0_1] : memref<1x8x384xbf16, #tpu.memory_space<vmem>>, vector<1x8x384xbf16>
    %3 = vector.shape_cast %2 : vector<1x8x384xbf16> to vector<8x384xbf16>
    %4 = vector.extract_strided_slice %3 {offsets = [0, 0], sizes = [8, 128], strides = [1, 1]} : vector<8x384xbf16> to vector<8x128xbf16>
    %5 = vector.extract_strided_slice %3 {offsets = [0, 128], sizes = [8, 128], strides = [1, 1]} : vector<8x384xbf16> to vector<8x128xbf16>
    %6 = vector.extract_strided_slice %3 {offsets = [0, 256], sizes = [8, 128], strides = [1, 1]} : vector<8x384xbf16> to vector<8x128xbf16>
    %7 = tpu.iota {dimensions = array<i32: 1>} : vector<8x8xi32>
    %8 = vector.broadcast %1 : i32 to vector<8x8xi32>
    %9 = arith.cmpi slt, %7, %8 : vector<8x8xi32>
    %10 = tpu.iota {dimensions = array<i32: 0>} : vector<8x8xi32>
    %11 = arith.cmpi sge, %10, %7 : vector<8x8xi32>
    %12 = arith.andi %9, %11 : vector<8x8xi1>
    %13 = vector.extract_strided_slice %4 {offsets = [0, 0], sizes = [8, 32], strides = [1, 1]} : vector<8x128xbf16> to vector<8x32xbf16>
    %14 = arith.extf %13 : vector<8x32xbf16> to vector<8x32xf32>
    %cst = arith.constant 0.176776692 : f32
    %15 = vector.broadcast %cst : f32 to vector<8x32xf32>
    %16 = arith.mulf %14, %15 : vector<8x32xf32>
    %17 = arith.truncf %16 : vector<8x32xf32> to vector<8x32xbf16>
    %18 = vector.extract_strided_slice %5 {offsets = [0, 0], sizes = [8, 32], strides = [1, 1]} : vector<8x128xbf16> to vector<8x32xbf16>
    %cst_2 = arith.constant dense<0.000000e+00> : vector<8x8xf32>
    %19 = tpu.matmul %17, %18, %cst_2 {dimension_numbers = #tpu.dot_dimension_numbers<[1], [1], [0], [0], [0, 0, 1, 0], [], []>} : vector<8x32xbf16>, vector<8x32xbf16>, vector<8x8xf32> -> vector<8x8xf32>
    %cst_3 = arith.constant -1.000000e+09 : f32
    %20 = vector.broadcast %cst_3 : f32 to vector<8x8xf32>
    %21 = arith.select %12, %19, %20 : vector<8x8xi1>, vector<8x8xf32>
    %cst_4 = arith.constant dense<0xFF800000> : vector<8xf32>
    %22 = vector.multi_reduction <maximumf>, %21, %cst_4 [1] : vector<8x8xf32> to vector<8xf32>
    %23 = vector.shape_cast %22 : vector<8xf32> to vector<8x1xf32>
    %24 = vector.broadcast %23 : vector<8x1xf32> to vector<8x8xf32>
    %25 = arith.subf %21, %24 : vector<8x8xf32>
    %26 = math.exp %25 : vector<8x8xf32>
    %cst_5 = arith.constant dense<0.000000e+00> : vector<8xf32>
    %27 = vector.multi_reduction <add>, %26, %cst_5 [1] : vector<8x8xf32> to vector<8xf32>
    %28 = vector.shape_cast %27 : vector<8xf32> to vector<8x1xf32>
    %29 = tpu.reciprocal %28 {approx = true} : vector<8x1xf32> -> vector<8x1xf32>
    %30 = vector.broadcast %29 : vector<8x1xf32> to vector<8x8xf32>
    %31 = arith.mulf %26, %30 : vector<8x8xf32>
    %32 = arith.truncf %31 : vector<8x8xf32> to vector<8x8xbf16>
    %33 = vector.extract_strided_slice %6 {offsets = [0, 0], sizes = [8, 32], strides = [1, 1]} : vector<8x128xbf16> to vector<8x32xbf16>
    %cst_6 = arith.constant dense<0.000000e+00> : vector<8x32xf32>
    %34 = tpu.matmul %32, %33, %cst_6 {dimension_numbers = #tpu.dot_dimension_numbers<[1], [0], [0], [1], [0, 0, 1, 1], [], []>} : vector<8x8xbf16>, vector<8x32xbf16>, vector<8x32xf32> -> vector<8x32xf32>
    %35 = vector.extract_strided_slice %4 {offsets = [0, 32], sizes = [8, 32], strides = [1, 1]} : vector<8x128xbf16> to vector<8x32xbf16>
    %36 = arith.extf %35 : vector<8x32xbf16> to vector<8x32xf32>
    %cst_7 = arith.constant 0.176776692 : f32
    %37 = vector.broadcast %cst_7 : f32 to vector<8x32xf32>
    %38 = arith.mulf %36, %37 : vector<8x32xf32>
    %39 = arith.truncf %38 : vector<8x32xf32> to vector<8x32xbf16>
    %40 = vector.extract_strided_slice %5 {offsets = [0, 32], sizes = [8, 32], strides = [1, 1]} : vector<8x128xbf16> to vector<8x32xbf16>
    %cst_8 = arith.constant dense<0.000000e+00> : vector<8x8xf32>
    %41 = tpu.matmul %39, %40, %cst_8 {dimension_numbers = #tpu.dot_dimension_numbers<[1], [1], [0], [0], [0, 0, 1, 0], [], []>} : vector<8x32xbf16>, vector<8x32xbf16>, vector<8x8xf32> -> vector<8x8xf32>
    %cst_9 = arith.constant -1.000000e+09 : f32
    %42 = vector.broadcast %cst_9 : f32 to vector<8x8xf32>
    %43 = arith.select %12, %41, %42 : vector<8x8xi1>, vector<8x8xf32>
    %cst_10 = arith.constant dense<0xFF800000> : vector<8xf32>
    %44 = vector.multi_reduction <maximumf>, %43, %cst_10 [1] : vector<8x8xf32> to vector<8xf32>
    %45 = vector.shape_cast %44 : vector<8xf32> to vector<8x1xf32>
    %46 = vector.broadcast %45 : vector<8x1xf32> to vector<8x8xf32>
    %47 = arith.subf %43, %46 : vector<8x8xf32>
    %48 = math.exp %47 : vector<8x8xf32>
    %cst_11 = arith.constant dense<0.000000e+00> : vector<8xf32>
    %49 = vector.multi_reduction <add>, %48, %cst_11 [1] : vector<8x8xf32> to vector<8xf32>
    %50 = vector.shape_cast %49 : vector<8xf32> to vector<8x1xf32>
    %51 = tpu.reciprocal %50 {approx = true} : vector<8x1xf32> -> vector<8x1xf32>
    %52 = vector.broadcast %51 : vector<8x1xf32> to vector<8x8xf32>
    %53 = arith.mulf %48, %52 : vector<8x8xf32>
    %54 = arith.truncf %53 : vector<8x8xf32> to vector<8x8xbf16>
    %55 = vector.extract_strided_slice %6 {offsets = [0, 32], sizes = [8, 32], strides = [1, 1]} : vector<8x128xbf16> to vector<8x32xbf16>
    %cst_12 = arith.constant dense<0.000000e+00> : vector<8x32xf32>
    %56 = tpu.matmul %54, %55, %cst_12 {dimension_numbers = #tpu.dot_dimension_numbers<[1], [0], [0], [1], [0, 0, 1, 1], [], []>} : vector<8x8xbf16>, vector<8x32xbf16>, vector<8x32xf32> -> vector<8x32xf32>
    %57 = vector.extract_strided_slice %4 {offsets = [0, 64], sizes = [8, 32], strides = [1, 1]} : vector<8x128xbf16> to vector<8x32xbf16>
    %58 = arith.extf %57 : vector<8x32xbf16> to vector<8x32xf32>
    %cst_13 = arith.constant 0.176776692 : f32
    %59 = vector.broadcast %cst_13 : f32 to vector<8x32xf32>
    %60 = arith.mulf %58, %59 : vector<8x32xf32>
    %61 = arith.truncf %60 : vector<8x32xf32> to vector<8x32xbf16>
    %62 = vector.extract_strided_slice %5 {offsets = [0, 64], sizes = [8, 32], strides = [1, 1]} : vector<8x128xbf16> to vector<8x32xbf16>
    %cst_14 = arith.constant dense<0.000000e+00> : vector<8x8xf32>
    %63 = tpu.matmul %61, %62, %cst_14 {dimension_numbers = #tpu.dot_dimension_numbers<[1], [1], [0], [0], [0, 0, 1, 0], [], []>} : vector<8x32xbf16>, vector<8x32xbf16>, vector<8x8xf32> -> vector<8x8xf32>
    %cst_15 = arith.constant -1.000000e+09 : f32
    %64 = vector.broadcast %cst_15 : f32 to vector<8x8xf32>
    %65 = arith.select %12, %63, %64 : vector<8x8xi1>, vector<8x8xf32>
    %cst_16 = arith.constant dense<0xFF800000> : vector<8xf32>
    %66 = vector.multi_reduction <maximumf>, %65, %cst_16 [1] : vector<8x8xf32> to vector<8xf32>
    %67 = vector.shape_cast %66 : vector<8xf32> to vector<8x1xf32>
    %68 = vector.broadcast %67 : vector<8x1xf32> to vector<8x8xf32>
    %69 = arith.subf %65, %68 : vector<8x8xf32>
    %70 = math.exp %69 : vector<8x8xf32>
    %cst_17 = arith.constant dense<0.000000e+00> : vector<8xf32>
    %71 = vector.multi_reduction <add>, %70, %cst_17 [1] : vector<8x8xf32> to vector<8xf32>
    %72 = vector.shape_cast %71 : vector<8xf32> to vector<8x1xf32>
    %73 = tpu.reciprocal %72 {approx = true} : vector<8x1xf32> -> vector<8x1xf32>
    %74 = vector.broadcast %73 : vector<8x1xf32> to vector<8x8xf32>
    %75 = arith.mulf %70, %74 : vector<8x8xf32>
    %76 = arith.truncf %75 : vector<8x8xf32> to vector<8x8xbf16>
    %77 = vector.extract_strided_slice %6 {offsets = [0, 64], sizes = [8, 32], strides = [1, 1]} : vector<8x128xbf16> to vector<8x32xbf16>
    %cst_18 = arith.constant dense<0.000000e+00> : vector<8x32xf32>
    %78 = tpu.matmul %76, %77, %cst_18 {dimension_numbers = #tpu.dot_dimension_numbers<[1], [0], [0], [1], [0, 0, 1, 1], [], []>} : vector<8x8xbf16>, vector<8x32xbf16>, vector<8x32xf32> -> vector<8x32xf32>
    %79 = vector.extract_strided_slice %4 {offsets = [0, 96], sizes = [8, 32], strides = [1, 1]} : vector<8x128xbf16> to vector<8x32xbf16>
    %80 = arith.extf %79 : vector<8x32xbf16> to vector<8x32xf32>
    %cst_19 = arith.constant 0.176776692 : f32
    %81 = vector.broadcast %cst_19 : f32 to vector<8x32xf32>
    %82 = arith.mulf %80, %81 : vector<8x32xf32>
    %83 = arith.truncf %82 : vector<8x32xf32> to vector<8x32xbf16>
    %84 = vector.extract_strided_slice %5 {offsets = [0, 96], sizes = [8, 32], strides = [1, 1]} : vector<8x128xbf16> to vector<8x32xbf16>
    %cst_20 = arith.constant dense<0.000000e+00> : vector<8x8xf32>
    %85 = tpu.matmul %83, %84, %cst_20 {dimension_numbers = #tpu.dot_dimension_numbers<[1], [1], [0], [0], [0, 0, 1, 0], [], []>} : vector<8x32xbf16>, vector<8x32xbf16>, vector<8x8xf32> -> vector<8x8xf32>
    %cst_21 = arith.constant -1.000000e+09 : f32
    %86 = vector.broadcast %cst_21 : f32 to vector<8x8xf32>
    %87 = arith.select %12, %85, %86 : vector<8x8xi1>, vector<8x8xf32>
    %cst_22 = arith.constant dense<0xFF800000> : vector<8xf32>
    %88 = vector.multi_reduction <maximumf>, %87, %cst_22 [1] : vector<8x8xf32> to vector<8xf32>
    %89 = vector.shape_cast %88 : vector<8xf32> to vector<8x1xf32>
    %90 = vector.broadcast %89 : vector<8x1xf32> to vector<8x8xf32>
    %91 = arith.subf %87, %90 : vector<8x8xf32>
    %92 = math.exp %91 : vector<8x8xf32>
    %cst_23 = arith.constant dense<0.000000e+00> : vector<8xf32>
    %93 = vector.multi_reduction <add>, %92, %cst_23 [1] : vector<8x8xf32> to vector<8xf32>
    %94 = vector.shape_cast %93 : vector<8xf32> to vector<8x1xf32>
    %95 = tpu.reciprocal %94 {approx = true} : vector<8x1xf32> -> vector<8x1xf32>
    %96 = vector.broadcast %95 : vector<8x1xf32> to vector<8x8xf32>
    %97 = arith.mulf %92, %96 : vector<8x8xf32>
    %98 = arith.truncf %97 : vector<8x8xf32> to vector<8x8xbf16>
    %99 = vector.extract_strided_slice %6 {offsets = [0, 96], sizes = [8, 32], strides = [1, 1]} : vector<8x128xbf16> to vector<8x32xbf16>
    %cst_24 = arith.constant dense<0.000000e+00> : vector<8x32xf32>
    %100 = tpu.matmul %98, %99, %cst_24 {dimension_numbers = #tpu.dot_dimension_numbers<[1], [0], [0], [1], [0, 0, 1, 1], [], []>} : vector<8x8xbf16>, vector<8x32xbf16>, vector<8x32xf32> -> vector<8x32xf32>
    %101 = tpu.concatenate %34, %56, %78, %100 in 1 : vector<8x32xf32>, vector<8x32xf32>, vector<8x32xf32>, vector<8x32xf32> -> vector<8x128xf32>
    %102 = arith.truncf %101 : vector<8x128xf32> to vector<8x128xbf16>
    %c0_25 = arith.constant 0 : index
    %c0_26 = arith.constant 0 : index
    %c0_27 = arith.constant 0 : index
    %103 = vector.load %arg3[%c0_25, %c0_26, %c0_27] : memref<1x8x128xbf16, #tpu.memory_space<vmem>>, vector<1x8x128xbf16>
    %104 = vector.shape_cast %103 : vector<1x8x128xbf16> to vector<8x128xbf16>
    %105 = vector.shape_cast %102 : vector<8x128xbf16> to vector<1x8x128xbf16>
    tpu.vector_store %arg3[%c0_25, %c0_26, %c0_27], %105 {strides = array<i32>} : memref<1x8x128xbf16, #tpu.memory_space<vmem>>, vector<1x8x128xbf16>,
    return
  }
  func.func @transform_0(%arg0: i32, %arg1: memref<2xi32, #tpu.memory_space<smem>>) -> (i32, i32, i32) {
    %c0_i32 = arith.constant 0 : i32
    %c0_i32_0 = arith.constant 0 : i32
    %c0_i32_1 = arith.constant 0 : i32
    return %arg0, %c0_i32, %c0_i32_0 : i32, i32, i32
  }
  func.func @transform_1(%arg0: i32, %arg1: memref<2xi32, #tpu.memory_space<smem>>) -> (i32, i32, i32) {
    %c0_i32 = arith.constant 0 : i32
    %c0_i32_0 = arith.constant 0 : i32
    %c0_i32_1 = arith.constant 0 : i32
    return %arg0, %c0_i32, %c0_i32_0 : i32, i32, i32
  }
}

module attributes {stable_mosaic.version = 11 : i64} {
  func.func @kernel(%arg0: i32, %arg1: i32, %arg2: i32, %arg3: memref<16x128xbf16, #tpu.memory_space<vmem>>, %arg4: memref<128x128xbf16, #tpu.memory_space<vmem>>, %arg5: memref<1x128xf32, #tpu.memory_space<vmem>>, %arg6: memref<1x128xf32, #tpu.memory_space<vmem>>, %arg7: memref<1x128xf32, #tpu.memory_space<vmem>>, %arg8: memref<16x128xbf16, #tpu.memory_space<vmem>>, %arg9: memref<16x128xf32, #tpu.memory_space<vmem>>) attributes {dimension_semantics = [#tpu.dimension_semantics<parallel>, #tpu.dimension_semantics<parallel>, #tpu.dimension_semantics<arbitrary>], iteration_bounds = array<i64: 1, 1, 1>, scalar_prefetch = 0 : i64, scratch_operands = 1 : i64, tpu.core_type = #tpu.core_type<tc>, window_params = [{transform_indices = @transform_0, window_bounds = array<i64: 16, 128>}, {transform_indices = @transform_1, window_bounds = array<i64: 128, 128>}, {transform_indices = @transform_2, window_bounds = array<i64: 1, 128>}, {transform_indices = @transform_3, window_bounds = array<i64: 1, 128>}, {transform_indices = @transform_4, window_bounds = array<i64: 1, 128>}, {transform_indices = @transform_5, window_bounds = array<i64: 16, 128>}]} {
    %c0_i32 = arith.constant 0 : i32
    %0 = arith.cmpi eq, %arg2, %c0_i32 : i32
    %1 = arith.extui %0 : i1 to i32
    %c0_i32_0 = arith.constant 0 : i32
    %2 = arith.cmpi ne, %1, %c0_i32_0 : i32
    scf.if %2 {
      %cst_19 = arith.constant 0.000000e+00 : f32
      %38 = vector.broadcast %cst_19 : f32 to vector<16x128xf32>
      %c0_20 = arith.constant 0 : index
      %c0_21 = arith.constant 0 : index
      %39 = vector.load %arg9[%c0_20, %c0_21] : memref<16x128xf32, #tpu.memory_space<vmem>>, vector<16x128xf32>
      tpu.vector_store %arg9[%c0_20, %c0_21], %38 {strides = array<i32>} : memref<16x128xf32, #tpu.memory_space<vmem>>, vector<16x128xf32>,
    } else {
    }
    %c0 = arith.constant 0 : index
    %c0_1 = arith.constant 0 : index
    %3 = vector.load %arg3[%c0, %c0_1] : memref<16x128xbf16, #tpu.memory_space<vmem>>, vector<16x128xbf16>
    %4 = arith.extf %3 : vector<16x128xbf16> to vector<16x128xf32>
    %cst = arith.constant dense<0.000000e+00> : vector<16xf32>
    %5 = vector.multi_reduction <add>, %4, %cst [1] : vector<16x128xf32> to vector<16xf32>
    %6 = vector.shape_cast %5 : vector<16xf32> to vector<16x1xf32>
    %cst_2 = arith.constant 1.280000e+02 : f32
    %7 = vector.broadcast %cst_2 : f32 to vector<16x1xf32>
    %8 = arith.divf %6, %7 : vector<16x1xf32>
    %9 = vector.broadcast %8 : vector<16x1xf32> to vector<16x128xf32>
    %10 = arith.subf %4, %9 : vector<16x128xf32>
    %11 = arith.mulf %10, %10 : vector<16x128xf32>
    %cst_3 = arith.constant dense<0.000000e+00> : vector<16xf32>
    %12 = vector.multi_reduction <add>, %11, %cst_3 [1] : vector<16x128xf32> to vector<16xf32>
    %13 = vector.shape_cast %12 : vector<16xf32> to vector<16x1xf32>
    %cst_4 = arith.constant 1.280000e+02 : f32
    %14 = vector.broadcast %cst_4 : f32 to vector<16x1xf32>
    %15 = arith.divf %13, %14 : vector<16x1xf32>
    %16 = vector.broadcast %8 : vector<16x1xf32> to vector<16x128xf32>
    %17 = arith.subf %4, %16 : vector<16x128xf32>
    %cst_5 = arith.constant 9.99999997E-7 : f32
    %18 = vector.broadcast %cst_5 : f32 to vector<16x1xf32>
    %19 = arith.addf %15, %18 : vector<16x1xf32>
    %20 = math.rsqrt %19 : vector<16x1xf32>
    %21 = vector.broadcast %20 : vector<16x1xf32> to vector<16x128xf32>
    %22 = arith.mulf %17, %21 : vector<16x128xf32>
    %c0_6 = arith.constant 0 : index
    %c0_7 = arith.constant 0 : index
    %23 = vector.load %arg6[%c0_6, %c0_7] : memref<1x128xf32, #tpu.memory_space<vmem>>, vector<1x128xf32>
    %24 = vector.broadcast %23 : vector<1x128xf32> to vector<16x128xf32>
    %25 = arith.mulf %22, %24 : vector<16x128xf32>
    %c0_8 = arith.constant 0 : index
    %c0_9 = arith.constant 0 : index
    %26 = vector.load %arg7[%c0_8, %c0_9] : memref<1x128xf32, #tpu.memory_space<vmem>>, vector<1x128xf32>
    %27 = vector.broadcast %26 : vector<1x128xf32> to vector<16x128xf32>
    %28 = arith.addf %25, %27 : vector<16x128xf32>
    %c0_10 = arith.constant 0 : index
    %c0_11 = arith.constant 0 : index
    %29 = vector.load %arg9[%c0_10, %c0_11] : memref<16x128xf32, #tpu.memory_space<vmem>>, vector<16x128xf32>
    %30 = arith.truncf %28 : vector<16x128xf32> to vector<16x128xbf16>
    %c0_12 = arith.constant 0 : index
    %c0_13 = arith.constant 0 : index
    %31 = vector.load %arg4[%c0_12, %c0_13] : memref<128x128xbf16, #tpu.memory_space<vmem>>, vector<128x128xbf16>
    %cst_14 = arith.constant dense<0.000000e+00> : vector<16x128xf32>
    %32 = tpu.matmul %30, %31, %cst_14 {dimension_numbers = #tpu.dot_dimension_numbers<[1], [0], [0], [1], [0, 0, 1, 1], [], []>} : vector<16x128xbf16>, vector<128x128xbf16>, vector<16x128xf32> -> vector<16x128xf32>
    %33 = arith.addf %29, %32 : vector<16x128xf32>
    %c0_15 = arith.constant 0 : index
    %c0_16 = arith.constant 0 : index
    %34 = vector.load %arg9[%c0_15, %c0_16] : memref<16x128xf32, #tpu.memory_space<vmem>>, vector<16x128xf32>
    tpu.vector_store %arg9[%c0_15, %c0_16], %33 {strides = array<i32>} : memref<16x128xf32, #tpu.memory_space<vmem>>, vector<16x128xf32>,
    %c0_i32_17 = arith.constant 0 : i32
    %35 = arith.cmpi eq, %arg2, %c0_i32_17 : i32
    %36 = arith.extui %35 : i1 to i32
    %c0_i32_18 = arith.constant 0 : i32
    %37 = arith.cmpi ne, %36, %c0_i32_18 : i32
    scf.if %37 {
      %c0_19 = arith.constant 0 : index
      %c0_20 = arith.constant 0 : index
      %38 = vector.load %arg9[%c0_19, %c0_20] : memref<16x128xf32, #tpu.memory_space<vmem>>, vector<16x128xf32>
      %c0_21 = arith.constant 0 : index
      %c0_22 = arith.constant 0 : index
      %39 = vector.load %arg5[%c0_21, %c0_22] : memref<1x128xf32, #tpu.memory_space<vmem>>, vector<1x128xf32>
      %40 = vector.broadcast %39 : vector<1x128xf32> to vector<16x128xf32>
      %41 = arith.addf %38, %40 : vector<16x128xf32>
      %42 = arith.truncf %41 : vector<16x128xf32> to vector<16x128xbf16>
      %c0_23 = arith.constant 0 : index
      %c0_24 = arith.constant 0 : index
      %43 = vector.load %arg8[%c0_23, %c0_24] : memref<16x128xbf16, #tpu.memory_space<vmem>>, vector<16x128xbf16>
      tpu.vector_store %arg8[%c0_23, %c0_24], %42 {strides = array<i32>} : memref<16x128xbf16, #tpu.memory_space<vmem>>, vector<16x128xbf16>,
    } else {
    }
    return
  }
  func.func @transform_0(%arg0: i32, %arg1: i32, %arg2: i32) -> (i32, i32) {
    %c0_i32 = arith.constant 0 : i32
    return %arg0, %arg2 : i32, i32
  }
  func.func @transform_1(%arg0: i32, %arg1: i32, %arg2: i32) -> (i32, i32) {
    %c0_i32 = arith.constant 0 : i32
    return %arg2, %arg1 : i32, i32
  }
  func.func @transform_2(%arg0: i32, %arg1: i32, %arg2: i32) -> (i32, i32) {
    %c0_i32 = arith.constant 0 : i32
    %c0_i32_0 = arith.constant 0 : i32
    return %c0_i32, %arg1 : i32, i32
  }
  func.func @transform_3(%arg0: i32, %arg1: i32, %arg2: i32) -> (i32, i32) {
    %c0_i32 = arith.constant 0 : i32
    %c0_i32_0 = arith.constant 0 : i32
    return %c0_i32, %arg2 : i32, i32
  }
  func.func @transform_4(%arg0: i32, %arg1: i32, %arg2: i32) -> (i32, i32) {
    %c0_i32 = arith.constant 0 : i32
    %c0_i32_0 = arith.constant 0 : i32
    return %c0_i32, %arg2 : i32, i32
  }
  func.func @transform_5(%arg0: i32, %arg1: i32, %arg2: i32) -> (i32, i32) {
    %c0_i32 = arith.constant 0 : i32
    return %arg0, %arg1 : i32, i32
  }
}

module attributes {stable_mosaic.version = 11 : i64} {
  func.func @kernel(%arg0: i32, %arg1: i32, %arg2: i32, %arg3: memref<16x128xbf16, #tpu.memory_space<vmem>>, %arg4: memref<128x128xbf16, #tpu.memory_space<vmem>>, %arg5: memref<1x128xf32, #tpu.memory_space<vmem>>, %arg6: memref<16x128xbf16, #tpu.memory_space<vmem>>, %arg7: memref<16x128xbf16, #tpu.memory_space<vmem>>, %arg8: memref<16x128xf32, #tpu.memory_space<vmem>>) attributes {dimension_semantics = [#tpu.dimension_semantics<parallel>, #tpu.dimension_semantics<parallel>, #tpu.dimension_semantics<arbitrary>], iteration_bounds = array<i64: 1, 1, 1>, scalar_prefetch = 0 : i64, scratch_operands = 1 : i64, tpu.core_type = #tpu.core_type<tc>, window_params = [{transform_indices = @transform_0, window_bounds = array<i64: 16, 128>}, {transform_indices = @transform_1, window_bounds = array<i64: 128, 128>}, {transform_indices = @transform_2, window_bounds = array<i64: 1, 128>}, {transform_indices = @transform_3, window_bounds = array<i64: 16, 128>}, {transform_indices = @transform_4, window_bounds = array<i64: 16, 128>}]} {
    %c0_i32 = arith.constant 0 : i32
    %0 = arith.cmpi eq, %arg2, %c0_i32 : i32
    %1 = arith.extui %0 : i1 to i32
    %c0_i32_0 = arith.constant 0 : i32
    %2 = arith.cmpi ne, %1, %c0_i32_0 : i32
    scf.if %2 {
      %cst_10 = arith.constant 0.000000e+00 : f32
      %12 = vector.broadcast %cst_10 : f32 to vector<16x128xf32>
      %c0_11 = arith.constant 0 : index
      %c0_12 = arith.constant 0 : index
      %13 = vector.load %arg8[%c0_11, %c0_12] : memref<16x128xf32, #tpu.memory_space<vmem>>, vector<16x128xf32>
      tpu.vector_store %arg8[%c0_11, %c0_12], %12 {strides = array<i32>} : memref<16x128xf32, #tpu.memory_space<vmem>>, vector<16x128xf32>,
    } else {
    }
    %c0 = arith.constant 0 : index
    %c0_1 = arith.constant 0 : index
    %3 = vector.load %arg3[%c0, %c0_1] : memref<16x128xbf16, #tpu.memory_space<vmem>>, vector<16x128xbf16>
    %c0_2 = arith.constant 0 : index
    %c0_3 = arith.constant 0 : index
    %4 = vector.load %arg8[%c0_2, %c0_3] : memref<16x128xf32, #tpu.memory_space<vmem>>, vector<16x128xf32>
    %c0_4 = arith.constant 0 : index
    %c0_5 = arith.constant 0 : index
    %5 = vector.load %arg4[%c0_4, %c0_5] : memref<128x128xbf16, #tpu.memory_space<vmem>>, vector<128x128xbf16>
    %cst = arith.constant dense<0.000000e+00> : vector<16x128xf32>
    %6 = tpu.matmul %3, %5, %cst {dimension_numbers = #tpu.dot_dimension_numbers<[1], [0], [0], [1], [0, 0, 1, 1], [], []>} : vector<16x128xbf16>, vector<128x128xbf16>, vector<16x128xf32> -> vector<16x128xf32>
    %7 = arith.addf %4, %6 : vector<16x128xf32>
    %c0_6 = arith.constant 0 : index
    %c0_7 = arith.constant 0 : index
    %8 = vector.load %arg8[%c0_6, %c0_7] : memref<16x128xf32, #tpu.memory_space<vmem>>, vector<16x128xf32>
    tpu.vector_store %arg8[%c0_6, %c0_7], %7 {strides = array<i32>} : memref<16x128xf32, #tpu.memory_space<vmem>>, vector<16x128xf32>,
    %c0_i32_8 = arith.constant 0 : i32
    %9 = arith.cmpi eq, %arg2, %c0_i32_8 : i32
    %10 = arith.extui %9 : i1 to i32
    %c0_i32_9 = arith.constant 0 : i32
    %11 = arith.cmpi ne, %10, %c0_i32_9 : i32
    scf.if %11 {
      %c0_10 = arith.constant 0 : index
      %c0_11 = arith.constant 0 : index
      %12 = vector.load %arg8[%c0_10, %c0_11] : memref<16x128xf32, #tpu.memory_space<vmem>>, vector<16x128xf32>
      %c0_12 = arith.constant 0 : index
      %c0_13 = arith.constant 0 : index
      %13 = vector.load %arg5[%c0_12, %c0_13] : memref<1x128xf32, #tpu.memory_space<vmem>>, vector<1x128xf32>
      %14 = vector.broadcast %13 : vector<1x128xf32> to vector<16x128xf32>
      %15 = arith.addf %12, %14 : vector<16x128xf32>
      %c0_14 = arith.constant 0 : index
      %c0_15 = arith.constant 0 : index
      %16 = vector.load %arg6[%c0_14, %c0_15] : memref<16x128xbf16, #tpu.memory_space<vmem>>, vector<16x128xbf16>
      %17 = arith.extf %16 : vector<16x128xbf16> to vector<16x128xf32>
      %18 = arith.addf %15, %17 : vector<16x128xf32>
      %19 = arith.truncf %18 : vector<16x128xf32> to vector<16x128xbf16>
      %c0_16 = arith.constant 0 : index
      %c0_17 = arith.constant 0 : index
      %20 = vector.load %arg7[%c0_16, %c0_17] : memref<16x128xbf16, #tpu.memory_space<vmem>>, vector<16x128xbf16>
      tpu.vector_store %arg7[%c0_16, %c0_17], %19 {strides = array<i32>} : memref<16x128xbf16, #tpu.memory_space<vmem>>, vector<16x128xbf16>,
    } else {
    }
    return
  }
  func.func @transform_0(%arg0: i32, %arg1: i32, %arg2: i32) -> (i32, i32) {
    %c0_i32 = arith.constant 0 : i32
    return %arg0, %arg2 : i32, i32
  }
  func.func @transform_1(%arg0: i32, %arg1: i32, %arg2: i32) -> (i32, i32) {
    %c0_i32 = arith.constant 0 : i32
    return %arg2, %arg1 : i32, i32
  }
  func.func @transform_2(%arg0: i32, %arg1: i32, %arg2: i32) -> (i32, i32) {
    %c0_i32 = arith.constant 0 : i32
    %c0_i32_0 = arith.constant 0 : i32
    return %c0_i32, %arg1 : i32, i32
  }
  func.func @transform_3(%arg0: i32, %arg1: i32, %arg2: i32) -> (i32, i32) {
    %c0_i32 = arith.constant 0 : i32
    return %arg0, %arg1 : i32, i32
  }
  func.func @transform_4(%arg0: i32, %arg1: i32, %arg2: i32) -> (i32, i32) {
    %c0_i32 = arith.constant 0 : i32
    return %arg0, %arg1 : i32, i32
  }
}

module attributes {stable_mosaic.version = 11 : i64} {
  func.func @kernel(%arg0: i32, %arg1: memref<2xi32, #tpu.memory_space<smem>>, %arg2: memref<1x8x128xbf16, #tpu.memory_space<vmem>>, %arg3: memref<1x16x256xbf16, #tpu.memory_space<vmem>>, %arg4: memref<1x8x128xbf16, #tpu.memory_space<vmem>>) attributes {dimension_semantics = [#tpu.dimension_semantics<parallel>], iteration_bounds = array<i64: 2>, scalar_prefetch = 1 : i64, scratch_operands = 0 : i64, tpu.core_type = #tpu.core_type<tc>, window_params = [{transform_indices = @transform_0, window_bounds = array<i64: 1, 8, 128>}, {transform_indices = @transform_1, window_bounds = array<i64: 1, 16, 256>}, {transform_indices = @transform_2, window_bounds = array<i64: 1, 8, 128>}]} {
    %0 = arith.index_cast %arg0 : i32 to index
    %1 = memref.load %arg1[%0] : memref<2xi32, #tpu.memory_space<smem>>
    %c0 = arith.constant 0 : index
    %c0_0 = arith.constant 0 : index
    %c0_1 = arith.constant 0 : index
    %2 = vector.load %arg2[%c0, %c0_0, %c0_1] : memref<1x8x128xbf16, #tpu.memory_space<vmem>>, vector<1x8x128xbf16>
    %3 = vector.shape_cast %2 : vector<1x8x128xbf16> to vector<8x128xbf16>
    %c0_2 = arith.constant 0 : index
    %c0_3 = arith.constant 0 : index
    %c0_4 = arith.constant 0 : index
    %4 = vector.load %arg3[%c0_2, %c0_3, %c0_4] : memref<1x16x256xbf16, #tpu.memory_space<vmem>>, vector<1x16x256xbf16>
    %5 = vector.shape_cast %4 : vector<1x16x256xbf16> to vector<16x256xbf16>
    %6 = vector.extract_strided_slice %5 {offsets = [0, 0], sizes = [16, 128], strides = [1, 1]} : vector<16x256xbf16> to vector<16x128xbf16>
    %7 = vector.extract_strided_slice %5 {offsets = [0, 128], sizes = [16, 128], strides = [1, 1]} : vector<16x256xbf16> to vector<16x128xbf16>
    %8 = tpu.iota {dimensions = array<i32: 1>} : vector<8x16xi32>
    %9 = vector.broadcast %1 : i32 to vector<8x16xi32>
    %10 = arith.cmpi slt, %8, %9 : vector<8x16xi32>
    %11 = vector.extract_strided_slice %3 {offsets = [0, 0], sizes = [8, 32], strides = [1, 1]} : vector<8x128xbf16> to vector<8x32xbf16>
    %12 = arith.extf %11 : vector<8x32xbf16> to vector<8x32xf32>
    %cst = arith.constant 0.176776692 : f32
    %13 = vector.broadcast %cst : f32 to vector<8x32xf32>
    %14 = arith.mulf %12, %13 : vector<8x32xf32>
    %15 = arith.truncf %14 : vector<8x32xf32> to vector<8x32xbf16>
    %16 = vector.extract_strided_slice %6 {offsets = [0, 0], sizes = [16, 32], strides = [1, 1]} : vector<16x128xbf16> to vector<16x32xbf16>
    %cst_5 = arith.constant dense<0.000000e+00> : vector<8x16xf32>
    %17 = tpu.matmul %15, %16, %cst_5 {dimension_numbers = #tpu.dot_dimension_numbers<[1], [1], [0], [0], [0, 0, 1, 0], [], []>} : vector<8x32xbf16>, vector<16x32xbf16>, vector<8x16xf32> -> vector<8x16xf32>
    %cst_6 = arith.constant -1.000000e+09 : f32
    %18 = vector.broadcast %cst_6 : f32 to vector<8x16xf32>
    %19 = arith.select %10, %17, %18 : vector<8x16xi1>, vector<8x16xf32>
    %cst_7 = arith.constant dense<0xFF800000> : vector<8xf32>
    %20 = vector.multi_reduction <maximumf>, %19, %cst_7 [1] : vector<8x16xf32> to vector<8xf32>
    %21 = vector.shape_cast %20 : vector<8xf32> to vector<8x1xf32>
    %22 = vector.broadcast %21 : vector<8x1xf32> to vector<8x16xf32>
    %23 = arith.subf %19, %22 : vector<8x16xf32>
    %24 = math.exp %23 : vector<8x16xf32>
    %cst_8 = arith.constant dense<0.000000e+00> : vector<8xf32>
    %25 = vector.multi_reduction <add>, %24, %cst_8 [1] : vector<8x16xf32> to vector<8xf32>
    %26 = vector.shape_cast %25 : vector<8xf32> to vector<8x1xf32>
    %27 = tpu.reciprocal %26 {approx = true} : vector<8x1xf32> -> vector<8x1xf32>
    %28 = vector.broadcast %27 : vector<8x1xf32> to vector<8x16xf32>
    %29 = arith.mulf %24, %28 : vector<8x16xf32>
    %30 = arith.truncf %29 : vector<8x16xf32> to vector<8x16xbf16>
    %31 = vector.extract_strided_slice %7 {offsets = [0, 0], sizes = [16, 32], strides = [1, 1]} : vector<16x128xbf16> to vector<16x32xbf16>
    %cst_9 = arith.constant dense<0.000000e+00> : vector<8x32xf32>
    %32 = tpu.matmul %30, %31, %cst_9 {dimension_numbers = #tpu.dot_dimension_numbers<[1], [0], [0], [1], [0, 0, 1, 1], [], []>} : vector<8x16xbf16>, vector<16x32xbf16>, vector<8x32xf32> -> vector<8x32xf32>
    %33 = vector.extract_strided_slice %3 {offsets = [0, 32], sizes = [8, 32], strides = [1, 1]} : vector<8x128xbf16> to vector<8x32xbf16>
    %34 = arith.extf %33 : vector<8x32xbf16> to vector<8x32xf32>
    %cst_10 = arith.constant 0.176776692 : f32
    %35 = vector.broadcast %cst_10 : f32 to vector<8x32xf32>
    %36 = arith.mulf %34, %35 : vector<8x32xf32>
    %37 = arith.truncf %36 : vector<8x32xf32> to vector<8x32xbf16>
    %38 = vector.extract_strided_slice %6 {offsets = [0, 32], sizes = [16, 32], strides = [1, 1]} : vector<16x128xbf16> to vector<16x32xbf16>
    %cst_11 = arith.constant dense<0.000000e+00> : vector<8x16xf32>
    %39 = tpu.matmul %37, %38, %cst_11 {dimension_numbers = #tpu.dot_dimension_numbers<[1], [1], [0], [0], [0, 0, 1, 0], [], []>} : vector<8x32xbf16>, vector<16x32xbf16>, vector<8x16xf32> -> vector<8x16xf32>
    %cst_12 = arith.constant -1.000000e+09 : f32
    %40 = vector.broadcast %cst_12 : f32 to vector<8x16xf32>
    %41 = arith.select %10, %39, %40 : vector<8x16xi1>, vector<8x16xf32>
    %cst_13 = arith.constant dense<0xFF800000> : vector<8xf32>
    %42 = vector.multi_reduction <maximumf>, %41, %cst_13 [1] : vector<8x16xf32> to vector<8xf32>
    %43 = vector.shape_cast %42 : vector<8xf32> to vector<8x1xf32>
    %44 = vector.broadcast %43 : vector<8x1xf32> to vector<8x16xf32>
    %45 = arith.subf %41, %44 : vector<8x16xf32>
    %46 = math.exp %45 : vector<8x16xf32>
    %cst_14 = arith.constant dense<0.000000e+00> : vector<8xf32>
    %47 = vector.multi_reduction <add>, %46, %cst_14 [1] : vector<8x16xf32> to vector<8xf32>
    %48 = vector.shape_cast %47 : vector<8xf32> to vector<8x1xf32>
    %49 = tpu.reciprocal %48 {approx = true} : vector<8x1xf32> -> vector<8x1xf32>
    %50 = vector.broadcast %49 : vector<8x1xf32> to vector<8x16xf32>
    %51 = arith.mulf %46, %50 : vector<8x16xf32>
    %52 = arith.truncf %51 : vector<8x16xf32> to vector<8x16xbf16>
    %53 = vector.extract_strided_slice %7 {offsets = [0, 32], sizes = [16, 32], strides = [1, 1]} : vector<16x128xbf16> to vector<16x32xbf16>
    %cst_15 = arith.constant dense<0.000000e+00> : vector<8x32xf32>
    %54 = tpu.matmul %52, %53, %cst_15 {dimension_numbers = #tpu.dot_dimension_numbers<[1], [0], [0], [1], [0, 0, 1, 1], [], []>} : vector<8x16xbf16>, vector<16x32xbf16>, vector<8x32xf32> -> vector<8x32xf32>
    %55 = vector.extract_strided_slice %3 {offsets = [0, 64], sizes = [8, 32], strides = [1, 1]} : vector<8x128xbf16> to vector<8x32xbf16>
    %56 = arith.extf %55 : vector<8x32xbf16> to vector<8x32xf32>
    %cst_16 = arith.constant 0.176776692 : f32
    %57 = vector.broadcast %cst_16 : f32 to vector<8x32xf32>
    %58 = arith.mulf %56, %57 : vector<8x32xf32>
    %59 = arith.truncf %58 : vector<8x32xf32> to vector<8x32xbf16>
    %60 = vector.extract_strided_slice %6 {offsets = [0, 64], sizes = [16, 32], strides = [1, 1]} : vector<16x128xbf16> to vector<16x32xbf16>
    %cst_17 = arith.constant dense<0.000000e+00> : vector<8x16xf32>
    %61 = tpu.matmul %59, %60, %cst_17 {dimension_numbers = #tpu.dot_dimension_numbers<[1], [1], [0], [0], [0, 0, 1, 0], [], []>} : vector<8x32xbf16>, vector<16x32xbf16>, vector<8x16xf32> -> vector<8x16xf32>
    %cst_18 = arith.constant -1.000000e+09 : f32
    %62 = vector.broadcast %cst_18 : f32 to vector<8x16xf32>
    %63 = arith.select %10, %61, %62 : vector<8x16xi1>, vector<8x16xf32>
    %cst_19 = arith.constant dense<0xFF800000> : vector<8xf32>
    %64 = vector.multi_reduction <maximumf>, %63, %cst_19 [1] : vector<8x16xf32> to vector<8xf32>
    %65 = vector.shape_cast %64 : vector<8xf32> to vector<8x1xf32>
    %66 = vector.broadcast %65 : vector<8x1xf32> to vector<8x16xf32>
    %67 = arith.subf %63, %66 : vector<8x16xf32>
    %68 = math.exp %67 : vector<8x16xf32>
    %cst_20 = arith.constant dense<0.000000e+00> : vector<8xf32>
    %69 = vector.multi_reduction <add>, %68, %cst_20 [1] : vector<8x16xf32> to vector<8xf32>
    %70 = vector.shape_cast %69 : vector<8xf32> to vector<8x1xf32>
    %71 = tpu.reciprocal %70 {approx = true} : vector<8x1xf32> -> vector<8x1xf32>
    %72 = vector.broadcast %71 : vector<8x1xf32> to vector<8x16xf32>
    %73 = arith.mulf %68, %72 : vector<8x16xf32>
    %74 = arith.truncf %73 : vector<8x16xf32> to vector<8x16xbf16>
    %75 = vector.extract_strided_slice %7 {offsets = [0, 64], sizes = [16, 32], strides = [1, 1]} : vector<16x128xbf16> to vector<16x32xbf16>
    %cst_21 = arith.constant dense<0.000000e+00> : vector<8x32xf32>
    %76 = tpu.matmul %74, %75, %cst_21 {dimension_numbers = #tpu.dot_dimension_numbers<[1], [0], [0], [1], [0, 0, 1, 1], [], []>} : vector<8x16xbf16>, vector<16x32xbf16>, vector<8x32xf32> -> vector<8x32xf32>
    %77 = vector.extract_strided_slice %3 {offsets = [0, 96], sizes = [8, 32], strides = [1, 1]} : vector<8x128xbf16> to vector<8x32xbf16>
    %78 = arith.extf %77 : vector<8x32xbf16> to vector<8x32xf32>
    %cst_22 = arith.constant 0.176776692 : f32
    %79 = vector.broadcast %cst_22 : f32 to vector<8x32xf32>
    %80 = arith.mulf %78, %79 : vector<8x32xf32>
    %81 = arith.truncf %80 : vector<8x32xf32> to vector<8x32xbf16>
    %82 = vector.extract_strided_slice %6 {offsets = [0, 96], sizes = [16, 32], strides = [1, 1]} : vector<16x128xbf16> to vector<16x32xbf16>
    %cst_23 = arith.constant dense<0.000000e+00> : vector<8x16xf32>
    %83 = tpu.matmul %81, %82, %cst_23 {dimension_numbers = #tpu.dot_dimension_numbers<[1], [1], [0], [0], [0, 0, 1, 0], [], []>} : vector<8x32xbf16>, vector<16x32xbf16>, vector<8x16xf32> -> vector<8x16xf32>
    %cst_24 = arith.constant -1.000000e+09 : f32
    %84 = vector.broadcast %cst_24 : f32 to vector<8x16xf32>
    %85 = arith.select %10, %83, %84 : vector<8x16xi1>, vector<8x16xf32>
    %cst_25 = arith.constant dense<0xFF800000> : vector<8xf32>
    %86 = vector.multi_reduction <maximumf>, %85, %cst_25 [1] : vector<8x16xf32> to vector<8xf32>
    %87 = vector.shape_cast %86 : vector<8xf32> to vector<8x1xf32>
    %88 = vector.broadcast %87 : vector<8x1xf32> to vector<8x16xf32>
    %89 = arith.subf %85, %88 : vector<8x16xf32>
    %90 = math.exp %89 : vector<8x16xf32>
    %cst_26 = arith.constant dense<0.000000e+00> : vector<8xf32>
    %91 = vector.multi_reduction <add>, %90, %cst_26 [1] : vector<8x16xf32> to vector<8xf32>
    %92 = vector.shape_cast %91 : vector<8xf32> to vector<8x1xf32>
    %93 = tpu.reciprocal %92 {approx = true} : vector<8x1xf32> -> vector<8x1xf32>
    %94 = vector.broadcast %93 : vector<8x1xf32> to vector<8x16xf32>
    %95 = arith.mulf %90, %94 : vector<8x16xf32>
    %96 = arith.truncf %95 : vector<8x16xf32> to vector<8x16xbf16>
    %97 = vector.extract_strided_slice %7 {offsets = [0, 96], sizes = [16, 32], strides = [1, 1]} : vector<16x128xbf16> to vector<16x32xbf16>
    %cst_27 = arith.constant dense<0.000000e+00> : vector<8x32xf32>
    %98 = tpu.matmul %96, %97, %cst_27 {dimension_numbers = #tpu.dot_dimension_numbers<[1], [0], [0], [1], [0, 0, 1, 1], [], []>} : vector<8x16xbf16>, vector<16x32xbf16>, vector<8x32xf32> -> vector<8x32xf32>
    %99 = tpu.concatenate %32, %54, %76, %98 in 1 : vector<8x32xf32>, vector<8x32xf32>, vector<8x32xf32>, vector<8x32xf32> -> vector<8x128xf32>
    %100 = arith.truncf %99 : vector<8x128xf32> to vector<8x128xbf16>
    %c0_28 = arith.constant 0 : index
    %c0_29 = arith.constant 0 : index
    %c0_30 = arith.constant 0 : index
    %101 = vector.load %arg4[%c0_28, %c0_29, %c0_30] : memref<1x8x128xbf16, #tpu.memory_space<vmem>>, vector<1x8x128xbf16>
    %102 = vector.shape_cast %101 : vector<1x8x128xbf16> to vector<8x128xbf16>
    %103 = vector.shape_cast %100 : vector<8x128xbf16> to vector<1x8x128xbf16>
    tpu.vector_store %arg4[%c0_28, %c0_29, %c0_30], %103 {strides = array<i32>} : memref<1x8x128xbf16, #tpu.memory_space<vmem>>, vector<1x8x128xbf16>,
    return
  }
  func.func @transform_0(%arg0: i32, %arg1: memref<2xi32, #tpu.memory_space<smem>>) -> (i32, i32, i32) {
    %c0_i32 = arith.constant 0 : i32
    %c0_i32_0 = arith.constant 0 : i32
    %c0_i32_1 = arith.constant 0 : i32
    return %arg0, %c0_i32, %c0_i32_0 : i32, i32, i32
  }
  func.func @transform_1(%arg0: i32, %arg1: memref<2xi32, #tpu.memory_space<smem>>) -> (i32, i32, i32) {
    %c0_i32 = arith.constant 0 : i32
    %c0_i32_0 = arith.constant 0 : i32
    %c0_i32_1 = arith.constant 0 : i32
    return %arg0, %c0_i32, %c0_i32_0 : i32, i32, i32
  }
  func.func @transform_2(%arg0: i32, %arg1: memref<2xi32, #tpu.memory_space<smem>>) -> (i32, i32, i32) {
    %c0_i32 = arith.constant 0 : i32
    %c0_i32_0 = arith.constant 0 : i32
    %c0_i32_1 = arith.constant 0 : i32
    return %arg0, %c0_i32, %c0_i32_0 : i32, i32, i32
  }
}

module attributes {stable_mosaic.version = 11 : i64} {
  func.func @kernel(%arg0: i32, %arg1: i32, %arg2: i32, %arg3: memref<16x128xbf16, #tpu.memory_space<vmem>>, %arg4: memref<128x256xbf16, #tpu.memory_space<vmem>>, %arg5: memref<1x256xf32, #tpu.memory_space<vmem>>, %arg6: memref<1x128xf32, #tpu.memory_space<vmem>>, %arg7: memref<1x128xf32, #tpu.memory_space<vmem>>, %arg8: memref<16x256xbf16, #tpu.memory_space<vmem>>, %arg9: memref<16x256xf32, #tpu.memory_space<vmem>>) attributes {dimension_semantics = [#tpu.dimension_semantics<parallel>, #tpu.dimension_semantics<parallel>, #tpu.dimension_semantics<arbitrary>], iteration_bounds = array<i64: 1, 1, 1>, scalar_prefetch = 0 : i64, scratch_operands = 1 : i64, tpu.core_type = #tpu.core_type<tc>, window_params = [{transform_indices = @transform_0, window_bounds = array<i64: 16, 128>}, {transform_indices = @transform_1, window_bounds = array<i64: 128, 256>}, {transform_indices = @transform_2, window_bounds = array<i64: 1, 256>}, {transform_indices = @transform_3, window_bounds = array<i64: 1, 128>}, {transform_indices = @transform_4, window_bounds = array<i64: 1, 128>}, {transform_indices = @transform_5, window_bounds = array<i64: 16, 256>}]} {
    %c0_i32 = arith.constant 0 : i32
    %0 = arith.cmpi eq, %arg2, %c0_i32 : i32
    %1 = arith.extui %0 : i1 to i32
    %c0_i32_0 = arith.constant 0 : i32
    %2 = arith.cmpi ne, %1, %c0_i32_0 : i32
    scf.if %2 {
      %cst_19 = arith.constant 0.000000e+00 : f32
      %38 = vector.broadcast %cst_19 : f32 to vector<16x256xf32>
      %c0_20 = arith.constant 0 : index
      %c0_21 = arith.constant 0 : index
      %39 = vector.load %arg9[%c0_20, %c0_21] : memref<16x256xf32, #tpu.memory_space<vmem>>, vector<16x256xf32>
      tpu.vector_store %arg9[%c0_20, %c0_21], %38 {strides = array<i32>} : memref<16x256xf32, #tpu.memory_space<vmem>>, vector<16x256xf32>,
    } else {
    }
    %c0 = arith.constant 0 : index
    %c0_1 = arith.constant 0 : index
    %3 = vector.load %arg3[%c0, %c0_1] : memref<16x128xbf16, #tpu.memory_space<vmem>>, vector<16x128xbf16>
    %4 = arith.extf %3 : vector<16x128xbf16> to vector<16x128xf32>
    %cst = arith.constant dense<0.000000e+00> : vector<16xf32>
    %5 = vector.multi_reduction <add>, %4, %cst [1] : vector<16x128xf32> to vector<16xf32>
    %6 = vector.shape_cast %5 : vector<16xf32> to vector<16x1xf32>
    %cst_2 = arith.constant 1.280000e+02 : f32
    %7 = vector.broadcast %cst_2 : f32 to vector<16x1xf32>
    %8 = arith.divf %6, %7 : vector<16x1xf32>
    %9 = vector.broadcast %8 : vector<16x1xf32> to vector<16x128xf32>
    %10 = arith.subf %4, %9 : vector<16x128xf32>
    %11 = arith.mulf %10, %10 : vector<16x128xf32>
    %cst_3 = arith.constant dense<0.000000e+00> : vector<16xf32>
    %12 = vector.multi_reduction <add>, %11, %cst_3 [1] : vector<16x128xf32> to vector<16xf32>
    %13 = vector.shape_cast %12 : vector<16xf32> to vector<16x1xf32>
    %cst_4 = arith.constant 1.280000e+02 : f32
    %14 = vector.broadcast %cst_4 : f32 to vector<16x1xf32>
    %15 = arith.divf %13, %14 : vector<16x1xf32>
    %16 = vector.broadcast %8 : vector<16x1xf32> to vector<16x128xf32>
    %17 = arith.subf %4, %16 : vector<16x128xf32>
    %cst_5 = arith.constant 9.99999997E-7 : f32
    %18 = vector.broadcast %cst_5 : f32 to vector<16x1xf32>
    %19 = arith.addf %15, %18 : vector<16x1xf32>
    %20 = math.rsqrt %19 : vector<16x1xf32>
    %21 = vector.broadcast %20 : vector<16x1xf32> to vector<16x128xf32>
    %22 = arith.mulf %17, %21 : vector<16x128xf32>
    %c0_6 = arith.constant 0 : index
    %c0_7 = arith.constant 0 : index
    %23 = vector.load %arg6[%c0_6, %c0_7] : memref<1x128xf32, #tpu.memory_space<vmem>>, vector<1x128xf32>
    %24 = vector.broadcast %23 : vector<1x128xf32> to vector<16x128xf32>
    %25 = arith.mulf %22, %24 : vector<16x128xf32>
    %c0_8 = arith.constant 0 : index
    %c0_9 = arith.constant 0 : index
    %26 = vector.load %arg7[%c0_8, %c0_9] : memref<1x128xf32, #tpu.memory_space<vmem>>, vector<1x128xf32>
    %27 = vector.broadcast %26 : vector<1x128xf32> to vector<16x128xf32>
    %28 = arith.addf %25, %27 : vector<16x128xf32>
    %c0_10 = arith.constant 0 : index
    %c0_11 = arith.constant 0 : index
    %29 = vector.load %arg9[%c0_10, %c0_11] : memref<16x256xf32, #tpu.memory_space<vmem>>, vector<16x256xf32>
    %30 = arith.truncf %28 : vector<16x128xf32> to vector<16x128xbf16>
    %c0_12 = arith.constant 0 : index
    %c0_13 = arith.constant 0 : index
    %31 = vector.load %arg4[%c0_12, %c0_13] : memref<128x256xbf16, #tpu.memory_space<vmem>>, vector<128x256xbf16>
    %cst_14 = arith.constant dense<0.000000e+00> : vector<16x256xf32>
    %32 = tpu.matmul %30, %31, %cst_14 {dimension_numbers = #tpu.dot_dimension_numbers<[1], [0], [0], [1], [0, 0, 1, 1], [], []>} : vector<16x128xbf16>, vector<128x256xbf16>, vector<16x256xf32> -> vector<16x256xf32>
    %33 = arith.addf %29, %32 : vector<16x256xf32>
    %c0_15 = arith.constant 0 : index
    %c0_16 = arith.constant 0 : index
    %34 = vector.load %arg9[%c0_15, %c0_16] : memref<16x256xf32, #tpu.memory_space<vmem>>, vector<16x256xf32>
    tpu.vector_store %arg9[%c0_15, %c0_16], %33 {strides = array<i32>} : memref<16x256xf32, #tpu.memory_space<vmem>>, vector<16x256xf32>,
    %c0_i32_17 = arith.constant 0 : i32
    %35 = arith.cmpi eq, %arg2, %c0_i32_17 : i32
    %36 = arith.extui %35 : i1 to i32
    %c0_i32_18 = arith.constant 0 : i32
    %37 = arith.cmpi ne, %36, %c0_i32_18 : i32
    scf.if %37 {
      %c0_19 = arith.constant 0 : index
      %c0_20 = arith.constant 0 : index
      %38 = vector.load %arg9[%c0_19, %c0_20] : memref<16x256xf32, #tpu.memory_space<vmem>>, vector<16x256xf32>
      %c0_21 = arith.constant 0 : index
      %c0_22 = arith.constant 0 : index
      %39 = vector.load %arg5[%c0_21, %c0_22] : memref<1x256xf32, #tpu.memory_space<vmem>>, vector<1x256xf32>
      %40 = vector.broadcast %39 : vector<1x256xf32> to vector<16x256xf32>
      %41 = arith.addf %38, %40 : vector<16x256xf32>
      %42 = arith.mulf %41, %41 : vector<16x256xf32>
      %43 = arith.mulf %41, %42 : vector<16x256xf32>
      %cst_23 = arith.constant 4.471500e-02 : f32
      %44 = vector.broadcast %cst_23 : f32 to vector<16x256xf32>
      %45 = arith.mulf %44, %43 : vector<16x256xf32>
      %46 = arith.addf %41, %45 : vector<16x256xf32>
      %cst_24 = arith.constant 0.797884583 : f32
      %47 = vector.broadcast %cst_24 : f32 to vector<16x256xf32>
      %48 = arith.mulf %47, %46 : vector<16x256xf32>
      %49 = math.tanh %48 : vector<16x256xf32>
      %cst_25 = arith.constant 1.000000e+00 : f32
      %50 = vector.broadcast %cst_25 : f32 to vector<16x256xf32>
      %51 = arith.addf %50, %49 : vector<16x256xf32>
      %cst_26 = arith.constant 5.000000e-01 : f32
      %52 = vector.broadcast %cst_26 : f32 to vector<16x256xf32>
      %53 = arith.mulf %52, %51 : vector<16x256xf32>
      %54 = arith.mulf %41, %53 : vector<16x256xf32>
      %55 = arith.truncf %54 : vector<16x256xf32> to vector<16x256xbf16>
      %c0_27 = arith.constant 0 : index
      %c0_28 = arith.constant 0 : index
      %56 = vector.load %arg8[%c0_27, %c0_28] : memref<16x256xbf16, #tpu.memory_space<vmem>>, vector<16x256xbf16>
      tpu.vector_store %arg8[%c0_27, %c0_28], %55 {strides = array<i32>} : memref<16x256xbf16, #tpu.memory_space<vmem>>, vector<16x256xbf16>,
    } else {
    }
    return
  }
  func.func @transform_0(%arg0: i32, %arg1: i32, %arg2: i32) -> (i32, i32) {
    %c0_i32 = arith.constant 0 : i32
    return %arg0, %arg2 : i32, i32
  }
  func.func @transform_1(%arg0: i32, %arg1: i32, %arg2: i32) -> (i32, i32) {
    %c0_i32 = arith.constant 0 : i32
    return %arg2, %arg1 : i32, i32
  }
  func.func @transform_2(%arg0: i32, %arg1: i32, %arg2: i32) -> (i32, i32) {
    %c0_i32 = arith.constant 0 : i32
    %c0_i32_0 = arith.constant 0 : i32
    return %c0_i32, %arg1 : i32, i32
  }
  func.func @transform_3(%arg0: i32, %arg1: i32, %arg2: i32) -> (i32, i32) {
    %c0_i32 = arith.constant 0 : i32
    %c0_i32_0 = arith.constant 0 : i32
    return %c0_i32, %arg2 : i32, i32
  }
  func.func @transform_4(%arg0: i32, %arg1: i32, %arg2: i32) -> (i32, i32) {
    %c0_i32 = arith.constant 0 : i32
    %c0_i32_0 = arith.constant 0 : i32
    return %c0_i32, %arg2 : i32, i32
  }
  func.func @transform_5(%arg0: i32, %arg1: i32, %arg2: i32) -> (i32, i32) {
    %c0_i32 = arith.constant 0 : i32
    return %arg0, %arg1 : i32, i32
  }
}

module attributes {stable_mosaic.version = 11 : i64} {
  func.func @kernel(%arg0: i32, %arg1: i32, %arg2: i32, %arg3: memref<16x256xbf16, #tpu.memory_space<vmem>>, %arg4: memref<256x128xbf16, #tpu.memory_space<vmem>>, %arg5: memref<1x128xf32, #tpu.memory_space<vmem>>, %arg6: memref<16x128xbf16, #tpu.memory_space<vmem>>, %arg7: memref<16x128xbf16, #tpu.memory_space<vmem>>, %arg8: memref<16x128xf32, #tpu.memory_space<vmem>>) attributes {dimension_semantics = [#tpu.dimension_semantics<parallel>, #tpu.dimension_semantics<parallel>, #tpu.dimension_semantics<arbitrary>], iteration_bounds = array<i64: 1, 1, 1>, scalar_prefetch = 0 : i64, scratch_operands = 1 : i64, tpu.core_type = #tpu.core_type<tc>, window_params = [{transform_indices = @transform_0, window_bounds = array<i64: 16, 256>}, {transform_indices = @transform_1, window_bounds = array<i64: 256, 128>}, {transform_indices = @transform_2, window_bounds = array<i64: 1, 128>}, {transform_indices = @transform_3, window_bounds = array<i64: 16, 128>}, {transform_indices = @transform_4, window_bounds = array<i64: 16, 128>}]} {
    %c0_i32 = arith.constant 0 : i32
    %0 = arith.cmpi eq, %arg2, %c0_i32 : i32
    %1 = arith.extui %0 : i1 to i32
    %c0_i32_0 = arith.constant 0 : i32
    %2 = arith.cmpi ne, %1, %c0_i32_0 : i32
    scf.if %2 {
      %cst_10 = arith.constant 0.000000e+00 : f32
      %12 = vector.broadcast %cst_10 : f32 to vector<16x128xf32>
      %c0_11 = arith.constant 0 : index
      %c0_12 = arith.constant 0 : index
      %13 = vector.load %arg8[%c0_11, %c0_12] : memref<16x128xf32, #tpu.memory_space<vmem>>, vector<16x128xf32>
      tpu.vector_store %arg8[%c0_11, %c0_12], %12 {strides = array<i32>} : memref<16x128xf32, #tpu.memory_space<vmem>>, vector<16x128xf32>,
    } else {
    }
    %c0 = arith.constant 0 : index
    %c0_1 = arith.constant 0 : index
    %3 = vector.load %arg3[%c0, %c0_1] : memref<16x256xbf16, #tpu.memory_space<vmem>>, vector<16x256xbf16>
    %c0_2 = arith.constant 0 : index
    %c0_3 = arith.constant 0 : index
    %4 = vector.load %arg8[%c0_2, %c0_3] : memref<16x128xf32, #tpu.memory_space<vmem>>, vector<16x128xf32>
    %c0_4 = arith.constant 0 : index
    %c0_5 = arith.constant 0 : index
    %5 = vector.load %arg4[%c0_4, %c0_5] : memref<256x128xbf16, #tpu.memory_space<vmem>>, vector<256x128xbf16>
    %cst = arith.constant dense<0.000000e+00> : vector<16x128xf32>
    %6 = tpu.matmul %3, %5, %cst {dimension_numbers = #tpu.dot_dimension_numbers<[1], [0], [0], [1], [0, 0, 1, 1], [], []>} : vector<16x256xbf16>, vector<256x128xbf16>, vector<16x128xf32> -> vector<16x128xf32>
    %7 = arith.addf %4, %6 : vector<16x128xf32>
    %c0_6 = arith.constant 0 : index
    %c0_7 = arith.constant 0 : index
    %8 = vector.load %arg8[%c0_6, %c0_7] : memref<16x128xf32, #tpu.memory_space<vmem>>, vector<16x128xf32>
    tpu.vector_store %arg8[%c0_6, %c0_7], %7 {strides = array<i32>} : memref<16x128xf32, #tpu.memory_space<vmem>>, vector<16x128xf32>,
    %c0_i32_8 = arith.constant 0 : i32
    %9 = arith.cmpi eq, %arg2, %c0_i32_8 : i32
    %10 = arith.extui %9 : i1 to i32
    %c0_i32_9 = arith.constant 0 : i32
    %11 = arith.cmpi ne, %10, %c0_i32_9 : i32
    scf.if %11 {
      %c0_10 = arith.constant 0 : index
      %c0_11 = arith.constant 0 : index
      %12 = vector.load %arg8[%c0_10, %c0_11] : memref<16x128xf32, #tpu.memory_space<vmem>>, vector<16x128xf32>
      %c0_12 = arith.constant 0 : index
      %c0_13 = arith.constant 0 : index
      %13 = vector.load %arg5[%c0_12, %c0_13] : memref<1x128xf32, #tpu.memory_space<vmem>>, vector<1x128xf32>
      %14 = vector.broadcast %13 : vector<1x128xf32> to vector<16x128xf32>
      %15 = arith.addf %12, %14 : vector<16x128xf32>
      %c0_14 = arith.constant 0 : index
      %c0_15 = arith.constant 0 : index
      %16 = vector.load %arg6[%c0_14, %c0_15] : memref<16x128xbf16, #tpu.memory_space<vmem>>, vector<16x128xbf16>
      %17 = arith.extf %16 : vector<16x128xbf16> to vector<16x128xf32>
      %18 = arith.addf %15, %17 : vector<16x128xf32>
      %19 = arith.truncf %18 : vector<16x128xf32> to vector<16x128xbf16>
      %c0_16 = arith.constant 0 : index
      %c0_17 = arith.constant 0 : index
      %20 = vector.load %arg7[%c0_16, %c0_17] : memref<16x128xbf16, #tpu.memory_space<vmem>>, vector<16x128xbf16>
      tpu.vector_store %arg7[%c0_16, %c0_17], %19 {strides = array<i32>} : memref<16x128xbf16, #tpu.memory_space<vmem>>, vector<16x128xbf16>,
    } else {
    }
    return
  }
  func.func @transform_0(%arg0: i32, %arg1: i32, %arg2: i32) -> (i32, i32) {
    %c0_i32 = arith.constant 0 : i32
    return %arg0, %arg2 : i32, i32
  }
  func.func @transform_1(%arg0: i32, %arg1: i32, %arg2: i32) -> (i32, i32) {
    %c0_i32 = arith.constant 0 : i32
    return %arg2, %arg1 : i32, i32
  }
  func.func @transform_2(%arg0: i32, %arg1: i32, %arg2: i32) -> (i32, i32) {
    %c0_i32 = arith.constant 0 : i32
    %c0_i32_0 = arith.constant 0 : i32
    return %c0_i32, %arg1 : i32, i32
  }
  func.func @transform_3(%arg0: i32, %arg1: i32, %arg2: i32) -> (i32, i32) {
    %c0_i32 = arith.constant 0 : i32
    return %arg0, %arg1 : i32, i32
  }
  func.func @transform_4(%arg0: i32, %arg1: i32, %arg2: i32) -> (i32, i32) {
    %c0_i32 = arith.constant 0 : i32
    return %arg0, %arg1 : i32, i32
  }
}

module attributes {stable_mosaic.version = 11 : i64} {
  func.func @kernel(%arg0: i32, %arg1: memref<16x128xbf16, #tpu.memory_space<vmem>>, %arg2: memref<1x128xf32, #tpu.memory_space<vmem>>, %arg3: memref<1x128xf32, #tpu.memory_space<vmem>>, %arg4: memref<16x128xbf16, #tpu.memory_space<vmem>>) attributes {dimension_semantics = [#tpu.dimension_semantics<parallel>], iteration_bounds = array<i64: 1>, scalar_prefetch = 0 : i64, scratch_operands = 0 : i64, tpu.core_type = #tpu.core_type<tc>, window_params = [{transform_indices = @transform_0, window_bounds = array<i64: 16, 128>}, {pipeline_mode = #tpu.pipeline_mode<synchronous>, transform_indices = @transform_1, window_bounds = array<i64: 1, 128>}, {pipeline_mode = #tpu.pipeline_mode<synchronous>, transform_indices = @transform_2, window_bounds = array<i64: 1, 128>}, {transform_indices = @transform_3, window_bounds = array<i64: 16, 128>}]} {
    %c0 = arith.constant 0 : index
    %c0_0 = arith.constant 0 : index
    %0 = vector.load %arg1[%c0, %c0_0] : memref<16x128xbf16, #tpu.memory_space<vmem>>, vector<16x128xbf16>
    %1 = arith.extf %0 : vector<16x128xbf16> to vector<16x128xf32>
    %cst = arith.constant dense<0.000000e+00> : vector<16xf32>
    %2 = vector.multi_reduction <add>, %1, %cst [1] : vector<16x128xf32> to vector<16xf32>
    %3 = vector.shape_cast %2 : vector<16xf32> to vector<16x1xf32>
    %cst_1 = arith.constant 1.280000e+02 : f32
    %4 = vector.broadcast %cst_1 : f32 to vector<16x1xf32>
    %5 = arith.divf %3, %4 : vector<16x1xf32>
    %6 = vector.broadcast %5 : vector<16x1xf32> to vector<16x128xf32>
    %7 = arith.subf %1, %6 : vector<16x128xf32>
    %8 = arith.mulf %7, %7 : vector<16x128xf32>
    %cst_2 = arith.constant dense<0.000000e+00> : vector<16xf32>
    %9 = vector.multi_reduction <add>, %8, %cst_2 [1] : vector<16x128xf32> to vector<16xf32>
    %10 = vector.shape_cast %9 : vector<16xf32> to vector<16x1xf32>
    %cst_3 = arith.constant 1.280000e+02 : f32
    %11 = vector.broadcast %cst_3 : f32 to vector<16x1xf32>
    %12 = arith.divf %10, %11 : vector<16x1xf32>
    %13 = vector.broadcast %5 : vector<16x1xf32> to vector<16x128xf32>
    %14 = arith.subf %1, %13 : vector<16x128xf32>
    %cst_4 = arith.constant 9.99999997E-7 : f32
    %15 = vector.broadcast %cst_4 : f32 to vector<16x1xf32>
    %16 = arith.addf %12, %15 : vector<16x1xf32>
    %17 = math.rsqrt %16 : vector<16x1xf32>
    %18 = vector.broadcast %17 : vector<16x1xf32> to vector<16x128xf32>
    %19 = arith.mulf %14, %18 : vector<16x128xf32>
    %c0_5 = arith.constant 0 : index
    %c0_6 = arith.constant 0 : index
    %20 = vector.load %arg2[%c0_5, %c0_6] : memref<1x128xf32, #tpu.memory_space<vmem>>, vector<1x128xf32>
    %21 = vector.broadcast %20 : vector<1x128xf32> to vector<16x128xf32>
    %22 = arith.mulf %19, %21 : vector<16x128xf32>
    %c0_7 = arith.constant 0 : index
    %c0_8 = arith.constant 0 : index
    %23 = vector.load %arg3[%c0_7, %c0_8] : memref<1x128xf32, #tpu.memory_space<vmem>>, vector<1x128xf32>
    %24 = vector.broadcast %23 : vector<1x128xf32> to vector<16x128xf32>
    %25 = arith.addf %22, %24 : vector<16x128xf32>
    %26 = arith.truncf %25 : vector<16x128xf32> to vector<16x128xbf16>
    %c0_9 = arith.constant 0 : index
    %c0_10 = arith.constant 0 : index
    %27 = vector.load %arg4[%c0_9, %c0_10] : memref<16x128xbf16, #tpu.memory_space<vmem>>, vector<16x128xbf16>
    tpu.vector_store %arg4[%c0_9, %c0_10], %26 {strides = array<i32>} : memref<16x128xbf16, #tpu.memory_space<vmem>>, vector<16x128xbf16>,
    return
  }
  func.func @transform_0(%arg0: i32) -> (i32, i32) {
    %c0_i32 = arith.constant 0 : i32
    %c0_i32_0 = arith.constant 0 : i32
    return %arg0, %c0_i32 : i32, i32
  }
  func.func @transform_1(%arg0: i32) -> (i32, i32) {
    %c0_i32 = arith.constant 0 : i32
    %c0_i32_0 = arith.constant 0 : i32
    %c0_i32_1 = arith.constant 0 : i32
    return %c0_i32, %c0_i32_0 : i32, i32
  }
  func.func @transform_2(%arg0: i32) -> (i32, i32) {
    %c0_i32 = arith.constant 0 : i32
    %c0_i32_0 = arith.constant 0 : i32
    %c0_i32_1 = arith.constant 0 : i32
    return %c0_i32, %c0_i32_0 : i32, i32
  }
  func.func @transform_3(%arg0: i32) -> (i32, i32) {
    %c0_i32 = arith.constant 0 : i32
    %c0_i32_0 = arith.constant 0 : i32
    return %arg0, %c0_i32 : i32, i32
  }
}

module attributes {stable_mosaic.version = 11 : i64} {
  func.func @kernel(%arg0: i32, %arg1: i32, %arg2: i32, %arg3: memref<16x128xbf16, #tpu.memory_space<vmem>>, %arg4: memref<128x256xbf16, #tpu.memory_space<vmem>>, %arg5: memref<1x256xf32, #tpu.memory_space<vmem>>, %arg6: memref<16x256xf32, #tpu.memory_space<vmem>>) attributes {dimension_semantics = [#tpu.dimension_semantics<parallel>, #tpu.dimension_semantics<parallel>, #tpu.dimension_semantics<arbitrary>], iteration_bounds = array<i64: 1, 1, 1>, scalar_prefetch = 0 : i64, scratch_operands = 0 : i64, tpu.core_type = #tpu.core_type<tc>, window_params = [{transform_indices = @transform_0, window_bounds = array<i64: 16, 128>}, {transform_indices = @transform_1, window_bounds = array<i64: 128, 256>}, {transform_indices = @transform_2, window_bounds = array<i64: 1, 256>}, {transform_indices = @transform_3, window_bounds = array<i64: 16, 256>}]} {
    %c0_i32 = arith.constant 0 : i32
    %0 = arith.cmpi eq, %arg2, %c0_i32 : i32
    %1 = arith.extui %0 : i1 to i32
    %c0_i32_0 = arith.constant 0 : i32
    %2 = arith.cmpi ne, %1, %c0_i32_0 : i32
    scf.if %2 {
      %cst_10 = arith.constant 0.000000e+00 : f32
      %12 = vector.broadcast %cst_10 : f32 to vector<16x256xf32>
      %c0_11 = arith.constant 0 : index
      %c0_12 = arith.constant 0 : index
      %13 = vector.load %arg6[%c0_11, %c0_12] : memref<16x256xf32, #tpu.memory_space<vmem>>, vector<16x256xf32>
      tpu.vector_store %arg6[%c0_11, %c0_12], %12 {strides = array<i32>} : memref<16x256xf32, #tpu.memory_space<vmem>>, vector<16x256xf32>,
    } else {
    }
    %c0 = arith.constant 0 : index
    %c0_1 = arith.constant 0 : index
    %3 = vector.load %arg3[%c0, %c0_1] : memref<16x128xbf16, #tpu.memory_space<vmem>>, vector<16x128xbf16>
    %c0_2 = arith.constant 0 : index
    %c0_3 = arith.constant 0 : index
    %4 = vector.load %arg6[%c0_2, %c0_3] : memref<16x256xf32, #tpu.memory_space<vmem>>, vector<16x256xf32>
    %c0_4 = arith.constant 0 : index
    %c0_5 = arith.constant 0 : index
    %5 = vector.load %arg4[%c0_4, %c0_5] : memref<128x256xbf16, #tpu.memory_space<vmem>>, vector<128x256xbf16>
    %cst = arith.constant dense<0.000000e+00> : vector<16x256xf32>
    %6 = tpu.matmul %3, %5, %cst {dimension_numbers = #tpu.dot_dimension_numbers<[1], [0], [0], [1], [0, 0, 1, 1], [], []>} : vector<16x128xbf16>, vector<128x256xbf16>, vector<16x256xf32> -> vector<16x256xf32>
    %7 = arith.addf %4, %6 : vector<16x256xf32>
    %c0_6 = arith.constant 0 : index
    %c0_7 = arith.constant 0 : index
    %8 = vector.load %arg6[%c0_6, %c0_7] : memref<16x256xf32, #tpu.memory_space<vmem>>, vector<16x256xf32>
    tpu.vector_store %arg6[%c0_6, %c0_7], %7 {strides = array<i32>} : memref<16x256xf32, #tpu.memory_space<vmem>>, vector<16x256xf32>,
    %c0_i32_8 = arith.constant 0 : i32
    %9 = arith.cmpi eq, %arg2, %c0_i32_8 : i32
    %10 = arith.extui %9 : i1 to i32
    %c0_i32_9 = arith.constant 0 : i32
    %11 = arith.cmpi ne, %10, %c0_i32_9 : i32
    scf.if %11 {
      %c0_10 = arith.constant 0 : index
      %c0_11 = arith.constant 0 : index
      %12 = vector.load %arg6[%c0_10, %c0_11] : memref<16x256xf32, #tpu.memory_space<vmem>>, vector<16x256xf32>
      %c0_12 = arith.constant 0 : index
      %c0_13 = arith.constant 0 : index
      %13 = vector.load %arg5[%c0_12, %c0_13] : memref<1x256xf32, #tpu.memory_space<vmem>>, vector<1x256xf32>
      %14 = vector.broadcast %13 : vector<1x256xf32> to vector<16x256xf32>
      %15 = arith.addf %12, %14 : vector<16x256xf32>
      %c0_14 = arith.constant 0 : index
      %c0_15 = arith.constant 0 : index
      %16 = vector.load %arg6[%c0_14, %c0_15] : memref<16x256xf32, #tpu.memory_space<vmem>>, vector<16x256xf32>
      tpu.vector_store %arg6[%c0_14, %c0_15], %15 {strides = array<i32>} : memref<16x256xf32, #tpu.memory_space<vmem>>, vector<16x256xf32>,
    } else {
    }
    return
  }
  func.func @transform_0(%arg0: i32, %arg1: i32, %arg2: i32) -> (i32, i32) {
    %c0_i32 = arith.constant 0 : i32
    return %arg0, %arg2 : i32, i32
  }
  func.func @transform_1(%arg0: i32, %arg1: i32, %arg2: i32) -> (i32, i32) {
    %c0_i32 = arith.constant 0 : i32
    return %arg2, %arg1 : i32, i32
  }
  func.func @transform_2(%arg0: i32, %arg1: i32, %arg2: i32) -> (i32, i32) {
    %c0_i32 = arith.constant 0 : i32
    %c0_i32_0 = arith.constant 0 : i32
    return %c0_i32, %arg1 : i32, i32
  }
  func.func @transform_3(%arg0: i32, %arg1: i32, %arg2: i32) -> (i32, i32) {
    %c0_i32 = arith.constant 0 : i32
    return %arg0, %arg1 : i32, i32
  }
}

</mosaic_0001>

<bundles_post_ra>
// kernel: _lambda_.33
= control target key start
LH: loop header
LB: loop body
LE: loop exit
PB: predicated region body
PF: predicated region fallthrough
CT: control target
= control target key end

     0   :  { %9 = vsyncpa [#allocation4], 0  ;;  %s300_s18 = smov [#allocation3]   ;;  %s301_s20 = smov 64   ;;  %s352_s0 = inlined_call_operand.vmem [shape: bf16[32,128], index: 0, kind: input, shape index: {}]   ;;  %s353_s1 = inlined_call_operand.hbm [shape: bf16[128,128], index: 1, kind: input, shape index: {}]   ;;  %s354_s2 = inlined_call_operand.vmem [shape: f32[1,128], index: 2, kind: input, shape index: {}]   ;;  %s355_s3 = inlined_call_operand.vmem [shape: bf16[32,128], index: 3, kind: input, shape index: {}]   ;;  %s356_s4 = inlined_call_operand.vmem [shape: bf16[32,128], index: 4, kind: output, shape index: {}]  }
   0x1   :  { %s16_s17 = sshll.u32 %s353_s1, 4  ;;  %s18_s19 = sshll.u32 %s300_s18, 4  ;;  %s17_s17 = int_to_ptr.hbm [resolvable:$true] %s16_s17  ;;  %s19_s19 = int_to_ptr.vmem [resolvable:$true] %s18_s19 }
   0x2   :  { %s302_s21 = smov 4  }
   0x3   :  { %24 = dma.hbm_to_vmem [thread:$0]  %s17_s17, 1024, %s19_s19, [#allocation4], %s301_s20, %s301_s20, %s302_s21  }
   0x4   :  { %298 = dma.done.wait [#allocation4], 1024  }
   0x5   :  { %299 = vsyncadd [#allocation4], 4294966272  ;;  %v241_v0 = vld [vmem:[#allocation3 + $0x38] sm:$0xff]  ;;  %v240_v1 = vld [vmem:[#allocation3 + $0x30] sm:$0xff] }
   0x6   :  { %125 = vmatpush.bf16.msra.mxu0 %v241_v0  ;;  %262 = vmatpush.bf16.msra.mxu1 %v241_v0  ;;  %v239_v2 = vld [vmem:[#allocation3 + $0x28] sm:$0xff]  ;;  %v238_v3 = vld [vmem:[#allocation3 + $0x20] sm:$0xff]  ;;  %v237_v4 = vld [vmem:[#allocation3 + $0x18] sm:$0xff] }
   0x7   :  { %v236_v5 = vld [vmem:[#allocation3 + $0x10] sm:$0xff]  ;;  %v235_v6 = vld [vmem:[#allocation3 + $0x8] sm:$0xff]  ;;  %v234_v7 = vld [vmem:[#allocation3] sm:$0xff] }
   0x8   :  { %v232_v8 = vld [vmem:[%s352_s0] sm:$0xff]  ;;  %v233_v9 = vld [vmem:[%s352_s0 + $0x8] sm:$0xff] }
   0x9   :  { %v273_v12 = vld [vmem:[%s354_s2] ss:$0 sm:$0xff]  ;;  %v260_v14 = vld [vmem:[%s355_s3 + $0x8] sm:$0xff]  }
   0xa   :  { %126 = vmatpush.bf16.msra.mxu0 %v240_v1  ;;  %263 = vmatpush.bf16.msra.mxu1 %v240_v1  ;;  %v243_v13 = vld [vmem:[%s355_s3] sm:$0xff]   ;;  %v248_v16 = vunpack.c.l.bf16 %v260_v14  ;;  %v249_v20 = vunpack.c.h.bf16 %v260_v14 }
   0xb   :  { %v244_v15 = vunpack.c.l.bf16 %v243_v13  ;;  %v245_v19 = vunpack.c.h.bf16 %v243_v13 }
   0xe   :  { %127 = vmatpush.bf16.msra.mxu0 %v239_v2  ;;  %264 = vmatpush.bf16.msra.mxu1 %v239_v2 }
  0x12   :  { %128 = vmatpush.bf16.msra.mxu0 %v238_v3  ;;  %265 = vmatpush.bf16.msra.mxu1 %v238_v3 }
  0x16   :  { %129 = vmatpush.bf16.msra.mxu0 %v237_v4  ;;  %266 = vmatpush.bf16.msra.mxu1 %v237_v4 }
  0x1a   :  { %130 = vmatpush.bf16.msra.mxu0 %v236_v5  ;;  %267 = vmatpush.bf16.msra.mxu1 %v236_v5 }
  0x1e   :  { %131 = vmatpush.bf16.msra.mxu0 %v235_v6  ;;  %268 = vmatpush.bf16.msra.mxu1 %v235_v6 }
  0x22   :  { %132 = vmatpush.bf16.msra.mxu0 %v234_v7  ;;  %269 = vmatpush.bf16.msra.mxu1 %v234_v7 }
  0x25   :  { %133 = vmatmul.bf16.vlgmr.msra.gmra.mxu0 %v232_v8  ;;  %138 = vmatmul.bf16.vlgmr.msra.gmra.mxu1 %v233_v9 }
  0xa2   :  { %v134_v10 = vpop.f32.mrf.mxu0  ;;  %v139_v11 = vpop.f32.mrf.mxu1 }
  0xa3   :  { %v163_v17 = vadd.f32 %v273_v12, %v134_v10  ;;  %v165_v18 = vadd.f32 %v273_v12, %v139_v11 }
  0xa5   :  { %v175_v25 = vadd.f32 %v244_v15, %v163_v17  ;;  %v177_v26 = vadd.f32 %v248_v16, %v165_v18 }
  0xaa   :  { %v136_v21 = vpop.f32.mrf.mxu0  ;;  %v141_v22 = vpop.f32.mrf.mxu1 }
  0xab   :  { %v164_v23 = vadd.f32 %v273_v12, %v136_v21  ;;  %v166_v24 = vadd.f32 %v273_v12, %v141_v22 }
  0xad   :  { %v176_v27 = vadd.f32 %v245_v19, %v164_v23  ;;  %v178_v28 = vadd.f32 %v249_v20, %v166_v24 }
  0xaf   :  { %v253_v29 = vpack.c.bf16 %v176_v27, %v175_v25  ;;  %v258_v30 = vpack.c.bf16 %v178_v28, %v177_v26 }
  0xb1   :  { %254 = vst [vmem:[%s356_s4] sm:$0xff] %v253_v29  }
  0xb2   :  { %261 = vst [vmem:[%s356_s4 + $0x8] sm:$0xff] %v258_v30  }
  0xb3   :  { %191 = vsyncpa [#allocation4], 1 }

// kernel: _lambda_.32
= control target key start
LH: loop header
LB: loop body
LE: loop exit
PB: predicated region body
PF: predicated region fallthrough
CT: control target
= control target key end

     0   :  { %s631_s12 = smov [#allocation3]   ;;  %s765_s0 = inlined_call_operand.vmem [shape: s32[2], index: 0, kind: input, shape index: {}]   ;;  %s766_s1 = inlined_call_operand.vmem [shape: bf16[2,16,384], index: 1, kind: input, shape index: {}]   ;;  %s767_s2 = inlined_call_operand.vmem [shape: bf16[2,16,128], index: 2, kind: output, shape index: {}]  }
   0x1   :  { %s8_s11 = sshll.u32 %s765_s0, 4  ;;  %s9_s11 = int_to_ptr.vmem [resolvable:$true] %s8_s11 }
   0x2   :  { %11 = dma.vmem_to_smem %s9_s11, 16, %s631_s12, [#allocation2] }
   0x3   :  { %625 = dma.done.wait [#allocation2], 16 }
   0x4   :  { %626 = vsyncadd [#allocation2], 4294967280 }
   0x5   :  { %14 = sfence }
   0x6   :  { %s653_s13 = smov 0  }
   0x7 LB: > { %s659_s14 = sadd.s32 4294967295, %s629_s13   ;;  %p519_p0 = scmp.ge.s32.totalorder %s629_s13, 1  ;;  %s629_s13 = sphi %s653_s13, %s20_s13  }
   0x8   : > { %p96_p1 = scmp.lt.s32.totalorder %s629_s13, 3 }
   0xa   : > { %p97_p2 = pnand %p519_p0, %p96_p1 }
   0xb   : > { %p116_p3 = scmp.lt.s32.totalorder (!%p97_p2), %s659_s14, 1  ;;  %s632_s19 = smov (!%p97_p2), 96  }
   0xc   : > { %100 = sbr.rel (%p97_p2) target bundleno = 1086 (0x43e), region = 24  ;;  %s633_s20 = smov (!%p97_p2), 32  }
   0xd   : > { %s127_s21 = sld [smem:[#allocation3 + %s659_s14]] (!%p97_p2)  ;;  %s634_s22 = smov (!%p97_p2), 64  }
  0x11   : > { %s665_s0 = scalar_select %p116_p3, %s659_s14, 1  ;;  %vm146_vm0 = vcmask 261120   ;;  %v132_v14 = vlaneseq  ;;  %vm169_vm2 = vcmask 130048   ;;  %vm450_vm3 = vcmask 523264  }
  0x12   : > { %vm453_vm4 = vcmask 785408  }
  0x13   : > { %s549_s15 = smul.u32 24, %s665_s0  ;;  %v133_v15 = vand.u32 127, %v132_v14  ;;  %v134_v16 = vstv %s127_s21  ;;  %s541_s23 = sshll.u32 %s665_s0, 3 }
  0x14   : > { %s125_s26 = scalar_lea.vmem %s767_s2, %s541_s23 }
  0x15   : > { %s671_s18 = scalar_lea.vmem %s766_s1, %s549_s15  ;;  %vm685_vm1 = vcmp.lt.s32.totalorder %v133_v15, %v134_v16 }
  0x16   : > { %v542_v0 = vld [vmem:[%s671_s18 + $0x4] sm:$0xf]  ;;  %v523_v1 = vld [vmem:[%s671_s18 + $0xc] sm:$0xf0]  ;;  %v128_v2 = vld [vmem:[%s671_s18] sm:$0xf] }
  0x17   : > { %v526_v3 = vor.u32 %v542_v0, %v523_v1  ;;  %v130_v4 = vld [vmem:[%s671_s18 + $0xc] sm:$0xf]  ;;  %v136_v5 = vunpack.c.l.bf16 %v128_v2  ;;  %v530_v42 = vld [vmem:[%s671_s18 + $0x8] sm:$0xf]  ;;  %v543_v43 = vld [vmem:[%s671_s18 + $0x10] sm:$0xf0] }
  0x18   : > { %v137_v6 = vunpack.c.l.bf16 %v130_v4  ;;  %v709_v44 = vor.u32 %v543_v43, %v530_v42 }
  0x19   : > { %v151_v7 = vsel %vm146_vm0, %v526_v3, 0  ;;  %v138_v8 = vmul.f32 0.17677669, %v136_v5  ;;  %219 = vrot.lane.b32.xlu1 %v526_v3, %s632_s19 }
  0x1a   : > { %160 = vmatpush.bf16.xpose.msra.mxu0 %v151_v7  ;;  %v139_v9 = vmul.f32 0.17677669, %v137_v6  ;;  %209 = vmatpush.bf16.msra.mxu1 %v709_v44 }
  0x1c   : > { %v140_v10 = vpack.c.bf16 %v139_v9, %v138_v8 }
  0x1e   : > { %217 = vrot.lane.b32.xlu2 %v140_v10, %s632_s19 }
  0x21   : > { %527 = vmatmul.msk.bf16.vlgmr.msra.gmra.mxu0 %vm146_vm0, %v140_v10 }
  0x26   : > { %357 = vrot.lane.b32.xlu2 %v526_v3, %s633_s20 }
  0x78   : > { %v218_v13 = vpop.permute.xlu2 %217 }
  0x80   : > { %v358_v32 = vpop.permute.xlu2 %357 }
  0x81   : > { %v363_v34 = vsel %vm146_vm0, %v358_v32, 0 }
  0x82   : > { %372 = vmatpush.bf16.xpose.msrb.mxu0 %v363_v34 }
  0x8b   : > { %v220_v11 = vpop.permute.xlu1 %219 }
  0x8c   : > { %v225_v12 = vsel %vm146_vm0, %v220_v11, 0 }
  0x8d   : > { %234 = vmatpush.bf16.xpose.msra.mxu2 %v225_v12 }
  0x94   : > { %533 = vmatmul.msk.bf16.vlgmr.msra.gmra.mxu2 %vm146_vm0, %v218_v13 }
  0x9e   : > { %v162_v18 = vpop.f32.mrf.mxu0 }
  0x9f   : > { %v167_v19 = vsel %vm685_vm1, %v162_v18, -1e+09 }
  0xa0   : > { %v170_v20 = vsel %vm169_vm2, %v167_v19, -inf }
  0xa1   : > { %171 = vmax.xlane.f32.xlu0 %v170_v20 }
  0xa6   : > { %v164_v21 = vpop.f32.mrf.mxu0 }
  0xa7   : > { %v168_v22 = vsel %vm685_vm1, %v164_v21, -1e+09 }
  0xa8   : > { %v173_v23 = vsel %vm169_vm2, %v168_v22, -inf }
  0xa9   : > { %174 = vmax.xlane.f32.xlu0 %v173_v23 }
  0xbd   : > { %288 = vrot.lane.b32.xlu0 %v526_v3, %s634_s22 }
  0xc5   : > { %286 = vrot.lane.b32.xlu0 %v140_v10, %s634_s22 }
 0x114   : > { %v172_v24 = vpop.xlane.xlu0 %171 }
 0x115   : > { %v176_v25 = vsub.f32 %v167_v19, %v172_v24 }
 0x117   : > { %v178_v26 = vmul.f32 1.442695, %v176_v25  ;;  %v236_v33 = vpop.f32.mrf.mxu2 }
 0x118   : > { %v241_v35 = vsel %vm685_vm1, %v236_v33, -1e+09 }
 0x119   : > { %577 = vpow2.f32 %v178_v26  ;;  %v243_v36 = vsel %vm169_vm2, %v241_v35, -inf }
 0x11a   : > { %244 = vmax.xlane.f32.xlu0 %v243_v36 }
 0x11c   : > { %v175_v27 = vpop.xlane.xlu0 %174 }
 0x11d   : > { %v177_v28 = vsub.f32 %v168_v22, %v175_v27 }
 0x11f   : > { %v578_v29 = vpop.eup %577  ;;  %v180_v30 = vmul.f32 1.442695, %v177_v28  ;;  %v238_v39 = vpop.f32.mrf.mxu2 }
 0x120   : > { %v182_v31 = vsel %vm169_vm2, %v578_v29, 0.0  ;;  %v242_v40 = vsel %vm685_vm1, %v238_v39, -1e+09 }
 0x121   : > { %579 = vpow2.f32 %v180_v30  ;;  %183 = vadd.xlane.f32.xlu1 %v182_v31  ;;  %v246_v41 = vsel %vm169_vm2, %v242_v40, -inf }
 0x127   : > { %v580_v37 = vpop.eup %579 }
 0x128   : > { %v185_v38 = vsel %vm169_vm2, %v580_v37, 0.0 }
 0x129   : > { %186 = vadd.xlane.f32.xlu2 %v185_v38 }
 0x12f   : > { %v289_v45 = vpop.permute.xlu0 %288 }
 0x130   : > { %v294_v46 = vsel %vm146_vm0, %v289_v45, 0 }
 0x131   : > { %303 = vmatpush.bf16.xpose.msrb.mxu1 %v294_v46 }
 0x137   : > { %v287_v55 = vpop.permute.xlu0 %286 }
 0x141   : > { %355 = vrot.lane.b32.xlu2 %v140_v10, %s633_s20 }
 0x16a   : > { %247 = vmax.xlane.f32.xlu2 %v246_v41 }
 0x182   : > { %266 = vrot.lane.b32.xlu2 %v709_v44, %s632_s19 }
 0x18d   : > { %v245_v5 = vpop.xlane.xlu0 %244 }
 0x18e   : > { %v249_v7 = vsub.f32 %v241_v35, %v245_v5 }
 0x190   : > { %v251_v10 = vmul.f32 1.442695, %v249_v7 }
 0x194   : > { %v184_v47 = vpop.xlane.xlu1 %183 }
 0x195   : > { %581 = vrcp.f32 %v184_v47 }
 0x19b   : > { %v582_v49 = vpop.eup %581 }
 0x19c   : > { %v187_v48 = vpop.xlane.xlu2 %186  ;;  %v190_v52 = vmul.f32 %v582_v49, %v578_v29 }
 0x19d   : > { %583 = vrcp.f32 %v187_v48 }
 0x1a3   : > { %v584_v50 = vpop.eup %583 }
 0x1a4   : > { %v356_v51 = vpop.permute.xlu2 %355  ;;  %v191_v53 = vmul.f32 %v584_v50, %v580_v37 }
 0x1a5   : > { %537 = vmatmul.msk.bf16.vlgmr.msrb.gmra.mxu0 %vm146_vm0, %v356_v51 }
 0x1a6   : > { %v192_v54 = vpack.c.bf16 %v191_v53, %v190_v52 }
 0x1a8   : > { %532 = vmatmul.msk.bf16.vlgmr.msra.gmra.mxu1 %vm169_vm2, %v192_v54 }
 0x1b8   : > { %535 = vmatmul.msk.bf16.vlgmr.msrb.gmra.mxu1 %vm146_vm0, %v287_v55 }
 0x1dd   : > { %v248_v56 = vpop.xlane.xlu2 %247 }
 0x1de   : > { %v250_v57 = vsub.f32 %v242_v40, %v248_v56 }
 0x1e0   : > { %v253_v58 = vmul.f32 1.442695, %v250_v57 }
 0x1e2   : > { %585 = vpow2.f32 %v253_v58 }
 0x1e3   : > { %587 = vpow2.f32 %v251_v10 }
 0x1e5   : > { %v267_v21 = vpop.permute.xlu2 %266 }
 0x1e6   : > { %279 = vmatpush.bf16.msra.mxu3 %v267_v21 }
 0x1e8   : > { %v718_v59 = vpop.eup %585 }
 0x1e9   : > { %v258_v60 = vsel %vm169_vm2, %v718_v59, 0.0  ;;  %v588_v14 = vpop.eup %587 }
 0x1ea   : > { %259 = vadd.xlane.f32.xlu0 %v258_v60  ;;  %v255_v15 = vsel %vm169_vm2, %v588_v14, 0.0 }
 0x222   : > { %v374_v61 = vpop.f32.mrf.mxu0 }
 0x223   : > { %v379_v62 = vsel %vm685_vm1, %v374_v61, -1e+09 }
 0x224   : > { %v381_v63 = vsel %vm169_vm2, %v379_v62, -inf }
 0x225   : > { %v725_v0 = vpop.f32.mrf.mxu1  ;;  %382 = vmax.xlane.f32.xlu1 %v381_v63 }
 0x22a   : > { %v376_v1 = vpop.f32.mrf.mxu0 }
 0x22b   : > { %v380_v2 = vsel %vm685_vm1, %v376_v1, -1e+09 }
 0x22c   : > { %v384_v3 = vsel %vm169_vm2, %v380_v2, -inf }
 0x22d   : > { %v730_v4 = vpop.f32.mrf.mxu1  ;;  %385 = vmax.xlane.f32.xlu1 %v384_v3 }
 0x235   : > { %v305_v6 = vpop.f32.mrf.mxu1 }
 0x236   : > { %v310_v8 = vsel %vm685_vm1, %v305_v6, -1e+09 }
 0x237   : > { %v312_v9 = vsel %vm169_vm2, %v310_v8, -inf }
 0x238   : > { %313 = vmax.xlane.f32.xlu1 %v312_v9 }
 0x23d   : > { %v307_v11 = vpop.f32.mrf.mxu1 }
 0x23e   : > { %v311_v12 = vsel %vm685_vm1, %v307_v11, -1e+09 }
 0x23f   : > { %v315_v13 = vsel %vm169_vm2, %v311_v12, -inf }
 0x240   : > { %316 = vmax.xlane.f32.xlu1 %v315_v13 }
 0x248   : > { %256 = vadd.xlane.f32.xlu1 %v255_v15 }
 0x25d   : > { %v260_v34 = vpop.xlane.xlu0 %259 }
 0x298   : > { %v383_v16 = vpop.xlane.xlu1 %382 }
 0x299   : > { %v387_v18 = vsub.f32 %v379_v62, %v383_v16 }
 0x29b   : > { %v389_v19 = vmul.f32 1.442695, %v387_v18 }
 0x29d   : > { %589 = vpow2.f32 %v389_v19 }
 0x2a0   : > { %v386_v20 = vpop.xlane.xlu1 %385 }
 0x2a1   : > { %v388_v22 = vsub.f32 %v380_v2, %v386_v20 }
 0x2a3   : > { %v590_v23 = vpop.eup %589  ;;  %v391_v24 = vmul.f32 1.442695, %v388_v22 }
 0x2a4   : > { %v393_v17 = vsel %vm169_vm2, %v590_v23, 0.0 }
 0x2a5   : > { %591 = vpow2.f32 %v391_v24  ;;  %394 = vadd.xlane.f32.xlu1 %v393_v17 }
 0x2ab   : > { %v592_v25 = vpop.eup %591  ;;  %v314_v26 = vpop.xlane.xlu1 %313 }
 0x2ac   : > { %v318_v27 = vsub.f32 %v310_v8, %v314_v26  ;;  %v396_v28 = vsel %vm169_vm2, %v592_v25, 0.0 }
 0x2ad   : > { %397 = vadd.xlane.f32.xlu0 %v396_v28 }
 0x2ae   : > { %v320_v29 = vmul.f32 1.442695, %v318_v27 }
 0x2b0   : > { %593 = vpow2.f32 %v320_v29 }
 0x2b3   : > { %v317_v30 = vpop.xlane.xlu1 %316 }
 0x2b4   : > { %v319_v31 = vsub.f32 %v311_v12, %v317_v30 }
 0x2b6   : > { %v594_v32 = vpop.eup %593  ;;  %v322_v33 = vmul.f32 1.442695, %v319_v31 }
 0x2b7   : > { %v324_v35 = vsel %vm169_vm2, %v594_v32, 0.0 }
 0x2b8   : > { %595 = vpow2.f32 %v322_v33  ;;  %325 = vadd.xlane.f32.xlu1 %v324_v35 }
 0x2b9   : > { %597 = vrcp.f32 %v260_v34 }
 0x2bb   : > { %v257_v36 = vpop.xlane.xlu1 %256 }
 0x2bc   : > { %599 = vrcp.f32 %v257_v36 }
 0x2be   : > { %v596_v37 = vpop.eup %595 }
 0x2bf   : > { %v327_v38 = vsel %vm169_vm2, %v596_v37, 0.0  ;;  %v598_v39 = vpop.eup %597 }
 0x2c0   : > { %328 = vadd.xlane.f32.xlu0 %v327_v38  ;;  %v264_v42 = vmul.f32 %v598_v39, %v718_v59 }
 0x2c2   : > { %v600_v40 = vpop.eup %599 }
 0x2c3   : > { %v263_v41 = vmul.f32 %v600_v40, %v588_v14 }
 0x2c5   : > { %v265_v43 = vpack.c.bf16 %v264_v42, %v263_v41 }
 0x2c7   : > { %534 = vmatmul.msk.bf16.vlgmr.msra.gmra.mxu3 %vm169_vm2, %v265_v43 }
 0x2d1   : > { %335 = vrot.lane.b32.xlu1 %v709_v44, %s634_s22 }
 0x2d4   : > { %404 = vrot.lane.b32.xlu0 %v709_v44, %s633_s20 }
 0x318   : > { %v395_v46 = vpop.xlane.xlu1 %394 }
 0x320   : > { %v398_v45 = vpop.xlane.xlu0 %397 }
 0x32b   : > { %v326_v48 = vpop.xlane.xlu1 %325 }
 0x333   : > { %v329_v47 = vpop.xlane.xlu0 %328 }
 0x334   : > { %601 = vrcp.f32 %v329_v47 }
 0x335   : > { %603 = vrcp.f32 %v326_v48 }
 0x336   : > { %605 = vrcp.f32 %v398_v45 }
 0x337   : > { %607 = vrcp.f32 %v395_v46 }
 0x33a   : > { %v602_v49 = vpop.eup %601 }
 0x33b   : > { %v604_v50 = vpop.eup %603  ;;  %v333_v52 = vmul.f32 %v602_v49, %v596_v37 }
 0x33c   : > { %v606_v51 = vpop.eup %605  ;;  %v332_v54 = vmul.f32 %v604_v50, %v594_v32 }
 0x33d   : > { %v608_v53 = vpop.eup %607  ;;  %v402_v56 = vmul.f32 %v606_v51, %v592_v25 }
 0x33e   : > { %v334_v57 = vpack.c.bf16 %v333_v52, %v332_v54  ;;  %v401_v58 = vmul.f32 %v608_v53, %v590_v23 }
 0x340   : > { %v403_v59 = vpack.c.bf16 %v402_v56, %v401_v58 }
 0x343   : > { %v336_v55 = vpop.permute.xlu1 %335 }
 0x344   : > { %348 = vmatpush.bf16.msrb.mxu3 %v336_v55 }
 0x346   : > { %v405_v44 = vpop.permute.xlu0 %404 }
 0x347   : > { %536 = vmatmul.msk.bf16.vlgmr.msrb.gmra.mxu3 %vm169_vm2, %v334_v57  ;;  %417 = vmatpush.bf16.msrb.mxu2 %v405_v44 }
 0x34a   : > { %v281_v60 = vpop.f32.mrf.mxu3  ;;  %538 = vmatmul.msk.bf16.vlgmr.msrb.gmra.mxu2 %vm169_vm2, %v403_v59 }
 0x352   : > { %v283_v61 = vpop.f32.mrf.mxu3 }
 0x353   : > { %v562_v62 = vpack.i.bf16 %v283_v61, %v281_v60 }
 0x355   : > { %563 = vrot.lane.b32.xlu2 %v562_v62, %s633_s20 }
 0x3af   : > { %v564_v7 = vpop.permute.xlu2 %563 }
 0x3b0   : > { %v566_v9 = vunpack.i.h.bf16 %v564_v7  ;;  %v565_v10 = vunpack.i.l.bf16 %v564_v7 }
 0x3b2   : > { %v449_v14 = vsel %vm146_vm0, %v730_v4, %v566_v9  ;;  %v448_v15 = vsel %vm146_vm0, %v725_v0, %v565_v10 }
 0x3ca   : > { %v350_v63 = vpop.f32.mrf.mxu3 }
 0x3cd   : > { %v419_v1 = vpop.f32.mrf.mxu2 }
 0x3d2   : > { %v352_v2 = vpop.f32.mrf.mxu3 }
 0x3d3   : > { %v567_v3 = vpack.i.bf16 %v352_v2, %v350_v63 }
 0x3d5   : > { %568 = vrot.lane.b32.xlu2 %v567_v3, %s634_s22  ;;  %v421_v5 = vpop.f32.mrf.mxu2 }
 0x3d6   : > { %v572_v6 = vpack.i.bf16 %v421_v5, %v419_v1 }
 0x3dd   : > { %573 = vrot.lane.b32.xlu2 %v572_v6, %s632_s19 }
 0x42f   : > { %v569_v8 = vpop.permute.xlu2 %568 }
 0x430   : > { %v571_v11 = vunpack.i.h.bf16 %v569_v8  ;;  %v570_v12 = vunpack.i.l.bf16 %v569_v8 }
 0x432   : > { %v452_v19 = vsel %vm450_vm3, %v449_v14, %v571_v11  ;;  %v451_v20 = vsel %vm450_vm3, %v448_v15, %v570_v12 }
 0x437   : > { %v574_v13 = vpop.permute.xlu2 %573 }
 0x438   : > { %v576_v16 = vunpack.i.h.bf16 %v574_v13  ;;  %v575_v18 = vunpack.i.l.bf16 %v574_v13 }
 0x43a   : > { %v455_v21 = vsel %vm453_vm4, %v452_v19, %v576_v16  ;;  %v454_v22 = vsel %vm453_vm4, %v451_v20, %v575_v18 }
 0x43b   : > { %v547_v23 = vpack.c.bf16 %v455_v21, %v454_v22 }
 0x43d   : > { %548 = vst [vmem:[%s125_s26] sm:$0xff] %v547_v23  }
 0x43e PF: > { %s20_s13 = sadd.s32 1, %s629_s13  }
 0x43f   : > { %p17_p4 = scmp.ge.s32.totalorder %s20_s13, 4  }
 0x441   :  { %19 = sbr.rel (!%p17_p4) target bundleno = 7 (0x7), region = 54 }

// kernel: _lambda_.31
= control target key start
LH: loop header
LB: loop body
LE: loop exit
PB: predicated region body
PF: predicated region fallthrough
CT: control target
= control target key end

     0   :  { %10 = vsyncpa [#allocation4], 0  ;;  %s653_s21 = smov [#allocation3]   ;;  %s654_s23 = smov 192   ;;  %s759_s0 = inlined_call_operand.vmem [shape: bf16[32,128], index: 0, kind: input, shape index: {}]   ;;  %s760_s1 = inlined_call_operand.hbm [shape: bf16[128,384], index: 1, kind: input, shape index: {}]   ;;  %s761_s2 = inlined_call_operand.vmem [shape: f32[1,384], index: 2, kind: input, shape index: {}]   ;;  %s762_s3 = inlined_call_operand.vmem [shape: f32[1,128], index: 3, kind: input, shape index: {}]   ;;  %s763_s4 = inlined_call_operand.vmem [shape: f32[1,128], index: 4, kind: input, shape index: {}]   ;;  %s764_s5 = inlined_call_operand.vmem [shape: bf16[32,384], index: 5, kind: output, shape index: {}]  }
   0x1   :  { %s17_s20 = sshll.u32 %s760_s1, 4  ;;  %s19_s22 = sshll.u32 %s653_s21, 4  ;;  %s18_s20 = int_to_ptr.hbm [resolvable:$true] %s17_s20  ;;  %s20_s22 = int_to_ptr.vmem [resolvable:$true] %s19_s22 }
   0x2   :  { %s655_s24 = smov 12  }
   0x3   :  { %25 = dma.hbm_to_vmem [thread:$0]  %s18_s20, 3072, %s20_s22, [#allocation4], %s654_s23, %s654_s23, %s655_s24  }
   0x4   :  { %651 = dma.done.wait [#allocation4], 3072  }
   0x5   :  { %652 = vsyncadd [#allocation4], 4294964224  ;;  %v602_v0 = vld [vmem:[%s759_s0 + $0x8] sm:$0xff]   ;;  %v595_v1 = vld [vmem:[%s759_s0] sm:$0xff]   ;;  %v656_v6 = vmov 128.0  }
   0x6   :  { %v600_v2 = vunpack.c.l.bf16 %v602_v0  ;;  %v596_v3 = vunpack.c.l.bf16 %v595_v1  ;;  %v601_v4 = vunpack.c.h.bf16 %v602_v0  ;;  %v597_v5 = vunpack.c.h.bf16 %v595_v1  ;;  %v560_v29 = vld [vmem:[#allocation3 + $0xa8] sm:$0xf]  ;;  %v592_v30 = vld [vmem:[#allocation3 + $0xb0] sm:$0xf0]  ;;  %v591_v31 = vld [vmem:[#allocation3 + $0xac] sm:$0xf] }
   0x7   :  { %617 = vrcp.f32 %v656_v6  ;;  %v561_v32 = vor.u32 %v592_v30, %v560_v29  ;;  %v562_v33 = vld [vmem:[#allocation3 + $0xb4] sm:$0xf0]  ;;  %v568_v34 = vld [vmem:[#allocation3 + $0xb0] sm:$0xf]  ;;  %v593_v35 = vld [vmem:[#allocation3 + $0xb8] sm:$0xf0] }
   0x8   :  { %64 = vadd.xlane.f32.xlu1 %v600_v2  ;;  %60 = vadd.xlane.f32.xlu0 %v596_v3  ;;  %v565_v36 = vor.u32 %v591_v31, %v562_v33  ;;  %v569_v37 = vor.u32 %v593_v35, %v568_v34  ;;  %v548_v38 = vld [vmem:[#allocation3 + $0x90] sm:$0xf]  ;;  %v589_v39 = vld [vmem:[#allocation3 + $0x98] sm:$0xf0]  ;;  %v588_v40 = vld [vmem:[#allocation3 + $0x94] sm:$0xf] }
   0x9   :  { %337 = vmatpush.bf16.msra.mxu0 %v561_v32  ;;  %603 = vmatpush.bf16.msra.mxu3 %v561_v32  ;;  %v549_v41 = vor.u32 %v589_v39, %v548_v38  ;;  %v550_v42 = vld [vmem:[#allocation3 + $0x9c] sm:$0xf0]  ;;  %v556_v43 = vld [vmem:[#allocation3 + $0x98] sm:$0xf]  ;;  %v590_v44 = vld [vmem:[#allocation3 + $0xa0] sm:$0xf0] }
   0xa   :  { %356 = vmatpush.bf16.msra.mxu1 %v565_v36  ;;  %375 = vmatpush.bf16.msra.mxu2 %v569_v37  ;;  %v553_v45 = vor.u32 %v588_v40, %v550_v42  ;;  %v557_v46 = vor.u32 %v590_v44, %v556_v43  ;;  %v536_v47 = vld [vmem:[#allocation3 + $0x78] sm:$0xf]  ;;  %v586_v48 = vld [vmem:[#allocation3 + $0x80] sm:$0xf0]  ;;  %v585_v49 = vld [vmem:[#allocation3 + $0x7c] sm:$0xf] }
   0xb   :  { %v537_v50 = vor.u32 %v586_v48, %v536_v47  ;;  %v538_v51 = vld [vmem:[#allocation3 + $0x84] sm:$0xf0]  ;;  %v544_v52 = vld [vmem:[#allocation3 + $0x80] sm:$0xf]  ;;  %v587_v53 = vld [vmem:[#allocation3 + $0x88] sm:$0xf0] }
   0xc   :  { %v541_v54 = vor.u32 %v585_v49, %v538_v51  ;;  %v545_v55 = vor.u32 %v587_v53, %v544_v52  ;;  %v524_v56 = vld [vmem:[#allocation3 + $0x60] sm:$0xf]  ;;  %v583_v57 = vld [vmem:[#allocation3 + $0x68] sm:$0xf0]  ;;  %v582_v58 = vld [vmem:[#allocation3 + $0x64] sm:$0xf] }
   0xd   :  { %v618_v7 = vpop.eup %617  ;;  %338 = vmatpush.bf16.msra.mxu0 %v549_v41  ;;  %604 = vmatpush.bf16.msra.mxu3 %v549_v41  ;;  %v525_v59 = vor.u32 %v583_v57, %v524_v56  ;;  %v526_v60 = vld [vmem:[#allocation3 + $0x6c] sm:$0xf0]  ;;  %v532_v61 = vld [vmem:[#allocation3 + $0x68] sm:$0xf]  ;;  %v584_v62 = vld [vmem:[#allocation3 + $0x70] sm:$0xf0] }
   0xe   :  { %v69_v8 = vmul.f32 128.0, %v618_v7  ;;  %vm73_vm0 = vweird.f32 %v618_v7  ;;  %357 = vmatpush.bf16.msra.mxu1 %v553_v45  ;;  %376 = vmatpush.bf16.msra.mxu2 %v557_v46  ;;  %v529_v63 = vor.u32 %v582_v58, %v526_v60  ;;  %v533_v0 = vor.u32 %v584_v62, %v532_v61  ;;  %v512_v1 = vld [vmem:[#allocation3 + $0x48] sm:$0xf]  ;;  %v520_v6 = vld [vmem:[#allocation3 + $0x50] sm:$0xf] }
   0xf   :  { %v496_v29 = vld [vmem:[#allocation3 + $0x20] sm:$0xf]  ;;  %v575_v30 = vld [vmem:[#allocation3 + $0x28] sm:$0xf0]  ;;  %v570_v37 = vld [vmem:[#allocation3 + $0x4] sm:$0xf] }
  0x10   :  { %66 = vadd.xlane.f32.xlu1 %v601_v4  ;;  %62 = vadd.xlane.f32.xlu0 %v597_v5  ;;  %v70_v9 = vsub.f32 1.0, %v69_v8  ;;  %v497_v34 = vor.u32 %v575_v30, %v496_v29  ;;  %v476_v35 = vld [vmem:[#allocation3] sm:$0xf]  ;;  %v571_v36 = vld [vmem:[#allocation3 + $0x8] sm:$0xf0] }
  0x11   :  { %339 = vmatpush.bf16.msra.mxu0 %v537_v50  ;;  %605 = vmatpush.bf16.msra.mxu3 %v537_v50  ;;  %v477_v40 = vor.u32 %v571_v36, %v476_v35  ;;  %v478_v41 = vld [vmem:[#allocation3 + $0xc] sm:$0xf0]  ;;  %v484_v42 = vld [vmem:[#allocation3 + $0x8] sm:$0xf]  ;;  %v572_v43 = vld [vmem:[#allocation3 + $0x10] sm:$0xf0] }
  0x12   :  { %v71_v10 = vmul.f32 %v618_v7, %v70_v9  ;;  %358 = vmatpush.bf16.msra.mxu1 %v541_v54  ;;  %377 = vmatpush.bf16.msra.mxu2 %v545_v55  ;;  %v481_v44 = vor.u32 %v570_v37, %v478_v41  ;;  %v485_v45 = vor.u32 %v572_v43, %v484_v42 }
  0x14   :  { %v72_v11 = vadd.f32 %v618_v7, %v71_v10  ;;  %v500_v10 = vld [vmem:[#allocation3 + $0x30] sm:$0xf] }
  0x15   :  { %340 = vmatpush.bf16.msra.mxu0 %v525_v59  ;;  %606 = vmatpush.bf16.msra.mxu3 %v525_v59 }
  0x16   :  { %v696_v12 = vsel %vm73_vm0, %v618_v7, %v72_v11  ;;  %359 = vmatpush.bf16.msra.mxu1 %v529_v63  ;;  %378 = vmatpush.bf16.msra.mxu2 %v533_v0  ;;  %v581_v7 = vld [vmem:[#allocation3 + $0x58] sm:$0xf0] }
  0x17   :  { %v521_v9 = vor.u32 %v581_v7, %v520_v6  ;;  %v577_v11 = vld [vmem:[#allocation3 + $0x38] sm:$0xf0] }
  0x1a   :  { %379 = vmatpush.bf16.msra.mxu2 %v521_v9 }
  0x7b   :  { %v65_v13 = vpop.xlane.xlu1 %64  ;;  %v61_v14 = vpop.xlane.xlu0 %60 }
  0x7c   :  { %v77_v15 = vmul.f32 %v696_v12, %v65_v13  ;;  %v75_v16 = vmul.f32 %v696_v12, %v61_v14  ;;  %v576_v13 = vld [vmem:[#allocation3 + $0x34] sm:$0xf]  ;;  %v501_v14 = vor.u32 %v577_v11, %v500_v10 }
  0x7e   :  { %v700_v17 = vsub.f32 %v600_v2, %v77_v15  ;;  %v702_v18 = vsub.f32 %v596_v3, %v75_v16  ;;  %v580_v2 = vld [vmem:[#allocation3 + $0x50] sm:$0xf0]  ;;  %v579_v3 = vld [vmem:[#allocation3 + $0x4c] sm:$0xf]  ;;  %v502_v15 = vld [vmem:[#allocation3 + $0x3c] sm:$0xf0] }
  0x7f   :  { %v508_v16 = vld [vmem:[#allocation3 + $0x38] sm:$0xf] }
  0x80   :  { %v85_v19 = vmul.f32 %v700_v17, %v700_v17  ;;  %v83_v20 = vmul.f32 %v702_v18, %v702_v18 }
  0x82   :  { %91 = vadd.xlane.f32.xlu0 %v85_v19  ;;  %87 = vadd.xlane.f32.xlu2 %v83_v20  ;;  %v578_v19 = vld [vmem:[#allocation3 + $0x40] sm:$0xf0]  ;;  %v505_v20 = vor.u32 %v576_v13, %v502_v15  ;;  %v615_v15 = vld [vmem:[%s762_s3] ss:$0 sm:$0xff] }
  0x83   :  { %v67_v21 = vpop.xlane.xlu1 %66  ;;  %v63_v22 = vpop.xlane.xlu0 %62 }
  0x84   :  { %v78_v23 = vmul.f32 %v696_v12, %v67_v21  ;;  %v76_v24 = vmul.f32 %v696_v12, %v63_v22  ;;  %v509_v21 = vor.u32 %v578_v19, %v508_v16  ;;  %v488_v22 = vld [vmem:[#allocation3 + $0x18] sm:$0xf] }
  0x86   :  { %v710_v25 = vsub.f32 %v601_v4, %v78_v23  ;;  %v712_v26 = vsub.f32 %v597_v5, %v76_v24  ;;  %v513_v4 = vor.u32 %v580_v2, %v512_v1  ;;  %v514_v5 = vld [vmem:[#allocation3 + $0x54] sm:$0xf0]  ;;  %380 = vmatpush.bf16.msra.mxu2 %v509_v21  ;;  %v574_v23 = vld [vmem:[#allocation3 + $0x20] sm:$0xf0]  ;;  %v573_v24 = vld [vmem:[#allocation3 + $0x1c] sm:$0xf] }
  0x87   :  { %v517_v8 = vor.u32 %v579_v3, %v514_v5 }
  0x88   :  { %v86_v27 = vmul.f32 %v710_v25, %v710_v25  ;;  %v84_v28 = vmul.f32 %v712_v26, %v712_v26  ;;  %341 = vmatpush.bf16.msra.mxu0 %v513_v4  ;;  %607 = vmatpush.bf16.msra.mxu3 %v513_v4 }
  0x89   :  { %360 = vmatpush.bf16.msra.mxu1 %v517_v8 }
  0x8a   :  { %93 = vadd.xlane.f32.xlu1 %v86_v27  ;;  %89 = vadd.xlane.f32.xlu2 %v84_v28  ;;  %v489_v27 = vor.u32 %v574_v23, %v488_v22  ;;  %v490_v28 = vld [vmem:[#allocation3 + $0x24] sm:$0xf0] }
  0x8b   :  { %v493_v33 = vor.u32 %v573_v24, %v490_v28  ;;  %381 = vmatpush.bf16.msra.mxu2 %v497_v34 }
  0x8c   :  { %342 = vmatpush.bf16.msra.mxu0 %v501_v14  ;;  %608 = vmatpush.bf16.msra.mxu3 %v501_v14 }
  0x8d   :  { %361 = vmatpush.bf16.msra.mxu1 %v505_v20 }
  0x8f   :  { %382 = vmatpush.bf16.msra.mxu2 %v485_v45 }
  0x90   :  { %343 = vmatpush.bf16.msra.mxu0 %v489_v27  ;;  %609 = vmatpush.bf16.msra.mxu3 %v489_v27 }
  0x91   :  { %362 = vmatpush.bf16.msra.mxu1 %v493_v33 }
  0x94   :  { %344 = vmatpush.bf16.msra.mxu0 %v477_v40  ;;  %610 = vmatpush.bf16.msra.mxu3 %v477_v40 }
  0x95   :  { %363 = vmatpush.bf16.msra.mxu1 %v481_v44 }
  0xf5   :  { %v88_v31 = vpop.xlane.xlu2 %87  ;;  %v92_v32 = vpop.xlane.xlu0 %91 }
  0xf6   :  { %v95_v38 = vmul.f32 %v88_v31, %v696_v12  ;;  %v97_v39 = vmul.f32 %v92_v32, %v696_v12 }
  0xf8   :  { %v99_v46 = vadd.f32 1e-06, %v95_v38  ;;  %v101_v47 = vadd.f32 1e-06, %v97_v39 }
  0xfa   :  { %619 = vrsqrt.f32 %v99_v46  ;;  %vm129_vm1 = vweird.f32 %v101_v47  ;;  %vm109_vm5 = vweird.f32 %v99_v46 }
  0xfb   :  { %621 = vrsqrt.f32 %v101_v47 }
  0xfd   :  { %v94_v48 = vpop.xlane.xlu1 %93  ;;  %v90_v49 = vpop.xlane.xlu2 %89 }
  0xfe   :  { %v98_v50 = vmul.f32 %v94_v48, %v696_v12  ;;  %v96_v51 = vmul.f32 %v90_v49, %v696_v12 }
 0x100   :  { %v620_v52 = vpop.eup %619  ;;  %v102_v53 = vadd.f32 1e-06, %v98_v50  ;;  %v100_v54 = vadd.f32 1e-06, %v96_v51 }
 0x101   :  { %v622_v55 = vpop.eup %621  ;;  %v104_v56 = vmul.f32 %v620_v52, %v99_v46  ;;  %vm110_vm3 = vweird.f32 %v620_v52 }
 0x102   :  { %v124_v57 = vmul.f32 %v622_v55, %v101_v47  ;;  %623 = vrsqrt.f32 %v102_v53  ;;  %vm130_vm2 = vweird.f32 %v622_v55  ;;  %vm111_vm6 = vmor %vm109_vm5, %vm110_vm3  ;;  %vm139_vm7 = vweird.f32 %v102_v53 }
 0x103   :  { %v105_v58 = vmul.f32 %v620_v52, %v104_v56  ;;  %625 = vrsqrt.f32 %v100_v54  ;;  %vm131_vm4 = vmor %vm129_vm1, %vm130_vm2  ;;  %vm119_vm11 = vweird.f32 %v100_v54 }
 0x104   :  { %v125_v59 = vmul.f32 %v622_v55, %v124_v57 }
 0x105   :  { %v106_v60 = vmul.f32 0.5, %v105_v58 }
 0x106   :  { %v126_v61 = vmul.f32 0.5, %v125_v59 }
 0x107   :  { %v107_v62 = vsub.f32 1.5, %v106_v60 }
 0x108   :  { %v624_v63 = vpop.eup %623  ;;  %v127_v0 = vsub.f32 1.5, %v126_v61 }
 0x109   :  { %v626_v1 = vpop.eup %625  ;;  %v134_v2 = vmul.f32 %v624_v63, %v102_v53  ;;  %v108_v12 = vmul.f32 %v620_v52, %v107_v62  ;;  %vm140_vm8 = vweird.f32 %v624_v63 }
 0x10a   :  { %v128_v3 = vmul.f32 %v622_v55, %v127_v0  ;;  %v114_v4 = vmul.f32 %v626_v1, %v100_v54  ;;  %vm141_vm9 = vmor %vm139_vm7, %vm140_vm8  ;;  %vm120_vm10 = vweird.f32 %v626_v1 }
 0x10b   :  { %v135_v5 = vmul.f32 %v624_v63, %v134_v2  ;;  %v112_v9 = vsel %vm111_vm6, %v620_v52, %v108_v12  ;;  %vm121_vm12 = vmor %vm119_vm11, %vm120_vm10 }
 0x10c   :  { %v115_v6 = vmul.f32 %v626_v1, %v114_v4  ;;  %v132_v7 = vsel %vm131_vm4, %v622_v55, %v128_v3  ;;  %v143_v16 = vmul.f32 %v112_v9, %v702_v18 }
 0x10d   :  { %v136_v8 = vmul.f32 0.5, %v135_v5  ;;  %v145_v13 = vmul.f32 %v132_v7, %v700_v17  ;;  %v616_v17 = vld [vmem:[%s763_s4] ss:$0 sm:$0xff] }
 0x10e   :  { %v116_v10 = vmul.f32 0.5, %v115_v6  ;;  %v151_v28 = vmul.f32 %v615_v15, %v143_v16 }
 0x10f   :  { %v137_v11 = vsub.f32 1.5, %v136_v8  ;;  %v153_v24 = vmul.f32 %v615_v15, %v145_v13 }
 0x110   :  { %v117_v14 = vsub.f32 1.5, %v116_v10  ;;  %v159_v32 = vadd.f32 %v616_v17, %v151_v28 }
 0x111   :  { %v138_v19 = vmul.f32 %v624_v63, %v137_v11  ;;  %v161_v31 = vadd.f32 %v616_v17, %v153_v24 }
 0x112   :  { %v118_v20 = vmul.f32 %v626_v1, %v117_v14 }
 0x113   :  { %v142_v21 = vsel %vm141_vm9, %v624_v63, %v138_v19 }
 0x114   :  { %v146_v22 = vmul.f32 %v142_v21, %v710_v25  ;;  %v122_v23 = vsel %vm121_vm12, %v626_v1, %v118_v20  ;;  %v433_v25 = vld [vmem:[%s761_s2] sm:$0x7] }
 0x115   :  { %v144_v27 = vmul.f32 %v122_v23, %v712_v26  ;;  %v435_v26 = vperm.slane %v433_v25, 0  ;;  %v436_v36 = vperm.slane %v433_v25, 1  ;;  %v437_v42 = vperm.slane %v433_v25, 2 }
 0x116   :  { %v154_v29 = vmul.f32 %v615_v15, %v146_v22 }
 0x117   :  { %v152_v30 = vmul.f32 %v615_v15, %v144_v27 }
 0x118   :  { %v162_v18 = vadd.f32 %v616_v17, %v154_v29 }
 0x119   :  { %v160_v33 = vadd.f32 %v616_v17, %v152_v30 }
 0x11a   :  { %v176_v34 = vpack.c.bf16 %v162_v18, %v161_v31 }
 0x11b   :  { %v175_v35 = vpack.c.bf16 %v160_v33, %v159_v32 }
 0x11c   :  { %350 = vmatmul.bf16.vlgmr.msra.gmra.mxu3 %v176_v34 }
 0x11d   :  { %345 = vmatmul.bf16.vlgmr.msra.gmra.mxu0 %v175_v35  ;;  %364 = vmatmul.bf16.vlgmr.msra.gmra.mxu1 %v175_v35 }
 0x11e   :  { %383 = vmatmul.bf16.vlgmr.msra.gmra.mxu2 %v175_v35 }
 0x12d   :  { %369 = vmatmul.bf16.gmra.mxu1 %v176_v34 }
 0x12e   :  { %388 = vmatmul.bf16.gmra.mxu2 %v176_v34 }
 0x19a   :  { %v346_v37 = vpop.f32.mrf.mxu0  ;;  %v365_v38 = vpop.f32.mrf.mxu1 }
 0x19b   :  { %v441_v39 = vadd.f32 %v435_v26, %v346_v37  ;;  %v442_v40 = vadd.f32 %v436_v36, %v365_v38 }
 0x19d   :  { %v453_v41 = vpack.c.bf16 %v442_v40, %v441_v39 }
 0x19f   :  { %461 = vst [vmem:[%s764_s5] sm:$0xff] %v453_v41  ;;  %v351_v51 = vpop.f32.mrf.mxu3 }
 0x1a0   :  { %v447_v55 = vadd.f32 %v435_v26, %v351_v51 }
 0x1a1   :  { %v384_v43 = vpop.f32.mrf.mxu2 }
 0x1a2   :  { %v443_v44 = vadd.f32 %v437_v42, %v384_v43  ;;  %v348_v45 = vpop.f32.mrf.mxu0  ;;  %v367_v46 = vpop.f32.mrf.mxu1 }
 0x1a3   :  { %v444_v47 = vadd.f32 %v435_v26, %v348_v45  ;;  %v445_v48 = vadd.f32 %v436_v36, %v367_v46 }
 0x1a4   :  { %v454_v49 = vpack.c.bf16 %v443_v44, %v443_v44 }
 0x1a5   :  { %v455_v50 = vpack.c.bf16 %v445_v48, %v444_v47 }
 0x1a6   :  { %462 = vst [vmem:[%s764_s5 + $0x8] sm:$0xf] %v454_v49 }
 0x1a7   :  { %463 = vst [vmem:[%s764_s5 + $0xc] sm:$0xff] %v455_v50  ;;  %v353_v59 = vpop.f32.mrf.mxu3 }
 0x1a8   :  { %v450_v63 = vadd.f32 %v435_v26, %v353_v59 }
 0x1a9   :  { %v386_v52 = vpop.f32.mrf.mxu2 }
 0x1aa   :  { %v446_v53 = vadd.f32 %v437_v42, %v386_v52  ;;  %v370_v54 = vpop.f32.mrf.mxu1 }
 0x1ab   :  { %v448_v56 = vadd.f32 %v436_v36, %v370_v54 }
 0x1ac   :  { %v456_v57 = vpack.c.bf16 %v446_v53, %v446_v53 }
 0x1ad   :  { %v457_v58 = vpack.c.bf16 %v448_v56, %v447_v55 }
 0x1ae   :  { %464 = vst [vmem:[%s764_s5 + $0x14] sm:$0xf] %v456_v57 }
 0x1af   :  { %465 = vst [vmem:[%s764_s5 + $0x18] sm:$0xff] %v457_v58 }
 0x1b1   :  { %v389_v60 = vpop.f32.mrf.mxu2 }
 0x1b2   :  { %v449_v61 = vadd.f32 %v437_v42, %v389_v60  ;;  %v372_v62 = vpop.f32.mrf.mxu1 }
 0x1b3   :  { %v451_v0 = vadd.f32 %v436_v36, %v372_v62 }
 0x1b4   :  { %v458_v1 = vpack.c.bf16 %v449_v61, %v449_v61 }
 0x1b5   :  { %v459_v2 = vpack.c.bf16 %v451_v0, %v450_v63 }
 0x1b6   :  { %466 = vst [vmem:[%s764_s5 + $0x20] sm:$0xf] %v458_v1 }
 0x1b7   :  { %467 = vst [vmem:[%s764_s5 + $0x24] sm:$0xff] %v459_v2 }
 0x1b9   :  { %v391_v12 = vpop.f32.mrf.mxu2 }
 0x1ba   :  { %v452_v3 = vadd.f32 %v437_v42, %v391_v12 }
 0x1bc   :  { %v460_v4 = vpack.c.bf16 %v452_v3, %v452_v3 }
 0x1be   :  { %468 = vst [vmem:[%s764_s5 + $0x2c] sm:$0xf] %v460_v4 }
 0x1bf   :  { %473 = vsyncpa [#allocation4], 1 }

// kernel: _lambda_.34
= control target key start
LH: loop header
LB: loop body
LE: loop exit
PB: predicated region body
PF: predicated region fallthrough
CT: control target
= control target key end

     0   :  { %v546_v6 = vmov 128.0   ;;  %s779_s0 = inlined_call_operand.vmem [shape: bf16[32,128], index: 0, kind: input, shape index: {}]   ;;  %s780_s3 = inlined_call_operand.vmem [shape: f32[1,128], index: 3, kind: input, shape index: {}]   ;;  %s781_s4 = inlined_call_operand.vmem [shape: f32[1,128], index: 4, kind: input, shape index: {}]   ;;  %s782_s1 = inlined_call_operand.vmem [shape: bf16[128,256], index: 1, kind: input, shape index: {}]   ;;  %s783_s2 = inlined_call_operand.vmem [shape: f32[1,256], index: 2, kind: input, shape index: {}]   ;;  %s784_s5 = inlined_call_operand.vmem [shape: bf16[32,256], index: 5, kind: output, shape index: {}]  }
   0x1   :  { %v500_v0 = vld [vmem:[%s779_s0 + $0x8] sm:$0xff]   ;;  %v493_v1 = vld [vmem:[%s779_s0] sm:$0xff]   ;;  %520 = vrcp.f32 %v546_v6  ;;  %v470_v29 = vld [vmem:[%s782_s1 + $0x70] sm:$0xf] }
   0x2   :  { %v498_v2 = vunpack.c.l.bf16 %v500_v0  ;;  %v494_v3 = vunpack.c.l.bf16 %v493_v1  ;;  %v499_v4 = vunpack.c.h.bf16 %v500_v0  ;;  %v495_v5 = vunpack.c.h.bf16 %v493_v1  ;;  %v491_v30 = vld [vmem:[%s782_s1 + $0x74] sm:$0xf0]  ;;  %v490_v31 = vld [vmem:[%s782_s1 + $0x74] sm:$0xf]  ;;  %v472_v33 = vld [vmem:[%s782_s1 + $0x78] sm:$0xf0] }
   0x3   :  { %v471_v32 = vor.u32 %v491_v30, %v470_v29  ;;  %v475_v34 = vor.u32 %v490_v31, %v472_v33  ;;  %v462_v35 = vld [vmem:[%s782_s1 + $0x60] sm:$0xf]  ;;  %v489_v36 = vld [vmem:[%s782_s1 + $0x64] sm:$0xf0]  ;;  %v488_v37 = vld [vmem:[%s782_s1 + $0x64] sm:$0xf] }
   0x4   :  { %44 = vadd.xlane.f32.xlu0 %v498_v2  ;;  %40 = vadd.xlane.f32.xlu1 %v494_v3  ;;  %v463_v38 = vor.u32 %v489_v36, %v462_v35  ;;  %v464_v39 = vld [vmem:[%s782_s1 + $0x68] sm:$0xf0]  ;;  %v454_v41 = vld [vmem:[%s782_s1 + $0x50] sm:$0xf]  ;;  %v487_v42 = vld [vmem:[%s782_s1 + $0x54] sm:$0xf0] }
   0x5   :  { %249 = vmatpush.bf16.msra.mxu0 %v471_v32  ;;  %501 = vmatpush.bf16.msra.mxu2 %v471_v32  ;;  %v467_v40 = vor.u32 %v488_v37, %v464_v39  ;;  %v486_v43 = vld [vmem:[%s782_s1 + $0x54] sm:$0xf]  ;;  %v455_v44 = vor.u32 %v487_v42, %v454_v41  ;;  %v456_v45 = vld [vmem:[%s782_s1 + $0x58] sm:$0xf0]  ;;  %v446_v47 = vld [vmem:[%s782_s1 + $0x40] sm:$0xf] }
   0x6   :  { %268 = vmatpush.bf16.msra.mxu1 %v475_v34  ;;  %509 = vmatpush.bf16.msra.mxu3 %v475_v34  ;;  %v459_v46 = vor.u32 %v486_v43, %v456_v45  ;;  %v485_v48 = vld [vmem:[%s782_s1 + $0x44] sm:$0xf0]  ;;  %v484_v49 = vld [vmem:[%s782_s1 + $0x44] sm:$0xf]  ;;  %v448_v51 = vld [vmem:[%s782_s1 + $0x48] sm:$0xf0] }
   0x7   :  { %v521_v7 = vpop.eup %520  ;;  %v447_v50 = vor.u32 %v485_v48, %v446_v47  ;;  %v451_v52 = vor.u32 %v484_v49, %v448_v51  ;;  %v438_v53 = vld [vmem:[%s782_s1 + $0x30] sm:$0xf]  ;;  %v483_v54 = vld [vmem:[%s782_s1 + $0x34] sm:$0xf0]  ;;  %v482_v55 = vld [vmem:[%s782_s1 + $0x34] sm:$0xf] }
   0x8   :  { %v49_v8 = vmul.f32 128.0, %v521_v7  ;;  %vm53_vm0 = vweird.f32 %v521_v7  ;;  %v439_v56 = vor.u32 %v483_v54, %v438_v53  ;;  %v440_v57 = vld [vmem:[%s782_s1 + $0x38] sm:$0xf0]  ;;  %v430_v59 = vld [vmem:[%s782_s1 + $0x20] sm:$0xf] }
   0x9   :  { %250 = vmatpush.bf16.msra.mxu0 %v463_v38  ;;  %502 = vmatpush.bf16.msra.mxu2 %v463_v38  ;;  %v443_v58 = vor.u32 %v482_v55, %v440_v57  ;;  %v481_v60 = vld [vmem:[%s782_s1 + $0x24] sm:$0xf0]  ;;  %v480_v61 = vld [vmem:[%s782_s1 + $0x24] sm:$0xf]  ;;  %v432_v63 = vld [vmem:[%s782_s1 + $0x28] sm:$0xf0] }
   0xa   :  { %v50_v9 = vsub.f32 1.0, %v49_v8  ;;  %269 = vmatpush.bf16.msra.mxu1 %v467_v40  ;;  %510 = vmatpush.bf16.msra.mxu3 %v467_v40  ;;  %v431_v62 = vor.u32 %v481_v60, %v430_v59  ;;  %v435_v0 = vor.u32 %v480_v61, %v432_v63  ;;  %v422_v1 = vld [vmem:[%s782_s1 + $0x10] sm:$0xf]  ;;  %v414_v6 = vld [vmem:[%s782_s1] sm:$0xf] }
   0xb   :  { %v518_v53 = vld [vmem:[%s780_s3] ss:$0 sm:$0xff] }
   0xc   :  { %46 = vadd.xlane.f32.xlu0 %v499_v4  ;;  %42 = vadd.xlane.f32.xlu1 %v495_v5  ;;  %v51_v10 = vmul.f32 %v521_v7, %v50_v9  ;;  %v476_v9 = vld [vmem:[%s782_s1 + $0x4] sm:$0xf]  ;;  %v519_v60 = vld [vmem:[%s781_s4] ss:$0 sm:$0xff] }
   0xd   :  { %251 = vmatpush.bf16.msra.mxu0 %v455_v44  ;;  %503 = vmatpush.bf16.msra.mxu2 %v455_v44 }
   0xe   :  { %v52_v11 = vadd.f32 %v521_v7, %v51_v10  ;;  %270 = vmatpush.bf16.msra.mxu1 %v459_v46  ;;  %511 = vmatpush.bf16.msra.mxu3 %v459_v46  ;;  %v416_v10 = vld [vmem:[%s782_s1 + $0x8] sm:$0xf0] }
  0x10   :  { %v583_v12 = vsel %vm53_vm0, %v521_v7, %v52_v11  ;;  %v477_v7 = vld [vmem:[%s782_s1 + $0x4] sm:$0xf0] }
  0x11   :  { %252 = vmatpush.bf16.msra.mxu0 %v447_v50  ;;  %504 = vmatpush.bf16.msra.mxu2 %v447_v50 }
  0x12   :  { %271 = vmatpush.bf16.msra.mxu1 %v451_v52  ;;  %512 = vmatpush.bf16.msra.mxu3 %v451_v52 }
  0x15   :  { %253 = vmatpush.bf16.msra.mxu0 %v439_v56  ;;  %505 = vmatpush.bf16.msra.mxu2 %v439_v56 }
  0x16   :  { %272 = vmatpush.bf16.msra.mxu1 %v443_v58  ;;  %513 = vmatpush.bf16.msra.mxu3 %v443_v58 }
  0x19   :  { %254 = vmatpush.bf16.msra.mxu0 %v431_v62  ;;  %506 = vmatpush.bf16.msra.mxu2 %v431_v62 }
  0x1a   :  { %273 = vmatpush.bf16.msra.mxu1 %v435_v0  ;;  %514 = vmatpush.bf16.msra.mxu3 %v435_v0 }
  0x77   :  { %v45_v13 = vpop.xlane.xlu0 %44  ;;  %v41_v14 = vpop.xlane.xlu1 %40 }
  0x78   :  { %v57_v15 = vmul.f32 %v583_v12, %v45_v13  ;;  %v55_v16 = vmul.f32 %v583_v12, %v41_v14 }
  0x7a   :  { %v587_v17 = vsub.f32 %v494_v3, %v55_v16  ;;  %v589_v18 = vsub.f32 %v498_v2, %v57_v15  ;;  %v479_v2 = vld [vmem:[%s782_s1 + $0x14] sm:$0xf0]  ;;  %v478_v3 = vld [vmem:[%s782_s1 + $0x14] sm:$0xf]  ;;  %v415_v16 = vor.u32 %v477_v7, %v414_v6 }
  0x7c   :  { %v65_v19 = vmul.f32 %v589_v18, %v589_v18  ;;  %v63_v20 = vmul.f32 %v587_v17, %v587_v17 }
  0x7e   :  { %71 = vadd.xlane.f32.xlu2 %v65_v19  ;;  %67 = vadd.xlane.f32.xlu0 %v63_v20  ;;  %v419_v19 = vor.u32 %v476_v9, %v416_v10 }
  0x7f   :  { %v47_v21 = vpop.xlane.xlu0 %46  ;;  %v43_v22 = vpop.xlane.xlu1 %42 }
  0x80   :  { %v58_v23 = vmul.f32 %v583_v12, %v47_v21  ;;  %v56_v24 = vmul.f32 %v583_v12, %v43_v22 }
  0x82   :  { %v597_v25 = vsub.f32 %v499_v4, %v58_v23  ;;  %v599_v26 = vsub.f32 %v495_v5, %v56_v24  ;;  %v423_v4 = vor.u32 %v479_v2, %v422_v1  ;;  %v424_v5 = vld [vmem:[%s782_s1 + $0x18] sm:$0xf0] }
  0x83   :  { %v427_v8 = vor.u32 %v478_v3, %v424_v5 }
  0x84   :  { %v66_v27 = vmul.f32 %v597_v25, %v597_v25  ;;  %v64_v28 = vmul.f32 %v599_v26, %v599_v26  ;;  %255 = vmatpush.bf16.msra.mxu0 %v423_v4  ;;  %507 = vmatpush.bf16.msra.mxu2 %v423_v4 }
  0x85   :  { %274 = vmatpush.bf16.msra.mxu1 %v427_v8  ;;  %515 = vmatpush.bf16.msra.mxu3 %v427_v8 }
  0x86   :  { %73 = vadd.xlane.f32.xlu2 %v66_v27  ;;  %69 = vadd.xlane.f32.xlu1 %v64_v28 }
  0x88   :  { %256 = vmatpush.bf16.msra.mxu0 %v415_v16  ;;  %508 = vmatpush.bf16.msra.mxu2 %v415_v16 }
  0x89   :  { %275 = vmatpush.bf16.msra.mxu1 %v419_v19  ;;  %516 = vmatpush.bf16.msra.mxu3 %v419_v19 }
  0xf1   :  { %v72_v11 = vpop.xlane.xlu2 %71  ;;  %v68_v13 = vpop.xlane.xlu0 %67 }
  0xf2   :  { %v77_v14 = vmul.f32 %v72_v11, %v583_v12  ;;  %v75_v15 = vmul.f32 %v68_v13, %v583_v12 }
  0xf4   :  { %v81_v20 = vadd.f32 1e-06, %v77_v14  ;;  %v79_v21 = vadd.f32 1e-06, %v75_v15 }
  0xf6   :  { %522 = vrsqrt.f32 %v81_v20  ;;  %vm89_vm2 = vweird.f32 %v79_v21  ;;  %vm109_vm4 = vweird.f32 %v81_v20 }
  0xf7   :  { %524 = vrsqrt.f32 %v79_v21 }
  0xf9   :  { %v74_v22 = vpop.xlane.xlu2 %73  ;;  %v70_v23 = vpop.xlane.xlu1 %69 }
  0xfa   :  { %v78_v24 = vmul.f32 %v74_v22, %v583_v12  ;;  %v76_v27 = vmul.f32 %v70_v23, %v583_v12 }
  0xfc   :  { %v523_v28 = vpop.eup %522  ;;  %v82_v29 = vadd.f32 1e-06, %v78_v24  ;;  %v80_v30 = vadd.f32 1e-06, %v76_v27 }
  0xfd   :  { %v525_v31 = vpop.eup %524  ;;  %v104_v32 = vmul.f32 %v523_v28, %v81_v20  ;;  %vm110_vm1 = vweird.f32 %v523_v28 }
  0xfe   :  { %v84_v33 = vmul.f32 %v525_v31, %v79_v21  ;;  %526 = vrsqrt.f32 %v82_v29  ;;  %vm90_vm3 = vweird.f32 %v525_v31  ;;  %vm111_vm5 = vmor %vm109_vm4, %vm110_vm1  ;;  %vm99_vm8 = vweird.f32 %v80_v30 }
  0xff   :  { %v105_v34 = vmul.f32 %v523_v28, %v104_v32  ;;  %528 = vrsqrt.f32 %v80_v30  ;;  %vm91_vm6 = vmor %vm89_vm2, %vm90_vm3  ;;  %vm119_vm10 = vweird.f32 %v82_v29 }
 0x100   :  { %v85_v35 = vmul.f32 %v525_v31, %v84_v33 }
 0x101   :  { %v106_v36 = vmul.f32 0.5, %v105_v34 }
 0x102   :  { %v86_v37 = vmul.f32 0.5, %v85_v35 }
 0x103   :  { %v107_v38 = vsub.f32 1.5, %v106_v36 }
 0x104   :  { %v527_v39 = vpop.eup %526  ;;  %v87_v40 = vsub.f32 1.5, %v86_v37 }
 0x105   :  { %v529_v41 = vpop.eup %528  ;;  %v108_v42 = vmul.f32 %v523_v28, %v107_v38  ;;  %v114_v43 = vmul.f32 %v527_v39, %v82_v29  ;;  %vm120_vm7 = vweird.f32 %v527_v39 }
 0x106   :  { %v88_v12 = vmul.f32 %v525_v31, %v87_v40  ;;  %v94_v44 = vmul.f32 %v529_v41, %v80_v30  ;;  %vm100_vm9 = vweird.f32 %v529_v41  ;;  %vm121_vm11 = vmor %vm119_vm10, %vm120_vm7 }
 0x107   :  { %v115_v45 = vmul.f32 %v527_v39, %v114_v43  ;;  %v112_v48 = vsel %vm111_vm5, %v523_v28, %v108_v42  ;;  %vm101_vm12 = vmor %vm99_vm8, %vm100_vm9 }
 0x108   :  { %v95_v46 = vmul.f32 %v529_v41, %v94_v44  ;;  %v92_v50 = vsel %vm91_vm6, %v525_v31, %v88_v12  ;;  %v125_v54 = vmul.f32 %v112_v48, %v589_v18 }
 0x109   :  { %v116_v47 = vmul.f32 0.5, %v115_v45  ;;  %v123_v56 = vmul.f32 %v92_v50, %v587_v17 }
 0x10a   :  { %v96_v49 = vmul.f32 0.5, %v95_v46  ;;  %v133_v62 = vmul.f32 %v518_v53, %v125_v54 }
 0x10b   :  { %v117_v51 = vsub.f32 1.5, %v116_v47  ;;  %v131_v0 = vmul.f32 %v518_v53, %v123_v56 }
 0x10c   :  { %v97_v52 = vsub.f32 1.5, %v96_v49  ;;  %v141_v2 = vadd.f32 %v519_v60, %v133_v62 }
 0x10d   :  { %v118_v55 = vmul.f32 %v527_v39, %v117_v51  ;;  %v139_v17 = vadd.f32 %v519_v60, %v131_v0 }
 0x10e   :  { %v98_v57 = vmul.f32 %v529_v41, %v97_v52 }
 0x10f   :  { %v122_v58 = vsel %vm121_vm11, %v527_v39, %v118_v55 }
 0x110   :  { %v102_v59 = vsel %vm101_vm12, %v529_v41, %v98_v57  ;;  %v126_v61 = vmul.f32 %v122_v58, %v597_v25  ;;  %v314_v25 = vld [vmem:[%s783_s2] sm:$0x3] }
 0x111   :  { %v124_v63 = vmul.f32 %v102_v59, %v599_v26  ;;  %v316_v7 = vperm.slane %v314_v25, 0  ;;  %v317_v8 = vperm.slane %v314_v25, 1 }
 0x112   :  { %v134_v18 = vmul.f32 %v518_v53, %v126_v61 }
 0x113   :  { %v132_v1 = vmul.f32 %v518_v53, %v124_v63 }
 0x114   :  { %v142_v3 = vadd.f32 %v519_v60, %v134_v18 }
 0x115   :  { %v140_v4 = vadd.f32 %v519_v60, %v132_v1 }
 0x116   :  { %v152_v5 = vpack.c.bf16 %v142_v3, %v141_v2 }
 0x117   :  { %v151_v6 = vpack.c.bf16 %v140_v4, %v139_v17 }
 0x118   :  { %262 = vmatmul.bf16.vlgmr.msra.gmra.mxu2 %v152_v5  ;;  %281 = vmatmul.bf16.vlgmr.msra.gmra.mxu3 %v152_v5 }
 0x119   :  { %257 = vmatmul.bf16.vlgmr.msra.gmra.mxu0 %v151_v6  ;;  %276 = vmatmul.bf16.vlgmr.msra.gmra.mxu1 %v151_v6 }
 0x196   :  { %v258_v26 = vpop.f32.mrf.mxu0  ;;  %v277_v9 = vpop.f32.mrf.mxu1 }
 0x197   :  { %v718_v10 = vadd.f32 %v316_v7, %v258_v26  ;;  %v720_v11 = vadd.f32 %v317_v8, %v277_v9 }
 0x199   :  { %v328_v13 = vmul.f32 %v718_v10, %v718_v10  ;;  %v329_v14 = vmul.f32 %v720_v11, %v720_v11 }
 0x19b   :  { %v336_v15 = vmul.f32 %v328_v13, %v718_v10  ;;  %v337_v16 = vmul.f32 %v329_v14, %v720_v11  ;;  %v263_v19 = vpop.f32.mrf.mxu2  ;;  %v282_v20 = vpop.f32.mrf.mxu3 }
 0x19c   :  { %v728_v21 = vadd.f32 %v316_v7, %v263_v19  ;;  %v730_v22 = vadd.f32 %v317_v8, %v282_v20 }
 0x19d   :  { %v344_v23 = vmul.f32 0.044715, %v336_v15  ;;  %v345_v24 = vmul.f32 0.044715, %v337_v16 }
 0x19e   :  { %v332_v27 = vmul.f32 %v728_v21, %v728_v21  ;;  %v333_v28 = vmul.f32 %v730_v22, %v730_v22  ;;  %v260_v29 = vpop.f32.mrf.mxu0  ;;  %v279_v30 = vpop.f32.mrf.mxu1 }
 0x19f   :  { %v352_v31 = vadd.f32 %v344_v23, %v718_v10  ;;  %v353_v32 = vadd.f32 %v345_v24, %v720_v11  ;;  %v738_v33 = vadd.f32 %v316_v7, %v260_v29  ;;  %v740_v34 = vadd.f32 %v317_v8, %v279_v30 }
 0x1a0   :  { %v340_v35 = vmul.f32 %v332_v27, %v728_v21  ;;  %v341_v36 = vmul.f32 %v333_v28, %v730_v22 }
 0x1a1   :  { %v360_v37 = vmul.f32 0.7978846, %v352_v31  ;;  %v361_v38 = vmul.f32 0.7978846, %v353_v32  ;;  %v330_v39 = vmul.f32 %v738_v33, %v738_v33  ;;  %v331_v40 = vmul.f32 %v740_v34, %v740_v34 }
 0x1a2   :  { %v348_v41 = vmul.f32 0.044715, %v340_v35  ;;  %v349_v42 = vmul.f32 0.044715, %v341_v36 }
 0x1a3   :  { %530 = vtanh.f32 %v360_v37  ;;  %v338_v43 = vmul.f32 %v330_v39, %v738_v33  ;;  %v339_v12 = vmul.f32 %v331_v40, %v740_v34  ;;  %v265_v44 = vpop.f32.mrf.mxu2  ;;  %v284_v45 = vpop.f32.mrf.mxu3 }
 0x1a4   :  { %532 = vtanh.f32 %v361_v38  ;;  %v356_v46 = vadd.f32 %v348_v41, %v728_v21  ;;  %v357_v47 = vadd.f32 %v349_v42, %v730_v22  ;;  %v752_v48 = vadd.f32 %v316_v7, %v265_v44 }
 0x1a5   :  { %v346_v49 = vmul.f32 0.044715, %v338_v43  ;;  %v347_v50 = vmul.f32 0.044715, %v339_v12  ;;  %v327_v51 = vadd.f32 %v317_v8, %v284_v45 }
 0x1a6   :  { %v364_v52 = vmul.f32 0.7978846, %v356_v46  ;;  %v365_v53 = vmul.f32 0.7978846, %v357_v47  ;;  %v334_v54 = vmul.f32 %v752_v48, %v752_v48 }
 0x1a7   :  { %v354_v55 = vadd.f32 %v346_v49, %v738_v33  ;;  %v355_v56 = vadd.f32 %v347_v50, %v740_v34  ;;  %v335_v57 = vmul.f32 %v327_v51, %v327_v51 }
 0x1a8   :  { %534 = vtanh.f32 %v364_v52  ;;  %v342_v58 = vmul.f32 %v334_v54, %v752_v48 }
 0x1a9   :  { %v531_v59 = vpop.eup %530  ;;  %536 = vtanh.f32 %v365_v53  ;;  %v362_v60 = vmul.f32 0.7978846, %v354_v55  ;;  %v363_v61 = vmul.f32 0.7978846, %v355_v56  ;;  %v343_v62 = vmul.f32 %v335_v57, %v327_v51 }
 0x1aa   :  { %v533_v63 = vpop.eup %532  ;;  %v376_v0 = vadd.f32 1.0, %v531_v59  ;;  %v350_v18 = vmul.f32 0.044715, %v342_v58 }
 0x1ab   :  { %v377_v1 = vadd.f32 1.0, %v533_v63  ;;  %538 = vtanh.f32 %v362_v60  ;;  %v351_v2 = vmul.f32 0.044715, %v343_v62 }
 0x1ac   :  { %v384_v3 = vmul.f32 0.5, %v376_v0  ;;  %540 = vtanh.f32 %v363_v61  ;;  %v358_v17 = vadd.f32 %v350_v18, %v752_v48 }
 0x1ad   :  { %v385_v4 = vmul.f32 0.5, %v377_v1  ;;  %v359_v5 = vadd.f32 %v351_v2, %v327_v51 }
 0x1ae   :  { %v535_v6 = vpop.eup %534  ;;  %v392_v25 = vmul.f32 %v384_v3, %v718_v10  ;;  %v366_v7 = vmul.f32 0.7978846, %v358_v17 }
 0x1af   :  { %v537_v8 = vpop.eup %536  ;;  %v393_v26 = vmul.f32 %v385_v4, %v720_v11  ;;  %v380_v9 = vadd.f32 1.0, %v535_v6  ;;  %v367_v13 = vmul.f32 0.7978846, %v359_v5 }
 0x1b0   :  { %v381_v14 = vadd.f32 1.0, %v537_v8  ;;  %542 = vtanh.f32 %v366_v7 }
 0x1b1   :  { %v539_v15 = vpop.eup %538  ;;  %v400_v16 = vpack.c.bf16 %v393_v26, %v392_v25  ;;  %v388_v19 = vmul.f32 0.5, %v380_v9  ;;  %544 = vtanh.f32 %v367_v13 }
 0x1b2   :  { %v541_v20 = vpop.eup %540  ;;  %v389_v23 = vmul.f32 0.5, %v381_v14  ;;  %v378_v24 = vadd.f32 1.0, %v539_v15 }
 0x1b3   :  { %404 = vst [vmem:[%s784_s5] sm:$0xff] %v400_v16  ;;  %v396_v10 = vmul.f32 %v388_v19, %v728_v21  ;;  %v379_v27 = vadd.f32 1.0, %v541_v20 }
 0x1b4   :  { %v397_v11 = vmul.f32 %v389_v23, %v730_v22  ;;  %v386_v28 = vmul.f32 0.5, %v378_v24 }
 0x1b5   :  { %v387_v29 = vmul.f32 0.5, %v379_v27 }
 0x1b6   :  { %v543_v30 = vpop.eup %542  ;;  %v402_v31 = vpack.c.bf16 %v397_v11, %v396_v10  ;;  %v394_v32 = vmul.f32 %v386_v28, %v738_v33 }
 0x1b7   :  { %v545_v35 = vpop.eup %544  ;;  %v395_v36 = vmul.f32 %v387_v29, %v740_v34  ;;  %v382_v37 = vadd.f32 1.0, %v543_v30 }
 0x1b8   :  { %406 = vst [vmem:[%s784_s5 + $0x10] sm:$0xff] %v402_v31  ;;  %v383_v38 = vadd.f32 1.0, %v545_v35 }
 0x1b9   :  { %v401_v39 = vpack.c.bf16 %v395_v36, %v394_v32  ;;  %v390_v21 = vmul.f32 0.5, %v382_v37 }
 0x1ba   :  { %v391_v40 = vmul.f32 0.5, %v383_v38 }
 0x1bb   :  { %405 = vst [vmem:[%s784_s5 + $0x8] sm:$0xff] %v401_v39  ;;  %v398_v22 = vmul.f32 %v390_v21, %v752_v48 }
 0x1bc   :  { %v399_v41 = vmul.f32 %v391_v40, %v327_v51 }
 0x1be   :  { %v403_v33 = vpack.c.bf16 %v399_v41, %v398_v22 }
 0x1c0   :  { %407 = vst [vmem:[%s784_s5 + $0x18] sm:$0xff] %v403_v33 }

// kernel: _lambda_.35
= control target key start
LH: loop header
LB: loop body
LE: loop exit
PB: predicated region body
PF: predicated region fallthrough
CT: control target
= control target key end

     0   :  { %9 = vsyncpa [#allocation4], 0  ;;  %s449_s18 = smov [#allocation3]   ;;  %s450_s20 = smov 64   ;;  %s519_s0 = inlined_call_operand.vmem [shape: bf16[32,256], index: 0, kind: input, shape index: {}]   ;;  %s520_s1 = inlined_call_operand.hbm [shape: bf16[256,128], index: 1, kind: input, shape index: {}]   ;;  %s521_s2 = inlined_call_operand.vmem [shape: f32[1,128], index: 2, kind: input, shape index: {}]   ;;  %s522_s3 = inlined_call_operand.vmem [shape: bf16[32,128], index: 3, kind: input, shape index: {}]   ;;  %s523_s4 = inlined_call_operand.vmem [shape: bf16[32,128], index: 4, kind: output, shape index: {}]  }
   0x1   :  { %s16_s17 = sshll.u32 %s520_s1, 4  ;;  %s18_s19 = sshll.u32 %s449_s18, 4  ;;  %s17_s17 = int_to_ptr.hbm [resolvable:$true] %s16_s17  ;;  %s19_s19 = int_to_ptr.vmem [resolvable:$true] %s18_s19 }
   0x2   :  { %s451_s21 = smov 4  }
   0x3   :  { %24 = dma.hbm_to_vmem [thread:$0]  %s17_s17, 2048, %s19_s19, [#allocation4], %s450_s20, %s450_s20, %s451_s21  }
   0x4   :  { %447 = dma.done.wait [#allocation4], 2048  }
   0x5   :  { %448 = vsyncadd [#allocation4], 4294965248  ;;  %v374_v0 = vld [vmem:[#allocation3 + $0x38] sm:$0xff]  ;;  %v373_v2 = vld [vmem:[#allocation3 + $0x30] sm:$0xff] }
   0x6   :  { %v382_v1 = vld [vmem:[#allocation3 + $0x78] sm:$0xff]  ;;  %197 = vmatpush.bf16.msra.mxu0 %v374_v0  ;;  %403 = vmatpush.bf16.msra.mxu2 %v374_v0  ;;  %v381_v3 = vld [vmem:[#allocation3 + $0x70] sm:$0xff]  ;;  %v372_v4 = vld [vmem:[#allocation3 + $0x28] sm:$0xff] }
   0x7   :  { %216 = vmatpush.bf16.msra.mxu1 %v382_v1  ;;  %411 = vmatpush.bf16.msra.mxu3 %v382_v1  ;;  %v380_v5 = vld [vmem:[#allocation3 + $0x68] sm:$0xff]  ;;  %v371_v6 = vld [vmem:[#allocation3 + $0x20] sm:$0xff]  ;;  %v370_v8 = vld [vmem:[#allocation3 + $0x18] sm:$0xff] }
   0x8   :  { %v379_v7 = vld [vmem:[#allocation3 + $0x60] sm:$0xff]  ;;  %v378_v9 = vld [vmem:[#allocation3 + $0x58] sm:$0xff]  ;;  %v369_v10 = vld [vmem:[#allocation3 + $0x10] sm:$0xff] }
   0x9   :  { %v377_v11 = vld [vmem:[#allocation3 + $0x50] sm:$0xff]  ;;  %v368_v12 = vld [vmem:[#allocation3 + $0x8] sm:$0xff]  ;;  %v367_v14 = vld [vmem:[#allocation3] sm:$0xff] }
   0xa   :  { %198 = vmatpush.bf16.msra.mxu0 %v373_v2  ;;  %404 = vmatpush.bf16.msra.mxu2 %v373_v2  ;;  %v376_v13 = vld [vmem:[#allocation3 + $0x48] sm:$0xff]  ;;  %v375_v15 = vld [vmem:[#allocation3 + $0x40] sm:$0xff]  ;;  %v293_v18 = vld [vmem:[%s519_s0 + $0x10] sm:$0xf] }
   0xb   :  { %217 = vmatpush.bf16.msra.mxu1 %v381_v3  ;;  %412 = vmatpush.bf16.msra.mxu3 %v381_v3  ;;  %v285_v16 = vld [vmem:[%s519_s0] sm:$0xf]  ;;  %v364_v17 = vld [vmem:[%s519_s0 + $0x4] sm:$0xf0]  ;;  %v366_v19 = vld [vmem:[%s519_s0 + $0x14] sm:$0xf0] }
   0xc   :  { %v363_v20 = vld [vmem:[%s519_s0 + $0x4] sm:$0xf]  ;;  %v287_v21 = vld [vmem:[%s519_s0 + $0x8] sm:$0xf0]  ;;  %v365_v22 = vld [vmem:[%s519_s0 + $0x14] sm:$0xf]  ;;  %v286_v24 = vor.u32 %v364_v17, %v285_v16  ;;  %v294_v25 = vor.u32 %v366_v19, %v293_v18 }
   0xd   :  { %v295_v23 = vld [vmem:[%s519_s0 + $0x18] sm:$0xf0]  ;;  %v290_v26 = vor.u32 %v363_v20, %v287_v21  ;;  %v422_v31 = vld [vmem:[%s521_s2] ss:$0 sm:$0xff]  ;;  %v401_v42 = vld [vmem:[%s522_s3 + $0x8] sm:$0xff]  }
   0xe   :  { %199 = vmatpush.bf16.msra.mxu0 %v372_v4  ;;  %405 = vmatpush.bf16.msra.mxu2 %v372_v4  ;;  %v298_v27 = vor.u32 %v365_v22, %v295_v23  ;;  %v384_v33 = vld [vmem:[%s522_s3] sm:$0xff]   ;;  %v389_v47 = vunpack.c.l.bf16 %v401_v42  ;;  %v390_v52 = vunpack.c.h.bf16 %v401_v42 }
   0xf   :  { %218 = vmatpush.bf16.msra.mxu1 %v380_v5  ;;  %413 = vmatpush.bf16.msra.mxu3 %v380_v5  ;;  %v385_v38 = vunpack.c.l.bf16 %v384_v33  ;;  %v386_v40 = vunpack.c.h.bf16 %v384_v33 }
  0x12   :  { %200 = vmatpush.bf16.msra.mxu0 %v371_v6  ;;  %406 = vmatpush.bf16.msra.mxu2 %v371_v6 }
  0x13   :  { %219 = vmatpush.bf16.msra.mxu1 %v379_v7  ;;  %414 = vmatpush.bf16.msra.mxu3 %v379_v7 }
  0x16   :  { %201 = vmatpush.bf16.msra.mxu0 %v370_v8  ;;  %407 = vmatpush.bf16.msra.mxu2 %v370_v8 }
  0x17   :  { %220 = vmatpush.bf16.msra.mxu1 %v378_v9  ;;  %415 = vmatpush.bf16.msra.mxu3 %v378_v9 }
  0x1a   :  { %202 = vmatpush.bf16.msra.mxu0 %v369_v10  ;;  %408 = vmatpush.bf16.msra.mxu2 %v369_v10 }
  0x1b   :  { %221 = vmatpush.bf16.msra.mxu1 %v377_v11  ;;  %416 = vmatpush.bf16.msra.mxu3 %v377_v11 }
  0x1e   :  { %203 = vmatpush.bf16.msra.mxu0 %v368_v12  ;;  %409 = vmatpush.bf16.msra.mxu2 %v368_v12 }
  0x1f   :  { %222 = vmatpush.bf16.msra.mxu1 %v376_v13  ;;  %417 = vmatpush.bf16.msra.mxu3 %v376_v13 }
  0x22   :  { %204 = vmatpush.bf16.msra.mxu0 %v367_v14  ;;  %410 = vmatpush.bf16.msra.mxu2 %v367_v14 }
  0x23   :  { %223 = vmatpush.bf16.msra.mxu1 %v375_v15  ;;  %418 = vmatpush.bf16.msra.mxu3 %v375_v15 }
  0x25   :  { %205 = vmatmul.bf16.vlgmr.msra.gmra.mxu0 %v286_v24  ;;  %210 = vmatmul.bf16.vlgmr.msra.gmra.mxu2 %v294_v25 }
  0x26   :  { %224 = vmatmul.bf16.vlgmr.msra.gmra.mxu1 %v290_v26  ;;  %229 = vmatmul.bf16.vlgmr.msra.gmra.mxu3 %v298_v27 }
  0xa2   :  { %v206_v28 = vpop.f32.mrf.mxu0 }
  0xa3   :  { %v225_v29 = vpop.f32.mrf.mxu1 }
  0xa4   :  { %v226_v30 = vadd.f32 %v225_v29, %v206_v28 }
  0xa6   :  { %v254_v37 = vadd.f32 %v422_v31, %v226_v30 }
  0xa8   :  { %v211_v32 = vpop.f32.mrf.mxu2  ;;  %v266_v44 = vadd.f32 %v385_v38, %v254_v37 }
  0xa9   :  { %v230_v34 = vpop.f32.mrf.mxu3 }
  0xaa   :  { %v208_v35 = vpop.f32.mrf.mxu0  ;;  %v231_v41 = vadd.f32 %v230_v34, %v211_v32 }
  0xab   :  { %v227_v36 = vpop.f32.mrf.mxu1 }
  0xac   :  { %v228_v39 = vadd.f32 %v227_v36, %v208_v35  ;;  %v256_v49 = vadd.f32 %v422_v31, %v231_v41 }
  0xae   :  { %v255_v43 = vadd.f32 %v422_v31, %v228_v39  ;;  %v268_v54 = vadd.f32 %v389_v47, %v256_v49 }
  0xb0   :  { %v267_v45 = vadd.f32 %v386_v40, %v255_v43  ;;  %v213_v46 = vpop.f32.mrf.mxu2 }
  0xb1   :  { %v232_v48 = vpop.f32.mrf.mxu3 }
  0xb2   :  { %v394_v50 = vpack.c.bf16 %v267_v45, %v266_v44  ;;  %v233_v51 = vadd.f32 %v232_v48, %v213_v46 }
  0xb4   :  { %395 = vst [vmem:[%s523_s4] sm:$0xff] %v394_v50   ;;  %v257_v53 = vadd.f32 %v422_v31, %v233_v51 }
  0xb6   :  { %v269_v55 = vadd.f32 %v390_v52, %v257_v53 }
  0xb8   :  { %v399_v56 = vpack.c.bf16 %v269_v55, %v268_v54 }
  0xba   :  { %402 = vst [vmem:[%s523_s4 + $0x8] sm:$0xff] %v399_v56  }
  0xbb   :  { %282 = vsyncpa [#allocation4], 1 }

// kernel: _lambda_.46
= control target key start
LH: loop header
LB: loop body
LE: loop exit
PB: predicated region body
PF: predicated region fallthrough
CT: control target
= control target key end

     0   :  { %8 = vsyncpa [#allocation4], 0  ;;  %s389_s15 = smov [#allocation3]   ;;  %s390_s17 = smov 128   ;;  %s436_s0 = inlined_call_operand.vmem [shape: bf16[32,128], index: 0, kind: input, shape index: {}]   ;;  %s437_s1 = inlined_call_operand.hbm [shape: bf16[128,256], index: 1, kind: input, shape index: {}]   ;;  %s438_s2 = inlined_call_operand.vmem [shape: f32[1,256], index: 2, kind: input, shape index: {}]   ;;  %s439_s3 = inlined_call_operand.vmem [shape: bf16[32,256], index: 3, kind: output, shape index: {}]  }
   0x1   :  { %s15_s14 = sshll.u32 %s437_s1, 4  ;;  %s17_s16 = sshll.u32 %s389_s15, 4  ;;  %s16_s14 = int_to_ptr.hbm [resolvable:$true] %s15_s14  ;;  %s18_s16 = int_to_ptr.vmem [resolvable:$true] %s17_s16 }
   0x2   :  { %s391_s18 = smov 8  }
   0x3   :  { %23 = dma.hbm_to_vmem [thread:$0]  %s16_s14, 2048, %s18_s16, [#allocation4], %s390_s17, %s390_s17, %s391_s18  }
   0x4   :  { %387 = dma.done.wait [#allocation4], 2048  }
   0x5   :  { %388 = vsyncadd [#allocation4], 4294965248  ;;  %v320_v0 = vld [vmem:[#allocation3 + $0x70] sm:$0xf]  ;;  %v343_v1 = vld [vmem:[#allocation3 + $0x74] sm:$0xf0] }
   0x6   :  { %v342_v2 = vld [vmem:[#allocation3 + $0x74] sm:$0xf]  ;;  %v321_v3 = vor.u32 %v343_v1, %v320_v0  ;;  %v322_v4 = vld [vmem:[#allocation3 + $0x78] sm:$0xf0]  ;;  %v312_v5 = vld [vmem:[#allocation3 + $0x60] sm:$0xf] }
   0x7   :  { %v341_v6 = vld [vmem:[#allocation3 + $0x64] sm:$0xf0]  ;;  %v325_v7 = vor.u32 %v342_v2, %v322_v4  ;;  %v340_v8 = vld [vmem:[#allocation3 + $0x64] sm:$0xf]  ;;  %v314_v9 = vld [vmem:[#allocation3 + $0x68] sm:$0xf0] }
   0x8   :  { %162 = vmatpush.bf16.msra.mxu0 %v321_v3  ;;  %344 = vmatpush.bf16.msra.mxu2 %v321_v3  ;;  %v313_v10 = vor.u32 %v341_v6, %v312_v5  ;;  %v317_v11 = vor.u32 %v340_v8, %v314_v9  ;;  %v304_v12 = vld [vmem:[#allocation3 + $0x50] sm:$0xf]  ;;  %v339_v13 = vld [vmem:[#allocation3 + $0x54] sm:$0xf0]  ;;  %v338_v14 = vld [vmem:[#allocation3 + $0x54] sm:$0xf] }
   0x9   :  { %181 = vmatpush.bf16.msra.mxu1 %v325_v7  ;;  %352 = vmatpush.bf16.msra.mxu3 %v325_v7  ;;  %v306_v15 = vld [vmem:[#allocation3 + $0x58] sm:$0xf0]  ;;  %v305_v16 = vor.u32 %v339_v13, %v304_v12  ;;  %v296_v18 = vld [vmem:[#allocation3 + $0x40] sm:$0xf]  ;;  %v337_v19 = vld [vmem:[#allocation3 + $0x44] sm:$0xf0] }
   0xa   :  { %v309_v17 = vor.u32 %v338_v14, %v306_v15  ;;  %v336_v20 = vld [vmem:[#allocation3 + $0x44] sm:$0xf]  ;;  %v298_v21 = vld [vmem:[#allocation3 + $0x48] sm:$0xf0]  ;;  %v297_v22 = vor.u32 %v337_v19, %v296_v18  ;;  %v288_v24 = vld [vmem:[#allocation3 + $0x30] sm:$0xf] }
   0xb   :  { %v301_v23 = vor.u32 %v336_v20, %v298_v21  ;;  %v335_v25 = vld [vmem:[#allocation3 + $0x34] sm:$0xf0]  ;;  %v334_v26 = vld [vmem:[#allocation3 + $0x34] sm:$0xf]  ;;  %v290_v27 = vld [vmem:[#allocation3 + $0x38] sm:$0xf0] }
   0xc   :  { %163 = vmatpush.bf16.msra.mxu0 %v313_v10  ;;  %345 = vmatpush.bf16.msra.mxu2 %v313_v10  ;;  %v289_v28 = vor.u32 %v335_v25, %v288_v24  ;;  %v293_v29 = vor.u32 %v334_v26, %v290_v27  ;;  %v280_v30 = vld [vmem:[#allocation3 + $0x20] sm:$0xf]  ;;  %v333_v31 = vld [vmem:[#allocation3 + $0x24] sm:$0xf0]  ;;  %v332_v32 = vld [vmem:[#allocation3 + $0x24] sm:$0xf] }
   0xd   :  { %182 = vmatpush.bf16.msra.mxu1 %v317_v11  ;;  %353 = vmatpush.bf16.msra.mxu3 %v317_v11  ;;  %v282_v33 = vld [vmem:[#allocation3 + $0x28] sm:$0xf0]  ;;  %v281_v34 = vor.u32 %v333_v31, %v280_v30  ;;  %v272_v36 = vld [vmem:[#allocation3 + $0x10] sm:$0xf]  ;;  %v331_v37 = vld [vmem:[#allocation3 + $0x14] sm:$0xf0] }
   0xe   :  { %v285_v35 = vor.u32 %v332_v32, %v282_v33  ;;  %v330_v38 = vld [vmem:[#allocation3 + $0x14] sm:$0xf]  ;;  %v274_v39 = vld [vmem:[#allocation3 + $0x18] sm:$0xf0]  ;;  %v273_v40 = vor.u32 %v331_v37, %v272_v36  ;;  %v264_v42 = vld [vmem:[#allocation3] sm:$0xf] }
   0xf   :  { %v277_v41 = vor.u32 %v330_v38, %v274_v39  ;;  %v329_v43 = vld [vmem:[#allocation3 + $0x4] sm:$0xf0]  ;;  %v328_v44 = vld [vmem:[#allocation3 + $0x4] sm:$0xf]  ;;  %v266_v45 = vld [vmem:[#allocation3 + $0x8] sm:$0xf0] }
  0x10   :  { %164 = vmatpush.bf16.msra.mxu0 %v305_v16  ;;  %346 = vmatpush.bf16.msra.mxu2 %v305_v16  ;;  %v265_v46 = vor.u32 %v329_v43, %v264_v42  ;;  %v269_v47 = vor.u32 %v328_v44, %v266_v45  ;;  %v326_v48 = vld [vmem:[%s436_s0] sm:$0xff]  ;;  %v327_v49 = vld [vmem:[%s436_s0 + $0x8] sm:$0xff] }
  0x11   :  { %183 = vmatpush.bf16.msra.mxu1 %v309_v17  ;;  %354 = vmatpush.bf16.msra.mxu3 %v309_v17  ;;  %v227_v50 = vld [vmem:[%s438_s2] sm:$0x3] }
  0x12   :  { %v229_v51 = vperm.slane %v227_v50, 0  ;;  %v230_v52 = vperm.slane %v227_v50, 1 }
  0x14   :  { %165 = vmatpush.bf16.msra.mxu0 %v297_v22  ;;  %347 = vmatpush.bf16.msra.mxu2 %v297_v22 }
  0x15   :  { %184 = vmatpush.bf16.msra.mxu1 %v301_v23  ;;  %355 = vmatpush.bf16.msra.mxu3 %v301_v23 }
  0x18   :  { %166 = vmatpush.bf16.msra.mxu0 %v289_v28  ;;  %348 = vmatpush.bf16.msra.mxu2 %v289_v28 }
  0x19   :  { %185 = vmatpush.bf16.msra.mxu1 %v293_v29  ;;  %356 = vmatpush.bf16.msra.mxu3 %v293_v29 }
  0x1c   :  { %167 = vmatpush.bf16.msra.mxu0 %v281_v34  ;;  %349 = vmatpush.bf16.msra.mxu2 %v281_v34 }
  0x1d   :  { %186 = vmatpush.bf16.msra.mxu1 %v285_v35  ;;  %357 = vmatpush.bf16.msra.mxu3 %v285_v35 }
  0x20   :  { %168 = vmatpush.bf16.msra.mxu0 %v273_v40  ;;  %350 = vmatpush.bf16.msra.mxu2 %v273_v40 }
  0x21   :  { %187 = vmatpush.bf16.msra.mxu1 %v277_v41  ;;  %358 = vmatpush.bf16.msra.mxu3 %v277_v41 }
  0x24   :  { %169 = vmatpush.bf16.msra.mxu0 %v265_v46  ;;  %351 = vmatpush.bf16.msra.mxu2 %v265_v46 }
  0x25   :  { %188 = vmatpush.bf16.msra.mxu1 %v269_v47  ;;  %359 = vmatpush.bf16.msra.mxu3 %v269_v47 }
  0x27   :  { %170 = vmatmul.bf16.vlgmr.msra.gmra.mxu0 %v326_v48  ;;  %175 = vmatmul.bf16.vlgmr.msra.gmra.mxu2 %v327_v49 }
  0x28   :  { %189 = vmatmul.bf16.vlgmr.msra.gmra.mxu1 %v326_v48  ;;  %194 = vmatmul.bf16.vlgmr.msra.gmra.mxu3 %v327_v49 }
  0xa4   :  { %v171_v53 = vpop.f32.mrf.mxu0 }
  0xa5   :  { %v233_v54 = vadd.f32 %v229_v51, %v171_v53  ;;  %v190_v55 = vpop.f32.mrf.mxu1 }
  0xa6   :  { %v234_v56 = vadd.f32 %v230_v52, %v190_v55 }
  0xa8   :  { %v241_v57 = vpack.c.bf16 %v234_v56, %v233_v54 }
  0xaa   :  { %245 = vst [vmem:[%s439_s3] sm:$0xff] %v241_v57  ;;  %v176_v58 = vpop.f32.mrf.mxu2 }
  0xab   :  { %v237_v59 = vadd.f32 %v229_v51, %v176_v58  ;;  %v195_v60 = vpop.f32.mrf.mxu3 }
  0xac   :  { %v238_v61 = vadd.f32 %v230_v52, %v195_v60  ;;  %v173_v62 = vpop.f32.mrf.mxu0 }
  0xad   :  { %v235_v63 = vadd.f32 %v229_v51, %v173_v62  ;;  %v192_v0 = vpop.f32.mrf.mxu1 }
  0xae   :  { %v243_v1 = vpack.c.bf16 %v238_v61, %v237_v59  ;;  %v236_v2 = vadd.f32 %v230_v52, %v192_v0 }
  0xb0   :  { %247 = vst [vmem:[%s439_s3 + $0x10] sm:$0xff] %v243_v1  ;;  %v242_v3 = vpack.c.bf16 %v236_v2, %v235_v63 }
  0xb2   :  { %246 = vst [vmem:[%s439_s3 + $0x8] sm:$0xff] %v242_v3  ;;  %v178_v4 = vpop.f32.mrf.mxu2 }
  0xb3   :  { %v239_v5 = vadd.f32 %v229_v51, %v178_v4  ;;  %v197_v6 = vpop.f32.mrf.mxu3 }
  0xb4   :  { %v240_v7 = vadd.f32 %v230_v52, %v197_v6 }
  0xb6   :  { %v244_v8 = vpack.c.bf16 %v240_v7, %v239_v5 }
  0xb8   :  { %248 = vst [vmem:[%s439_s3 + $0x18] sm:$0xff] %v244_v8 }
  0xb9   :  { %253 = vsyncpa [#allocation4], 1 }

// kernel: _lambda_.41
= control target key start
LH: loop header
LB: loop body
LE: loop exit
PB: predicated region body
PF: predicated region fallthrough
CT: control target
= control target key end

     0   :  { %v170_v6 = vmov 128.0   ;;  %s229_s0 = inlined_call_operand.vmem [shape: bf16[32,128], index: 0, kind: input, shape index: {}]   ;;  %s230_s1 = inlined_call_operand.vmem [shape: f32[1,128], index: 1, kind: input, shape index: {}]   ;;  %s231_s2 = inlined_call_operand.vmem [shape: f32[1,128], index: 2, kind: input, shape index: {}]   ;;  %s232_s3 = inlined_call_operand.vmem [shape: bf16[32,128], index: 3, kind: output, shape index: {}]  }
   0x1   :  { %v155_v0 = vld [vmem:[%s229_s0 + $0x8] sm:$0xff]   ;;  %v138_v1 = vld [vmem:[%s229_s0] sm:$0xff]   ;;  %160 = vrcp.f32 %v170_v6 }
   0x2   :  { %v143_v2 = vunpack.c.l.bf16 %v155_v0  ;;  %v139_v3 = vunpack.c.l.bf16 %v138_v1  ;;  %v144_v4 = vunpack.c.h.bf16 %v155_v0  ;;  %v140_v5 = vunpack.c.h.bf16 %v138_v1  ;;  %v158_v0 = vld [vmem:[%s230_s1] ss:$0 sm:$0xff] }
   0x4   :  { %26 = vadd.xlane.f32.xlu1 %v143_v2  ;;  %22 = vadd.xlane.f32.xlu0 %v139_v3 }
   0x7   :  { %v161_v7 = vpop.eup %160 }
   0x8   :  { %v31_v8 = vmul.f32 128.0, %v161_v7  ;;  %vm35_vm0 = vweird.f32 %v161_v7 }
   0xa   :  { %v32_v9 = vsub.f32 1.0, %v31_v8 }
   0xc   :  { %28 = vadd.xlane.f32.xlu1 %v144_v4  ;;  %24 = vadd.xlane.f32.xlu0 %v140_v5  ;;  %v33_v10 = vmul.f32 %v161_v7, %v32_v9 }
   0xe   :  { %v34_v11 = vadd.f32 %v161_v7, %v33_v10 }
  0x10   :  { %v36_v12 = vsel %vm35_vm0, %v161_v7, %v34_v11  ;;  %v159_v7 = vld [vmem:[%s231_s2] ss:$0 sm:$0xff] }
  0x77   :  { %v27_v13 = vpop.xlane.xlu1 %26  ;;  %v23_v14 = vpop.xlane.xlu0 %22 }
  0x78   :  { %v39_v15 = vmul.f32 %v36_v12, %v27_v13  ;;  %v37_v16 = vmul.f32 %v36_v12, %v23_v14 }
  0x7a   :  { %v197_v17 = vsub.f32 %v143_v2, %v39_v15  ;;  %v199_v18 = vsub.f32 %v139_v3, %v37_v16 }
  0x7c   :  { %v47_v19 = vmul.f32 %v197_v17, %v197_v17  ;;  %v45_v20 = vmul.f32 %v199_v18, %v199_v18 }
  0x7e   :  { %53 = vadd.xlane.f32.xlu0 %v47_v19  ;;  %49 = vadd.xlane.f32.xlu2 %v45_v20 }
  0x7f   :  { %v29_v21 = vpop.xlane.xlu1 %28  ;;  %v25_v22 = vpop.xlane.xlu0 %24 }
  0x80   :  { %v40_v23 = vmul.f32 %v36_v12, %v29_v21  ;;  %v38_v24 = vmul.f32 %v36_v12, %v25_v22 }
  0x82   :  { %v205_v25 = vsub.f32 %v144_v4, %v40_v23  ;;  %v207_v26 = vsub.f32 %v140_v5, %v38_v24 }
  0x84   :  { %v48_v27 = vmul.f32 %v205_v25, %v205_v25  ;;  %v46_v28 = vmul.f32 %v207_v26, %v207_v26 }
  0x86   :  { %55 = vadd.xlane.f32.xlu1 %v48_v27  ;;  %51 = vadd.xlane.f32.xlu2 %v46_v28 }
  0xf1   :  { %v50_v29 = vpop.xlane.xlu2 %49  ;;  %v54_v30 = vpop.xlane.xlu0 %53 }
  0xf2   :  { %v57_v31 = vmul.f32 %v50_v29, %v36_v12  ;;  %v59_v32 = vmul.f32 %v54_v30, %v36_v12 }
  0xf4   :  { %v61_v33 = vadd.f32 1e-06, %v57_v31  ;;  %v63_v34 = vadd.f32 1e-06, %v59_v32 }
  0xf6   :  { %162 = vrsqrt.f32 %v61_v33  ;;  %vm91_vm3 = vweird.f32 %v63_v34  ;;  %vm71_vm4 = vweird.f32 %v61_v33 }
  0xf7   :  { %164 = vrsqrt.f32 %v63_v34 }
  0xf9   :  { %v56_v35 = vpop.xlane.xlu1 %55  ;;  %v52_v36 = vpop.xlane.xlu2 %51 }
  0xfa   :  { %v60_v37 = vmul.f32 %v56_v35, %v36_v12  ;;  %v58_v38 = vmul.f32 %v52_v36, %v36_v12 }
  0xfc   :  { %v163_v39 = vpop.eup %162  ;;  %v64_v40 = vadd.f32 1e-06, %v60_v37  ;;  %v62_v41 = vadd.f32 1e-06, %v58_v38 }
  0xfd   :  { %v165_v42 = vpop.eup %164  ;;  %v66_v43 = vmul.f32 %v163_v39, %v61_v33  ;;  %vm72_vm2 = vweird.f32 %v163_v39 }
  0xfe   :  { %v86_v44 = vmul.f32 %v165_v42, %v63_v34  ;;  %166 = vrsqrt.f32 %v64_v40  ;;  %vm92_vm1 = vweird.f32 %v165_v42  ;;  %vm73_vm6 = vmor %vm71_vm4, %vm72_vm2  ;;  %vm101_vm9 = vweird.f32 %v64_v40 }
  0xff   :  { %v67_v45 = vmul.f32 %v163_v39, %v66_v43  ;;  %168 = vrsqrt.f32 %v62_v41  ;;  %vm93_vm5 = vmor %vm91_vm3, %vm92_vm1  ;;  %vm81_vm11 = vweird.f32 %v62_v41 }
 0x100   :  { %v87_v46 = vmul.f32 %v165_v42, %v86_v44 }
 0x101   :  { %v68_v47 = vmul.f32 0.5, %v67_v45 }
 0x102   :  { %v88_v48 = vmul.f32 0.5, %v87_v46 }
 0x103   :  { %v69_v49 = vsub.f32 1.5, %v68_v47 }
 0x104   :  { %v167_v50 = vpop.eup %166  ;;  %v89_v51 = vsub.f32 1.5, %v88_v48 }
 0x105   :  { %v169_v52 = vpop.eup %168  ;;  %v96_v53 = vmul.f32 %v167_v50, %v64_v40  ;;  %v70_v54 = vmul.f32 %v163_v39, %v69_v49  ;;  %vm102_vm7 = vweird.f32 %v167_v50 }
 0x106   :  { %v90_v55 = vmul.f32 %v165_v42, %v89_v51  ;;  %v76_v56 = vmul.f32 %v169_v52, %v62_v41  ;;  %vm82_vm8 = vweird.f32 %v169_v52  ;;  %vm103_vm10 = vmor %vm101_vm9, %vm102_vm7 }
 0x107   :  { %v97_v57 = vmul.f32 %v167_v50, %v96_v53  ;;  %v74_v61 = vsel %vm73_vm6, %v163_v39, %v70_v54  ;;  %vm83_vm12 = vmor %vm81_vm11, %vm82_vm8 }
 0x108   :  { %v77_v58 = vmul.f32 %v169_v52, %v76_v56  ;;  %v94_v59 = vsel %vm93_vm5, %v165_v42, %v90_v55  ;;  %v105_v3 = vmul.f32 %v74_v61, %v199_v18 }
 0x109   :  { %v98_v60 = vmul.f32 0.5, %v97_v57  ;;  %v107_v1 = vmul.f32 %v94_v59, %v197_v17 }
 0x10a   :  { %v78_v62 = vmul.f32 0.5, %v77_v58  ;;  %v113_v11 = vmul.f32 %v158_v0, %v105_v3 }
 0x10b   :  { %v99_v63 = vsub.f32 1.5, %v98_v60  ;;  %v115_v8 = vmul.f32 %v158_v0, %v107_v1 }
 0x10c   :  { %v79_v2 = vsub.f32 1.5, %v78_v62  ;;  %v121_v17 = vadd.f32 %v159_v7, %v113_v11 }
 0x10d   :  { %v100_v4 = vmul.f32 %v167_v50, %v99_v63  ;;  %v123_v15 = vadd.f32 %v159_v7, %v115_v8 }
 0x10e   :  { %v80_v5 = vmul.f32 %v169_v52, %v79_v2 }
 0x10f   :  { %v104_v6 = vsel %vm103_vm10, %v167_v50, %v100_v4 }
 0x110   :  { %v108_v9 = vmul.f32 %v104_v6, %v205_v25  ;;  %v84_v10 = vsel %vm83_vm12, %v169_v52, %v80_v5 }
 0x111   :  { %v106_v12 = vmul.f32 %v84_v10, %v207_v26 }
 0x112   :  { %v116_v13 = vmul.f32 %v158_v0, %v108_v9 }
 0x113   :  { %v114_v14 = vmul.f32 %v158_v0, %v106_v12 }
 0x114   :  { %v124_v16 = vadd.f32 %v159_v7, %v116_v13 }
 0x115   :  { %v122_v18 = vadd.f32 %v159_v7, %v114_v14 }
 0x116   :  { %v153_v19 = vpack.c.bf16 %v124_v16, %v123_v15 }
 0x117   :  { %v148_v20 = vpack.c.bf16 %v122_v18, %v121_v17 }
 0x118   :  { %156 = vst [vmem:[%s232_s3 + $0x8] sm:$0xff] %v153_v19  }
 0x119   :  { %149 = vst [vmem:[%s232_s3] sm:$0xff] %v148_v20  }

// kernel: _lambda_.39
= control target key start
LH: loop header
LB: loop body
LE: loop exit
PB: predicated region body
PF: predicated region fallthrough
CT: control target
= control target key end

     0   :  { %10 = vsyncpa [#allocation4], 0  ;;  %s592_s21 = smov [#allocation3]   ;;  %s593_s23 = smov 128   ;;  %s728_s0 = inlined_call_operand.vmem [shape: bf16[32,128], index: 0, kind: input, shape index: {}]   ;;  %s729_s1 = inlined_call_operand.hbm [shape: bf16[128,256], index: 1, kind: input, shape index: {}]   ;;  %s730_s2 = inlined_call_operand.vmem [shape: f32[1,256], index: 2, kind: input, shape index: {}]   ;;  %s731_s3 = inlined_call_operand.vmem [shape: f32[1,128], index: 3, kind: input, shape index: {}]   ;;  %s732_s4 = inlined_call_operand.vmem [shape: f32[1,128], index: 4, kind: input, shape index: {}]   ;;  %s733_s5 = inlined_call_operand.vmem [shape: bf16[32,256], index: 5, kind: output, shape index: {}]  }
   0x1   :  { %s17_s20 = sshll.u32 %s729_s1, 4  ;;  %s19_s22 = sshll.u32 %s592_s21, 4  ;;  %s18_s20 = int_to_ptr.hbm [resolvable:$true] %s17_s20  ;;  %s20_s22 = int_to_ptr.vmem [resolvable:$true] %s19_s22 }
   0x2   :  { %s594_s24 = smov 8  }
   0x3   :  { %25 = dma.hbm_to_vmem [thread:$0]  %s18_s20, 2048, %s20_s22, [#allocation4], %s593_s23, %s593_s23, %s594_s24  }
   0x4   :  { %590 = dma.done.wait [#allocation4], 2048  }
   0x5   :  { %591 = vsyncadd [#allocation4], 4294965248  ;;  %v517_v0 = vld [vmem:[%s728_s0 + $0x8] sm:$0xff]   ;;  %v510_v1 = vld [vmem:[%s728_s0] sm:$0xff]   ;;  %v595_v6 = vmov 128.0  }
   0x6   :  { %v515_v2 = vunpack.c.l.bf16 %v517_v0  ;;  %v511_v3 = vunpack.c.l.bf16 %v510_v1  ;;  %v516_v4 = vunpack.c.h.bf16 %v517_v0  ;;  %v512_v5 = vunpack.c.h.bf16 %v510_v1  ;;  %v487_v29 = vld [vmem:[#allocation3 + $0x70] sm:$0xf]  ;;  %v508_v30 = vld [vmem:[#allocation3 + $0x74] sm:$0xf0]  ;;  %v507_v31 = vld [vmem:[#allocation3 + $0x74] sm:$0xf] }
   0x7   :  { %540 = vrcp.f32 %v595_v6  ;;  %v488_v32 = vor.u32 %v508_v30, %v487_v29  ;;  %v489_v33 = vld [vmem:[#allocation3 + $0x78] sm:$0xf0]  ;;  %v479_v35 = vld [vmem:[#allocation3 + $0x60] sm:$0xf]  ;;  %v506_v36 = vld [vmem:[#allocation3 + $0x64] sm:$0xf0] }
   0x8   :  { %60 = vadd.xlane.f32.xlu0 %v515_v2  ;;  %56 = vadd.xlane.f32.xlu1 %v511_v3  ;;  %v492_v34 = vor.u32 %v507_v31, %v489_v33  ;;  %v505_v37 = vld [vmem:[#allocation3 + $0x64] sm:$0xf]  ;;  %v480_v38 = vor.u32 %v506_v36, %v479_v35  ;;  %v481_v39 = vld [vmem:[#allocation3 + $0x68] sm:$0xf0]  ;;  %v471_v41 = vld [vmem:[#allocation3 + $0x50] sm:$0xf] }
   0x9   :  { %265 = vmatpush.bf16.msra.mxu0 %v488_v32  ;;  %518 = vmatpush.bf16.msra.mxu2 %v488_v32  ;;  %v484_v40 = vor.u32 %v505_v37, %v481_v39  ;;  %v504_v42 = vld [vmem:[#allocation3 + $0x54] sm:$0xf0]  ;;  %v503_v43 = vld [vmem:[#allocation3 + $0x54] sm:$0xf]  ;;  %v473_v45 = vld [vmem:[#allocation3 + $0x58] sm:$0xf0] }
   0xa   :  { %284 = vmatpush.bf16.msra.mxu1 %v492_v34  ;;  %526 = vmatpush.bf16.msra.mxu3 %v492_v34  ;;  %v472_v44 = vor.u32 %v504_v42, %v471_v41  ;;  %v476_v46 = vor.u32 %v503_v43, %v473_v45  ;;  %v463_v47 = vld [vmem:[#allocation3 + $0x40] sm:$0xf]  ;;  %v502_v48 = vld [vmem:[#allocation3 + $0x44] sm:$0xf0]  ;;  %v501_v49 = vld [vmem:[#allocation3 + $0x44] sm:$0xf] }
   0xb   :  { %v464_v50 = vor.u32 %v502_v48, %v463_v47  ;;  %v465_v51 = vld [vmem:[#allocation3 + $0x48] sm:$0xf0]  ;;  %v455_v53 = vld [vmem:[#allocation3 + $0x30] sm:$0xf]  ;;  %v500_v54 = vld [vmem:[#allocation3 + $0x34] sm:$0xf0] }
   0xc   :  { %v468_v52 = vor.u32 %v501_v49, %v465_v51  ;;  %v499_v55 = vld [vmem:[#allocation3 + $0x34] sm:$0xf]  ;;  %v456_v56 = vor.u32 %v500_v54, %v455_v53  ;;  %v457_v57 = vld [vmem:[#allocation3 + $0x38] sm:$0xf0]  ;;  %v447_v59 = vld [vmem:[#allocation3 + $0x20] sm:$0xf] }
   0xd   :  { %v541_v7 = vpop.eup %540  ;;  %266 = vmatpush.bf16.msra.mxu0 %v480_v38  ;;  %519 = vmatpush.bf16.msra.mxu2 %v480_v38  ;;  %v460_v58 = vor.u32 %v499_v55, %v457_v57  ;;  %v498_v60 = vld [vmem:[#allocation3 + $0x24] sm:$0xf0]  ;;  %v497_v61 = vld [vmem:[#allocation3 + $0x24] sm:$0xf]  ;;  %v449_v63 = vld [vmem:[#allocation3 + $0x28] sm:$0xf0] }
   0xe   :  { %v65_v8 = vmul.f32 128.0, %v541_v7  ;;  %vm69_vm0 = vweird.f32 %v541_v7  ;;  %285 = vmatpush.bf16.msra.mxu1 %v484_v40  ;;  %527 = vmatpush.bf16.msra.mxu3 %v484_v40  ;;  %v448_v62 = vor.u32 %v498_v60, %v447_v59  ;;  %v452_v0 = vor.u32 %v497_v61, %v449_v63  ;;  %v439_v1 = vld [vmem:[#allocation3 + $0x10] sm:$0xf]  ;;  %v431_v6 = vld [vmem:[#allocation3] sm:$0xf] }
   0xf   :  { %v538_v53 = vld [vmem:[%s731_s3] ss:$0 sm:$0xff] }
  0x10   :  { %62 = vadd.xlane.f32.xlu0 %v516_v4  ;;  %58 = vadd.xlane.f32.xlu1 %v512_v5  ;;  %v66_v9 = vsub.f32 1.0, %v65_v8  ;;  %v539_v60 = vld [vmem:[%s732_s4] ss:$0 sm:$0xff] }
  0x11   :  { %267 = vmatpush.bf16.msra.mxu0 %v472_v44  ;;  %520 = vmatpush.bf16.msra.mxu2 %v472_v44 }
  0x12   :  { %v67_v10 = vmul.f32 %v541_v7, %v66_v9  ;;  %286 = vmatpush.bf16.msra.mxu1 %v476_v46  ;;  %528 = vmatpush.bf16.msra.mxu3 %v476_v46  ;;  %v493_v9 = vld [vmem:[#allocation3 + $0x4] sm:$0xf] }
  0x14   :  { %v68_v11 = vadd.f32 %v541_v7, %v67_v10  ;;  %v433_v10 = vld [vmem:[#allocation3 + $0x8] sm:$0xf0] }
  0x15   :  { %268 = vmatpush.bf16.msra.mxu0 %v464_v50  ;;  %521 = vmatpush.bf16.msra.mxu2 %v464_v50 }
  0x16   :  { %v635_v12 = vsel %vm69_vm0, %v541_v7, %v68_v11  ;;  %287 = vmatpush.bf16.msra.mxu1 %v468_v52  ;;  %529 = vmatpush.bf16.msra.mxu3 %v468_v52  ;;  %v494_v7 = vld [vmem:[#allocation3 + $0x4] sm:$0xf0] }
  0x19   :  { %269 = vmatpush.bf16.msra.mxu0 %v456_v56  ;;  %522 = vmatpush.bf16.msra.mxu2 %v456_v56 }
  0x1a   :  { %288 = vmatpush.bf16.msra.mxu1 %v460_v58  ;;  %530 = vmatpush.bf16.msra.mxu3 %v460_v58 }
  0x1d   :  { %270 = vmatpush.bf16.msra.mxu0 %v448_v62  ;;  %523 = vmatpush.bf16.msra.mxu2 %v448_v62 }
  0x1e   :  { %289 = vmatpush.bf16.msra.mxu1 %v452_v0  ;;  %531 = vmatpush.bf16.msra.mxu3 %v452_v0 }
  0x7b   :  { %v61_v13 = vpop.xlane.xlu0 %60  ;;  %v57_v14 = vpop.xlane.xlu1 %56 }
  0x7c   :  { %v73_v15 = vmul.f32 %v635_v12, %v61_v13  ;;  %v71_v16 = vmul.f32 %v635_v12, %v57_v14 }
  0x7e   :  { %v639_v17 = vsub.f32 %v511_v3, %v71_v16  ;;  %v641_v18 = vsub.f32 %v515_v2, %v73_v15  ;;  %v496_v2 = vld [vmem:[#allocation3 + $0x14] sm:$0xf0]  ;;  %v495_v3 = vld [vmem:[#allocation3 + $0x14] sm:$0xf]  ;;  %v432_v16 = vor.u32 %v494_v7, %v431_v6 }
  0x80   :  { %v81_v19 = vmul.f32 %v641_v18, %v641_v18  ;;  %v79_v20 = vmul.f32 %v639_v17, %v639_v17 }
  0x82   :  { %87 = vadd.xlane.f32.xlu2 %v81_v19  ;;  %83 = vadd.xlane.f32.xlu0 %v79_v20  ;;  %v436_v19 = vor.u32 %v493_v9, %v433_v10 }
  0x83   :  { %v63_v21 = vpop.xlane.xlu0 %62  ;;  %v59_v22 = vpop.xlane.xlu1 %58 }
  0x84   :  { %v74_v23 = vmul.f32 %v635_v12, %v63_v21  ;;  %v72_v24 = vmul.f32 %v635_v12, %v59_v22 }
  0x86   :  { %v649_v25 = vsub.f32 %v516_v4, %v74_v23  ;;  %v651_v26 = vsub.f32 %v512_v5, %v72_v24  ;;  %v440_v4 = vor.u32 %v496_v2, %v439_v1  ;;  %v441_v5 = vld [vmem:[#allocation3 + $0x18] sm:$0xf0] }
  0x87   :  { %v444_v8 = vor.u32 %v495_v3, %v441_v5 }
  0x88   :  { %v82_v27 = vmul.f32 %v649_v25, %v649_v25  ;;  %v80_v28 = vmul.f32 %v651_v26, %v651_v26  ;;  %271 = vmatpush.bf16.msra.mxu0 %v440_v4  ;;  %524 = vmatpush.bf16.msra.mxu2 %v440_v4 }
  0x89   :  { %290 = vmatpush.bf16.msra.mxu1 %v444_v8  ;;  %532 = vmatpush.bf16.msra.mxu3 %v444_v8 }
  0x8a   :  { %89 = vadd.xlane.f32.xlu2 %v82_v27  ;;  %85 = vadd.xlane.f32.xlu1 %v80_v28 }
  0x8c   :  { %272 = vmatpush.bf16.msra.mxu0 %v432_v16  ;;  %525 = vmatpush.bf16.msra.mxu2 %v432_v16 }
  0x8d   :  { %291 = vmatpush.bf16.msra.mxu1 %v436_v19  ;;  %533 = vmatpush.bf16.msra.mxu3 %v436_v19 }
  0xf5   :  { %v88_v11 = vpop.xlane.xlu2 %87  ;;  %v84_v13 = vpop.xlane.xlu0 %83 }
  0xf6   :  { %v93_v14 = vmul.f32 %v88_v11, %v635_v12  ;;  %v91_v15 = vmul.f32 %v84_v13, %v635_v12 }
  0xf8   :  { %v97_v20 = vadd.f32 1e-06, %v93_v14  ;;  %v95_v21 = vadd.f32 1e-06, %v91_v15 }
  0xfa   :  { %542 = vrsqrt.f32 %v97_v20  ;;  %vm105_vm2 = vweird.f32 %v95_v21  ;;  %vm125_vm4 = vweird.f32 %v97_v20 }
  0xfb   :  { %544 = vrsqrt.f32 %v95_v21 }
  0xfd   :  { %v90_v22 = vpop.xlane.xlu2 %89  ;;  %v86_v23 = vpop.xlane.xlu1 %85 }
  0xfe   :  { %v94_v24 = vmul.f32 %v90_v22, %v635_v12  ;;  %v92_v27 = vmul.f32 %v86_v23, %v635_v12 }
 0x100   :  { %v543_v28 = vpop.eup %542  ;;  %v98_v29 = vadd.f32 1e-06, %v94_v24  ;;  %v96_v30 = vadd.f32 1e-06, %v92_v27 }
 0x101   :  { %v545_v31 = vpop.eup %544  ;;  %v120_v32 = vmul.f32 %v543_v28, %v97_v20  ;;  %vm126_vm1 = vweird.f32 %v543_v28 }
 0x102   :  { %v100_v33 = vmul.f32 %v545_v31, %v95_v21  ;;  %546 = vrsqrt.f32 %v98_v29  ;;  %vm106_vm3 = vweird.f32 %v545_v31  ;;  %vm127_vm5 = vmor %vm125_vm4, %vm126_vm1  ;;  %vm115_vm8 = vweird.f32 %v96_v30 }
 0x103   :  { %v121_v34 = vmul.f32 %v543_v28, %v120_v32  ;;  %548 = vrsqrt.f32 %v96_v30  ;;  %vm107_vm6 = vmor %vm105_vm2, %vm106_vm3  ;;  %vm135_vm10 = vweird.f32 %v98_v29 }
 0x104   :  { %v101_v35 = vmul.f32 %v545_v31, %v100_v33 }
 0x105   :  { %v122_v36 = vmul.f32 0.5, %v121_v34 }
 0x106   :  { %v102_v37 = vmul.f32 0.5, %v101_v35 }
 0x107   :  { %v123_v38 = vsub.f32 1.5, %v122_v36 }
 0x108   :  { %v547_v39 = vpop.eup %546  ;;  %v103_v40 = vsub.f32 1.5, %v102_v37 }
 0x109   :  { %v549_v41 = vpop.eup %548  ;;  %v124_v42 = vmul.f32 %v543_v28, %v123_v38  ;;  %v130_v43 = vmul.f32 %v547_v39, %v98_v29  ;;  %vm136_vm7 = vweird.f32 %v547_v39 }
 0x10a   :  { %v104_v12 = vmul.f32 %v545_v31, %v103_v40  ;;  %v110_v44 = vmul.f32 %v549_v41, %v96_v30  ;;  %vm116_vm9 = vweird.f32 %v549_v41  ;;  %vm137_vm11 = vmor %vm135_vm10, %vm136_vm7 }
 0x10b   :  { %v131_v45 = vmul.f32 %v547_v39, %v130_v43  ;;  %v128_v48 = vsel %vm127_vm5, %v543_v28, %v124_v42  ;;  %vm117_vm12 = vmor %vm115_vm8, %vm116_vm9 }
 0x10c   :  { %v111_v46 = vmul.f32 %v549_v41, %v110_v44  ;;  %v108_v50 = vsel %vm107_vm6, %v545_v31, %v104_v12  ;;  %v141_v54 = vmul.f32 %v128_v48, %v641_v18 }
 0x10d   :  { %v132_v47 = vmul.f32 0.5, %v131_v45  ;;  %v139_v56 = vmul.f32 %v108_v50, %v639_v17 }
 0x10e   :  { %v112_v49 = vmul.f32 0.5, %v111_v46  ;;  %v149_v62 = vmul.f32 %v538_v53, %v141_v54 }
 0x10f   :  { %v133_v51 = vsub.f32 1.5, %v132_v47  ;;  %v147_v0 = vmul.f32 %v538_v53, %v139_v56 }
 0x110   :  { %v113_v52 = vsub.f32 1.5, %v112_v49  ;;  %v157_v2 = vadd.f32 %v539_v60, %v149_v62 }
 0x111   :  { %v134_v55 = vmul.f32 %v547_v39, %v133_v51  ;;  %v155_v17 = vadd.f32 %v539_v60, %v147_v0 }
 0x112   :  { %v114_v57 = vmul.f32 %v549_v41, %v113_v52 }
 0x113   :  { %v138_v58 = vsel %vm137_vm11, %v547_v39, %v134_v55 }
 0x114   :  { %v118_v59 = vsel %vm117_vm12, %v549_v41, %v114_v57  ;;  %v142_v61 = vmul.f32 %v138_v58, %v649_v25  ;;  %v330_v25 = vld [vmem:[%s730_s2] sm:$0x3] }
 0x115   :  { %v140_v63 = vmul.f32 %v118_v59, %v651_v26  ;;  %v332_v7 = vperm.slane %v330_v25, 0  ;;  %v333_v8 = vperm.slane %v330_v25, 1 }
 0x116   :  { %v150_v18 = vmul.f32 %v538_v53, %v142_v61 }
 0x117   :  { %v148_v1 = vmul.f32 %v538_v53, %v140_v63 }
 0x118   :  { %v158_v3 = vadd.f32 %v539_v60, %v150_v18 }
 0x119   :  { %v156_v4 = vadd.f32 %v539_v60, %v148_v1 }
 0x11a   :  { %v168_v5 = vpack.c.bf16 %v158_v3, %v157_v2 }
 0x11b   :  { %v167_v6 = vpack.c.bf16 %v156_v4, %v155_v17 }
 0x11c   :  { %278 = vmatmul.bf16.vlgmr.msra.gmra.mxu2 %v168_v5  ;;  %297 = vmatmul.bf16.vlgmr.msra.gmra.mxu3 %v168_v5 }
 0x11d   :  { %273 = vmatmul.bf16.vlgmr.msra.gmra.mxu0 %v167_v6  ;;  %292 = vmatmul.bf16.vlgmr.msra.gmra.mxu1 %v167_v6 }
 0x19a   :  { %v274_v26 = vpop.f32.mrf.mxu0  ;;  %v293_v9 = vpop.f32.mrf.mxu1 }
 0x19b   :  { %v674_v10 = vadd.f32 %v332_v7, %v274_v26  ;;  %v676_v11 = vadd.f32 %v333_v8, %v293_v9 }
 0x19d   :  { %v344_v13 = vmul.f32 %v674_v10, %v674_v10  ;;  %v345_v14 = vmul.f32 %v676_v11, %v676_v11 }
 0x19f   :  { %v352_v15 = vmul.f32 %v344_v13, %v674_v10  ;;  %v353_v16 = vmul.f32 %v345_v14, %v676_v11  ;;  %v279_v19 = vpop.f32.mrf.mxu2  ;;  %v298_v20 = vpop.f32.mrf.mxu3 }
 0x1a0   :  { %v684_v21 = vadd.f32 %v332_v7, %v279_v19  ;;  %v686_v22 = vadd.f32 %v333_v8, %v298_v20 }
 0x1a1   :  { %v360_v23 = vmul.f32 0.044715, %v352_v15  ;;  %v361_v24 = vmul.f32 0.044715, %v353_v16 }
 0x1a2   :  { %v348_v27 = vmul.f32 %v684_v21, %v684_v21  ;;  %v349_v28 = vmul.f32 %v686_v22, %v686_v22  ;;  %v276_v29 = vpop.f32.mrf.mxu0  ;;  %v295_v30 = vpop.f32.mrf.mxu1 }
 0x1a3   :  { %v368_v31 = vadd.f32 %v360_v23, %v674_v10  ;;  %v369_v32 = vadd.f32 %v361_v24, %v676_v11  ;;  %v694_v33 = vadd.f32 %v332_v7, %v276_v29  ;;  %v696_v34 = vadd.f32 %v333_v8, %v295_v30 }
 0x1a4   :  { %v356_v35 = vmul.f32 %v348_v27, %v684_v21  ;;  %v357_v36 = vmul.f32 %v349_v28, %v686_v22 }
 0x1a5   :  { %v376_v37 = vmul.f32 0.7978846, %v368_v31  ;;  %v377_v38 = vmul.f32 0.7978846, %v369_v32  ;;  %v346_v39 = vmul.f32 %v694_v33, %v694_v33  ;;  %v347_v40 = vmul.f32 %v696_v34, %v696_v34 }
 0x1a6   :  { %v364_v41 = vmul.f32 0.044715, %v356_v35  ;;  %v365_v42 = vmul.f32 0.044715, %v357_v36 }
 0x1a7   :  { %550 = vtanh.f32 %v376_v37  ;;  %v354_v43 = vmul.f32 %v346_v39, %v694_v33  ;;  %v355_v12 = vmul.f32 %v347_v40, %v696_v34  ;;  %v281_v44 = vpop.f32.mrf.mxu2  ;;  %v300_v45 = vpop.f32.mrf.mxu3 }
 0x1a8   :  { %552 = vtanh.f32 %v377_v38  ;;  %v372_v46 = vadd.f32 %v364_v41, %v684_v21  ;;  %v373_v47 = vadd.f32 %v365_v42, %v686_v22  ;;  %v342_v48 = vadd.f32 %v332_v7, %v281_v44 }
 0x1a9   :  { %v362_v49 = vmul.f32 0.044715, %v354_v43  ;;  %v363_v50 = vmul.f32 0.044715, %v355_v12  ;;  %v343_v51 = vadd.f32 %v333_v8, %v300_v45 }
 0x1aa   :  { %v380_v52 = vmul.f32 0.7978846, %v372_v46  ;;  %v381_v53 = vmul.f32 0.7978846, %v373_v47  ;;  %v350_v54 = vmul.f32 %v342_v48, %v342_v48 }
 0x1ab   :  { %v370_v55 = vadd.f32 %v362_v49, %v694_v33  ;;  %v371_v56 = vadd.f32 %v363_v50, %v696_v34  ;;  %v351_v57 = vmul.f32 %v343_v51, %v343_v51 }
 0x1ac   :  { %554 = vtanh.f32 %v380_v52  ;;  %v358_v58 = vmul.f32 %v350_v54, %v342_v48 }
 0x1ad   :  { %v551_v59 = vpop.eup %550  ;;  %556 = vtanh.f32 %v381_v53  ;;  %v378_v60 = vmul.f32 0.7978846, %v370_v55  ;;  %v379_v61 = vmul.f32 0.7978846, %v371_v56  ;;  %v359_v62 = vmul.f32 %v351_v57, %v343_v51 }
 0x1ae   :  { %v553_v63 = vpop.eup %552  ;;  %v392_v0 = vadd.f32 1.0, %v551_v59  ;;  %v366_v18 = vmul.f32 0.044715, %v358_v58 }
 0x1af   :  { %v393_v1 = vadd.f32 1.0, %v553_v63  ;;  %558 = vtanh.f32 %v378_v60  ;;  %v367_v2 = vmul.f32 0.044715, %v359_v62 }
 0x1b0   :  { %v400_v3 = vmul.f32 0.5, %v392_v0  ;;  %560 = vtanh.f32 %v379_v61  ;;  %v374_v17 = vadd.f32 %v366_v18, %v342_v48 }
 0x1b1   :  { %v401_v4 = vmul.f32 0.5, %v393_v1  ;;  %v375_v5 = vadd.f32 %v367_v2, %v343_v51 }
 0x1b2   :  { %v555_v6 = vpop.eup %554  ;;  %v408_v25 = vmul.f32 %v400_v3, %v674_v10  ;;  %v382_v7 = vmul.f32 0.7978846, %v374_v17 }
 0x1b3   :  { %v557_v8 = vpop.eup %556  ;;  %v409_v26 = vmul.f32 %v401_v4, %v676_v11  ;;  %v396_v9 = vadd.f32 1.0, %v555_v6  ;;  %v383_v13 = vmul.f32 0.7978846, %v375_v5 }
 0x1b4   :  { %v397_v14 = vadd.f32 1.0, %v557_v8  ;;  %562 = vtanh.f32 %v382_v7 }
 0x1b5   :  { %v559_v15 = vpop.eup %558  ;;  %v416_v16 = vpack.c.bf16 %v409_v26, %v408_v25  ;;  %v404_v19 = vmul.f32 0.5, %v396_v9  ;;  %564 = vtanh.f32 %v383_v13 }
 0x1b6   :  { %v561_v20 = vpop.eup %560  ;;  %v405_v23 = vmul.f32 0.5, %v397_v14  ;;  %v394_v24 = vadd.f32 1.0, %v559_v15 }
 0x1b7   :  { %420 = vst [vmem:[%s733_s5] sm:$0xff] %v416_v16  ;;  %v412_v10 = vmul.f32 %v404_v19, %v684_v21  ;;  %v395_v27 = vadd.f32 1.0, %v561_v20 }
 0x1b8   :  { %v413_v11 = vmul.f32 %v405_v23, %v686_v22  ;;  %v402_v28 = vmul.f32 0.5, %v394_v24 }
 0x1b9   :  { %v403_v29 = vmul.f32 0.5, %v395_v27 }
 0x1ba   :  { %v563_v30 = vpop.eup %562  ;;  %v418_v31 = vpack.c.bf16 %v413_v11, %v412_v10  ;;  %v410_v32 = vmul.f32 %v402_v28, %v694_v33 }
 0x1bb   :  { %v565_v35 = vpop.eup %564  ;;  %v411_v36 = vmul.f32 %v403_v29, %v696_v34  ;;  %v398_v37 = vadd.f32 1.0, %v563_v30 }
 0x1bc   :  { %422 = vst [vmem:[%s733_s5 + $0x10] sm:$0xff] %v418_v31  ;;  %v399_v38 = vadd.f32 1.0, %v565_v35 }
 0x1bd   :  { %v417_v39 = vpack.c.bf16 %v411_v36, %v410_v32  ;;  %v406_v21 = vmul.f32 0.5, %v398_v37 }
 0x1be   :  { %v407_v40 = vmul.f32 0.5, %v399_v38 }
 0x1bf   :  { %421 = vst [vmem:[%s733_s5 + $0x8] sm:$0xff] %v417_v39  ;;  %v414_v22 = vmul.f32 %v406_v21, %v342_v48 }
 0x1c0   :  { %v415_v41 = vmul.f32 %v407_v40, %v343_v51 }
 0x1c2   :  { %v419_v42 = vpack.c.bf16 %v415_v41, %v414_v22 }
 0x1c4   :  { %423 = vst [vmem:[%s733_s5 + $0x18] sm:$0xff] %v419_v42 }
 0x1c5   :  { %428 = vsyncpa [#allocation4], 1 }

// kernel: _lambda_.42
= control target key start
LH: loop header
LB: loop body
LE: loop exit
PB: predicated region body
PF: predicated region fallthrough
CT: control target
= control target key end

     0   :  { %10 = vsyncpa [#allocation4], 0  ;;  %s528_s21 = smov [#allocation3]   ;;  %s529_s23 = smov 192   ;;  %s605_s0 = inlined_call_operand.vmem [shape: bf16[16,128], index: 0, kind: input, shape index: {}]   ;;  %s606_s1 = inlined_call_operand.hbm [shape: bf16[128,384], index: 1, kind: input, shape index: {}]   ;;  %s607_s2 = inlined_call_operand.vmem [shape: f32[1,384], index: 2, kind: input, shape index: {}]   ;;  %s608_s3 = inlined_call_operand.vmem [shape: f32[1,128], index: 3, kind: input, shape index: {}]   ;;  %s609_s4 = inlined_call_operand.vmem [shape: f32[1,128], index: 4, kind: input, shape index: {}]   ;;  %s610_s5 = inlined_call_operand.vmem [shape: bf16[16,384], index: 5, kind: output, shape index: {}]  }
   0x1   :  { %s17_s20 = sshll.u32 %s606_s1, 4  ;;  %s19_s22 = sshll.u32 %s528_s21, 4  ;;  %s18_s20 = int_to_ptr.hbm [resolvable:$true] %s17_s20  ;;  %s20_s22 = int_to_ptr.vmem [resolvable:$true] %s19_s22 }
   0x2   :  { %s530_s24 = smov 12  }
   0x3   :  { %25 = dma.hbm_to_vmem [thread:$0]  %s18_s20, 3072, %s20_s22, [#allocation4], %s529_s23, %s529_s23, %s530_s24  }
   0x4   :  { %526 = dma.done.wait [#allocation4], 3072  }
   0x5   :  { %527 = vsyncadd [#allocation4], 4294964224  ;;  %v487_v0 = vld [vmem:[%s605_s0] sm:$0xff]   ;;  %v531_v3 = vmov 128.0   ;;  %v452_v18 = vld [vmem:[#allocation3 + $0xa8] sm:$0xf] }
   0x6   :  { %v488_v1 = vunpack.c.l.bf16 %v487_v0  ;;  %v489_v2 = vunpack.c.h.bf16 %v487_v0  ;;  %496 = vrcp.f32 %v531_v3  ;;  %v484_v19 = vld [vmem:[#allocation3 + $0xb0] sm:$0xf0]  ;;  %v483_v20 = vld [vmem:[#allocation3 + $0xac] sm:$0xf]  ;;  %v454_v22 = vld [vmem:[#allocation3 + $0xb4] sm:$0xf0] }
   0x7   :  { %v453_v21 = vor.u32 %v484_v19, %v452_v18  ;;  %v460_v23 = vld [vmem:[#allocation3 + $0xb0] sm:$0xf]  ;;  %v485_v24 = vld [vmem:[#allocation3 + $0xb8] sm:$0xf0]  ;;  %v457_v25 = vor.u32 %v483_v20, %v454_v22  ;;  %v480_v29 = vld [vmem:[#allocation3 + $0x94] sm:$0xf] }
   0x8   :  { %50 = vadd.xlane.f32.xlu0 %v488_v1  ;;  %v461_v26 = vor.u32 %v485_v24, %v460_v23  ;;  %v440_v27 = vld [vmem:[#allocation3 + $0x90] sm:$0xf]  ;;  %v481_v28 = vld [vmem:[#allocation3 + $0x98] sm:$0xf0]  ;;  %v442_v31 = vld [vmem:[#allocation3 + $0x9c] sm:$0xf0] }
   0x9   :  { %276 = vmatpush.bf16.msra.mxu0 %v453_v21  ;;  %290 = vmatpush.bf16.msra.mxu1 %v457_v25  ;;  %v441_v30 = vor.u32 %v481_v28, %v440_v27  ;;  %v448_v32 = vld [vmem:[#allocation3 + $0x98] sm:$0xf]  ;;  %v482_v33 = vld [vmem:[#allocation3 + $0xa0] sm:$0xf0]  ;;  %v445_v34 = vor.u32 %v480_v29, %v442_v31  ;;  %v477_v38 = vld [vmem:[#allocation3 + $0x7c] sm:$0xf] }
   0xa   :  { %304 = vmatpush.bf16.msra.mxu2 %v461_v26  ;;  %v449_v35 = vor.u32 %v482_v33, %v448_v32  ;;  %v428_v36 = vld [vmem:[#allocation3 + $0x78] sm:$0xf]  ;;  %v478_v37 = vld [vmem:[#allocation3 + $0x80] sm:$0xf0]  ;;  %v430_v40 = vld [vmem:[#allocation3 + $0x84] sm:$0xf0] }
   0xb   :  { %v429_v39 = vor.u32 %v478_v37, %v428_v36  ;;  %v436_v41 = vld [vmem:[#allocation3 + $0x80] sm:$0xf]  ;;  %v479_v42 = vld [vmem:[#allocation3 + $0x88] sm:$0xf0]  ;;  %v433_v43 = vor.u32 %v477_v38, %v430_v40  ;;  %v474_v47 = vld [vmem:[#allocation3 + $0x64] sm:$0xf] }
   0xc   :  { %v497_v4 = vpop.eup %496  ;;  %v437_v44 = vor.u32 %v479_v42, %v436_v41  ;;  %v416_v45 = vld [vmem:[#allocation3 + $0x60] sm:$0xf]  ;;  %v475_v46 = vld [vmem:[#allocation3 + $0x68] sm:$0xf0]  ;;  %v418_v49 = vld [vmem:[#allocation3 + $0x6c] sm:$0xf0] }
   0xd   :  { %v55_v5 = vmul.f32 128.0, %v497_v4  ;;  %vm59_vm0 = vweird.f32 %v497_v4  ;;  %277 = vmatpush.bf16.msra.mxu0 %v441_v30  ;;  %291 = vmatpush.bf16.msra.mxu1 %v445_v34  ;;  %v417_v48 = vor.u32 %v475_v46, %v416_v45  ;;  %v424_v50 = vld [vmem:[#allocation3 + $0x68] sm:$0xf]  ;;  %v476_v51 = vld [vmem:[#allocation3 + $0x70] sm:$0xf0]  ;;  %v421_v52 = vor.u32 %v474_v47, %v418_v49 }
   0xe   :  { %305 = vmatpush.bf16.msra.mxu2 %v449_v35  ;;  %v425_v53 = vor.u32 %v476_v51, %v424_v50  ;;  %v404_v54 = vld [vmem:[#allocation3 + $0x48] sm:$0xf]  ;;  %v472_v55 = vld [vmem:[#allocation3 + $0x50] sm:$0xf0]  ;;  %v471_v56 = vld [vmem:[#allocation3 + $0x4c] sm:$0xf] }
   0xf   :  { %v56_v6 = vsub.f32 1.0, %v55_v5  ;;  %v405_v57 = vor.u32 %v472_v55, %v404_v54  ;;  %v406_v58 = vld [vmem:[#allocation3 + $0x54] sm:$0xf0]  ;;  %v412_v59 = vld [vmem:[#allocation3 + $0x50] sm:$0xf] }
  0x10   :  { %52 = vadd.xlane.f32.xlu0 %v489_v2  ;;  %v473_v60 = vld [vmem:[#allocation3 + $0x58] sm:$0xf0]  ;;  %v409_v61 = vor.u32 %v471_v56, %v406_v58  ;;  %v392_v63 = vld [vmem:[#allocation3 + $0x30] sm:$0xf]  ;;  %v394_v3 = vld [vmem:[#allocation3 + $0x3c] sm:$0xf0] }
  0x11   :  { %v57_v7 = vmul.f32 %v497_v4, %v56_v6  ;;  %278 = vmatpush.bf16.msra.mxu0 %v429_v39  ;;  %292 = vmatpush.bf16.msra.mxu1 %v433_v43  ;;  %v413_v62 = vor.u32 %v473_v60, %v412_v59  ;;  %v469_v0 = vld [vmem:[#allocation3 + $0x38] sm:$0xf0]  ;;  %v470_v5 = vld [vmem:[#allocation3 + $0x40] sm:$0xf0]  ;;  %v368_v20 = vld [vmem:[#allocation3] sm:$0xf] }
  0x12   :  { %306 = vmatpush.bf16.msra.mxu2 %v437_v44  ;;  %v463_v21 = vld [vmem:[#allocation3 + $0x8] sm:$0xf0]  ;;  %v462_v22 = vld [vmem:[#allocation3 + $0x4] sm:$0xf]  ;;  %v370_v25 = vld [vmem:[#allocation3 + $0xc] sm:$0xf0] }
  0x13   :  { %v58_v8 = vadd.f32 %v497_v4, %v57_v7  ;;  %v369_v24 = vor.u32 %v463_v21, %v368_v20  ;;  %v376_v26 = vld [vmem:[#allocation3 + $0x8] sm:$0xf]  ;;  %v464_v27 = vld [vmem:[#allocation3 + $0x10] sm:$0xf0]  ;;  %v373_v29 = vor.u32 %v462_v22, %v370_v25  ;;  %v494_v47 = vld [vmem:[%s608_s3] ss:$0 sm:$0xff] }
  0x14   :  { %v377_v30 = vor.u32 %v464_v27, %v376_v26 }
  0x15   :  { %v568_v9 = vsel %vm59_vm0, %v497_v4, %v58_v8  ;;  %279 = vmatpush.bf16.msra.mxu0 %v417_v48  ;;  %293 = vmatpush.bf16.msra.mxu1 %v421_v52  ;;  %v400_v4 = vld [vmem:[#allocation3 + $0x38] sm:$0xf]  ;;  %v495_v52 = vld [vmem:[%s609_s4] ss:$0 sm:$0xff] }
  0x16   :  { %307 = vmatpush.bf16.msra.mxu2 %v425_v53  ;;  %v401_v7 = vor.u32 %v470_v5, %v400_v4  ;;  %v380_v8 = vld [vmem:[#allocation3 + $0x18] sm:$0xf] }
  0x19   :  { %280 = vmatpush.bf16.msra.mxu0 %v405_v57  ;;  %294 = vmatpush.bf16.msra.mxu1 %v409_v61 }
  0x1a   :  { %308 = vmatpush.bf16.msra.mxu2 %v413_v62 }
  0x1e   :  { %309 = vmatpush.bf16.msra.mxu2 %v401_v7 }
  0x7b   :  { %v51_v10 = vpop.xlane.xlu0 %50 }
  0x7c   :  { %v61_v11 = vmul.f32 %v568_v9, %v51_v10  ;;  %v466_v10 = vld [vmem:[#allocation3 + $0x20] sm:$0xf0] }
  0x7e   :  { %v571_v12 = vsub.f32 %v488_v1, %v61_v11  ;;  %v468_v1 = vld [vmem:[#allocation3 + $0x34] sm:$0xf]  ;;  %v465_v11 = vld [vmem:[#allocation3 + $0x1c] sm:$0xf] }
  0x7f   :  { %v397_v6 = vor.u32 %v468_v1, %v394_v3 }
  0x80   :  { %v65_v13 = vmul.f32 %v571_v12, %v571_v12 }
  0x81   :  { %295 = vmatpush.bf16.msra.mxu1 %v397_v6 }
  0x82   :  { %67 = vadd.xlane.f32.xlu1 %v65_v13  ;;  %v381_v13 = vor.u32 %v466_v10, %v380_v8 }
  0x83   :  { %v53_v14 = vpop.xlane.xlu0 %52 }
  0x84   :  { %v62_v15 = vmul.f32 %v568_v9, %v53_v14  ;;  %v382_v14 = vld [vmem:[#allocation3 + $0x24] sm:$0xf0] }
  0x85   :  { %v385_v18 = vor.u32 %v465_v11, %v382_v14 }
  0x86   :  { %v576_v16 = vsub.f32 %v489_v2, %v62_v15  ;;  %v393_v2 = vor.u32 %v469_v0, %v392_v63  ;;  %v388_v15 = vld [vmem:[#allocation3 + $0x20] sm:$0xf] }
  0x87   :  { %296 = vmatpush.bf16.msra.mxu1 %v385_v18 }
  0x88   :  { %v66_v17 = vmul.f32 %v576_v16, %v576_v16  ;;  %281 = vmatpush.bf16.msra.mxu0 %v393_v2 }
  0x8a   :  { %69 = vadd.xlane.f32.xlu1 %v66_v17  ;;  %v467_v17 = vld [vmem:[#allocation3 + $0x28] sm:$0xf0] }
  0x8b   :  { %v389_v19 = vor.u32 %v467_v17, %v388_v15  ;;  %297 = vmatpush.bf16.msra.mxu1 %v373_v29 }
  0x8c   :  { %282 = vmatpush.bf16.msra.mxu0 %v381_v13 }
  0x8d   :  { %310 = vmatpush.bf16.msra.mxu2 %v389_v19 }
  0x90   :  { %283 = vmatpush.bf16.msra.mxu0 %v369_v24 }
  0x91   :  { %311 = vmatpush.bf16.msra.mxu2 %v377_v30 }
  0xf5   :  { %v68_v23 = vpop.xlane.xlu1 %67 }
  0xf6   :  { %v71_v28 = vmul.f32 %v68_v23, %v568_v9 }
  0xf8   :  { %v73_v31 = vadd.f32 1e-06, %v71_v28 }
  0xfa   :  { %498 = vrsqrt.f32 %v73_v31  ;;  %vm81_vm2 = vweird.f32 %v73_v31 }
  0xfd   :  { %v70_v32 = vpop.xlane.xlu1 %69 }
  0xfe   :  { %v72_v33 = vmul.f32 %v70_v32, %v568_v9 }
 0x100   :  { %v499_v34 = vpop.eup %498  ;;  %v74_v35 = vadd.f32 1e-06, %v72_v33 }
 0x101   :  { %v76_v36 = vmul.f32 %v499_v34, %v73_v31  ;;  %vm82_vm1 = vweird.f32 %v499_v34 }
 0x102   :  { %500 = vrsqrt.f32 %v74_v35  ;;  %vm83_vm3 = vmor %vm81_vm2, %vm82_vm1  ;;  %vm91_vm5 = vweird.f32 %v74_v35 }
 0x103   :  { %v77_v37 = vmul.f32 %v499_v34, %v76_v36 }
 0x105   :  { %v78_v38 = vmul.f32 0.5, %v77_v37 }
 0x107   :  { %v79_v39 = vsub.f32 1.5, %v78_v38 }
 0x108   :  { %v501_v40 = vpop.eup %500 }
 0x109   :  { %v80_v41 = vmul.f32 %v499_v34, %v79_v39  ;;  %v86_v42 = vmul.f32 %v501_v40, %v74_v35  ;;  %vm92_vm4 = vweird.f32 %v501_v40 }
 0x10a   :  { %vm93_vm6 = vmor %vm91_vm5, %vm92_vm4 }
 0x10b   :  { %v87_v43 = vmul.f32 %v501_v40, %v86_v42  ;;  %v84_v44 = vsel %vm83_vm3, %v499_v34, %v80_v41 }
 0x10c   :  { %v95_v9 = vmul.f32 %v84_v44, %v571_v12  ;;  %v339_v12 = vld [vmem:[%s607_s2] sm:$0x7] }
 0x10d   :  { %v88_v45 = vmul.f32 0.5, %v87_v43  ;;  %v341_v57 = vperm.slane %v339_v12, 0  ;;  %v342_v58 = vperm.slane %v339_v12, 1  ;;  %v343_v63 = vperm.slane %v339_v12, 2 }
 0x10e   :  { %v101_v51 = vmul.f32 %v494_v47, %v95_v9 }
 0x10f   :  { %v89_v46 = vsub.f32 1.5, %v88_v45 }
 0x110   :  { %v107_v54 = vadd.f32 %v495_v52, %v101_v51 }
 0x111   :  { %v90_v48 = vmul.f32 %v501_v40, %v89_v46 }
 0x113   :  { %v94_v49 = vsel %vm93_vm6, %v501_v40, %v90_v48 }
 0x114   :  { %v96_v50 = vmul.f32 %v94_v49, %v576_v16 }
 0x116   :  { %v102_v53 = vmul.f32 %v494_v47, %v96_v50 }
 0x118   :  { %v108_v55 = vadd.f32 %v495_v52, %v102_v53 }
 0x11a   :  { %v115_v56 = vpack.c.bf16 %v108_v55, %v107_v54 }
 0x11c   :  { %284 = vmatmul.bf16.vlgmr.msra.gmra.mxu0 %v115_v56  ;;  %298 = vmatmul.bf16.vlgmr.msra.gmra.mxu1 %v115_v56 }
 0x11d   :  { %312 = vmatmul.bf16.vlgmr.msra.gmra.mxu2 %v115_v56 }
 0x199   :  { %v285_v59 = vpop.f32.mrf.mxu0  ;;  %v299_v16 = vpop.f32.mrf.mxu1 }
 0x19a   :  { %v347_v60 = vadd.f32 %v341_v57, %v285_v59  ;;  %v348_v61 = vadd.f32 %v342_v58, %v299_v16 }
 0x19c   :  { %v353_v62 = vpack.c.bf16 %v348_v61, %v347_v60 }
 0x19e   :  { %357 = vst [vmem:[%s610_s5] sm:$0xff] %v353_v62 }
 0x1a0   :  { %v313_v0 = vpop.f32.mrf.mxu2 }
 0x1a1   :  { %v349_v1 = vadd.f32 %v343_v63, %v313_v0  ;;  %v287_v2 = vpop.f32.mrf.mxu0  ;;  %v301_v3 = vpop.f32.mrf.mxu1 }
 0x1a2   :  { %v350_v4 = vadd.f32 %v341_v57, %v287_v2  ;;  %v351_v5 = vadd.f32 %v342_v58, %v301_v3 }
 0x1a3   :  { %v354_v6 = vpack.c.bf16 %v349_v1, %v349_v1 }
 0x1a4   :  { %v355_v7 = vpack.c.bf16 %v351_v5, %v350_v4 }
 0x1a5   :  { %358 = vst [vmem:[%s610_s5 + $0x8] sm:$0xf] %v354_v6 }
 0x1a6   :  { %359 = vst [vmem:[%s610_s5 + $0xc] sm:$0xff] %v355_v7 }
 0x1a8   :  { %v315_v8 = vpop.f32.mrf.mxu2 }
 0x1a9   :  { %v352_v10 = vadd.f32 %v343_v63, %v315_v8 }
 0x1ab   :  { %v356_v11 = vpack.c.bf16 %v352_v10, %v352_v10 }
 0x1ad   :  { %360 = vst [vmem:[%s610_s5 + $0x14] sm:$0xf] %v356_v11 }
 0x1ae   :  { %365 = vsyncpa [#allocation4], 1 }

// kernel: _lambda_.44
= control target key start
LH: loop header
LB: loop body
LE: loop exit
PB: predicated region body
PF: predicated region fallthrough
CT: control target
= control target key end

     0   :  { %s256_s1 = inlined_call_operand.vmem [shape: bf16[128,128], index: 1, kind: input, shape index: {}]   ;;  %s257_s2 = inlined_call_operand.vmem [shape: f32[1,128], index: 2, kind: input, shape index: {}]   ;;  %s258_s0 = inlined_call_operand.vmem [shape: bf16[16,128], index: 0, kind: input, shape index: {}]   ;;  %s259_s3 = inlined_call_operand.vmem [shape: bf16[16,128], index: 3, kind: input, shape index: {}]   ;;  %s260_s4 = inlined_call_operand.vmem [shape: bf16[16,128], index: 4, kind: output, shape index: {}]  }
   0x1   :  { %v184_v0 = vld [vmem:[%s256_s1 + $0x38] sm:$0xff]  ;;  %v183_v1 = vld [vmem:[%s256_s1 + $0x30] sm:$0xff]  ;;  %v182_v2 = vld [vmem:[%s256_s1 + $0x28] sm:$0xff] }
   0x2   :  { %97 = vmatpush.bf16.msra.mxu0 %v184_v0  ;;  %v181_v3 = vld [vmem:[%s256_s1 + $0x20] sm:$0xff]  ;;  %v180_v4 = vld [vmem:[%s256_s1 + $0x18] sm:$0xff]  ;;  %v179_v5 = vld [vmem:[%s256_s1 + $0x10] sm:$0xff] }
   0x3   :  { %v178_v6 = vld [vmem:[%s256_s1 + $0x8] sm:$0xff]  ;;  %v177_v7 = vld [vmem:[%s256_s1] sm:$0xff] }
   0x4   :  { %v176_v8 = vld [vmem:[%s258_s0] sm:$0xff] }
   0x5   :  { %v194_v10 = vld [vmem:[%s257_s2] ss:$0 sm:$0xff] }
   0x6   :  { %98 = vmatpush.bf16.msra.mxu0 %v183_v1  ;;  %v186_v11 = vld [vmem:[%s259_s3] sm:$0xff]  }
   0x7   :  { %v187_v13 = vunpack.c.l.bf16 %v186_v11  ;;  %v188_v14 = vunpack.c.h.bf16 %v186_v11 }
   0xa   :  { %99 = vmatpush.bf16.msra.mxu0 %v182_v2 }
   0xe   :  { %100 = vmatpush.bf16.msra.mxu0 %v181_v3 }
  0x12   :  { %101 = vmatpush.bf16.msra.mxu0 %v180_v4 }
  0x16   :  { %102 = vmatpush.bf16.msra.mxu0 %v179_v5 }
  0x1a   :  { %103 = vmatpush.bf16.msra.mxu0 %v178_v6 }
  0x1e   :  { %104 = vmatpush.bf16.msra.mxu0 %v177_v7 }
  0x21   :  { %105 = vmatmul.bf16.vlgmr.msra.gmra.mxu0 %v176_v8 }
  0x9e   :  { %v106_v9 = vpop.f32.mrf.mxu0 }
  0x9f   :  { %v124_v12 = vadd.f32 %v194_v10, %v106_v9 }
  0xa1   :  { %v130_v17 = vadd.f32 %v187_v13, %v124_v12 }
  0xa6   :  { %v108_v15 = vpop.f32.mrf.mxu0 }
  0xa7   :  { %v125_v16 = vadd.f32 %v194_v10, %v108_v15 }
  0xa9   :  { %v131_v18 = vadd.f32 %v188_v14, %v125_v16 }
  0xab   :  { %v192_v19 = vpack.c.bf16 %v131_v18, %v130_v17 }
  0xad   :  { %193 = vst [vmem:[%s260_s4] sm:$0xff] %v192_v19  }

// kernel: _lambda_.45
= control target key start
LH: loop header
LB: loop body
LE: loop exit
PB: predicated region body
PF: predicated region fallthrough
CT: control target
= control target key end

     0   :  { %10 = vsyncpa [#allocation4], 0  ;;  %s298_s21 = smov [#allocation3]   ;;  %s299_s23 = smov 64   ;;  %s350_s0 = inlined_call_operand.vmem [shape: bf16[16,128], index: 0, kind: input, shape index: {}]   ;;  %s351_s1 = inlined_call_operand.hbm [shape: bf16[128,128], index: 1, kind: input, shape index: {}]   ;;  %s352_s2 = inlined_call_operand.vmem [shape: f32[1,128], index: 2, kind: input, shape index: {}]   ;;  %s353_s3 = inlined_call_operand.vmem [shape: f32[1,128], index: 3, kind: input, shape index: {}]   ;;  %s354_s4 = inlined_call_operand.vmem [shape: f32[1,128], index: 4, kind: input, shape index: {}]   ;;  %s355_s5 = inlined_call_operand.vmem [shape: bf16[16,128], index: 5, kind: output, shape index: {}]  }
   0x1   :  { %s17_s20 = sshll.u32 %s351_s1, 4  ;;  %s19_s22 = sshll.u32 %s298_s21, 4  ;;  %s18_s20 = int_to_ptr.hbm [resolvable:$true] %s17_s20  ;;  %s20_s22 = int_to_ptr.vmem [resolvable:$true] %s19_s22 }
   0x2   :  { %s300_s24 = smov 4  }
   0x3   :  { %25 = dma.hbm_to_vmem [thread:$0]  %s18_s20, 1024, %s20_s22, [#allocation4], %s299_s23, %s299_s23, %s300_s24  }
   0x4   :  { %296 = dma.done.wait [#allocation4], 1024  }
   0x5   :  { %297 = vsyncadd [#allocation4], 4294966272  ;;  %v251_v0 = vld [vmem:[%s350_s0] sm:$0xff]   ;;  %v301_v3 = vmov 128.0   ;;  %v249_v18 = vld [vmem:[#allocation3 + $0x38] sm:$0xff] }
   0x6   :  { %v252_v1 = vunpack.c.l.bf16 %v251_v0  ;;  %v253_v2 = vunpack.c.h.bf16 %v251_v0  ;;  %266 = vrcp.f32 %v301_v3  ;;  %172 = vmatpush.bf16.msra.mxu0 %v249_v18  ;;  %v248_v19 = vld [vmem:[#allocation3 + $0x30] sm:$0xff]  ;;  %v247_v20 = vld [vmem:[#allocation3 + $0x28] sm:$0xff]  ;;  %v246_v21 = vld [vmem:[#allocation3 + $0x20] sm:$0xff] }
   0x7   :  { %v245_v22 = vld [vmem:[#allocation3 + $0x18] sm:$0xff]  ;;  %v244_v23 = vld [vmem:[#allocation3 + $0x10] sm:$0xff]  ;;  %v243_v24 = vld [vmem:[#allocation3 + $0x8] sm:$0xff] }
   0x8   :  { %46 = vadd.xlane.f32.xlu0 %v252_v1  ;;  %v242_v26 = vld [vmem:[#allocation3] sm:$0xff] }
   0x9   :  { %v263_v45 = vld [vmem:[%s353_s3] ss:$0 sm:$0xff] }
   0xa   :  { %173 = vmatpush.bf16.msra.mxu0 %v248_v19  ;;  %v264_v50 = vld [vmem:[%s354_s4] ss:$0 sm:$0xff] }
   0xb   :  { %v265_v56 = vld [vmem:[%s352_s2] ss:$0 sm:$0xff] }
   0xc   :  { %v267_v4 = vpop.eup %266 }
   0xd   :  { %v51_v5 = vmul.f32 128.0, %v267_v4  ;;  %vm55_vm0 = vweird.f32 %v267_v4 }
   0xe   :  { %174 = vmatpush.bf16.msra.mxu0 %v247_v20 }
   0xf   :  { %v52_v6 = vsub.f32 1.0, %v51_v5 }
  0x10   :  { %48 = vadd.xlane.f32.xlu0 %v253_v2 }
  0x11   :  { %v53_v7 = vmul.f32 %v267_v4, %v52_v6 }
  0x12   :  { %175 = vmatpush.bf16.msra.mxu0 %v246_v21 }
  0x13   :  { %v54_v8 = vadd.f32 %v267_v4, %v53_v7 }
  0x15   :  { %v56_v9 = vsel %vm55_vm0, %v267_v4, %v54_v8 }
  0x16   :  { %176 = vmatpush.bf16.msra.mxu0 %v245_v22 }
  0x1a   :  { %177 = vmatpush.bf16.msra.mxu0 %v244_v23 }
  0x1e   :  { %178 = vmatpush.bf16.msra.mxu0 %v243_v24 }
  0x22   :  { %179 = vmatpush.bf16.msra.mxu0 %v242_v26 }
  0x7b   :  { %v47_v10 = vpop.xlane.xlu0 %46 }
  0x7c   :  { %v57_v11 = vmul.f32 %v56_v9, %v47_v10 }
  0x7e   :  { %v59_v12 = vsub.f32 %v252_v1, %v57_v11 }
  0x80   :  { %v61_v13 = vmul.f32 %v59_v12, %v59_v12 }
  0x82   :  { %63 = vadd.xlane.f32.xlu1 %v61_v13 }
  0x83   :  { %v49_v14 = vpop.xlane.xlu0 %48 }
  0x84   :  { %v58_v15 = vmul.f32 %v56_v9, %v49_v14 }
  0x86   :  { %v60_v16 = vsub.f32 %v253_v2, %v58_v15 }
  0x88   :  { %v62_v17 = vmul.f32 %v60_v16, %v60_v16 }
  0x8a   :  { %65 = vadd.xlane.f32.xlu1 %v62_v17 }
  0xf5   :  { %v64_v25 = vpop.xlane.xlu1 %63 }
  0xf6   :  { %v67_v27 = vmul.f32 %v64_v25, %v56_v9 }
  0xf8   :  { %v69_v28 = vadd.f32 1e-06, %v67_v27 }
  0xfa   :  { %268 = vrsqrt.f32 %v69_v28  ;;  %vm77_vm2 = vweird.f32 %v69_v28 }
  0xfd   :  { %v66_v29 = vpop.xlane.xlu1 %65 }
  0xfe   :  { %v68_v30 = vmul.f32 %v66_v29, %v56_v9 }
 0x100   :  { %v269_v31 = vpop.eup %268  ;;  %v70_v32 = vadd.f32 1e-06, %v68_v30 }
 0x101   :  { %v72_v33 = vmul.f32 %v269_v31, %v69_v28  ;;  %vm78_vm1 = vweird.f32 %v269_v31 }
 0x102   :  { %270 = vrsqrt.f32 %v70_v32  ;;  %vm79_vm3 = vmor %vm77_vm2, %vm78_vm1  ;;  %vm87_vm5 = vweird.f32 %v70_v32 }
 0x103   :  { %v73_v34 = vmul.f32 %v269_v31, %v72_v33 }
 0x105   :  { %v74_v35 = vmul.f32 0.5, %v73_v34 }
 0x107   :  { %v75_v36 = vsub.f32 1.5, %v74_v35 }
 0x108   :  { %v271_v37 = vpop.eup %270 }
 0x109   :  { %v76_v38 = vmul.f32 %v269_v31, %v75_v36  ;;  %v82_v39 = vmul.f32 %v271_v37, %v70_v32  ;;  %vm88_vm4 = vweird.f32 %v271_v37 }
 0x10a   :  { %vm89_vm6 = vmor %vm87_vm5, %vm88_vm4 }
 0x10b   :  { %v83_v40 = vmul.f32 %v271_v37, %v82_v39  ;;  %v80_v42 = vsel %vm79_vm3, %v269_v31, %v76_v38 }
 0x10c   :  { %v91_v44 = vmul.f32 %v80_v42, %v59_v12 }
 0x10d   :  { %v84_v41 = vmul.f32 0.5, %v83_v40 }
 0x10e   :  { %v97_v49 = vmul.f32 %v263_v45, %v91_v44 }
 0x10f   :  { %v85_v43 = vsub.f32 1.5, %v84_v41 }
 0x110   :  { %v103_v52 = vadd.f32 %v264_v50, %v97_v49 }
 0x111   :  { %v86_v46 = vmul.f32 %v271_v37, %v85_v43 }
 0x113   :  { %v90_v47 = vsel %vm89_vm6, %v271_v37, %v86_v46 }
 0x114   :  { %v92_v48 = vmul.f32 %v90_v47, %v60_v16 }
 0x116   :  { %v98_v51 = vmul.f32 %v263_v45, %v92_v48 }
 0x118   :  { %v104_v53 = vadd.f32 %v264_v50, %v98_v51 }
 0x11a   :  { %v107_v54 = vpack.c.bf16 %v104_v53, %v103_v52 }
 0x11c   :  { %180 = vmatmul.bf16.vlgmr.msra.gmra.mxu0 %v107_v54 }
 0x199   :  { %v181_v55 = vpop.f32.mrf.mxu0 }
 0x19a   :  { %v199_v58 = vadd.f32 %v265_v56, %v181_v55 }
 0x1a1   :  { %v183_v57 = vpop.f32.mrf.mxu0 }
 0x1a2   :  { %v200_v59 = vadd.f32 %v265_v56, %v183_v57 }
 0x1a4   :  { %v257_v60 = vpack.c.bf16 %v200_v59, %v199_v58 }
 0x1a6   :  { %258 = vst [vmem:[%s355_s5] sm:$0xff] %v257_v60  }
 0x1a7   :  { %209 = vsyncpa [#allocation4], 1 }

// kernel: _lambda_.43
= control target key start
LH: loop header
LB: loop body
LE: loop exit
PB: predicated region body
PF: predicated region fallthrough
CT: control target
= control target key end

     0   :  { %s511_s12 = smov [#allocation3]   ;;  %s610_s0 = inlined_call_operand.vmem [shape: s32[2], index: 0, kind: input, shape index: {}]   ;;  %s611_s1 = inlined_call_operand.vmem [shape: bf16[2,8,384], index: 1, kind: input, shape index: {}]   ;;  %s612_s2 = inlined_call_operand.vmem [shape: bf16[2,8,128], index: 2, kind: output, shape index: {}]  }
   0x1   :  { %s8_s11 = sshll.u32 %s610_s0, 4  ;;  %s9_s11 = int_to_ptr.vmem [resolvable:$true] %s8_s11 }
   0x2   :  { %11 = dma.vmem_to_smem %s9_s11, 16, %s511_s12, [#allocation2] }
   0x3   :  { %505 = dma.done.wait [#allocation2], 16 }
   0x4   :  { %506 = vsyncadd [#allocation2], 4294967280 }
   0x5   :  { %14 = sfence }
   0x6   :  { %s533_s13 = smov 0  }
   0x7 LB: > { %s443_s14 = sadd.s32 4294967295, %s509_s13   ;;  %p447_p0 = scmp.ge.s32.totalorder %s509_s13, 1  ;;  %s509_s13 = sphi %s533_s13, %s20_s13  }
   0x8   : > { %p96_p1 = scmp.lt.s32.totalorder %s509_s13, 3 }
   0xa   : > { %p97_p2 = pnand %p447_p0, %p96_p1 }
   0xb   : > { %p115_p3 = scmp.lt.s32.totalorder (!%p97_p2), %s443_s14, 1  ;;  %s512_s19 = smov (!%p97_p2), 64  }
   0xc   : > { %100 = sbr.rel (%p97_p2) target bundleno = 1091 (0x443), region = 24  ;;  %s513_s20 = smov (!%p97_p2), 32  }
   0xd   : > { %s125_s21 = sld [smem:[#allocation3 + %s443_s14]] (!%p97_p2)  ;;  %s514_s22 = smov (!%p97_p2), 96  }
  0x11   : > { %s541_s0 = scalar_select %p115_p3, %s443_s14, 1  ;;  %vm142_vm0 = vcmask 261120   ;;  %v128_v7 = vlaneseq  ;;  %vm163_vm4 = vcmask 64512   ;;  %vm179_vm5 = vcmask 1043456  }
  0x12   : > { %vm384_vm6 = vcmask 523264   ;;  %vm386_vm7 = vcmask 785408  }
  0x13   : > { %s460_s15 = smul.u32 12, %s541_s0  ;;  %v129_v8 = vand.u32 127, %v128_v7  ;;  %v133_v9 = vshrl.u32 %v128_v7, 7  ;;  %v130_v10 = vstv %s125_s21  ;;  %s449_s23 = sshll.u32 %s541_s0, 2 }
  0x14   : > { %s123_s26 = scalar_lea.vmem %s612_s2, %s449_s23 }
  0x15   : > { %s547_s18 = scalar_lea.vmem %s611_s1, %s460_s15  ;;  %vm131_vm1 = vcmp.lt.s32.totalorder %v129_v8, %v130_v10  ;;  %vm134_vm2 = vcmp.ge.s32.totalorder %v133_v9, %v129_v8 }
  0x16   : > { %v126_v0 = vld [vmem:[%s547_s18] sm:$0xff]  ;;  %vm556_vm3 = vmand %vm131_vm1, %vm134_vm2  ;;  %v127_v26 = vld [vmem:[%s547_s18 + $0x8] sm:$0xf] }
  0x17   : > { %v140_v1 = vunpack.c.h.b16 %v126_v0  ;;  %v136_v2 = vunpack.c.l.bf16 %v126_v0  ;;  %v181_v27 = vsel %vm179_vm5, %v127_v26, 0  ;;  %v234_v50 = vunpack.c.l.b16 %v127_v26 }
  0x18   : > { %190 = vmatpush.bf16.msra.mxu1 %v181_v27 }
  0x19   : > { %v141_v3 = vpack.c.b16 %v140_v1, %v140_v1  ;;  %v137_v5 = vmul.f32 0.17677669, %v136_v2  ;;  %v235_v51 = vpack.c.b16 %v234_v50, %v234_v50 }
  0x1b   : > { %v147_v4 = vsel %vm142_vm0, %v141_v3, 0  ;;  %v138_v6 = vpack.c.bf16 %v137_v5, %v137_v5  ;;  %259 = vrot.lane.b32.xlu2 %v141_v3, %s512_s19 }
  0x1c   : > { %156 = vmatpush.bf16.xpose.msra.mxu0 %v147_v4 }
  0x23   : > { %450 = vmatmul.msk.bf16.vlgmr.msra.gmra.mxu0 %vm142_vm0, %v138_v6  ;;  %316 = vrot.lane.b32.xlu2 %v141_v3, %s513_s20 }
  0x2b   : > { %257 = vrot.lane.b32.xlu2 %v138_v6, %s512_s19 }
  0x33   : > { %314 = vrot.lane.b32.xlu2 %v138_v6, %s513_s20 }
  0x75   : > { %v260_v16 = vpop.permute.xlu2 %259 }
  0x76   : > { %v265_v28 = vsel %vm142_vm0, %v260_v16, 0 }
  0x77   : > { %274 = vmatpush.bf16.xpose.msrb.mxu1 %v265_v28 }
  0x7d   : > { %v317_v17 = vpop.permute.xlu2 %316 }
  0x7e   : > { %v322_v22 = vsel %vm142_vm0, %v317_v17, 0 }
  0x7f   : > { %331 = vmatpush.bf16.xpose.msrb.mxu0 %v322_v22 }
  0x85   : > { %v258_v21 = vpop.permute.xlu2 %257 }
  0x8d   : > { %v315_v25 = vpop.permute.xlu2 %314 }
  0x8e   : > { %456 = vmatmul.msk.bf16.vlgmr.msrb.gmra.mxu0 %vm142_vm0, %v315_v25 }
  0xa0   : > { %v158_v12 = vpop.f32.mrf.mxu0 }
  0xa1   : > { %v162_v13 = vsel %vm556_vm3, %v158_v12, -1e+09 }
  0xa2   : > { %v164_v14 = vsel %vm163_vm4, %v162_v13, -inf }
  0xa3   : > { %165 = vmax.xlane.f32.xlu0 %v164_v14 }
  0xa8   : > { %v160_v15 = vpop.f32.mrf.mxu0 }
  0xb7   : > { %199 = vrot.lane.b32.xlu0 %v141_v3, %s514_s22 }
 0x10b   : > { %v333_v35 = vpop.f32.mrf.mxu0 }
 0x10c   : > { %v337_v36 = vsel %vm556_vm3, %v333_v35, -1e+09 }
 0x10d   : > { %v338_v37 = vsel %vm163_vm4, %v337_v36, -inf }
 0x113   : > { %v335_v38 = vpop.f32.mrf.mxu0 }
 0x116   : > { %v166_v18 = vpop.xlane.xlu0 %165 }
 0x117   : > { %v167_v19 = vsub.f32 %v162_v13, %v166_v18 }
 0x119   : > { %v168_v20 = vmul.f32 1.442695, %v167_v19 }
 0x11b   : > { %473 = vpow2.f32 %v168_v20 }
 0x121   : > { %v474_v23 = vpop.eup %473 }
 0x122   : > { %v170_v24 = vsel %vm163_vm4, %v474_v23, 0.0 }
 0x123   : > { %171 = vadd.xlane.f32.xlu1 %v170_v24 }
 0x129   : > { %v200_v29 = vpop.permute.xlu0 %199 }
 0x12a   : > { %v205_v30 = vsel %vm142_vm0, %v200_v29, 0 }
 0x12b   : > { %214 = vmatpush.bf16.xpose.msra.mxu2 %v205_v30 }
 0x13c   : > { %197 = vrot.lane.b32.xlu1 %v138_v6, %s514_s22 }
 0x166   : > { %339 = vmax.xlane.f32.xlu1 %v338_v37 }
 0x196   : > { %v172_v31 = vpop.xlane.xlu1 %171 }
 0x197   : > { %475 = vrcp.f32 %v172_v31 }
 0x19d   : > { %v476_v32 = vpop.eup %475 }
 0x19e   : > { %v174_v33 = vmul.f32 %v476_v32, %v474_v23 }
 0x1a0   : > { %v175_v34 = vpack.c.bf16 %v174_v33, %v174_v33 }
 0x1a2   : > { %451 = vmatmul.msk.bf16.vlgmr.msra.gmra.mxu1 %vm163_vm4, %v175_v34 }
 0x1ae   : > { %v198_v39 = vpop.permute.xlu1 %197 }
 0x1af   : > { %452 = vmatmul.msk.bf16.vlgmr.msra.gmra.mxu2 %vm142_vm0, %v198_v39 }
 0x1b2   : > { %454 = vmatmul.msk.bf16.vlgmr.msrb.gmra.mxu1 %vm142_vm0, %v258_v21 }
 0x1d9   : > { %v340_v54 = vpop.xlane.xlu1 %339 }
 0x1da   : > { %v341_v58 = vsub.f32 %v337_v36, %v340_v54 }
 0x1dc   : > { %v342_v60 = vmul.f32 1.442695, %v341_v58 }
 0x21f   : > { %v578_v40 = vpop.f32.mrf.mxu1 }
 0x227   : > { %v194_v41 = vpop.f32.mrf.mxu1 }
 0x22f   : > { %v276_v42 = vpop.f32.mrf.mxu1 }
 0x230   : > { %v280_v43 = vsel %vm556_vm3, %v276_v42, -1e+09 }
 0x231   : > { %v281_v44 = vsel %vm163_vm4, %v280_v43, -inf }
 0x232   : > { %282 = vmax.xlane.f32.xlu2 %v281_v44  ;;  %v216_v45 = vpop.f32.mrf.mxu2 }
 0x233   : > { %v220_v46 = vsel %vm556_vm3, %v216_v45, -1e+09 }
 0x234   : > { %v221_v47 = vsel %vm163_vm4, %v220_v46, -inf }
 0x235   : > { %222 = vmax.xlane.f32.xlu0 %v221_v47 }
 0x237   : > { %v278_v48 = vpop.f32.mrf.mxu1 }
 0x23a   : > { %v218_v49 = vpop.f32.mrf.mxu2 }
 0x24a   : > { %236 = vrot.lane.b32.xlu2 %v235_v51, %s514_s22 }
 0x2a5   : > { %v283_v52 = vpop.xlane.xlu2 %282 }
 0x2a6   : > { %v284_v53 = vsub.f32 %v280_v43, %v283_v52 }
 0x2a8   : > { %v285_v55 = vmul.f32 1.442695, %v284_v53  ;;  %v223_v56 = vpop.xlane.xlu0 %222 }
 0x2a9   : > { %v224_v57 = vsub.f32 %v220_v46, %v223_v56 }
 0x2aa   : > { %477 = vpow2.f32 %v285_v55 }
 0x2ab   : > { %v225_v59 = vmul.f32 1.442695, %v224_v57 }
 0x2ad   : > { %479 = vpow2.f32 %v225_v59  ;;  %v237_v3 = vpop.permute.xlu2 %236 }
 0x2ae   : > { %481 = vpow2.f32 %v342_v60  ;;  %v242_v4 = vsel %vm179_vm5, %v237_v3, 0 }
 0x2af   : > { %251 = vmatpush.bf16.msra.mxu3 %v242_v4 }
 0x2b0   : > { %v478_v61 = vpop.eup %477 }
 0x2b1   : > { %v287_v62 = vsel %vm163_vm4, %v478_v61, 0.0 }
 0x2b2   : > { %288 = vadd.xlane.f32.xlu1 %v287_v62 }
 0x2b3   : > { %v480_v63 = vpop.eup %479 }
 0x2b4   : > { %v227_v0 = vsel %vm163_vm4, %v480_v63, 0.0  ;;  %v482_v1 = vpop.eup %481 }
 0x2b5   : > { %228 = vadd.xlane.f32.xlu0 %v227_v0  ;;  %v344_v2 = vsel %vm163_vm4, %v482_v1, 0.0 }
 0x2bd   : > { %345 = vadd.xlane.f32.xlu0 %v344_v2 }
 0x2cb   : > { %293 = vrot.lane.b32.xlu1 %v235_v51, %s512_s19 }
 0x2d1   : > { %350 = vrot.lane.b32.xlu0 %v235_v51, %s513_s20 }
 0x325   : > { %v289_v8 = vpop.xlane.xlu1 %288 }
 0x328   : > { %v229_v5 = vpop.xlane.xlu0 %228 }
 0x329   : > { %483 = vrcp.f32 %v229_v5 }
 0x32a   : > { %485 = vrcp.f32 %v289_v8 }
 0x32f   : > { %v484_v6 = vpop.eup %483 }
 0x330   : > { %v231_v7 = vmul.f32 %v484_v6, %v480_v63  ;;  %v346_v10 = vpop.xlane.xlu0 %345  ;;  %v486_v11 = vpop.eup %485 }
 0x331   : > { %487 = vrcp.f32 %v346_v10  ;;  %v291_v13 = vmul.f32 %v486_v11, %v478_v61 }
 0x332   : > { %v232_v9 = vpack.c.bf16 %v231_v7, %v231_v7 }
 0x333   : > { %v292_v17 = vpack.c.bf16 %v291_v13, %v291_v13 }
 0x334   : > { %453 = vmatmul.msk.bf16.vlgmr.msra.gmra.mxu3 %vm163_vm4, %v232_v9 }
 0x337   : > { %v488_v15 = vpop.eup %487 }
 0x338   : > { %v348_v16 = vmul.f32 %v488_v15, %v482_v1 }
 0x33a   : > { %v349_v20 = vpack.c.bf16 %v348_v16, %v348_v16 }
 0x33d   : > { %v294_v12 = vpop.permute.xlu1 %293 }
 0x33e   : > { %v299_v14 = vsel %vm179_vm5, %v294_v12, 0 }
 0x33f   : > { %308 = vmatpush.bf16.msrb.mxu3 %v299_v14 }
 0x343   : > { %v351_v18 = vpop.permute.xlu0 %350 }
 0x344   : > { %455 = vmatmul.msk.bf16.vlgmr.msrb.gmra.mxu3 %vm163_vm4, %v292_v17  ;;  %v356_v19 = vsel %vm179_vm5, %v351_v18, 0 }
 0x345   : > { %365 = vmatpush.bf16.msrb.mxu2 %v356_v19 }
 0x348   : > { %457 = vmatmul.msk.bf16.vlgmr.msrb.gmra.mxu2 %vm163_vm4, %v349_v20 }
 0x3b7   : > { %v253_v21 = vpop.f32.mrf.mxu3 }
 0x3b8   : > { %372 = vrot.lane.b32.xlu2 %v253_v21, %s513_s20 }
 0x3bf   : > { %v255_v22 = vpop.f32.mrf.mxu3 }
 0x3c7   : > { %v310_v23 = vpop.f32.mrf.mxu3 }
 0x3c8   : > { %376 = vrot.lane.b32.xlu2 %v310_v23, %s512_s19 }
 0x3cb   : > { %v367_v24 = vpop.f32.mrf.mxu2 }
 0x3cc   : > { %380 = vrot.lane.b32.xlu0 %v367_v24, %s514_s22 }
 0x3cf   : > { %v312_v25 = vpop.f32.mrf.mxu3 }
 0x3d3   : > { %v369_v26 = vpop.f32.mrf.mxu2 }
 0x412   : > { %v373_v27 = vpop.permute.xlu2 %372 }
 0x413   : > { %v383_v29 = vsel %vm142_vm0, %v578_v40, %v373_v27 }
 0x422   : > { %v377_v28 = vpop.permute.xlu2 %376 }
 0x423   : > { %v385_v30 = vsel %vm384_vm6, %v383_v29, %v377_v28 }
 0x43e   : > { %v381_v31 = vpop.permute.xlu0 %380 }
 0x43f   : > { %v387_v32 = vsel %vm386_vm7, %v385_v30, %v381_v31 }
 0x440   : > { %v388_v33 = vpack.c.bf16 %v387_v32, %v387_v32 }
 0x442   : > { %389 = vst [vmem:[%s123_s26] sm:$0xf] %v388_v33 }
 0x443 PF: > { %s20_s13 = sadd.s32 1, %s509_s13  }
 0x444   : > { %p17_p4 = scmp.ge.s32.totalorder %s20_s13, 4  }
 0x446   :  { %19 = sbr.rel (!%p17_p4) target bundleno = 7 (0x7), region = 54 }

// kernel: _lambda_.48
= control target key start
LH: loop header
LB: loop body
LE: loop exit
PB: predicated region body
PF: predicated region fallthrough
CT: control target
= control target key end

     0   :  { %9 = vsyncpa [#allocation4], 0  ;;  %s241_s18 = smov [#allocation3]   ;;  %s242_s20 = smov 64   ;;  %s284_s0 = inlined_call_operand.vmem [shape: bf16[16,128], index: 0, kind: input, shape index: {}]   ;;  %s285_s1 = inlined_call_operand.hbm [shape: bf16[128,128], index: 1, kind: input, shape index: {}]   ;;  %s286_s2 = inlined_call_operand.vmem [shape: f32[1,128], index: 2, kind: input, shape index: {}]   ;;  %s287_s3 = inlined_call_operand.vmem [shape: bf16[16,128], index: 3, kind: input, shape index: {}]   ;;  %s288_s4 = inlined_call_operand.vmem [shape: bf16[16,128], index: 4, kind: output, shape index: {}]  }
   0x1   :  { %s16_s17 = sshll.u32 %s285_s1, 4  ;;  %s18_s19 = sshll.u32 %s241_s18, 4  ;;  %s17_s17 = int_to_ptr.hbm [resolvable:$true] %s16_s17  ;;  %s19_s19 = int_to_ptr.vmem [resolvable:$true] %s18_s19 }
   0x2   :  { %s243_s21 = smov 4  }
   0x3   :  { %24 = dma.hbm_to_vmem [thread:$0]  %s17_s17, 1024, %s19_s19, [#allocation4], %s242_s20, %s242_s20, %s243_s21  }
   0x4   :  { %239 = dma.done.wait [#allocation4], 1024  }
   0x5   :  { %240 = vsyncadd [#allocation4], 4294966272  ;;  %v201_v0 = vld [vmem:[#allocation3 + $0x38] sm:$0xff]  ;;  %v200_v1 = vld [vmem:[#allocation3 + $0x30] sm:$0xff] }
   0x6   :  { %113 = vmatpush.bf16.msra.mxu0 %v201_v0  ;;  %v199_v2 = vld [vmem:[#allocation3 + $0x28] sm:$0xff]  ;;  %v198_v3 = vld [vmem:[#allocation3 + $0x20] sm:$0xff]  ;;  %v197_v4 = vld [vmem:[#allocation3 + $0x18] sm:$0xff] }
   0x7   :  { %v196_v5 = vld [vmem:[#allocation3 + $0x10] sm:$0xff]  ;;  %v195_v6 = vld [vmem:[#allocation3 + $0x8] sm:$0xff]  ;;  %v194_v7 = vld [vmem:[#allocation3] sm:$0xff] }
   0x8   :  { %v193_v8 = vld [vmem:[%s284_s0] sm:$0xff] }
   0x9   :  { %v214_v10 = vld [vmem:[%s286_s2] ss:$0 sm:$0xff] }
   0xa   :  { %114 = vmatpush.bf16.msra.mxu0 %v200_v1  ;;  %v203_v11 = vld [vmem:[%s287_s3] sm:$0xff]  }
   0xb   :  { %v204_v13 = vunpack.c.l.bf16 %v203_v11  ;;  %v205_v14 = vunpack.c.h.bf16 %v203_v11 }
   0xe   :  { %115 = vmatpush.bf16.msra.mxu0 %v199_v2 }
  0x12   :  { %116 = vmatpush.bf16.msra.mxu0 %v198_v3 }
  0x16   :  { %117 = vmatpush.bf16.msra.mxu0 %v197_v4 }
  0x1a   :  { %118 = vmatpush.bf16.msra.mxu0 %v196_v5 }
  0x1e   :  { %119 = vmatpush.bf16.msra.mxu0 %v195_v6 }
  0x22   :  { %120 = vmatpush.bf16.msra.mxu0 %v194_v7 }
  0x25   :  { %121 = vmatmul.bf16.vlgmr.msra.gmra.mxu0 %v193_v8 }
  0xa2   :  { %v122_v9 = vpop.f32.mrf.mxu0 }
  0xa3   :  { %v140_v12 = vadd.f32 %v214_v10, %v122_v9 }
  0xa5   :  { %v146_v17 = vadd.f32 %v204_v13, %v140_v12 }
  0xaa   :  { %v124_v15 = vpop.f32.mrf.mxu0 }
  0xab   :  { %v141_v16 = vadd.f32 %v214_v10, %v124_v15 }
  0xad   :  { %v147_v18 = vadd.f32 %v205_v14, %v141_v16 }
  0xaf   :  { %v209_v19 = vpack.c.bf16 %v147_v18, %v146_v17 }
  0xb1   :  { %210 = vst [vmem:[%s288_s4] sm:$0xff] %v209_v19  }
  0xb2   :  { %156 = vsyncpa [#allocation4], 1 }

// kernel: _lambda_.47
= control target key start
LH: loop header
LB: loop body
LE: loop exit
PB: predicated region body
PF: predicated region fallthrough
CT: control target
= control target key end

     0   :  { %s569_s15 = smov [#allocation3]   ;;  %s678_s0 = inlined_call_operand.vmem [shape: s32[2], index: 0, kind: input, shape index: {}]   ;;  %s679_s1 = inlined_call_operand.vmem [shape: bf16[2,8,128], index: 1, kind: input, shape index: {}]   ;;  %s680_s2 = inlined_call_operand.vmem [shape: bf16[2,16,256], index: 2, kind: input, shape index: {}]   ;;  %s681_s3 = inlined_call_operand.vmem [shape: bf16[2,8,128], index: 3, kind: output, shape index: {}]  }
   0x1   :  { %s9_s14 = sshll.u32 %s678_s0, 4  ;;  %s10_s14 = int_to_ptr.vmem [resolvable:$true] %s9_s14 }
   0x2   :  { %12 = dma.vmem_to_smem %s10_s14, 16, %s569_s15, [#allocation2] }
   0x3   :  { %563 = dma.done.wait [#allocation2], 16 }
   0x4   :  { %564 = vsyncadd [#allocation2], 4294967280 }
   0x5   :  { %15 = sfence }
   0x6   :  { %s596_s16 = smov 0  }
   0x7 LB: > { %s489_s17 = sadd.s32 4294967295, %s567_s16   ;;  %p493_p0 = scmp.ge.s32.totalorder %s567_s16, 1  ;;  %s567_s16 = sphi %s596_s16, %s21_s16  }
   0x8   : > { %p130_p1 = scmp.lt.s32.totalorder %s567_s16, 3 }
   0xa   : > { %p131_p2 = pnand %p493_p0, %p130_p1 }
   0xb   : > { %p155_p3 = scmp.lt.s32.totalorder (!%p131_p2), %s489_s17, 1  ;;  %s570_s26 = smov (!%p131_p2), 64  }
   0xc   : > { %134 = sbr.rel (%p131_p2) target bundleno = 1087 (0x43f), region = 28  ;;  %s571_s27 = smov (!%p131_p2), 32  }
   0xd   : > { %s169_s28 = sld [smem:[#allocation3 + %s489_s17]] (!%p131_p2)  ;;  %s572_s29 = smov (!%p131_p2), 96  }
  0x11   : > { %s604_s0 = scalar_select %p155_p3, %s489_s17, 1  ;;  %vm185_vm0 = vcmask 261120   ;;  %v173_v8 = vlaneseq  ;;  %vm206_vm2 = vcmask 130048   ;;  %vm418_vm3 = vcmask 523264  }
  0x12   : > { %vm420_vm4 = vcmask 785408  }
  0x13   : > { %s516_s18 = sshll.u32 %s604_s0, 4  ;;  %s494_s19 = sshll.u32 %s604_s0, 2  ;;  %v174_v9 = vand.u32 127, %v173_v8  ;;  %v175_v10 = vstv %s169_s28 }
  0x14   : > { %s611_s22 = scalar_lea.vmem %s680_s2, %s516_s18  ;;  %s158_s25 = scalar_lea.vmem %s679_s1, %s494_s19 }
  0x15   : > { %v500_v0 = vld [vmem:[%s611_s22] sm:$0xf]  ;;  %v518_v1 = vld [vmem:[%s611_s22 + $0x4] sm:$0xf0]  ;;  %vm626_vm1 = vcmp.lt.s32.totalorder %v174_v9, %v175_v10  ;;  %v517_v26 = vld [vmem:[%s611_s22 + $0x4] sm:$0xf]  ;;  %s167_s5 = scalar_lea.vmem %s681_s3, %s494_s19 }
  0x16   : > { %v170_v2 = vld [vmem:[%s158_s25] sm:$0xf]  ;;  %v501_v3 = vor.u32 %v518_v1, %v500_v0  ;;  %v503_v27 = vld [vmem:[%s611_s22 + $0x8] sm:$0xf0] }
  0x17   : > { %v177_v4 = vunpack.c.l.bf16 %v170_v2  ;;  %v506_v28 = vor.u32 %v517_v26, %v503_v27 }
  0x18   : > { %v190_v5 = vsel %vm185_vm0, %v501_v3, 0  ;;  %297 = vrot.lane.b32.xlu2 %v501_v3, %s570_s26 }
  0x19   : > { %v178_v6 = vmul.f32 0.17677669, %v177_v4  ;;  %199 = vmatpush.bf16.xpose.msra.mxu0 %v190_v5  ;;  %233 = vmatpush.bf16.msra.mxu1 %v506_v28 }
  0x1b   : > { %v179_v7 = vpack.c.bf16 %v178_v6, %v178_v6 }
  0x20   : > { %502 = vmatmul.msk.bf16.vlgmr.msra.gmra.mxu0 %vm185_vm0, %v179_v7  ;;  %352 = vrot.lane.b32.xlu2 %v501_v3, %s571_s27 }
  0x28   : > { %295 = vrot.lane.b32.xlu2 %v179_v7, %s570_s26 }
  0x30   : > { %350 = vrot.lane.b32.xlu2 %v179_v7, %s571_s27 }
  0x72   : > { %v298_v16 = vpop.permute.xlu2 %297 }
  0x73   : > { %v303_v29 = vsel %vm185_vm0, %v298_v16, 0 }
  0x74   : > { %312 = vmatpush.bf16.xpose.msrb.mxu1 %v303_v29 }
  0x7a   : > { %v353_v17 = vpop.permute.xlu2 %352 }
  0x7b   : > { %v358_v22 = vsel %vm185_vm0, %v353_v17, 0 }
  0x7c   : > { %367 = vmatpush.bf16.xpose.msrb.mxu0 %v358_v22 }
  0x82   : > { %v296_v21 = vpop.permute.xlu2 %295 }
  0x8a   : > { %v351_v25 = vpop.permute.xlu2 %350 }
  0x8b   : > { %512 = vmatmul.msk.bf16.vlgmr.msrb.gmra.mxu0 %vm185_vm0, %v351_v25 }
  0x9d   : > { %v201_v12 = vpop.f32.mrf.mxu0 }
  0x9e   : > { %v205_v13 = vsel %vm626_vm1, %v201_v12, -1e+09 }
  0x9f   : > { %v207_v14 = vsel %vm206_vm2, %v205_v13, -inf }
  0xa0   : > { %208 = vmax.xlane.f32.xlu0 %v207_v14 }
  0xa5   : > { %v203_v15 = vpop.f32.mrf.mxu0 }
  0xb4   : > { %242 = vrot.lane.b32.xlu0 %v501_v3, %s572_s29 }
 0x108   : > { %v369_v36 = vpop.f32.mrf.mxu0 }
 0x109   : > { %v373_v37 = vsel %vm626_vm1, %v369_v36, -1e+09 }
 0x10a   : > { %v374_v38 = vsel %vm206_vm2, %v373_v37, -inf }
 0x110   : > { %v371_v39 = vpop.f32.mrf.mxu0 }
 0x113   : > { %v209_v18 = vpop.xlane.xlu0 %208 }
 0x114   : > { %v210_v19 = vsub.f32 %v205_v13, %v209_v18 }
 0x116   : > { %v211_v20 = vmul.f32 1.442695, %v210_v19 }
 0x118   : > { %531 = vpow2.f32 %v211_v20 }
 0x11e   : > { %v532_v23 = vpop.eup %531 }
 0x11f   : > { %v213_v24 = vsel %vm206_vm2, %v532_v23, 0.0 }
 0x120   : > { %214 = vadd.xlane.f32.xlu1 %v213_v24 }
 0x126   : > { %v243_v30 = vpop.permute.xlu0 %242 }
 0x127   : > { %v248_v31 = vsel %vm185_vm0, %v243_v30, 0 }
 0x128   : > { %257 = vmatpush.bf16.xpose.msra.mxu2 %v248_v31 }
 0x139   : > { %240 = vrot.lane.b32.xlu1 %v179_v7, %s572_s29 }
 0x163   : > { %375 = vmax.xlane.f32.xlu1 %v374_v38 }
 0x193   : > { %v215_v32 = vpop.xlane.xlu1 %214 }
 0x194   : > { %533 = vrcp.f32 %v215_v32 }
 0x19a   : > { %v534_v33 = vpop.eup %533 }
 0x19b   : > { %v217_v34 = vmul.f32 %v534_v33, %v532_v23 }
 0x19d   : > { %v218_v35 = vpack.c.bf16 %v217_v34, %v217_v34 }
 0x19f   : > { %507 = vmatmul.msk.bf16.vlgmr.msra.gmra.mxu1 %vm206_vm2, %v218_v35 }
 0x1ab   : > { %v241_v40 = vpop.permute.xlu1 %240 }
 0x1ac   : > { %508 = vmatmul.msk.bf16.vlgmr.msra.gmra.mxu2 %vm185_vm0, %v241_v40 }
 0x1af   : > { %510 = vmatmul.msk.bf16.vlgmr.msrb.gmra.mxu1 %vm185_vm0, %v296_v21 }
 0x1d6   : > { %v376_v53 = vpop.xlane.xlu1 %375 }
 0x1d7   : > { %v377_v57 = vsub.f32 %v373_v37, %v376_v53 }
 0x1d9   : > { %v378_v59 = vmul.f32 1.442695, %v377_v57 }
 0x21c   : > { %v648_v41 = vpop.f32.mrf.mxu1 }
 0x224   : > { %v237_v42 = vpop.f32.mrf.mxu1 }
 0x22c   : > { %v314_v43 = vpop.f32.mrf.mxu1 }
 0x22d   : > { %v318_v44 = vsel %vm626_vm1, %v314_v43, -1e+09 }
 0x22e   : > { %v319_v45 = vsel %vm206_vm2, %v318_v44, -inf }
 0x22f   : > { %320 = vmax.xlane.f32.xlu2 %v319_v45  ;;  %v259_v46 = vpop.f32.mrf.mxu2 }
 0x230   : > { %v263_v47 = vsel %vm626_vm1, %v259_v46, -1e+09 }
 0x231   : > { %v264_v48 = vsel %vm206_vm2, %v263_v47, -inf }
 0x232   : > { %265 = vmax.xlane.f32.xlu0 %v264_v48 }
 0x234   : > { %v316_v49 = vpop.f32.mrf.mxu1 }
 0x237   : > { %v261_v50 = vpop.f32.mrf.mxu2 }
 0x247   : > { %276 = vrot.lane.b32.xlu2 %v506_v28, %s572_s29 }
 0x2a2   : > { %v321_v51 = vpop.xlane.xlu2 %320 }
 0x2a3   : > { %v322_v52 = vsub.f32 %v318_v44, %v321_v51 }
 0x2a5   : > { %v323_v54 = vmul.f32 1.442695, %v322_v52  ;;  %v266_v55 = vpop.xlane.xlu0 %265 }
 0x2a6   : > { %v267_v56 = vsub.f32 %v263_v47, %v266_v55 }
 0x2a7   : > { %535 = vpow2.f32 %v323_v54 }
 0x2a8   : > { %v268_v58 = vmul.f32 1.442695, %v267_v56 }
 0x2aa   : > { %537 = vpow2.f32 %v268_v58  ;;  %v277_v2 = vpop.permute.xlu2 %276 }
 0x2ab   : > { %539 = vpow2.f32 %v378_v59  ;;  %289 = vmatpush.bf16.msra.mxu3 %v277_v2 }
 0x2ad   : > { %v536_v60 = vpop.eup %535 }
 0x2ae   : > { %v325_v61 = vsel %vm206_vm2, %v536_v60, 0.0 }
 0x2af   : > { %326 = vadd.xlane.f32.xlu1 %v325_v61 }
 0x2b0   : > { %v538_v62 = vpop.eup %537 }
 0x2b1   : > { %v270_v63 = vsel %vm206_vm2, %v538_v62, 0.0  ;;  %v540_v0 = vpop.eup %539 }
 0x2b2   : > { %271 = vadd.xlane.f32.xlu0 %v270_v63  ;;  %v380_v1 = vsel %vm206_vm2, %v540_v0, 0.0 }
 0x2ba   : > { %381 = vadd.xlane.f32.xlu0 %v380_v1 }
 0x2c8   : > { %331 = vrot.lane.b32.xlu1 %v506_v28, %s570_s26 }
 0x2ce   : > { %386 = vrot.lane.b32.xlu0 %v506_v28, %s571_s27 }
 0x322   : > { %v327_v6 = vpop.xlane.xlu1 %326 }
 0x325   : > { %v272_v3 = vpop.xlane.xlu0 %271 }
 0x326   : > { %541 = vrcp.f32 %v272_v3 }
 0x327   : > { %543 = vrcp.f32 %v327_v6 }
 0x32c   : > { %v542_v4 = vpop.eup %541 }
 0x32d   : > { %v274_v5 = vmul.f32 %v542_v4, %v538_v62  ;;  %v382_v8 = vpop.xlane.xlu0 %381  ;;  %v544_v9 = vpop.eup %543 }
 0x32e   : > { %545 = vrcp.f32 %v382_v8  ;;  %v329_v12 = vmul.f32 %v544_v9, %v536_v60 }
 0x32f   : > { %v275_v7 = vpack.c.bf16 %v274_v5, %v274_v5 }
 0x330   : > { %v330_v14 = vpack.c.bf16 %v329_v12, %v329_v12 }
 0x331   : > { %509 = vmatmul.msk.bf16.vlgmr.msra.gmra.mxu3 %vm206_vm2, %v275_v7 }
 0x334   : > { %v546_v11 = vpop.eup %545 }
 0x335   : > { %v384_v13 = vmul.f32 %v546_v11, %v540_v0 }
 0x337   : > { %v385_v16 = vpack.c.bf16 %v384_v13, %v384_v13 }
 0x33a   : > { %v332_v10 = vpop.permute.xlu1 %331 }
 0x33b   : > { %344 = vmatpush.bf16.msrb.mxu3 %v332_v10 }
 0x340   : > { %v387_v15 = vpop.permute.xlu0 %386 }
 0x341   : > { %511 = vmatmul.msk.bf16.vlgmr.msrb.gmra.mxu3 %vm206_vm2, %v330_v14  ;;  %399 = vmatpush.bf16.msrb.mxu2 %v387_v15 }
 0x344   : > { %513 = vmatmul.msk.bf16.vlgmr.msrb.gmra.mxu2 %vm206_vm2, %v385_v16 }
 0x3b4   : > { %v291_v17 = vpop.f32.mrf.mxu3 }
 0x3b5   : > { %406 = vrot.lane.b32.xlu2 %v291_v17, %s571_s27 }
 0x3bc   : > { %v293_v18 = vpop.f32.mrf.mxu3 }
 0x3c4   : > { %v346_v19 = vpop.f32.mrf.mxu3 }
 0x3c5   : > { %410 = vrot.lane.b32.xlu2 %v346_v19, %s570_s26 }
 0x3c7   : > { %v401_v20 = vpop.f32.mrf.mxu2 }
 0x3c8   : > { %414 = vrot.lane.b32.xlu0 %v401_v20, %s572_s29 }
 0x3cc   : > { %v348_v21 = vpop.f32.mrf.mxu3 }
 0x3cf   : > { %v403_v22 = vpop.f32.mrf.mxu2 }
 0x40f   : > { %v407_v23 = vpop.permute.xlu2 %406 }
 0x410   : > { %v417_v25 = vsel %vm185_vm0, %v648_v41, %v407_v23 }
 0x41f   : > { %v411_v24 = vpop.permute.xlu2 %410 }
 0x420   : > { %v419_v26 = vsel %vm418_vm3, %v417_v25, %v411_v24 }
 0x43a   : > { %v415_v27 = vpop.permute.xlu0 %414 }
 0x43b   : > { %v421_v28 = vsel %vm420_vm4, %v419_v26, %v415_v27 }
 0x43c   : > { %v422_v29 = vpack.c.bf16 %v421_v28, %v421_v28 }
 0x43e   : > { %423 = vst [vmem:[%s167_s5] sm:$0xf] %v422_v29 }
 0x43f PF: > { %s21_s16 = sadd.s32 1, %s567_s16  }
 0x440   : > { %p18_p4 = scmp.ge.s32.totalorder %s21_s16, 4  }
 0x442   :  { %20 = sbr.rel (!%p18_p4) target bundleno = 7 (0x7), region = 61 }

// kernel: _lambda_.49
= control target key start
LH: loop header
LB: loop body
LE: loop exit
PB: predicated region body
PF: predicated region fallthrough
CT: control target
= control target key end

     0   :  { %10 = vsyncpa [#allocation4], 0  ;;  %s436_s21 = smov [#allocation3]   ;;  %s437_s23 = smov 128   ;;  %s507_s0 = inlined_call_operand.vmem [shape: bf16[16,128], index: 0, kind: input, shape index: {}]   ;;  %s508_s1 = inlined_call_operand.hbm [shape: bf16[128,256], index: 1, kind: input, shape index: {}]   ;;  %s509_s2 = inlined_call_operand.vmem [shape: f32[1,256], index: 2, kind: input, shape index: {}]   ;;  %s510_s3 = inlined_call_operand.vmem [shape: f32[1,128], index: 3, kind: input, shape index: {}]   ;;  %s511_s4 = inlined_call_operand.vmem [shape: f32[1,128], index: 4, kind: input, shape index: {}]   ;;  %s512_s5 = inlined_call_operand.vmem [shape: bf16[16,256], index: 5, kind: output, shape index: {}]  }
   0x1   :  { %s17_s20 = sshll.u32 %s508_s1, 4  ;;  %s19_s22 = sshll.u32 %s436_s21, 4  ;;  %s18_s20 = int_to_ptr.hbm [resolvable:$true] %s17_s20  ;;  %s20_s22 = int_to_ptr.vmem [resolvable:$true] %s19_s22 }
   0x2   :  { %s438_s24 = smov 8  }
   0x3   :  { %25 = dma.hbm_to_vmem [thread:$0]  %s18_s20, 2048, %s20_s22, [#allocation4], %s437_s23, %s437_s23, %s438_s24  }
   0x4   :  { %434 = dma.done.wait [#allocation4], 2048  }
   0x5   :  { %435 = vsyncadd [#allocation4], 4294965248  ;;  %v387_v0 = vld [vmem:[%s507_s0] sm:$0xff]   ;;  %v439_v3 = vmov 128.0   ;;  %v364_v18 = vld [vmem:[#allocation3 + $0x70] sm:$0xf] }
   0x6   :  { %v388_v1 = vunpack.c.l.bf16 %v387_v0  ;;  %v389_v2 = vunpack.c.h.bf16 %v387_v0  ;;  %396 = vrcp.f32 %v439_v3  ;;  %v385_v19 = vld [vmem:[#allocation3 + $0x74] sm:$0xf0]  ;;  %v384_v20 = vld [vmem:[#allocation3 + $0x74] sm:$0xf]  ;;  %v366_v22 = vld [vmem:[#allocation3 + $0x78] sm:$0xf0] }
   0x7   :  { %v365_v21 = vor.u32 %v385_v19, %v364_v18  ;;  %v369_v23 = vor.u32 %v384_v20, %v366_v22  ;;  %v356_v24 = vld [vmem:[#allocation3 + $0x60] sm:$0xf]  ;;  %v383_v25 = vld [vmem:[#allocation3 + $0x64] sm:$0xf0]  ;;  %v382_v26 = vld [vmem:[#allocation3 + $0x64] sm:$0xf] }
   0x8   :  { %48 = vadd.xlane.f32.xlu0 %v388_v1  ;;  %v357_v27 = vor.u32 %v383_v25, %v356_v24  ;;  %v358_v28 = vld [vmem:[#allocation3 + $0x68] sm:$0xf0]  ;;  %v348_v30 = vld [vmem:[#allocation3 + $0x50] sm:$0xf]  ;;  %v381_v31 = vld [vmem:[#allocation3 + $0x54] sm:$0xf0] }
   0x9   :  { %208 = vmatpush.bf16.msra.mxu0 %v365_v21  ;;  %222 = vmatpush.bf16.msra.mxu1 %v369_v23  ;;  %v361_v29 = vor.u32 %v382_v26, %v358_v28  ;;  %v380_v32 = vld [vmem:[#allocation3 + $0x54] sm:$0xf]  ;;  %v349_v33 = vor.u32 %v381_v31, %v348_v30  ;;  %v350_v34 = vld [vmem:[#allocation3 + $0x58] sm:$0xf0]  ;;  %v340_v36 = vld [vmem:[#allocation3 + $0x40] sm:$0xf] }
   0xa   :  { %v353_v35 = vor.u32 %v380_v32, %v350_v34  ;;  %v379_v37 = vld [vmem:[#allocation3 + $0x44] sm:$0xf0]  ;;  %v378_v38 = vld [vmem:[#allocation3 + $0x44] sm:$0xf]  ;;  %v342_v40 = vld [vmem:[#allocation3 + $0x48] sm:$0xf0] }
   0xb   :  { %v341_v39 = vor.u32 %v379_v37, %v340_v36  ;;  %v345_v41 = vor.u32 %v378_v38, %v342_v40  ;;  %v332_v42 = vld [vmem:[#allocation3 + $0x30] sm:$0xf]  ;;  %v377_v43 = vld [vmem:[#allocation3 + $0x34] sm:$0xf0]  ;;  %v376_v44 = vld [vmem:[#allocation3 + $0x34] sm:$0xf] }
   0xc   :  { %v397_v4 = vpop.eup %396  ;;  %v333_v45 = vor.u32 %v377_v43, %v332_v42  ;;  %v334_v46 = vld [vmem:[#allocation3 + $0x38] sm:$0xf0]  ;;  %v324_v48 = vld [vmem:[#allocation3 + $0x20] sm:$0xf]  ;;  %v375_v49 = vld [vmem:[#allocation3 + $0x24] sm:$0xf0] }
   0xd   :  { %v53_v5 = vmul.f32 128.0, %v397_v4  ;;  %vm57_vm0 = vweird.f32 %v397_v4  ;;  %209 = vmatpush.bf16.msra.mxu0 %v357_v27  ;;  %223 = vmatpush.bf16.msra.mxu1 %v361_v29  ;;  %v337_v47 = vor.u32 %v376_v44, %v334_v46  ;;  %v374_v50 = vld [vmem:[#allocation3 + $0x24] sm:$0xf]  ;;  %v325_v51 = vor.u32 %v375_v49, %v324_v48  ;;  %v326_v52 = vld [vmem:[#allocation3 + $0x28] sm:$0xf0] }
   0xe   :  { %v329_v53 = vor.u32 %v374_v50, %v326_v52  ;;  %v316_v54 = vld [vmem:[#allocation3 + $0x10] sm:$0xf]  ;;  %v373_v55 = vld [vmem:[#allocation3 + $0x14] sm:$0xf0]  ;;  %v372_v56 = vld [vmem:[#allocation3 + $0x14] sm:$0xf] }
   0xf   :  { %v54_v6 = vsub.f32 1.0, %v53_v5  ;;  %v317_v57 = vor.u32 %v373_v55, %v316_v54  ;;  %v318_v58 = vld [vmem:[#allocation3 + $0x18] sm:$0xf0]  ;;  %v308_v59 = vld [vmem:[#allocation3] sm:$0xf] }
  0x10   :  { %50 = vadd.xlane.f32.xlu0 %v389_v2  ;;  %v371_v60 = vld [vmem:[#allocation3 + $0x4] sm:$0xf0]  ;;  %v321_v61 = vor.u32 %v372_v56, %v318_v58  ;;  %v370_v62 = vld [vmem:[#allocation3 + $0x4] sm:$0xf]  ;;  %v310_v63 = vld [vmem:[#allocation3 + $0x8] sm:$0xf0] }
  0x11   :  { %v55_v7 = vmul.f32 %v397_v4, %v54_v6  ;;  %210 = vmatpush.bf16.msra.mxu0 %v349_v33  ;;  %224 = vmatpush.bf16.msra.mxu1 %v353_v35  ;;  %v313_v3 = vor.u32 %v370_v62, %v310_v63  ;;  %v394_v23 = vld [vmem:[%s510_s3] ss:$0 sm:$0xff] }
  0x12   :  { %v395_v28 = vld [vmem:[%s511_s4] ss:$0 sm:$0xff] }
  0x13   :  { %v56_v8 = vadd.f32 %v397_v4, %v55_v7 }
  0x15   :  { %v476_v9 = vsel %vm57_vm0, %v397_v4, %v56_v8  ;;  %211 = vmatpush.bf16.msra.mxu0 %v341_v39  ;;  %225 = vmatpush.bf16.msra.mxu1 %v345_v41 }
  0x19   :  { %212 = vmatpush.bf16.msra.mxu0 %v333_v45  ;;  %226 = vmatpush.bf16.msra.mxu1 %v337_v47 }
  0x1d   :  { %213 = vmatpush.bf16.msra.mxu0 %v325_v51  ;;  %227 = vmatpush.bf16.msra.mxu1 %v329_v53 }
  0x21   :  { %214 = vmatpush.bf16.msra.mxu0 %v317_v57  ;;  %228 = vmatpush.bf16.msra.mxu1 %v321_v61 }
  0x25   :  { %229 = vmatpush.bf16.msra.mxu1 %v313_v3 }
  0x7b   :  { %v49_v10 = vpop.xlane.xlu0 %48 }
  0x7c   :  { %v59_v11 = vmul.f32 %v476_v9, %v49_v10 }
  0x7e   :  { %v479_v12 = vsub.f32 %v388_v1, %v59_v11  ;;  %v309_v1 = vor.u32 %v371_v60, %v308_v59 }
  0x80   :  { %v63_v13 = vmul.f32 %v479_v12, %v479_v12  ;;  %215 = vmatpush.bf16.msra.mxu0 %v309_v1 }
  0x82   :  { %65 = vadd.xlane.f32.xlu1 %v63_v13 }
  0x83   :  { %v51_v14 = vpop.xlane.xlu0 %50 }
  0x84   :  { %v60_v15 = vmul.f32 %v476_v9, %v51_v14 }
  0x86   :  { %v484_v16 = vsub.f32 %v389_v2, %v60_v15 }
  0x88   :  { %v64_v17 = vmul.f32 %v484_v16, %v484_v16 }
  0x8a   :  { %67 = vadd.xlane.f32.xlu1 %v64_v17 }
  0xf5   :  { %v66_v0 = vpop.xlane.xlu1 %65 }
  0xf6   :  { %v69_v2 = vmul.f32 %v66_v0, %v476_v9 }
  0xf8   :  { %v71_v4 = vadd.f32 1e-06, %v69_v2 }
  0xfa   :  { %398 = vrsqrt.f32 %v71_v4  ;;  %vm79_vm2 = vweird.f32 %v71_v4 }
  0xfd   :  { %v68_v5 = vpop.xlane.xlu1 %67 }
  0xfe   :  { %v70_v6 = vmul.f32 %v68_v5, %v476_v9 }
 0x100   :  { %v399_v7 = vpop.eup %398  ;;  %v72_v8 = vadd.f32 1e-06, %v70_v6 }
 0x101   :  { %v74_v10 = vmul.f32 %v399_v7, %v71_v4  ;;  %vm80_vm1 = vweird.f32 %v399_v7 }
 0x102   :  { %400 = vrsqrt.f32 %v72_v8  ;;  %vm81_vm3 = vmor %vm79_vm2, %vm80_vm1  ;;  %vm89_vm5 = vweird.f32 %v72_v8 }
 0x103   :  { %v75_v11 = vmul.f32 %v399_v7, %v74_v10 }
 0x105   :  { %v76_v13 = vmul.f32 0.5, %v75_v11 }
 0x107   :  { %v77_v14 = vsub.f32 1.5, %v76_v13 }
 0x108   :  { %v401_v15 = vpop.eup %400 }
 0x109   :  { %v78_v17 = vmul.f32 %v399_v7, %v77_v14  ;;  %v84_v18 = vmul.f32 %v401_v15, %v72_v8  ;;  %vm90_vm4 = vweird.f32 %v401_v15 }
 0x10a   :  { %vm91_vm6 = vmor %vm89_vm5, %vm90_vm4 }
 0x10b   :  { %v85_v19 = vmul.f32 %v401_v15, %v84_v18  ;;  %v82_v21 = vsel %vm81_vm3, %v399_v7, %v78_v17 }
 0x10c   :  { %v93_v9 = vmul.f32 %v82_v21, %v479_v12  ;;  %v251_v12 = vld [vmem:[%s509_s2] sm:$0x3] }
 0x10d   :  { %v86_v20 = vmul.f32 0.5, %v85_v19  ;;  %v253_v33 = vperm.slane %v251_v12, 0  ;;  %v254_v34 = vperm.slane %v251_v12, 1 }
 0x10e   :  { %v99_v27 = vmul.f32 %v394_v23, %v93_v9 }
 0x10f   :  { %v87_v22 = vsub.f32 1.5, %v86_v20 }
 0x110   :  { %v105_v30 = vadd.f32 %v395_v28, %v99_v27 }
 0x111   :  { %v88_v24 = vmul.f32 %v401_v15, %v87_v22 }
 0x113   :  { %v92_v25 = vsel %vm91_vm6, %v401_v15, %v88_v24 }
 0x114   :  { %v94_v26 = vmul.f32 %v92_v25, %v484_v16 }
 0x116   :  { %v100_v29 = vmul.f32 %v394_v23, %v94_v26 }
 0x118   :  { %v106_v31 = vadd.f32 %v395_v28, %v100_v29 }
 0x11a   :  { %v111_v32 = vpack.c.bf16 %v106_v31, %v105_v30 }
 0x11c   :  { %216 = vmatmul.bf16.vlgmr.msra.gmra.mxu0 %v111_v32  ;;  %230 = vmatmul.bf16.vlgmr.msra.gmra.mxu1 %v111_v32 }
 0x199   :  { %v217_v35 = vpop.f32.mrf.mxu0  ;;  %v231_v36 = vpop.f32.mrf.mxu1 }
 0x19a   :  { %v257_v16 = vadd.f32 %v253_v33, %v217_v35  ;;  %v258_v37 = vadd.f32 %v254_v34, %v231_v36 }
 0x19c   :  { %v261_v38 = vmul.f32 %v257_v16, %v257_v16  ;;  %v262_v39 = vmul.f32 %v258_v37, %v258_v37 }
 0x19e   :  { %v265_v40 = vmul.f32 %v261_v38, %v257_v16  ;;  %v266_v41 = vmul.f32 %v262_v39, %v258_v37 }
 0x1a0   :  { %v269_v42 = vmul.f32 0.044715, %v265_v40  ;;  %v270_v43 = vmul.f32 0.044715, %v266_v41 }
 0x1a1   :  { %v219_v44 = vpop.f32.mrf.mxu0  ;;  %v233_v45 = vpop.f32.mrf.mxu1 }
 0x1a2   :  { %v273_v46 = vadd.f32 %v269_v42, %v257_v16  ;;  %v274_v47 = vadd.f32 %v270_v43, %v258_v37  ;;  %v259_v48 = vadd.f32 %v253_v33, %v219_v44  ;;  %v260_v49 = vadd.f32 %v254_v34, %v233_v45 }
 0x1a4   :  { %v277_v50 = vmul.f32 0.7978846, %v273_v46  ;;  %v278_v51 = vmul.f32 0.7978846, %v274_v47  ;;  %v263_v52 = vmul.f32 %v259_v48, %v259_v48  ;;  %v264_v53 = vmul.f32 %v260_v49, %v260_v49 }
 0x1a6   :  { %402 = vtanh.f32 %v277_v50  ;;  %v267_v54 = vmul.f32 %v263_v52, %v259_v48  ;;  %v268_v55 = vmul.f32 %v264_v53, %v260_v49 }
 0x1a7   :  { %404 = vtanh.f32 %v278_v51 }
 0x1a8   :  { %v271_v56 = vmul.f32 0.044715, %v267_v54  ;;  %v272_v57 = vmul.f32 0.044715, %v268_v55 }
 0x1aa   :  { %v275_v58 = vadd.f32 %v271_v56, %v259_v48  ;;  %v276_v59 = vadd.f32 %v272_v57, %v260_v49 }
 0x1ac   :  { %v403_v60 = vpop.eup %402  ;;  %v279_v61 = vmul.f32 0.7978846, %v275_v58  ;;  %v280_v62 = vmul.f32 0.7978846, %v276_v59 }
 0x1ad   :  { %v405_v63 = vpop.eup %404  ;;  %v285_v0 = vadd.f32 1.0, %v403_v60 }
 0x1ae   :  { %v286_v1 = vadd.f32 1.0, %v405_v63  ;;  %406 = vtanh.f32 %v279_v61 }
 0x1af   :  { %v289_v2 = vmul.f32 0.5, %v285_v0  ;;  %408 = vtanh.f32 %v280_v62 }
 0x1b0   :  { %v290_v3 = vmul.f32 0.5, %v286_v1 }
 0x1b1   :  { %v293_v4 = vmul.f32 %v289_v2, %v257_v16 }
 0x1b2   :  { %v294_v5 = vmul.f32 %v290_v3, %v258_v37 }
 0x1b4   :  { %v407_v6 = vpop.eup %406  ;;  %v297_v7 = vpack.c.bf16 %v294_v5, %v293_v4 }
 0x1b5   :  { %v409_v8 = vpop.eup %408  ;;  %v287_v10 = vadd.f32 1.0, %v407_v6 }
 0x1b6   :  { %299 = vst [vmem:[%s512_s5] sm:$0xff] %v297_v7  ;;  %v288_v11 = vadd.f32 1.0, %v409_v8 }
 0x1b7   :  { %v291_v13 = vmul.f32 0.5, %v287_v10 }
 0x1b8   :  { %v292_v14 = vmul.f32 0.5, %v288_v11 }
 0x1b9   :  { %v295_v15 = vmul.f32 %v291_v13, %v259_v48 }
 0x1ba   :  { %v296_v17 = vmul.f32 %v292_v14, %v260_v49 }
 0x1bc   :  { %v298_v18 = vpack.c.bf16 %v296_v17, %v295_v15 }
 0x1be   :  { %300 = vst [vmem:[%s512_s5 + $0x8] sm:$0xff] %v298_v18 }
 0x1bf   :  { %305 = vsyncpa [#allocation4], 1 }

// kernel: _lambda_.50
= control target key start
LH: loop header
LB: loop body
LE: loop exit
PB: predicated region body
PF: predicated region fallthrough
CT: control target
= control target key end

     0   :  { %9 = vsyncpa [#allocation4], 0  ;;  %s368_s18 = smov [#allocation3]   ;;  %s369_s20 = smov 64   ;;  %s420_s0 = inlined_call_operand.vmem [shape: bf16[16,256], index: 0, kind: input, shape index: {}]   ;;  %s421_s1 = inlined_call_operand.hbm [shape: bf16[256,128], index: 1, kind: input, shape index: {}]   ;;  %s422_s2 = inlined_call_operand.vmem [shape: f32[1,128], index: 2, kind: input, shape index: {}]   ;;  %s423_s3 = inlined_call_operand.vmem [shape: bf16[16,128], index: 3, kind: input, shape index: {}]   ;;  %s424_s4 = inlined_call_operand.vmem [shape: bf16[16,128], index: 4, kind: output, shape index: {}]  }
   0x1   :  { %s16_s17 = sshll.u32 %s421_s1, 4  ;;  %s18_s19 = sshll.u32 %s368_s18, 4  ;;  %s17_s17 = int_to_ptr.hbm [resolvable:$true] %s16_s17  ;;  %s19_s19 = int_to_ptr.vmem [resolvable:$true] %s18_s19 }
   0x2   :  { %s370_s21 = smov 4  }
   0x3   :  { %24 = dma.hbm_to_vmem [thread:$0]  %s17_s17, 2048, %s19_s19, [#allocation4], %s369_s20, %s369_s20, %s370_s21  }
   0x4   :  { %366 = dma.done.wait [#allocation4], 2048  }
   0x5   :  { %367 = vsyncadd [#allocation4], 4294965248  ;;  %v320_v0 = vld [vmem:[#allocation3 + $0x38] sm:$0xff]  ;;  %v319_v2 = vld [vmem:[#allocation3 + $0x30] sm:$0xff] }
   0x6   :  { %v328_v1 = vld [vmem:[#allocation3 + $0x78] sm:$0xff]  ;;  %181 = vmatpush.bf16.msra.mxu0 %v320_v0  ;;  %v327_v3 = vld [vmem:[#allocation3 + $0x70] sm:$0xff]  ;;  %v318_v4 = vld [vmem:[#allocation3 + $0x28] sm:$0xff] }
   0x7   :  { %195 = vmatpush.bf16.msra.mxu1 %v328_v1  ;;  %v326_v5 = vld [vmem:[#allocation3 + $0x68] sm:$0xff]  ;;  %v317_v6 = vld [vmem:[#allocation3 + $0x20] sm:$0xff]  ;;  %v316_v8 = vld [vmem:[#allocation3 + $0x18] sm:$0xff] }
   0x8   :  { %v325_v7 = vld [vmem:[#allocation3 + $0x60] sm:$0xff]  ;;  %v324_v9 = vld [vmem:[#allocation3 + $0x58] sm:$0xff]  ;;  %v315_v10 = vld [vmem:[#allocation3 + $0x10] sm:$0xff] }
   0x9   :  { %v323_v11 = vld [vmem:[#allocation3 + $0x50] sm:$0xff]  ;;  %v314_v12 = vld [vmem:[#allocation3 + $0x8] sm:$0xff]  ;;  %v313_v14 = vld [vmem:[#allocation3] sm:$0xff] }
   0xa   :  { %182 = vmatpush.bf16.msra.mxu0 %v319_v2  ;;  %v322_v13 = vld [vmem:[#allocation3 + $0x48] sm:$0xff]  ;;  %v321_v15 = vld [vmem:[#allocation3 + $0x40] sm:$0xff] }
   0xb   :  { %196 = vmatpush.bf16.msra.mxu1 %v327_v3  ;;  %v241_v16 = vld [vmem:[%s420_s0] sm:$0xf]  ;;  %v312_v17 = vld [vmem:[%s420_s0 + $0x4] sm:$0xf0]  ;;  %v311_v18 = vld [vmem:[%s420_s0 + $0x4] sm:$0xf] }
   0xc   :  { %v243_v19 = vld [vmem:[%s420_s0 + $0x8] sm:$0xf0]  ;;  %v242_v20 = vor.u32 %v312_v17, %v241_v16  ;;  %v341_v25 = vld [vmem:[%s422_s2] ss:$0 sm:$0xff] }
   0xd   :  { %v246_v21 = vor.u32 %v311_v18, %v243_v19  ;;  %v330_v26 = vld [vmem:[%s423_s3] sm:$0xff]  }
   0xe   :  { %183 = vmatpush.bf16.msra.mxu0 %v318_v4  ;;  %v331_v30 = vunpack.c.l.bf16 %v330_v26  ;;  %v332_v32 = vunpack.c.h.bf16 %v330_v26 }
   0xf   :  { %197 = vmatpush.bf16.msra.mxu1 %v326_v5 }
  0x12   :  { %184 = vmatpush.bf16.msra.mxu0 %v317_v6 }
  0x13   :  { %198 = vmatpush.bf16.msra.mxu1 %v325_v7 }
  0x16   :  { %185 = vmatpush.bf16.msra.mxu0 %v316_v8 }
  0x17   :  { %199 = vmatpush.bf16.msra.mxu1 %v324_v9 }
  0x1a   :  { %186 = vmatpush.bf16.msra.mxu0 %v315_v10 }
  0x1b   :  { %200 = vmatpush.bf16.msra.mxu1 %v323_v11 }
  0x1e   :  { %187 = vmatpush.bf16.msra.mxu0 %v314_v12 }
  0x1f   :  { %201 = vmatpush.bf16.msra.mxu1 %v322_v13 }
  0x22   :  { %188 = vmatpush.bf16.msra.mxu0 %v313_v14 }
  0x23   :  { %202 = vmatpush.bf16.msra.mxu1 %v321_v15 }
  0x25   :  { %189 = vmatmul.bf16.vlgmr.msra.gmra.mxu0 %v242_v20 }
  0x26   :  { %203 = vmatmul.bf16.vlgmr.msra.gmra.mxu1 %v246_v21 }
  0xa2   :  { %v190_v22 = vpop.f32.mrf.mxu0 }
  0xa3   :  { %v204_v23 = vpop.f32.mrf.mxu1 }
  0xa4   :  { %v205_v24 = vadd.f32 %v204_v23, %v190_v22 }
  0xa6   :  { %v222_v29 = vadd.f32 %v341_v25, %v205_v24 }
  0xa8   :  { %v228_v34 = vadd.f32 %v331_v30, %v222_v29 }
  0xaa   :  { %v192_v27 = vpop.f32.mrf.mxu0 }
  0xab   :  { %v206_v28 = vpop.f32.mrf.mxu1 }
  0xac   :  { %v207_v31 = vadd.f32 %v206_v28, %v192_v27 }
  0xae   :  { %v223_v33 = vadd.f32 %v341_v25, %v207_v31 }
  0xb0   :  { %v229_v35 = vadd.f32 %v332_v32, %v223_v33 }
  0xb2   :  { %v336_v36 = vpack.c.bf16 %v229_v35, %v228_v34 }
  0xb4   :  { %337 = vst [vmem:[%s424_s4] sm:$0xff] %v336_v36  }
  0xb5   :  { %238 = vsyncpa [#allocation4], 1 }

// kernel: _lambda_.60
= control target key start
LH: loop header
LB: loop body
LE: loop exit
PB: predicated region body
PF: predicated region fallthrough
CT: control target
= control target key end

     0   :  { %v103_v3 = vmov 128.0   ;;  %s136_s0 = inlined_call_operand.vmem [shape: bf16[16,128], index: 0, kind: input, shape index: {}]   ;;  %s137_s1 = inlined_call_operand.vmem [shape: f32[1,128], index: 1, kind: input, shape index: {}]   ;;  %s138_s2 = inlined_call_operand.vmem [shape: f32[1,128], index: 2, kind: input, shape index: {}]   ;;  %s139_s3 = inlined_call_operand.vmem [shape: bf16[16,128], index: 3, kind: output, shape index: {}]  }
   0x1   :  { %v86_v0 = vld [vmem:[%s136_s0] sm:$0xff]   ;;  %97 = vrcp.f32 %v103_v3 }
   0x2   :  { %v87_v1 = vunpack.c.l.bf16 %v86_v0  ;;  %v88_v2 = vunpack.c.h.bf16 %v86_v0  ;;  %v95_v36 = vld [vmem:[%s137_s1] ss:$0 sm:$0xff] }
   0x3   :  { %v96_v40 = vld [vmem:[%s138_s2] ss:$0 sm:$0xff] }
   0x4   :  { %18 = vadd.xlane.f32.xlu0 %v87_v1 }
   0x7   :  { %v98_v4 = vpop.eup %97 }
   0x8   :  { %v23_v5 = vmul.f32 128.0, %v98_v4  ;;  %vm27_vm0 = vweird.f32 %v98_v4 }
   0xa   :  { %v24_v6 = vsub.f32 1.0, %v23_v5 }
   0xc   :  { %20 = vadd.xlane.f32.xlu0 %v88_v2  ;;  %v25_v7 = vmul.f32 %v98_v4, %v24_v6 }
   0xe   :  { %v26_v8 = vadd.f32 %v98_v4, %v25_v7 }
  0x10   :  { %v28_v9 = vsel %vm27_vm0, %v98_v4, %v26_v8 }
  0x77   :  { %v19_v10 = vpop.xlane.xlu0 %18 }
  0x78   :  { %v29_v11 = vmul.f32 %v28_v9, %v19_v10 }
  0x7a   :  { %v31_v12 = vsub.f32 %v87_v1, %v29_v11 }
  0x7c   :  { %v33_v13 = vmul.f32 %v31_v12, %v31_v12 }
  0x7e   :  { %35 = vadd.xlane.f32.xlu1 %v33_v13 }
  0x7f   :  { %v21_v14 = vpop.xlane.xlu0 %20 }
  0x80   :  { %v30_v15 = vmul.f32 %v28_v9, %v21_v14 }
  0x82   :  { %v32_v16 = vsub.f32 %v88_v2, %v30_v15 }
  0x84   :  { %v34_v17 = vmul.f32 %v32_v16, %v32_v16 }
  0x86   :  { %37 = vadd.xlane.f32.xlu1 %v34_v17 }
  0xf1   :  { %v36_v18 = vpop.xlane.xlu1 %35 }
  0xf2   :  { %v39_v19 = vmul.f32 %v36_v18, %v28_v9 }
  0xf4   :  { %v41_v20 = vadd.f32 1e-06, %v39_v19 }
  0xf6   :  { %99 = vrsqrt.f32 %v41_v20  ;;  %vm49_vm2 = vweird.f32 %v41_v20 }
  0xf9   :  { %v38_v21 = vpop.xlane.xlu1 %37 }
  0xfa   :  { %v40_v22 = vmul.f32 %v38_v21, %v28_v9 }
  0xfc   :  { %v100_v23 = vpop.eup %99  ;;  %v42_v24 = vadd.f32 1e-06, %v40_v22 }
  0xfd   :  { %v44_v25 = vmul.f32 %v100_v23, %v41_v20  ;;  %vm50_vm1 = vweird.f32 %v100_v23 }
  0xfe   :  { %101 = vrsqrt.f32 %v42_v24  ;;  %vm51_vm3 = vmor %vm49_vm2, %vm50_vm1  ;;  %vm59_vm5 = vweird.f32 %v42_v24 }
  0xff   :  { %v45_v26 = vmul.f32 %v100_v23, %v44_v25 }
 0x101   :  { %v46_v27 = vmul.f32 0.5, %v45_v26 }
 0x103   :  { %v47_v28 = vsub.f32 1.5, %v46_v27 }
 0x104   :  { %v102_v29 = vpop.eup %101 }
 0x105   :  { %v48_v30 = vmul.f32 %v100_v23, %v47_v28  ;;  %v54_v31 = vmul.f32 %v102_v29, %v42_v24  ;;  %vm60_vm4 = vweird.f32 %v102_v29 }
 0x106   :  { %vm61_vm6 = vmor %vm59_vm5, %vm60_vm4 }
 0x107   :  { %v55_v32 = vmul.f32 %v102_v29, %v54_v31  ;;  %v52_v33 = vsel %vm51_vm3, %v100_v23, %v48_v30 }
 0x108   :  { %v63_v37 = vmul.f32 %v52_v33, %v31_v12 }
 0x109   :  { %v56_v34 = vmul.f32 0.5, %v55_v32 }
 0x10a   :  { %v69_v41 = vmul.f32 %v95_v36, %v63_v37 }
 0x10b   :  { %v57_v35 = vsub.f32 1.5, %v56_v34 }
 0x10c   :  { %v75_v44 = vadd.f32 %v96_v40, %v69_v41 }
 0x10d   :  { %v58_v38 = vmul.f32 %v102_v29, %v57_v35 }
 0x10f   :  { %v62_v39 = vsel %vm61_vm6, %v102_v29, %v58_v38 }
 0x110   :  { %v64_v42 = vmul.f32 %v62_v39, %v32_v16 }
 0x112   :  { %v70_v43 = vmul.f32 %v95_v36, %v64_v42 }
 0x114   :  { %v76_v45 = vadd.f32 %v96_v40, %v70_v43 }
 0x116   :  { %v92_v46 = vpack.c.bf16 %v76_v45, %v75_v44 }
 0x118   :  { %93 = vst [vmem:[%s139_s3] sm:$0xff] %v92_v46  }

// kernel: _lambda_.61
= control target key start
LH: loop header
LB: loop body
LE: loop exit
PB: predicated region body
PF: predicated region fallthrough
CT: control target
= control target key end

     0   :  { %8 = vsyncpa [#allocation3], 0  ;;  %s405_s0 = inlined_call_operand.vmem [shape: bf16[16,128], index: 0, kind: input, shape index: {}]   ;;  %s406_s1 = inlined_call_operand.hbm [shape: bf16[128,256], index: 1, kind: input, shape index: {}]   ;;  %s407_s2 = inlined_call_operand.vmem [shape: f32[1,256], index: 2, kind: input, shape index: {}]   ;;  %s408_s3 = inlined_call_operand.hbm [shape: f32[16,256], index: 3, kind: output, shape index: {}]  }
   0x1   :  { %9 = vsyncpa [#allocation4], 0  ;;  %s16_s14 = sshll.u32 %s406_s1, 4  ;;  %s367_s15 = smov [#allocation2]   ;;  %s17_s14 = int_to_ptr.hbm [resolvable:$true] %s16_s14 }
   0x2   :  { %s18_s16 = sshll.u32 %s367_s15, 4  ;;  %s368_s17 = smov 128   ;;  %s19_s16 = int_to_ptr.vmem [resolvable:$true] %s18_s16 }
   0x3   :  { %s369_s18 = smov 8  }
   0x4   :  { %24 = dma.hbm_to_vmem [thread:$0]  %s17_s14, 2048, %s19_s16, [#allocation3], %s368_s17, %s368_s17, %s369_s18  }
   0x5   :  { %363 = dma.done.wait [#allocation3], 2048  }
   0x6   :  { %364 = vsyncadd [#allocation3], 4294965248  ;;  %v285_v0 = vld [vmem:[#allocation2 + $0x70] sm:$0xf]  ;;  %v307_v1 = vld [vmem:[#allocation2 + $0x74] sm:$0xf0] }
   0x7   :  { %v306_v2 = vld [vmem:[#allocation2 + $0x74] sm:$0xf]  ;;  %v286_v3 = vor.u32 %v307_v1, %v285_v0  ;;  %v287_v4 = vld [vmem:[#allocation2 + $0x78] sm:$0xf0]  ;;  %v277_v5 = vld [vmem:[#allocation2 + $0x60] sm:$0xf] }
   0x8   :  { %v305_v6 = vld [vmem:[#allocation2 + $0x64] sm:$0xf0]  ;;  %v290_v7 = vor.u32 %v306_v2, %v287_v4  ;;  %v304_v8 = vld [vmem:[#allocation2 + $0x64] sm:$0xf]  ;;  %v279_v9 = vld [vmem:[#allocation2 + $0x68] sm:$0xf0] }
   0x9   :  { %147 = vmatpush.bf16.msra.mxu0 %v286_v3  ;;  %v278_v10 = vor.u32 %v305_v6, %v277_v5  ;;  %v282_v11 = vor.u32 %v304_v8, %v279_v9  ;;  %v269_v12 = vld [vmem:[#allocation2 + $0x50] sm:$0xf]  ;;  %v303_v13 = vld [vmem:[#allocation2 + $0x54] sm:$0xf0]  ;;  %v302_v14 = vld [vmem:[#allocation2 + $0x54] sm:$0xf] }
   0xa   :  { %161 = vmatpush.bf16.msra.mxu1 %v290_v7  ;;  %v271_v15 = vld [vmem:[#allocation2 + $0x58] sm:$0xf0]  ;;  %v270_v16 = vor.u32 %v303_v13, %v269_v12  ;;  %v261_v18 = vld [vmem:[#allocation2 + $0x40] sm:$0xf]  ;;  %v301_v19 = vld [vmem:[#allocation2 + $0x44] sm:$0xf0] }
   0xb   :  { %v274_v17 = vor.u32 %v302_v14, %v271_v15  ;;  %v300_v20 = vld [vmem:[#allocation2 + $0x44] sm:$0xf]  ;;  %v263_v21 = vld [vmem:[#allocation2 + $0x48] sm:$0xf0]  ;;  %v262_v22 = vor.u32 %v301_v19, %v261_v18  ;;  %v253_v24 = vld [vmem:[#allocation2 + $0x30] sm:$0xf] }
   0xc   :  { %v266_v23 = vor.u32 %v300_v20, %v263_v21  ;;  %v299_v25 = vld [vmem:[#allocation2 + $0x34] sm:$0xf0]  ;;  %v298_v26 = vld [vmem:[#allocation2 + $0x34] sm:$0xf]  ;;  %v255_v27 = vld [vmem:[#allocation2 + $0x38] sm:$0xf0] }
   0xd   :  { %148 = vmatpush.bf16.msra.mxu0 %v278_v10  ;;  %v254_v28 = vor.u32 %v299_v25, %v253_v24  ;;  %v258_v29 = vor.u32 %v298_v26, %v255_v27  ;;  %v245_v30 = vld [vmem:[#allocation2 + $0x20] sm:$0xf]  ;;  %v297_v31 = vld [vmem:[#allocation2 + $0x24] sm:$0xf0]  ;;  %v296_v32 = vld [vmem:[#allocation2 + $0x24] sm:$0xf] }
   0xe   :  { %162 = vmatpush.bf16.msra.mxu1 %v282_v11  ;;  %v247_v33 = vld [vmem:[#allocation2 + $0x28] sm:$0xf0]  ;;  %v246_v34 = vor.u32 %v297_v31, %v245_v30  ;;  %v237_v36 = vld [vmem:[#allocation2 + $0x10] sm:$0xf]  ;;  %v295_v37 = vld [vmem:[#allocation2 + $0x14] sm:$0xf0] }
   0xf   :  { %v250_v35 = vor.u32 %v296_v32, %v247_v33  ;;  %v294_v38 = vld [vmem:[#allocation2 + $0x14] sm:$0xf]  ;;  %v239_v39 = vld [vmem:[#allocation2 + $0x18] sm:$0xf0]  ;;  %v238_v40 = vor.u32 %v295_v37, %v237_v36  ;;  %v229_v42 = vld [vmem:[#allocation2] sm:$0xf] }
  0x10   :  { %v242_v41 = vor.u32 %v294_v38, %v239_v39  ;;  %v293_v43 = vld [vmem:[#allocation2 + $0x4] sm:$0xf0]  ;;  %v292_v44 = vld [vmem:[#allocation2 + $0x4] sm:$0xf]  ;;  %v231_v45 = vld [vmem:[#allocation2 + $0x8] sm:$0xf0] }
  0x11   :  { %149 = vmatpush.bf16.msra.mxu0 %v270_v16  ;;  %v230_v46 = vor.u32 %v293_v43, %v229_v42  ;;  %v234_v47 = vor.u32 %v292_v44, %v231_v45  ;;  %v291_v48 = vld [vmem:[%s405_s0] sm:$0xff]  ;;  %s370_s22 = smov [#allocation5]   ;;  %s210_s25 = sshll.u32 %s408_s3, 4  ;;  %s211_s25 = int_to_ptr.hbm [resolvable:$true] %s210_s25 }
  0x12   :  { %163 = vmatpush.bf16.msra.mxu1 %v274_v17  ;;  %v190_v49 = vld [vmem:[%s407_s2] sm:$0x3]  ;;  %s208_s23 = sshll.u32 %s370_s22, 4  ;;  %s371_s2 = smov 256   ;;  %s209_s23 = int_to_ptr.vmem [resolvable:$true] %s208_s23 }
  0x13   :  { %v192_v50 = vperm.slane %v190_v49, 0  ;;  %v193_v52 = vperm.slane %v190_v49, 1  ;;  %s372_s26 = smov 16  }
  0x15   :  { %150 = vmatpush.bf16.msra.mxu0 %v262_v22 }
  0x16   :  { %164 = vmatpush.bf16.msra.mxu1 %v266_v23 }
  0x19   :  { %151 = vmatpush.bf16.msra.mxu0 %v254_v28 }
  0x1a   :  { %165 = vmatpush.bf16.msra.mxu1 %v258_v29 }
  0x1d   :  { %152 = vmatpush.bf16.msra.mxu0 %v246_v34 }
  0x1e   :  { %166 = vmatpush.bf16.msra.mxu1 %v250_v35 }
  0x21   :  { %153 = vmatpush.bf16.msra.mxu0 %v238_v40 }
  0x22   :  { %167 = vmatpush.bf16.msra.mxu1 %v242_v41 }
  0x25   :  { %154 = vmatpush.bf16.msra.mxu0 %v230_v46 }
  0x26   :  { %168 = vmatpush.bf16.msra.mxu1 %v234_v47 }
  0x28   :  { %155 = vmatmul.bf16.vlgmr.msra.gmra.mxu0 %v291_v48 }
  0x29   :  { %169 = vmatmul.bf16.vlgmr.msra.gmra.mxu1 %v291_v48 }
  0xa5   :  { %v156_v51 = vpop.f32.mrf.mxu0 }
  0xa6   :  { %v170_v53 = vpop.f32.mrf.mxu1  ;;  %v196_v54 = vadd.f32 %v192_v50, %v156_v51 }
  0xa7   :  { %v197_v55 = vadd.f32 %v193_v52, %v170_v53 }
  0xa8   :  { %200 = vst [vmem:[#allocation5] sm:$0xff] %v196_v54 }
  0xa9   :  { %201 = vst [vmem:[#allocation5 + $0x8] sm:$0xff] %v197_v55 }
  0xad   :  { %v158_v56 = vpop.f32.mrf.mxu0 }
  0xae   :  { %v172_v57 = vpop.f32.mrf.mxu1  ;;  %v198_v58 = vadd.f32 %v192_v50, %v158_v56 }
  0xaf   :  { %v199_v59 = vadd.f32 %v193_v52, %v172_v57 }
  0xb0   :  { %202 = vst [vmem:[#allocation5 + $0x10] sm:$0xff] %v198_v58 }
  0xb1   :  { %203 = vst [vmem:[#allocation5 + $0x18] sm:$0xff] %v199_v59 }
  0xb2   :  { %216 = dma.vmem_to_hbm [thread:$0]  %s209_s23, 512, %s211_s25, [#allocation4], %s371_s2, %s371_s2, %s372_s26  }
  0xb3   :  { %365 = dma.done.wait [#allocation4], 512  }
  0xb4   :  { %366 = vsyncadd [#allocation4], 4294966784 }
  0xb5   :  { %221 = vsyncpa [#allocation3], 1 }
  0xb6   :  { %222 = vsyncpa [#allocation4], 1 }

</bundles_post_ra>
